<compile_context>
chip_gen: v7x
topology: tpu7x:2x2x1
jax: 0.10.0
libtpu: 0.0.40
codegen_flags: <defaults>
</compile_context>

<pallas_src>
import jax
import jax.numpy as jnp
from jax.experimental import pallas as pl
from jax.experimental.pallas import tpu as pltpu

_VMEM = pl.BlockSpec(memory_space=pltpu.MemorySpace.VMEM)


# ---------------------------------------------------------------------------
# Small helpers
# ---------------------------------------------------------------------------
def _round_up(x, m):
    return ((x + m - 1) // m) * m


def _choose_tm(m):
    if m <= 256:
        return m                      # full dim is always a legal block
    for cand in (256, 128, 64, 32, 16, 8):
        if m % cand == 0:
            return cand
    return m


def _choose_tk(k):
    # k is always a multiple of 128 (we pad); keep tiles 128-granular.
    if k <= 1024:
        return k
    for cand in range(1024, 127, -128):
        if k % cand == 0:
            return cand
    return k


# ---------------------------------------------------------------------------
# Fused conv-as-matmul kernel:
#   out = [ReLU]( (A @ B) * scale + bias [+ residual | + (Xs @ Wd)*sd + bd] )
# Grid = (M-tiles, K-steps); f32 accumulator lives in VMEM scratch.
# ---------------------------------------------------------------------------
def _make_conv_kernel(apply_relu, res_mode):
    """res_mode: 0 = none, 1 = direct residual, 2 = projected (1x1 conv+BN) residual."""
    def kernel(*refs):
        if res_mode == 0:
            a_ref, b_ref, s_ref, c_ref, o_ref, acc_ref = refs
        elif res_mode == 1:
            a_ref, b_ref, s_ref, c_ref, r_ref, o_ref, acc_ref = refs
        else:
            (a_ref, b_ref, s_ref, c_ref, xs_ref, wd_ref, sd_ref, cd_ref,
             o_ref, acc_ref) = refs
        k = pl.program_id(1)

        @pl.when(k == 0)
        def _init():
            acc_ref[...] = jnp.zeros_like(acc_ref)

        acc_ref[...] += jnp.dot(a_ref[...], b_ref[...],
                                preferred_element_type=jnp.float32)

        @pl.when(k == pl.num_programs(1) - 1)
        def _finalize():
            out = acc_ref[...] * s_ref[...] + c_ref[...]
            if res_mode == 1:
                out = out + r_ref[...].astype(jnp.float32)
            elif res_mode == 2:
                proj = jnp.dot(xs_ref[...], wd_ref[...],
                               preferred_element_type=jnp.float32)
                out = out + proj * sd_ref[...] + cd_ref[...]
            if apply_relu:
                out = jnp.maximum(out, 0.0)
            o_ref[...] = out.astype(o_ref.dtype)

    return kernel


def fused_matmul_bn(a, b, scale, bias, *, residual=None, proj=None,
                    apply_relu=True, out_dtype=jnp.bfloat16):
    m, kdim = a.shape
    k2, n = b.shape
    assert kdim == k2 and kdim % 128 == 0
    tm = _choose_tm(m)
    tk = _choose_tk(kdim)
    grid = (m // tm, kdim // tk)

    inputs = [a, b,
              scale.reshape(1, n).astype(jnp.float32),
              bias.reshape(1, n).astype(jnp.float32)]
    in_specs = [
        pl.BlockSpec((tm, tk), lambda i, k: (i, k)),
        pl.BlockSpec((tk, n), lambda i, k: (k, 0)),
        pl.BlockSpec((1, n), lambda i, k: (0, 0)),
        pl.BlockSpec((1, n), lambda i, k: (0, 0)),
    ]
    res_mode = 0
    if residual is not None:
        res_mode = 1
        inputs.append(residual)
        in_specs.append(pl.BlockSpec((tm, n), lambda i, k: (i, 0)))
    elif proj is not None:
        res_mode = 2
        xs, wd, sd, bd = proj
        cin = xs.shape[1]
        inputs += [xs, wd,
                   sd.reshape(1, n).astype(jnp.float32),
                   bd.reshape(1, n).astype(jnp.float32)]
        in_specs += [pl.BlockSpec((tm, cin), lambda i, k: (i, 0)),
                     pl.BlockSpec((cin, n), lambda i, k: (0, 0)),
                     pl.BlockSpec((1, n), lambda i, k: (0, 0)),
                     pl.BlockSpec((1, n), lambda i, k: (0, 0))]

    return pl.pallas_call(
        _make_conv_kernel(apply_relu, res_mode),
        out_shape=jax.ShapeDtypeStruct((m, n), out_dtype),
        grid=grid,
        in_specs=in_specs,
        out_specs=pl.BlockSpec((tm, n), lambda i, k: (i, 0)),
        scratch_shapes=[pltpu.VMEM((tm, n), jnp.float32)],
        compiler_params=pltpu.CompilerParams(
            dimension_semantics=("parallel", "arbitrary"),
            vmem_limit_bytes=32 * 1024 * 1024),   # actual use < 4 MiB; safe on v5e/v6e/v7x
    )(*inputs)


# ---------------------------------------------------------------------------
# MaxPool 3x3 / stride 2 / pad 1 : shifted-max kernel (no im2col slab)
# ---------------------------------------------------------------------------
def _make_maxpool_kernel(oh):
    def kernel(x_ref, o_ref):
        x = x_ref[...]                                      # (N, H+2, W+2, C), -inf padded
        w = jnp.maximum(jnp.maximum(x[:, :, 0:-2, :], x[:, :, 1:-1, :]),
                        x[:, :, 2:, :])                     # stride-1 window max along W
        for i in range(oh):                                 # H window max + stride-2 H select
            r = jnp.maximum(jnp.maximum(w[:, 2 * i], w[:, 2 * i + 1]),
                            w[:, 2 * i + 2])                # (N, W, C)
            o_ref[:, pl.ds(i, 1), :, :] = r[:, None, :, :]
    return kernel


def maxpool_3x3_s2_p1(x):
    n, h, w, c = x.shape
    xp = jnp.pad(x, ((0, 0), (1, 1), (1, 1), (0, 0)), constant_values=-jnp.inf)
    oh = (h - 1) // 2 + 1
    out = pl.pallas_call(
        _make_maxpool_kernel(oh),
        out_shape=jax.ShapeDtypeStruct((n, oh, w, c), x.dtype),
        in_specs=[_VMEM],
        out_specs=_VMEM,
    )(xp)
    return out[:, :, ::2, :]           # stride-2 W subsample (tiny XLA slice)


# ---------------------------------------------------------------------------
# AdaptiveAvgPool(1,1) + Linear (output padded to 128 lanes, sliced outside)
# ---------------------------------------------------------------------------
def _avgpool_fc_kernel(x_ref, w_ref, b_ref, o_ref):
    pooled = jnp.mean(x_ref[...].astype(jnp.float32), axis=1)        # (N, C)
    o_ref[...] = (jnp.dot(pooled.astype(w_ref.dtype), w_ref[...],
                          preferred_element_type=jnp.float32) + b_ref[...])


def avgpool_fc(x, w_pad, b_pad, out_class):
    n, h, w, c = x.shape
    xr = x.reshape(n, h * w, c)
    out = pl.pallas_call(
        _avgpool_fc_kernel,
        out_shape=jax.ShapeDtypeStruct((n, w_pad.shape[1]), jnp.float32),
        in_specs=[_VMEM] * 3,
        out_specs=_VMEM,
    )(xr, w_pad, b_pad)
    return out[:, :out_class]


# ---------------------------------------------------------------------------
# Plain-JAX glue: patch extraction with K padded to a multiple of 128
# ---------------------------------------------------------------------------
def _im2col(x, kh, kw, stride, pad, k_pad):
    n, h, w, c = x.shape
    if pad:
        x = jnp.pad(x, ((0, 0), (pad, pad), (pad, pad), (0, 0)))
    oh = (h + 2 * pad - kh) // stride + 1
    ow = (w + 2 * pad - kw) // stride + 1
    cols = [x[:, di:di + stride * oh:stride, dj:dj + stride * ow:stride, :]
            for di in range(kh) for dj in range(kw)]
    patches = jnp.stack(cols, axis=3).reshape(n * oh * ow, kh * kw * c)
    if k_pad > kh * kw * c:
        patches = jnp.pad(patches, ((0, 0), (0, k_pad - kh * kw * c)))
    return patches, oh, ow


def conv_bn(x, cp, *, stride, pad, apply_relu=True, residual=None, proj=None):
    n = x.shape[0]
    cout = cp["w"].shape[1]
    patches, oh, ow = _im2col(x, cp["kh"], cp["kw"], stride, pad, cp["kpad"])
    out = fused_matmul_bn(patches, cp["w"], cp["scale"], cp["bias"],
                          residual=residual, proj=proj, apply_relu=apply_relu)
    return out.reshape(n, oh, ow, cout)


# ---------------------------------------------------------------------------
# Deterministic synthetic parameters (PyTorch shapes), pre-packed for the kernels
# ---------------------------------------------------------------------------
def _conv_w(key, kh, kw, cin, cout):
    fan_in = kh * kw * cin
    return (jax.random.normal(key, (kh, kw, cin, cout), jnp.float32)
            * jnp.sqrt(2.0 / fan_in))


def _bn_scale_bias(key, c, eps=1e-5):
    k1, k2, k3, k4 = jax.random.split(key, 4)
    gamma = 1.0 + 0.1 * jax.random.normal(k1, (c,), jnp.float32)
    beta = 0.1 * jax.random.normal(k2, (c,), jnp.float32)
    mean = 0.1 * jax.random.normal(k3, (c,), jnp.float32)
    var = 1.0 + 0.1 * jax.random.uniform(k4, (c,), jnp.float32)
    scale = gamma / jnp.sqrt(var + eps)
    bias = beta - mean * scale
    return scale, bias


def _pack_conv(w_hwio, scale, bias):
    kh, kw, cin, cout = w_hwio.shape
    kdim = kh * kw * cin
    kpad = _round_up(kdim, 128)
    wmat = jnp.pad(w_hwio.reshape(kdim, cout),
                   ((0, kpad - kdim), (0, 0))).astype(jnp.bfloat16)
    return {"w": wmat,
            "scale": scale.reshape(1, cout).astype(jnp.float32),
            "bias": bias.reshape(1, cout).astype(jnp.float32),
            "kh": kh, "kw": kw, "kpad": kpad}


def _basic_block_params(key, cin, planes, stride):
    keys = jax.random.split(key, 6)
    bp = {"conv_a": _pack_conv(_conv_w(keys[0], 3, 3, cin, planes),
                               *_bn_scale_bias(keys[1], planes)),
          "conv_b": _pack_conv(_conv_w(keys[2], 3, 3, planes, planes),
                               *_bn_scale_bias(keys[3], planes)),
          "stride": stride, "down": None}
    if stride != 1 or cin != planes:          # BasicBlock.out_extend == 1
        wd = _conv_w(keys[4], 1, 1, cin, planes).reshape(cin, planes)
        sd, bd = _bn_scale_bias(keys[5], planes)
        bp["down"] = {"w": wd.astype(jnp.bfloat16),
                      "scale": sd.reshape(1, planes).astype(jnp.float32),
                      "bias": bd.reshape(1, planes).astype(jnp.float32)}
    return bp


def init_resnet_params(key, layers=(1, 1, 1, 1), out_class=5, in_ch=3):
    keys = jax.random.split(key, 8)
    params = {"conv1": _pack_conv(_conv_w(keys[0], 7, 7, in_ch, 64),
                                  *_bn_scale_bias(keys[1], 64)),
              "out_class": out_class}
    input_size = 64
    plan = [(64, layers[0], 1), (128, layers[1], 2),
            (256, layers[2], 2), (512, layers[3], 2)]
    all_layers = []
    for li, (planes, blocks, stride) in enumerate(plan):
        bkeys = jax.random.split(keys[2 + li], blocks)
        blist = [_basic_block_params(bkeys[0], input_size, planes, stride)]
        input_size = planes
        for bi in range(1, blocks):
            blist.append(_basic_block_params(bkeys[bi], input_size, planes, 1))
        all_layers.append(blist)
    params["layers"] = all_layers
    kf1, kf2 = jax.random.split(keys[6])
    fc_w = jax.random.normal(kf1, (512, out_class), jnp.float32) / jnp.sqrt(512.0)
    fc_b = 0.01 * jax.random.normal(kf2, (out_class,), jnp.float32)
    n_pad = _round_up(out_class, 128)
    params["fc_w"] = jnp.pad(fc_w, ((0, 0), (0, n_pad - out_class))).astype(jnp.bfloat16)
    params["fc_b"] = jnp.pad(fc_b, (0, n_pad - out_class)).reshape(1, n_pad).astype(jnp.float32)
    return params


# ---------------------------------------------------------------------------
# Forward pass
# ---------------------------------------------------------------------------
def basic_block_forward(x, bp):
    s = bp["stride"]
    out = conv_bn(x, bp["conv_a"], stride=s, pad=1, apply_relu=True)
    if bp["down"] is not None:
        cin = x.shape[-1]
        xs = x[:, ::s, ::s, :].reshape(-1, cin)          # 1x1-stride-s sampling of identity
        proj = (xs, bp["down"]["w"], bp["down"]["scale"], bp["down"]["bias"])
        out = conv_bn(out, bp["conv_b"], stride=1, pad=1, apply_relu=True, proj=proj)
    else:
        res = x.reshape(-1, x.shape[-1])
        out = conv_bn(out, bp["conv_b"], stride=1, pad=1, apply_relu=True, residual=res)
    return out


def resnet_forward(params, x_nchw):
    # NCHW (PyTorch convention) -> NHWC bf16 for the TPU kernels
    x = jnp.transpose(x_nchw, (0, 2, 3, 1)).astype(jnp.bfloat16)
    x = conv_bn(x, params["conv1"], stride=2, pad=3, apply_relu=True)   # conv1+bn1+relu
    x = maxpool_3x3_s2_p1(x)                                            # maxpool
    for layer in params["layers"]:                                      # layer1..layer4
        for bp in layer:
            x = basic_block_forward(x, bp)
    return avgpool_fc(x, params["fc_w"], params["fc_b"],                # avgpool+flatten+fc
                      params["out_class"])


if __name__ == "__main__":
    key = jax.random.PRNGKey(0)
    pkey, xkey = jax.random.split(key)
    params = init_resnet_params(pkey, layers=(1, 1, 1, 1), out_class=5, in_ch=3)
    x = jax.random.normal(xkey, (2, 3, 32, 32), jnp.float32)   # NCHW, like PyTorch

    forward = jax.jit(lambda inp: resnet_forward(params, inp))
    out = jax.block_until_ready(forward(x))
    assert out.shape == (2, 5), out.shape
    assert bool(jnp.all(jnp.isfinite(out)))
    print("KERNEL_OK")
</pallas_src>

<mosaic_0001>
module attributes {stable_mosaic.version = 11 : i64} {
  func.func @kernel(%arg0: i32, %arg1: i32, %arg2: memref<256x256xbf16, #tpu.memory_space<vmem>>, %arg3: memref<256x64xbf16, #tpu.memory_space<vmem>>, %arg4: memref<1x64xf32, #tpu.memory_space<vmem>>, %arg5: memref<1x64xf32, #tpu.memory_space<vmem>>, %arg6: memref<256x64xbf16, #tpu.memory_space<vmem>>, %arg7: memref<256x64xf32, #tpu.memory_space<vmem>>) attributes {dimension_semantics = [#tpu.dimension_semantics<parallel>, #tpu.dimension_semantics<arbitrary>], iteration_bounds = array<i64: 2, 1>, scalar_prefetch = 0 : i64, scratch_operands = 1 : i64, tpu.core_type = #tpu.core_type<tc>, window_params = [{transform_indices = @transform_0, window_bounds = array<i64: 256, 256>}, {transform_indices = @transform_1, window_bounds = array<i64: 256, 64>}, {pipeline_mode = #tpu.pipeline_mode<synchronous>, transform_indices = @transform_2, window_bounds = array<i64: 1, 64>}, {pipeline_mode = #tpu.pipeline_mode<synchronous>, transform_indices = @transform_3, window_bounds = array<i64: 1, 64>}, {transform_indices = @transform_4, window_bounds = array<i64: 256, 64>}]} {
    %c0_i32 = arith.constant 0 : i32
    %0 = arith.cmpi eq, %arg1, %c0_i32 : i32
    %1 = arith.extui %0 : i1 to i32
    %c0_i32_0 = arith.constant 0 : i32
    %2 = arith.cmpi ne, %1, %c0_i32_0 : i32
    scf.if %2 {
      %cst_10 = arith.constant 0.000000e+00 : f32
      %12 = vector.broadcast %cst_10 : f32 to vector<256x64xf32>
      %c0_11 = arith.constant 0 : index
      %c0_12 = arith.constant 0 : index
      %13 = vector.load %arg7[%c0_11, %c0_12] : memref<256x64xf32, #tpu.memory_space<vmem>>, vector<256x64xf32>
      tpu.vector_store %arg7[%c0_11, %c0_12], %12 {strides = array<i32>} : memref<256x64xf32, #tpu.memory_space<vmem>>, vector<256x64xf32>,
    } else {
    }
    %c0 = arith.constant 0 : index
    %c0_1 = arith.constant 0 : index
    %3 = vector.load %arg7[%c0, %c0_1] : memref<256x64xf32, #tpu.memory_space<vmem>>, vector<256x64xf32>
    %c0_2 = arith.constant 0 : index
    %c0_3 = arith.constant 0 : index
    %4 = vector.load %arg2[%c0_2, %c0_3] : memref<256x256xbf16, #tpu.memory_space<vmem>>, vector<256x256xbf16>
    %c0_4 = arith.constant 0 : index
    %c0_5 = arith.constant 0 : index
    %5 = vector.load %arg3[%c0_4, %c0_5] : memref<256x64xbf16, #tpu.memory_space<vmem>>, vector<256x64xbf16>
    %cst = arith.constant dense<0.000000e+00> : vector<256x64xf32>
    %6 = tpu.matmul %4, %5, %cst {dimension_numbers = #tpu.dot_dimension_numbers<[1], [0], [0], [1], [0, 0, 1, 1], [], []>} : vector<256x256xbf16>, vector<256x64xbf16>, vector<256x64xf32> -> vector<256x64xf32>
    %7 = arith.addf %3, %6 : vector<256x64xf32>
    %c0_6 = arith.constant 0 : index
    %c0_7 = arith.constant 0 : index
    %8 = vector.load %arg7[%c0_6, %c0_7] : memref<256x64xf32, #tpu.memory_space<vmem>>, vector<256x64xf32>
    tpu.vector_store %arg7[%c0_6, %c0_7], %7 {strides = array<i32>} : memref<256x64xf32, #tpu.memory_space<vmem>>, vector<256x64xf32>,
    %c0_i32_8 = arith.constant 0 : i32
    %9 = arith.cmpi eq, %arg1, %c0_i32_8 : i32
    %10 = arith.extui %9 : i1 to i32
    %c0_i32_9 = arith.constant 0 : i32
    %11 = arith.cmpi ne, %10, %c0_i32_9 : i32
    scf.if %11 {
      %c0_10 = arith.constant 0 : index
      %c0_11 = arith.constant 0 : index
      %12 = vector.load %arg7[%c0_10, %c0_11] : memref<256x64xf32, #tpu.memory_space<vmem>>, vector<256x64xf32>
      %c0_12 = arith.constant 0 : index
      %c0_13 = arith.constant 0 : index
      %13 = vector.load %arg4[%c0_12, %c0_13] : memref<1x64xf32, #tpu.memory_space<vmem>>, vector<1x64xf32>
      %14 = vector.broadcast %13 : vector<1x64xf32> to vector<256x64xf32>
      %15 = arith.mulf %12, %14 : vector<256x64xf32>
      %c0_14 = arith.constant 0 : index
      %c0_15 = arith.constant 0 : index
      %16 = vector.load %arg5[%c0_14, %c0_15] : memref<1x64xf32, #tpu.memory_space<vmem>>, vector<1x64xf32>
      %17 = vector.broadcast %16 : vector<1x64xf32> to vector<256x64xf32>
      %18 = arith.addf %15, %17 : vector<256x64xf32>
      %cst_16 = arith.constant 0.000000e+00 : f32
      %19 = vector.broadcast %cst_16 : f32 to vector<256x64xf32>
      %20 = arith.maximumf %18, %19 : vector<256x64xf32>
      %21 = arith.truncf %20 : vector<256x64xf32> to vector<256x64xbf16>
      %c0_17 = arith.constant 0 : index
      %c0_18 = arith.constant 0 : index
      %22 = vector.load %arg6[%c0_17, %c0_18] : memref<256x64xbf16, #tpu.memory_space<vmem>>, vector<256x64xbf16>
      tpu.vector_store %arg6[%c0_17, %c0_18], %21 {strides = array<i32>} : memref<256x64xbf16, #tpu.memory_space<vmem>>, vector<256x64xbf16>,
    } else {
    }
    return
  }
  func.func @transform_0(%arg0: i32, %arg1: i32) -> (i32, i32) {
    %c0_i32 = arith.constant 0 : i32
    return %arg0, %arg1 : i32, i32
  }
  func.func @transform_1(%arg0: i32, %arg1: i32) -> (i32, i32) {
    %c0_i32 = arith.constant 0 : i32
    %c0_i32_0 = arith.constant 0 : i32
    return %arg1, %c0_i32 : i32, i32
  }
  func.func @transform_2(%arg0: i32, %arg1: i32) -> (i32, i32) {
    %c0_i32 = arith.constant 0 : i32
    %c0_i32_0 = arith.constant 0 : i32
    %c0_i32_1 = arith.constant 0 : i32
    return %c0_i32, %c0_i32_0 : i32, i32
  }
  func.func @transform_3(%arg0: i32, %arg1: i32) -> (i32, i32) {
    %c0_i32 = arith.constant 0 : i32
    %c0_i32_0 = arith.constant 0 : i32
    %c0_i32_1 = arith.constant 0 : i32
    return %c0_i32, %c0_i32_0 : i32, i32
  }
  func.func @transform_4(%arg0: i32, %arg1: i32) -> (i32, i32) {
    %c0_i32 = arith.constant 0 : i32
    %c0_i32_0 = arith.constant 0 : i32
    return %arg0, %c0_i32 : i32, i32
  }
}

module attributes {stable_mosaic.version = 11 : i64} {
  func.func @kernel(%arg0: memref<2x18x18x64xbf16, #tpu.memory_space<vmem>>, %arg1: memref<2x8x16x64xbf16, #tpu.memory_space<vmem>>) attributes {dimension_semantics = [], scalar_prefetch = 0 : i64, scratch_operands = 0 : i64, tpu.core_type = #tpu.core_type<tc>} {
    %c0 = arith.constant 0 : index
    %c0_0 = arith.constant 0 : index
    %c0_1 = arith.constant 0 : index
    %c0_2 = arith.constant 0 : index
    %0 = vector.load %arg0[%c0, %c0_0, %c0_1, %c0_2] : memref<2x18x18x64xbf16, #tpu.memory_space<vmem>>, vector<2x18x18x64xbf16>
    %1 = vector.extract_strided_slice %0 {offsets = [0, 0, 0, 0], sizes = [2, 18, 16, 64], strides = [1, 1, 1, 1]} : vector<2x18x18x64xbf16> to vector<2x18x16x64xbf16>
    %2 = vector.extract_strided_slice %0 {offsets = [0, 0, 1, 0], sizes = [2, 18, 16, 64], strides = [1, 1, 1, 1]} : vector<2x18x18x64xbf16> to vector<2x18x16x64xbf16>
    %3 = arith.maximumf %1, %2 : vector<2x18x16x64xbf16>
    %4 = vector.extract_strided_slice %0 {offsets = [0, 0, 2, 0], sizes = [2, 18, 16, 64], strides = [1, 1, 1, 1]} : vector<2x18x18x64xbf16> to vector<2x18x16x64xbf16>
    %5 = arith.maximumf %3, %4 : vector<2x18x16x64xbf16>
    %6 = vector.extract_strided_slice %5 {offsets = [0, 0, 0, 0], sizes = [2, 1, 16, 64], strides = [1, 1, 1, 1]} : vector<2x18x16x64xbf16> to vector<2x1x16x64xbf16>
    %7 = vector.shape_cast %6 : vector<2x1x16x64xbf16> to vector<2x16x64xbf16>
    %8 = vector.extract_strided_slice %5 {offsets = [0, 1, 0, 0], sizes = [2, 1, 16, 64], strides = [1, 1, 1, 1]} : vector<2x18x16x64xbf16> to vector<2x1x16x64xbf16>
    %9 = vector.shape_cast %8 : vector<2x1x16x64xbf16> to vector<2x16x64xbf16>
    %10 = arith.maximumf %7, %9 : vector<2x16x64xbf16>
    %11 = vector.extract_strided_slice %5 {offsets = [0, 2, 0, 0], sizes = [2, 1, 16, 64], strides = [1, 1, 1, 1]} : vector<2x18x16x64xbf16> to vector<2x1x16x64xbf16>
    %12 = vector.shape_cast %11 : vector<2x1x16x64xbf16> to vector<2x16x64xbf16>
    %13 = arith.maximumf %10, %12 : vector<2x16x64xbf16>
    %14 = vector.shape_cast %13 : vector<2x16x64xbf16> to vector<2x1x16x64xbf16>
    %c0_3 = arith.constant 0 : index
    %c0_4 = arith.constant 0 : index
    %c0_5 = arith.constant 0 : index
    %c0_6 = arith.constant 0 : index
    %15 = vector.load %arg1[%c0_3, %c0_4, %c0_5, %c0_6] : memref<2x8x16x64xbf16, #tpu.memory_space<vmem>>, vector<2x1x16x64xbf16>
    tpu.vector_store %arg1[%c0_3, %c0_4, %c0_5, %c0_6], %14 {strides = array<i32>} : memref<2x8x16x64xbf16, #tpu.memory_space<vmem>>, vector<2x1x16x64xbf16>,
    %16 = vector.extract_strided_slice %5 {offsets = [0, 2, 0, 0], sizes = [2, 1, 16, 64], strides = [1, 1, 1, 1]} : vector<2x18x16x64xbf16> to vector<2x1x16x64xbf16>
    %17 = vector.shape_cast %16 : vector<2x1x16x64xbf16> to vector<2x16x64xbf16>
    %18 = vector.extract_strided_slice %5 {offsets = [0, 3, 0, 0], sizes = [2, 1, 16, 64], strides = [1, 1, 1, 1]} : vector<2x18x16x64xbf16> to vector<2x1x16x64xbf16>
    %19 = vector.shape_cast %18 : vector<2x1x16x64xbf16> to vector<2x16x64xbf16>
    %20 = arith.maximumf %17, %19 : vector<2x16x64xbf16>
    %21 = vector.extract_strided_slice %5 {offsets = [0, 4, 0, 0], sizes = [2, 1, 16, 64], strides = [1, 1, 1, 1]} : vector<2x18x16x64xbf16> to vector<2x1x16x64xbf16>
    %22 = vector.shape_cast %21 : vector<2x1x16x64xbf16> to vector<2x16x64xbf16>
    %23 = arith.maximumf %20, %22 : vector<2x16x64xbf16>
    %24 = vector.shape_cast %23 : vector<2x16x64xbf16> to vector<2x1x16x64xbf16>
    %c0_7 = arith.constant 0 : index
    %c1 = arith.constant 1 : index
    %c0_8 = arith.constant 0 : index
    %c0_9 = arith.constant 0 : index
    %25 = vector.load %arg1[%c0_7, %c1, %c0_8, %c0_9] : memref<2x8x16x64xbf16, #tpu.memory_space<vmem>>, vector<2x1x16x64xbf16>
    tpu.vector_store %arg1[%c0_7, %c1, %c0_8, %c0_9], %24 {strides = array<i32>} : memref<2x8x16x64xbf16, #tpu.memory_space<vmem>>, vector<2x1x16x64xbf16>,
    %26 = vector.extract_strided_slice %5 {offsets = [0, 4, 0, 0], sizes = [2, 1, 16, 64], strides = [1, 1, 1, 1]} : vector<2x18x16x64xbf16> to vector<2x1x16x64xbf16>
    %27 = vector.shape_cast %26 : vector<2x1x16x64xbf16> to vector<2x16x64xbf16>
    %28 = vector.extract_strided_slice %5 {offsets = [0, 5, 0, 0], sizes = [2, 1, 16, 64], strides = [1, 1, 1, 1]} : vector<2x18x16x64xbf16> to vector<2x1x16x64xbf16>
    %29 = vector.shape_cast %28 : vector<2x1x16x64xbf16> to vector<2x16x64xbf16>
    %30 = arith.maximumf %27, %29 : vector<2x16x64xbf16>
    %31 = vector.extract_strided_slice %5 {offsets = [0, 6, 0, 0], sizes = [2, 1, 16, 64], strides = [1, 1, 1, 1]} : vector<2x18x16x64xbf16> to vector<2x1x16x64xbf16>
    %32 = vector.shape_cast %31 : vector<2x1x16x64xbf16> to vector<2x16x64xbf16>
    %33 = arith.maximumf %30, %32 : vector<2x16x64xbf16>
    %34 = vector.shape_cast %33 : vector<2x16x64xbf16> to vector<2x1x16x64xbf16>
    %c0_10 = arith.constant 0 : index
    %c2 = arith.constant 2 : index
    %c0_11 = arith.constant 0 : index
    %c0_12 = arith.constant 0 : index
    %35 = vector.load %arg1[%c0_10, %c2, %c0_11, %c0_12] : memref<2x8x16x64xbf16, #tpu.memory_space<vmem>>, vector<2x1x16x64xbf16>
    tpu.vector_store %arg1[%c0_10, %c2, %c0_11, %c0_12], %34 {strides = array<i32>} : memref<2x8x16x64xbf16, #tpu.memory_space<vmem>>, vector<2x1x16x64xbf16>,
    %36 = vector.extract_strided_slice %5 {offsets = [0, 6, 0, 0], sizes = [2, 1, 16, 64], strides = [1, 1, 1, 1]} : vector<2x18x16x64xbf16> to vector<2x1x16x64xbf16>
    %37 = vector.shape_cast %36 : vector<2x1x16x64xbf16> to vector<2x16x64xbf16>
    %38 = vector.extract_strided_slice %5 {offsets = [0, 7, 0, 0], sizes = [2, 1, 16, 64], strides = [1, 1, 1, 1]} : vector<2x18x16x64xbf16> to vector<2x1x16x64xbf16>
    %39 = vector.shape_cast %38 : vector<2x1x16x64xbf16> to vector<2x16x64xbf16>
    %40 = arith.maximumf %37, %39 : vector<2x16x64xbf16>
    %41 = vector.extract_strided_slice %5 {offsets = [0, 8, 0, 0], sizes = [2, 1, 16, 64], strides = [1, 1, 1, 1]} : vector<2x18x16x64xbf16> to vector<2x1x16x64xbf16>
    %42 = vector.shape_cast %41 : vector<2x1x16x64xbf16> to vector<2x16x64xbf16>
    %43 = arith.maximumf %40, %42 : vector<2x16x64xbf16>
    %44 = vector.shape_cast %43 : vector<2x16x64xbf16> to vector<2x1x16x64xbf16>
    %c0_13 = arith.constant 0 : index
    %c3 = arith.constant 3 : index
    %c0_14 = arith.constant 0 : index
    %c0_15 = arith.constant 0 : index
    %45 = vector.load %arg1[%c0_13, %c3, %c0_14, %c0_15] : memref<2x8x16x64xbf16, #tpu.memory_space<vmem>>, vector<2x1x16x64xbf16>
    tpu.vector_store %arg1[%c0_13, %c3, %c0_14, %c0_15], %44 {strides = array<i32>} : memref<2x8x16x64xbf16, #tpu.memory_space<vmem>>, vector<2x1x16x64xbf16>,
    %46 = vector.extract_strided_slice %5 {offsets = [0, 8, 0, 0], sizes = [2, 1, 16, 64], strides = [1, 1, 1, 1]} : vector<2x18x16x64xbf16> to vector<2x1x16x64xbf16>
    %47 = vector.shape_cast %46 : vector<2x1x16x64xbf16> to vector<2x16x64xbf16>
    %48 = vector.extract_strided_slice %5 {offsets = [0, 9, 0, 0], sizes = [2, 1, 16, 64], strides = [1, 1, 1, 1]} : vector<2x18x16x64xbf16> to vector<2x1x16x64xbf16>
    %49 = vector.shape_cast %48 : vector<2x1x16x64xbf16> to vector<2x16x64xbf16>
    %50 = arith.maximumf %47, %49 : vector<2x16x64xbf16>
    %51 = vector.extract_strided_slice %5 {offsets = [0, 10, 0, 0], sizes = [2, 1, 16, 64], strides = [1, 1, 1, 1]} : vector<2x18x16x64xbf16> to vector<2x1x16x64xbf16>
    %52 = vector.shape_cast %51 : vector<2x1x16x64xbf16> to vector<2x16x64xbf16>
    %53 = arith.maximumf %50, %52 : vector<2x16x64xbf16>
    %54 = vector.shape_cast %53 : vector<2x16x64xbf16> to vector<2x1x16x64xbf16>
    %c0_16 = arith.constant 0 : index
    %c4 = arith.constant 4 : index
    %c0_17 = arith.constant 0 : index
    %c0_18 = arith.constant 0 : index
    %55 = vector.load %arg1[%c0_16, %c4, %c0_17, %c0_18] : memref<2x8x16x64xbf16, #tpu.memory_space<vmem>>, vector<2x1x16x64xbf16>
    tpu.vector_store %arg1[%c0_16, %c4, %c0_17, %c0_18], %54 {strides = array<i32>} : memref<2x8x16x64xbf16, #tpu.memory_space<vmem>>, vector<2x1x16x64xbf16>,
    %56 = vector.extract_strided_slice %5 {offsets = [0, 10, 0, 0], sizes = [2, 1, 16, 64], strides = [1, 1, 1, 1]} : vector<2x18x16x64xbf16> to vector<2x1x16x64xbf16>
    %57 = vector.shape_cast %56 : vector<2x1x16x64xbf16> to vector<2x16x64xbf16>
    %58 = vector.extract_strided_slice %5 {offsets = [0, 11, 0, 0], sizes = [2, 1, 16, 64], strides = [1, 1, 1, 1]} : vector<2x18x16x64xbf16> to vector<2x1x16x64xbf16>
    %59 = vector.shape_cast %58 : vector<2x1x16x64xbf16> to vector<2x16x64xbf16>
    %60 = arith.maximumf %57, %59 : vector<2x16x64xbf16>
    %61 = vector.extract_strided_slice %5 {offsets = [0, 12, 0, 0], sizes = [2, 1, 16, 64], strides = [1, 1, 1, 1]} : vector<2x18x16x64xbf16> to vector<2x1x16x64xbf16>
    %62 = vector.shape_cast %61 : vector<2x1x16x64xbf16> to vector<2x16x64xbf16>
    %63 = arith.maximumf %60, %62 : vector<2x16x64xbf16>
    %64 = vector.shape_cast %63 : vector<2x16x64xbf16> to vector<2x1x16x64xbf16>
    %c0_19 = arith.constant 0 : index
    %c5 = arith.constant 5 : index
    %c0_20 = arith.constant 0 : index
    %c0_21 = arith.constant 0 : index
    %65 = vector.load %arg1[%c0_19, %c5, %c0_20, %c0_21] : memref<2x8x16x64xbf16, #tpu.memory_space<vmem>>, vector<2x1x16x64xbf16>
    tpu.vector_store %arg1[%c0_19, %c5, %c0_20, %c0_21], %64 {strides = array<i32>} : memref<2x8x16x64xbf16, #tpu.memory_space<vmem>>, vector<2x1x16x64xbf16>,
    %66 = vector.extract_strided_slice %5 {offsets = [0, 12, 0, 0], sizes = [2, 1, 16, 64], strides = [1, 1, 1, 1]} : vector<2x18x16x64xbf16> to vector<2x1x16x64xbf16>
    %67 = vector.shape_cast %66 : vector<2x1x16x64xbf16> to vector<2x16x64xbf16>
    %68 = vector.extract_strided_slice %5 {offsets = [0, 13, 0, 0], sizes = [2, 1, 16, 64], strides = [1, 1, 1, 1]} : vector<2x18x16x64xbf16> to vector<2x1x16x64xbf16>
    %69 = vector.shape_cast %68 : vector<2x1x16x64xbf16> to vector<2x16x64xbf16>
    %70 = arith.maximumf %67, %69 : vector<2x16x64xbf16>
    %71 = vector.extract_strided_slice %5 {offsets = [0, 14, 0, 0], sizes = [2, 1, 16, 64], strides = [1, 1, 1, 1]} : vector<2x18x16x64xbf16> to vector<2x1x16x64xbf16>
    %72 = vector.shape_cast %71 : vector<2x1x16x64xbf16> to vector<2x16x64xbf16>
    %73 = arith.maximumf %70, %72 : vector<2x16x64xbf16>
    %74 = vector.shape_cast %73 : vector<2x16x64xbf16> to vector<2x1x16x64xbf16>
    %c0_22 = arith.constant 0 : index
    %c6 = arith.constant 6 : index
    %c0_23 = arith.constant 0 : index
    %c0_24 = arith.constant 0 : index
    %75 = vector.load %arg1[%c0_22, %c6, %c0_23, %c0_24] : memref<2x8x16x64xbf16, #tpu.memory_space<vmem>>, vector<2x1x16x64xbf16>
    tpu.vector_store %arg1[%c0_22, %c6, %c0_23, %c0_24], %74 {strides = array<i32>} : memref<2x8x16x64xbf16, #tpu.memory_space<vmem>>, vector<2x1x16x64xbf16>,
    %76 = vector.extract_strided_slice %5 {offsets = [0, 14, 0, 0], sizes = [2, 1, 16, 64], strides = [1, 1, 1, 1]} : vector<2x18x16x64xbf16> to vector<2x1x16x64xbf16>
    %77 = vector.shape_cast %76 : vector<2x1x16x64xbf16> to vector<2x16x64xbf16>
    %78 = vector.extract_strided_slice %5 {offsets = [0, 15, 0, 0], sizes = [2, 1, 16, 64], strides = [1, 1, 1, 1]} : vector<2x18x16x64xbf16> to vector<2x1x16x64xbf16>
    %79 = vector.shape_cast %78 : vector<2x1x16x64xbf16> to vector<2x16x64xbf16>
    %80 = arith.maximumf %77, %79 : vector<2x16x64xbf16>
    %81 = vector.extract_strided_slice %5 {offsets = [0, 16, 0, 0], sizes = [2, 1, 16, 64], strides = [1, 1, 1, 1]} : vector<2x18x16x64xbf16> to vector<2x1x16x64xbf16>
    %82 = vector.shape_cast %81 : vector<2x1x16x64xbf16> to vector<2x16x64xbf16>
    %83 = arith.maximumf %80, %82 : vector<2x16x64xbf16>
    %84 = vector.shape_cast %83 : vector<2x16x64xbf16> to vector<2x1x16x64xbf16>
    %c0_25 = arith.constant 0 : index
    %c7 = arith.constant 7 : index
    %c0_26 = arith.constant 0 : index
    %c0_27 = arith.constant 0 : index
    %85 = vector.load %arg1[%c0_25, %c7, %c0_26, %c0_27] : memref<2x8x16x64xbf16, #tpu.memory_space<vmem>>, vector<2x1x16x64xbf16>
    tpu.vector_store %arg1[%c0_25, %c7, %c0_26, %c0_27], %84 {strides = array<i32>} : memref<2x8x16x64xbf16, #tpu.memory_space<vmem>>, vector<2x1x16x64xbf16>,
    return
  }
}

module attributes {stable_mosaic.version = 11 : i64} {
  func.func @kernel(%arg0: i32, %arg1: i32, %arg2: memref<128x640xbf16, #tpu.memory_space<vmem>>, %arg3: memref<640x64xbf16, #tpu.memory_space<vmem>>, %arg4: memref<1x64xf32, #tpu.memory_space<vmem>>, %arg5: memref<1x64xf32, #tpu.memory_space<vmem>>, %arg6: memref<128x64xbf16, #tpu.memory_space<vmem>>, %arg7: memref<128x64xf32, #tpu.memory_space<vmem>>) attributes {dimension_semantics = [#tpu.dimension_semantics<parallel>, #tpu.dimension_semantics<arbitrary>], iteration_bounds = array<i64: 1, 1>, scalar_prefetch = 0 : i64, scratch_operands = 1 : i64, tpu.core_type = #tpu.core_type<tc>, window_params = [{transform_indices = @transform_0, window_bounds = array<i64: 128, 640>}, {transform_indices = @transform_1, window_bounds = array<i64: 640, 64>}, {pipeline_mode = #tpu.pipeline_mode<synchronous>, transform_indices = @transform_2, window_bounds = array<i64: 1, 64>}, {pipeline_mode = #tpu.pipeline_mode<synchronous>, transform_indices = @transform_3, window_bounds = array<i64: 1, 64>}, {transform_indices = @transform_4, window_bounds = array<i64: 128, 64>}]} {
    %c0_i32 = arith.constant 0 : i32
    %0 = arith.cmpi eq, %arg1, %c0_i32 : i32
    %1 = arith.extui %0 : i1 to i32
    %c0_i32_0 = arith.constant 0 : i32
    %2 = arith.cmpi ne, %1, %c0_i32_0 : i32
    scf.if %2 {
      %cst_10 = arith.constant 0.000000e+00 : f32
      %12 = vector.broadcast %cst_10 : f32 to vector<128x64xf32>
      %c0_11 = arith.constant 0 : index
      %c0_12 = arith.constant 0 : index
      %13 = vector.load %arg7[%c0_11, %c0_12] : memref<128x64xf32, #tpu.memory_space<vmem>>, vector<128x64xf32>
      tpu.vector_store %arg7[%c0_11, %c0_12], %12 {strides = array<i32>} : memref<128x64xf32, #tpu.memory_space<vmem>>, vector<128x64xf32>,
    } else {
    }
    %c0 = arith.constant 0 : index
    %c0_1 = arith.constant 0 : index
    %3 = vector.load %arg7[%c0, %c0_1] : memref<128x64xf32, #tpu.memory_space<vmem>>, vector<128x64xf32>
    %c0_2 = arith.constant 0 : index
    %c0_3 = arith.constant 0 : index
    %4 = vector.load %arg2[%c0_2, %c0_3] : memref<128x640xbf16, #tpu.memory_space<vmem>>, vector<128x640xbf16>
    %c0_4 = arith.constant 0 : index
    %c0_5 = arith.constant 0 : index
    %5 = vector.load %arg3[%c0_4, %c0_5] : memref<640x64xbf16, #tpu.memory_space<vmem>>, vector<640x64xbf16>
    %cst = arith.constant dense<0.000000e+00> : vector<128x64xf32>
    %6 = tpu.matmul %4, %5, %cst {dimension_numbers = #tpu.dot_dimension_numbers<[1], [0], [0], [1], [0, 0, 1, 1], [], []>} : vector<128x640xbf16>, vector<640x64xbf16>, vector<128x64xf32> -> vector<128x64xf32>
    %7 = arith.addf %3, %6 : vector<128x64xf32>
    %c0_6 = arith.constant 0 : index
    %c0_7 = arith.constant 0 : index
    %8 = vector.load %arg7[%c0_6, %c0_7] : memref<128x64xf32, #tpu.memory_space<vmem>>, vector<128x64xf32>
    tpu.vector_store %arg7[%c0_6, %c0_7], %7 {strides = array<i32>} : memref<128x64xf32, #tpu.memory_space<vmem>>, vector<128x64xf32>,
    %c0_i32_8 = arith.constant 0 : i32
    %9 = arith.cmpi eq, %arg1, %c0_i32_8 : i32
    %10 = arith.extui %9 : i1 to i32
    %c0_i32_9 = arith.constant 0 : i32
    %11 = arith.cmpi ne, %10, %c0_i32_9 : i32
    scf.if %11 {
      %c0_10 = arith.constant 0 : index
      %c0_11 = arith.constant 0 : index
      %12 = vector.load %arg7[%c0_10, %c0_11] : memref<128x64xf32, #tpu.memory_space<vmem>>, vector<128x64xf32>
      %c0_12 = arith.constant 0 : index
      %c0_13 = arith.constant 0 : index
      %13 = vector.load %arg4[%c0_12, %c0_13] : memref<1x64xf32, #tpu.memory_space<vmem>>, vector<1x64xf32>
      %14 = vector.broadcast %13 : vector<1x64xf32> to vector<128x64xf32>
      %15 = arith.mulf %12, %14 : vector<128x64xf32>
      %c0_14 = arith.constant 0 : index
      %c0_15 = arith.constant 0 : index
      %16 = vector.load %arg5[%c0_14, %c0_15] : memref<1x64xf32, #tpu.memory_space<vmem>>, vector<1x64xf32>
      %17 = vector.broadcast %16 : vector<1x64xf32> to vector<128x64xf32>
      %18 = arith.addf %15, %17 : vector<128x64xf32>
      %cst_16 = arith.constant 0.000000e+00 : f32
      %19 = vector.broadcast %cst_16 : f32 to vector<128x64xf32>
      %20 = arith.maximumf %18, %19 : vector<128x64xf32>
      %21 = arith.truncf %20 : vector<128x64xf32> to vector<128x64xbf16>
      %c0_17 = arith.constant 0 : index
      %c0_18 = arith.constant 0 : index
      %22 = vector.load %arg6[%c0_17, %c0_18] : memref<128x64xbf16, #tpu.memory_space<vmem>>, vector<128x64xbf16>
      tpu.vector_store %arg6[%c0_17, %c0_18], %21 {strides = array<i32>} : memref<128x64xbf16, #tpu.memory_space<vmem>>, vector<128x64xbf16>,
    } else {
    }
    return
  }
  func.func @transform_0(%arg0: i32, %arg1: i32) -> (i32, i32) {
    %c0_i32 = arith.constant 0 : i32
    return %arg0, %arg1 : i32, i32
  }
  func.func @transform_1(%arg0: i32, %arg1: i32) -> (i32, i32) {
    %c0_i32 = arith.constant 0 : i32
    %c0_i32_0 = arith.constant 0 : i32
    return %arg1, %c0_i32 : i32, i32
  }
  func.func @transform_2(%arg0: i32, %arg1: i32) -> (i32, i32) {
    %c0_i32 = arith.constant 0 : i32
    %c0_i32_0 = arith.constant 0 : i32
    %c0_i32_1 = arith.constant 0 : i32
    return %c0_i32, %c0_i32_0 : i32, i32
  }
  func.func @transform_3(%arg0: i32, %arg1: i32) -> (i32, i32) {
    %c0_i32 = arith.constant 0 : i32
    %c0_i32_0 = arith.constant 0 : i32
    %c0_i32_1 = arith.constant 0 : i32
    return %c0_i32, %c0_i32_0 : i32, i32
  }
  func.func @transform_4(%arg0: i32, %arg1: i32) -> (i32, i32) {
    %c0_i32 = arith.constant 0 : i32
    %c0_i32_0 = arith.constant 0 : i32
    return %arg0, %c0_i32 : i32, i32
  }
}

module attributes {stable_mosaic.version = 11 : i64} {
  func.func @kernel(%arg0: i32, %arg1: i32, %arg2: memref<128x640xbf16, #tpu.memory_space<vmem>>, %arg3: memref<640x64xbf16, #tpu.memory_space<vmem>>, %arg4: memref<1x64xf32, #tpu.memory_space<vmem>>, %arg5: memref<1x64xf32, #tpu.memory_space<vmem>>, %arg6: memref<128x64xbf16, #tpu.memory_space<vmem>>, %arg7: memref<128x64xbf16, #tpu.memory_space<vmem>>, %arg8: memref<128x64xf32, #tpu.memory_space<vmem>>) attributes {dimension_semantics = [#tpu.dimension_semantics<parallel>, #tpu.dimension_semantics<arbitrary>], iteration_bounds = array<i64: 1, 1>, scalar_prefetch = 0 : i64, scratch_operands = 1 : i64, tpu.core_type = #tpu.core_type<tc>, window_params = [{transform_indices = @transform_0, window_bounds = array<i64: 128, 640>}, {transform_indices = @transform_1, window_bounds = array<i64: 640, 64>}, {pipeline_mode = #tpu.pipeline_mode<synchronous>, transform_indices = @transform_2, window_bounds = array<i64: 1, 64>}, {pipeline_mode = #tpu.pipeline_mode<synchronous>, transform_indices = @transform_3, window_bounds = array<i64: 1, 64>}, {transform_indices = @transform_4, window_bounds = array<i64: 128, 64>}, {transform_indices = @transform_5, window_bounds = array<i64: 128, 64>}]} {
    %c0_i32 = arith.constant 0 : i32
    %0 = arith.cmpi eq, %arg1, %c0_i32 : i32
    %1 = arith.extui %0 : i1 to i32
    %c0_i32_0 = arith.constant 0 : i32
    %2 = arith.cmpi ne, %1, %c0_i32_0 : i32
    scf.if %2 {
      %cst_10 = arith.constant 0.000000e+00 : f32
      %12 = vector.broadcast %cst_10 : f32 to vector<128x64xf32>
      %c0_11 = arith.constant 0 : index
      %c0_12 = arith.constant 0 : index
      %13 = vector.load %arg8[%c0_11, %c0_12] : memref<128x64xf32, #tpu.memory_space<vmem>>, vector<128x64xf32>
      tpu.vector_store %arg8[%c0_11, %c0_12], %12 {strides = array<i32>} : memref<128x64xf32, #tpu.memory_space<vmem>>, vector<128x64xf32>,
    } else {
    }
    %c0 = arith.constant 0 : index
    %c0_1 = arith.constant 0 : index
    %3 = vector.load %arg8[%c0, %c0_1] : memref<128x64xf32, #tpu.memory_space<vmem>>, vector<128x64xf32>
    %c0_2 = arith.constant 0 : index
    %c0_3 = arith.constant 0 : index
    %4 = vector.load %arg2[%c0_2, %c0_3] : memref<128x640xbf16, #tpu.memory_space<vmem>>, vector<128x640xbf16>
    %c0_4 = arith.constant 0 : index
    %c0_5 = arith.constant 0 : index
    %5 = vector.load %arg3[%c0_4, %c0_5] : memref<640x64xbf16, #tpu.memory_space<vmem>>, vector<640x64xbf16>
    %cst = arith.constant dense<0.000000e+00> : vector<128x64xf32>
    %6 = tpu.matmul %4, %5, %cst {dimension_numbers = #tpu.dot_dimension_numbers<[1], [0], [0], [1], [0, 0, 1, 1], [], []>} : vector<128x640xbf16>, vector<640x64xbf16>, vector<128x64xf32> -> vector<128x64xf32>
    %7 = arith.addf %3, %6 : vector<128x64xf32>
    %c0_6 = arith.constant 0 : index
    %c0_7 = arith.constant 0 : index
    %8 = vector.load %arg8[%c0_6, %c0_7] : memref<128x64xf32, #tpu.memory_space<vmem>>, vector<128x64xf32>
    tpu.vector_store %arg8[%c0_6, %c0_7], %7 {strides = array<i32>} : memref<128x64xf32, #tpu.memory_space<vmem>>, vector<128x64xf32>,
    %c0_i32_8 = arith.constant 0 : i32
    %9 = arith.cmpi eq, %arg1, %c0_i32_8 : i32
    %10 = arith.extui %9 : i1 to i32
    %c0_i32_9 = arith.constant 0 : i32
    %11 = arith.cmpi ne, %10, %c0_i32_9 : i32
    scf.if %11 {
      %c0_10 = arith.constant 0 : index
      %c0_11 = arith.constant 0 : index
      %12 = vector.load %arg8[%c0_10, %c0_11] : memref<128x64xf32, #tpu.memory_space<vmem>>, vector<128x64xf32>
      %c0_12 = arith.constant 0 : index
      %c0_13 = arith.constant 0 : index
      %13 = vector.load %arg4[%c0_12, %c0_13] : memref<1x64xf32, #tpu.memory_space<vmem>>, vector<1x64xf32>
      %14 = vector.broadcast %13 : vector<1x64xf32> to vector<128x64xf32>
      %15 = arith.mulf %12, %14 : vector<128x64xf32>
      %c0_14 = arith.constant 0 : index
      %c0_15 = arith.constant 0 : index
      %16 = vector.load %arg5[%c0_14, %c0_15] : memref<1x64xf32, #tpu.memory_space<vmem>>, vector<1x64xf32>
      %17 = vector.broadcast %16 : vector<1x64xf32> to vector<128x64xf32>
      %18 = arith.addf %15, %17 : vector<128x64xf32>
      %c0_16 = arith.constant 0 : index
      %c0_17 = arith.constant 0 : index
      %19 = vector.load %arg6[%c0_16, %c0_17] : memref<128x64xbf16, #tpu.memory_space<vmem>>, vector<128x64xbf16>
      %20 = arith.extf %19 : vector<128x64xbf16> to vector<128x64xf32>
      %21 = arith.addf %18, %20 : vector<128x64xf32>
      %cst_18 = arith.constant 0.000000e+00 : f32
      %22 = vector.broadcast %cst_18 : f32 to vector<128x64xf32>
      %23 = arith.maximumf %21, %22 : vector<128x64xf32>
      %24 = arith.truncf %23 : vector<128x64xf32> to vector<128x64xbf16>
      %c0_19 = arith.constant 0 : index
      %c0_20 = arith.constant 0 : index
      %25 = vector.load %arg7[%c0_19, %c0_20] : memref<128x64xbf16, #tpu.memory_space<vmem>>, vector<128x64xbf16>
      tpu.vector_store %arg7[%c0_19, %c0_20], %24 {strides = array<i32>} : memref<128x64xbf16, #tpu.memory_space<vmem>>, vector<128x64xbf16>,
    } else {
    }
    return
  }
  func.func @transform_0(%arg0: i32, %arg1: i32) -> (i32, i32) {
    %c0_i32 = arith.constant 0 : i32
    return %arg0, %arg1 : i32, i32
  }
  func.func @transform_1(%arg0: i32, %arg1: i32) -> (i32, i32) {
    %c0_i32 = arith.constant 0 : i32
    %c0_i32_0 = arith.constant 0 : i32
    return %arg1, %c0_i32 : i32, i32
  }
  func.func @transform_2(%arg0: i32, %arg1: i32) -> (i32, i32) {
    %c0_i32 = arith.constant 0 : i32
    %c0_i32_0 = arith.constant 0 : i32
    %c0_i32_1 = arith.constant 0 : i32
    return %c0_i32, %c0_i32_0 : i32, i32
  }
  func.func @transform_3(%arg0: i32, %arg1: i32) -> (i32, i32) {
    %c0_i32 = arith.constant 0 : i32
    %c0_i32_0 = arith.constant 0 : i32
    %c0_i32_1 = arith.constant 0 : i32
    return %c0_i32, %c0_i32_0 : i32, i32
  }
  func.func @transform_4(%arg0: i32, %arg1: i32) -> (i32, i32) {
    %c0_i32 = arith.constant 0 : i32
    %c0_i32_0 = arith.constant 0 : i32
    return %arg0, %c0_i32 : i32, i32
  }
  func.func @transform_5(%arg0: i32, %arg1: i32) -> (i32, i32) {
    %c0_i32 = arith.constant 0 : i32
    %c0_i32_0 = arith.constant 0 : i32
    return %arg0, %c0_i32 : i32, i32
  }
}

module attributes {stable_mosaic.version = 11 : i64} {
  func.func @kernel(%arg0: i32, %arg1: i32, %arg2: memref<32x640xbf16, #tpu.memory_space<vmem>>, %arg3: memref<640x128xbf16, #tpu.memory_space<vmem>>, %arg4: memref<1x128xf32, #tpu.memory_space<vmem>>, %arg5: memref<1x128xf32, #tpu.memory_space<vmem>>, %arg6: memref<32x128xbf16, #tpu.memory_space<vmem>>, %arg7: memref<32x128xf32, #tpu.memory_space<vmem>>) attributes {dimension_semantics = [#tpu.dimension_semantics<parallel>, #tpu.dimension_semantics<arbitrary>], iteration_bounds = array<i64: 1, 1>, scalar_prefetch = 0 : i64, scratch_operands = 1 : i64, tpu.core_type = #tpu.core_type<tc>, window_params = [{transform_indices = @transform_0, window_bounds = array<i64: 32, 640>}, {transform_indices = @transform_1, window_bounds = array<i64: 640, 128>}, {pipeline_mode = #tpu.pipeline_mode<synchronous>, transform_indices = @transform_2, window_bounds = array<i64: 1, 128>}, {pipeline_mode = #tpu.pipeline_mode<synchronous>, transform_indices = @transform_3, window_bounds = array<i64: 1, 128>}, {transform_indices = @transform_4, window_bounds = array<i64: 32, 128>}]} {
    %c0_i32 = arith.constant 0 : i32
    %0 = arith.cmpi eq, %arg1, %c0_i32 : i32
    %1 = arith.extui %0 : i1 to i32
    %c0_i32_0 = arith.constant 0 : i32
    %2 = arith.cmpi ne, %1, %c0_i32_0 : i32
    scf.if %2 {
      %cst_10 = arith.constant 0.000000e+00 : f32
      %12 = vector.broadcast %cst_10 : f32 to vector<32x128xf32>
      %c0_11 = arith.constant 0 : index
      %c0_12 = arith.constant 0 : index
      %13 = vector.load %arg7[%c0_11, %c0_12] : memref<32x128xf32, #tpu.memory_space<vmem>>, vector<32x128xf32>
      tpu.vector_store %arg7[%c0_11, %c0_12], %12 {strides = array<i32>} : memref<32x128xf32, #tpu.memory_space<vmem>>, vector<32x128xf32>,
    } else {
    }
    %c0 = arith.constant 0 : index
    %c0_1 = arith.constant 0 : index
    %3 = vector.load %arg7[%c0, %c0_1] : memref<32x128xf32, #tpu.memory_space<vmem>>, vector<32x128xf32>
    %c0_2 = arith.constant 0 : index
    %c0_3 = arith.constant 0 : index
    %4 = vector.load %arg2[%c0_2, %c0_3] : memref<32x640xbf16, #tpu.memory_space<vmem>>, vector<32x640xbf16>
    %c0_4 = arith.constant 0 : index
    %c0_5 = arith.constant 0 : index
    %5 = vector.load %arg3[%c0_4, %c0_5] : memref<640x128xbf16, #tpu.memory_space<vmem>>, vector<640x128xbf16>
    %cst = arith.constant dense<0.000000e+00> : vector<32x128xf32>
    %6 = tpu.matmul %4, %5, %cst {dimension_numbers = #tpu.dot_dimension_numbers<[1], [0], [0], [1], [0, 0, 1, 1], [], []>} : vector<32x640xbf16>, vector<640x128xbf16>, vector<32x128xf32> -> vector<32x128xf32>
    %7 = arith.addf %3, %6 : vector<32x128xf32>
    %c0_6 = arith.constant 0 : index
    %c0_7 = arith.constant 0 : index
    %8 = vector.load %arg7[%c0_6, %c0_7] : memref<32x128xf32, #tpu.memory_space<vmem>>, vector<32x128xf32>
    tpu.vector_store %arg7[%c0_6, %c0_7], %7 {strides = array<i32>} : memref<32x128xf32, #tpu.memory_space<vmem>>, vector<32x128xf32>,
    %c0_i32_8 = arith.constant 0 : i32
    %9 = arith.cmpi eq, %arg1, %c0_i32_8 : i32
    %10 = arith.extui %9 : i1 to i32
    %c0_i32_9 = arith.constant 0 : i32
    %11 = arith.cmpi ne, %10, %c0_i32_9 : i32
    scf.if %11 {
      %c0_10 = arith.constant 0 : index
      %c0_11 = arith.constant 0 : index
      %12 = vector.load %arg7[%c0_10, %c0_11] : memref<32x128xf32, #tpu.memory_space<vmem>>, vector<32x128xf32>
      %c0_12 = arith.constant 0 : index
      %c0_13 = arith.constant 0 : index
      %13 = vector.load %arg4[%c0_12, %c0_13] : memref<1x128xf32, #tpu.memory_space<vmem>>, vector<1x128xf32>
      %14 = vector.broadcast %13 : vector<1x128xf32> to vector<32x128xf32>
      %15 = arith.mulf %12, %14 : vector<32x128xf32>
      %c0_14 = arith.constant 0 : index
      %c0_15 = arith.constant 0 : index
      %16 = vector.load %arg5[%c0_14, %c0_15] : memref<1x128xf32, #tpu.memory_space<vmem>>, vector<1x128xf32>
      %17 = vector.broadcast %16 : vector<1x128xf32> to vector<32x128xf32>
      %18 = arith.addf %15, %17 : vector<32x128xf32>
      %cst_16 = arith.constant 0.000000e+00 : f32
      %19 = vector.broadcast %cst_16 : f32 to vector<32x128xf32>
      %20 = arith.maximumf %18, %19 : vector<32x128xf32>
      %21 = arith.truncf %20 : vector<32x128xf32> to vector<32x128xbf16>
      %c0_17 = arith.constant 0 : index
      %c0_18 = arith.constant 0 : index
      %22 = vector.load %arg6[%c0_17, %c0_18] : memref<32x128xbf16, #tpu.memory_space<vmem>>, vector<32x128xbf16>
      tpu.vector_store %arg6[%c0_17, %c0_18], %21 {strides = array<i32>} : memref<32x128xbf16, #tpu.memory_space<vmem>>, vector<32x128xbf16>,
    } else {
    }
    return
  }
  func.func @transform_0(%arg0: i32, %arg1: i32) -> (i32, i32) {
    %c0_i32 = arith.constant 0 : i32
    return %arg0, %arg1 : i32, i32
  }
  func.func @transform_1(%arg0: i32, %arg1: i32) -> (i32, i32) {
    %c0_i32 = arith.constant 0 : i32
    %c0_i32_0 = arith.constant 0 : i32
    return %arg1, %c0_i32 : i32, i32
  }
  func.func @transform_2(%arg0: i32, %arg1: i32) -> (i32, i32) {
    %c0_i32 = arith.constant 0 : i32
    %c0_i32_0 = arith.constant 0 : i32
    %c0_i32_1 = arith.constant 0 : i32
    return %c0_i32, %c0_i32_0 : i32, i32
  }
  func.func @transform_3(%arg0: i32, %arg1: i32) -> (i32, i32) {
    %c0_i32 = arith.constant 0 : i32
    %c0_i32_0 = arith.constant 0 : i32
    %c0_i32_1 = arith.constant 0 : i32
    return %c0_i32, %c0_i32_0 : i32, i32
  }
  func.func @transform_4(%arg0: i32, %arg1: i32) -> (i32, i32) {
    %c0_i32 = arith.constant 0 : i32
    %c0_i32_0 = arith.constant 0 : i32
    return %arg0, %c0_i32 : i32, i32
  }
}

module attributes {stable_mosaic.version = 11 : i64} {
  func.func @kernel(%arg0: i32, %arg1: i32, %arg2: memref<32x384xbf16, #tpu.memory_space<vmem>>, %arg3: memref<384x128xbf16, #tpu.memory_space<vmem>>, %arg4: memref<1x128xf32, #tpu.memory_space<vmem>>, %arg5: memref<1x128xf32, #tpu.memory_space<vmem>>, %arg6: memref<32x64xbf16, #tpu.memory_space<vmem>>, %arg7: memref<64x128xbf16, #tpu.memory_space<vmem>>, %arg8: memref<1x128xf32, #tpu.memory_space<vmem>>, %arg9: memref<1x128xf32, #tpu.memory_space<vmem>>, %arg10: memref<32x128xbf16, #tpu.memory_space<vmem>>, %arg11: memref<32x128xf32, #tpu.memory_space<vmem>>) attributes {dimension_semantics = [#tpu.dimension_semantics<parallel>, #tpu.dimension_semantics<arbitrary>], iteration_bounds = array<i64: 1, 3>, scalar_prefetch = 0 : i64, scratch_operands = 1 : i64, tpu.core_type = #tpu.core_type<tc>, window_params = [{transform_indices = @transform_0, window_bounds = array<i64: 32, 384>}, {transform_indices = @transform_1, window_bounds = array<i64: 384, 128>}, {pipeline_mode = #tpu.pipeline_mode<synchronous>, transform_indices = @transform_2, window_bounds = array<i64: 1, 128>}, {pipeline_mode = #tpu.pipeline_mode<synchronous>, transform_indices = @transform_3, window_bounds = array<i64: 1, 128>}, {transform_indices = @transform_4, window_bounds = array<i64: 32, 64>}, {pipeline_mode = #tpu.pipeline_mode<synchronous>, transform_indices = @transform_5, window_bounds = array<i64: 64, 128>}, {pipeline_mode = #tpu.pipeline_mode<synchronous>, transform_indices = @transform_6, window_bounds = array<i64: 1, 128>}, {pipeline_mode = #tpu.pipeline_mode<synchronous>, transform_indices = @transform_7, window_bounds = array<i64: 1, 128>}, {transform_indices = @transform_8, window_bounds = array<i64: 32, 128>}]} {
    %c0_i32 = arith.constant 0 : i32
    %0 = arith.cmpi eq, %arg1, %c0_i32 : i32
    %1 = arith.extui %0 : i1 to i32
    %c0_i32_0 = arith.constant 0 : i32
    %2 = arith.cmpi ne, %1, %c0_i32_0 : i32
    scf.if %2 {
      %cst_9 = arith.constant 0.000000e+00 : f32
      %12 = vector.broadcast %cst_9 : f32 to vector<32x128xf32>
      %c0_10 = arith.constant 0 : index
      %c0_11 = arith.constant 0 : index
      %13 = vector.load %arg11[%c0_10, %c0_11] : memref<32x128xf32, #tpu.memory_space<vmem>>, vector<32x128xf32>
      tpu.vector_store %arg11[%c0_10, %c0_11], %12 {strides = array<i32>} : memref<32x128xf32, #tpu.memory_space<vmem>>, vector<32x128xf32>,
    } else {
    }
    %c0 = arith.constant 0 : index
    %c0_1 = arith.constant 0 : index
    %3 = vector.load %arg11[%c0, %c0_1] : memref<32x128xf32, #tpu.memory_space<vmem>>, vector<32x128xf32>
    %c0_2 = arith.constant 0 : index
    %c0_3 = arith.constant 0 : index
    %4 = vector.load %arg2[%c0_2, %c0_3] : memref<32x384xbf16, #tpu.memory_space<vmem>>, vector<32x384xbf16>
    %c0_4 = arith.constant 0 : index
    %c0_5 = arith.constant 0 : index
    %5 = vector.load %arg3[%c0_4, %c0_5] : memref<384x128xbf16, #tpu.memory_space<vmem>>, vector<384x128xbf16>
    %cst = arith.constant dense<0.000000e+00> : vector<32x128xf32>
    %6 = tpu.matmul %4, %5, %cst {dimension_numbers = #tpu.dot_dimension_numbers<[1], [0], [0], [1], [0, 0, 1, 1], [], []>} : vector<32x384xbf16>, vector<384x128xbf16>, vector<32x128xf32> -> vector<32x128xf32>
    %7 = arith.addf %3, %6 : vector<32x128xf32>
    %c0_6 = arith.constant 0 : index
    %c0_7 = arith.constant 0 : index
    %8 = vector.load %arg11[%c0_6, %c0_7] : memref<32x128xf32, #tpu.memory_space<vmem>>, vector<32x128xf32>
    tpu.vector_store %arg11[%c0_6, %c0_7], %7 {strides = array<i32>} : memref<32x128xf32, #tpu.memory_space<vmem>>, vector<32x128xf32>,
    %c2_i32 = arith.constant 2 : i32
    %9 = arith.cmpi eq, %arg1, %c2_i32 : i32
    %10 = arith.extui %9 : i1 to i32
    %c0_i32_8 = arith.constant 0 : i32
    %11 = arith.cmpi ne, %10, %c0_i32_8 : i32
    scf.if %11 {
      %c0_9 = arith.constant 0 : index
      %c0_10 = arith.constant 0 : index
      %12 = vector.load %arg11[%c0_9, %c0_10] : memref<32x128xf32, #tpu.memory_space<vmem>>, vector<32x128xf32>
      %c0_11 = arith.constant 0 : index
      %c0_12 = arith.constant 0 : index
      %13 = vector.load %arg4[%c0_11, %c0_12] : memref<1x128xf32, #tpu.memory_space<vmem>>, vector<1x128xf32>
      %14 = vector.broadcast %13 : vector<1x128xf32> to vector<32x128xf32>
      %15 = arith.mulf %12, %14 : vector<32x128xf32>
      %c0_13 = arith.constant 0 : index
      %c0_14 = arith.constant 0 : index
      %16 = vector.load %arg5[%c0_13, %c0_14] : memref<1x128xf32, #tpu.memory_space<vmem>>, vector<1x128xf32>
      %17 = vector.broadcast %16 : vector<1x128xf32> to vector<32x128xf32>
      %18 = arith.addf %15, %17 : vector<32x128xf32>
      %c0_15 = arith.constant 0 : index
      %c0_16 = arith.constant 0 : index
      %19 = vector.load %arg6[%c0_15, %c0_16] : memref<32x64xbf16, #tpu.memory_space<vmem>>, vector<32x64xbf16>
      %c0_17 = arith.constant 0 : index
      %c0_18 = arith.constant 0 : index
      %20 = vector.load %arg7[%c0_17, %c0_18] : memref<64x128xbf16, #tpu.memory_space<vmem>>, vector<64x128xbf16>
      %cst_19 = arith.constant dense<0.000000e+00> : vector<32x128xf32>
      %21 = tpu.matmul %19, %20, %cst_19 {dimension_numbers = #tpu.dot_dimension_numbers<[1], [0], [0], [1], [0, 0, 1, 1], [], []>} : vector<32x64xbf16>, vector<64x128xbf16>, vector<32x128xf32> -> vector<32x128xf32>
      %c0_20 = arith.constant 0 : index
      %c0_21 = arith.constant 0 : index
      %22 = vector.load %arg8[%c0_20, %c0_21] : memref<1x128xf32, #tpu.memory_space<vmem>>, vector<1x128xf32>
      %23 = vector.broadcast %22 : vector<1x128xf32> to vector<32x128xf32>
      %24 = arith.mulf %21, %23 : vector<32x128xf32>
      %25 = arith.addf %18, %24 : vector<32x128xf32>
      %c0_22 = arith.constant 0 : index
      %c0_23 = arith.constant 0 : index
      %26 = vector.load %arg9[%c0_22, %c0_23] : memref<1x128xf32, #tpu.memory_space<vmem>>, vector<1x128xf32>
      %27 = vector.broadcast %26 : vector<1x128xf32> to vector<32x128xf32>
      %28 = arith.addf %25, %27 : vector<32x128xf32>
      %cst_24 = arith.constant 0.000000e+00 : f32
      %29 = vector.broadcast %cst_24 : f32 to vector<32x128xf32>
      %30 = arith.maximumf %28, %29 : vector<32x128xf32>
      %31 = arith.truncf %30 : vector<32x128xf32> to vector<32x128xbf16>
      %c0_25 = arith.constant 0 : index
      %c0_26 = arith.constant 0 : index
      %32 = vector.load %arg10[%c0_25, %c0_26] : memref<32x128xbf16, #tpu.memory_space<vmem>>, vector<32x128xbf16>
      tpu.vector_store %arg10[%c0_25, %c0_26], %31 {strides = array<i32>} : memref<32x128xbf16, #tpu.memory_space<vmem>>, vector<32x128xbf16>,
    } else {
    }
    return
  }
  func.func @transform_0(%arg0: i32, %arg1: i32) -> (i32, i32) {
    %c0_i32 = arith.constant 0 : i32
    return %arg0, %arg1 : i32, i32
  }
  func.func @transform_1(%arg0: i32, %arg1: i32) -> (i32, i32) {
    %c0_i32 = arith.constant 0 : i32
    %c0_i32_0 = arith.constant 0 : i32
    return %arg1, %c0_i32 : i32, i32
  }
  func.func @transform_2(%arg0: i32, %arg1: i32) -> (i32, i32) {
    %c0_i32 = arith.constant 0 : i32
    %c0_i32_0 = arith.constant 0 : i32
    %c0_i32_1 = arith.constant 0 : i32
    return %c0_i32, %c0_i32_0 : i32, i32
  }
  func.func @transform_3(%arg0: i32, %arg1: i32) -> (i32, i32) {
    %c0_i32 = arith.constant 0 : i32
    %c0_i32_0 = arith.constant 0 : i32
    %c0_i32_1 = arith.constant 0 : i32
    return %c0_i32, %c0_i32_0 : i32, i32
  }
  func.func @transform_4(%arg0: i32, %arg1: i32) -> (i32, i32) {
    %c0_i32 = arith.constant 0 : i32
    %c0_i32_0 = arith.constant 0 : i32
    return %arg0, %c0_i32 : i32, i32
  }
  func.func @transform_5(%arg0: i32, %arg1: i32) -> (i32, i32) {
    %c0_i32 = arith.constant 0 : i32
    %c0_i32_0 = arith.constant 0 : i32
    %c0_i32_1 = arith.constant 0 : i32
    return %c0_i32, %c0_i32_0 : i32, i32
  }
  func.func @transform_6(%arg0: i32, %arg1: i32) -> (i32, i32) {
    %c0_i32 = arith.constant 0 : i32
    %c0_i32_0 = arith.constant 0 : i32
    %c0_i32_1 = arith.constant 0 : i32
    return %c0_i32, %c0_i32_0 : i32, i32
  }
  func.func @transform_7(%arg0: i32, %arg1: i32) -> (i32, i32) {
    %c0_i32 = arith.constant 0 : i32
    %c0_i32_0 = arith.constant 0 : i32
    %c0_i32_1 = arith.constant 0 : i32
    return %c0_i32, %c0_i32_0 : i32, i32
  }
  func.func @transform_8(%arg0: i32, %arg1: i32) -> (i32, i32) {
    %c0_i32 = arith.constant 0 : i32
    %c0_i32_0 = arith.constant 0 : i32
    return %arg0, %c0_i32 : i32, i32
  }
}

module attributes {stable_mosaic.version = 11 : i64} {
  func.func @kernel(%arg0: i32, %arg1: i32, %arg2: memref<8x384xbf16, #tpu.memory_space<vmem>>, %arg3: memref<384x256xbf16, #tpu.memory_space<vmem>>, %arg4: memref<1x256xf32, #tpu.memory_space<vmem>>, %arg5: memref<1x256xf32, #tpu.memory_space<vmem>>, %arg6: memref<8x256xbf16, #tpu.memory_space<vmem>>, %arg7: memref<8x256xf32, #tpu.memory_space<vmem>>) attributes {dimension_semantics = [#tpu.dimension_semantics<parallel>, #tpu.dimension_semantics<arbitrary>], iteration_bounds = array<i64: 1, 3>, scalar_prefetch = 0 : i64, scratch_operands = 1 : i64, tpu.core_type = #tpu.core_type<tc>, window_params = [{transform_indices = @transform_0, window_bounds = array<i64: 8, 384>}, {transform_indices = @transform_1, window_bounds = array<i64: 384, 256>}, {pipeline_mode = #tpu.pipeline_mode<synchronous>, transform_indices = @transform_2, window_bounds = array<i64: 1, 256>}, {pipeline_mode = #tpu.pipeline_mode<synchronous>, transform_indices = @transform_3, window_bounds = array<i64: 1, 256>}, {transform_indices = @transform_4, window_bounds = array<i64: 8, 256>}]} {
    %c0_i32 = arith.constant 0 : i32
    %0 = arith.cmpi eq, %arg1, %c0_i32 : i32
    %1 = arith.extui %0 : i1 to i32
    %c0_i32_0 = arith.constant 0 : i32
    %2 = arith.cmpi ne, %1, %c0_i32_0 : i32
    scf.if %2 {
      %cst_9 = arith.constant 0.000000e+00 : f32
      %12 = vector.broadcast %cst_9 : f32 to vector<8x256xf32>
      %c0_10 = arith.constant 0 : index
      %c0_11 = arith.constant 0 : index
      %13 = vector.load %arg7[%c0_10, %c0_11] : memref<8x256xf32, #tpu.memory_space<vmem>>, vector<8x256xf32>
      tpu.vector_store %arg7[%c0_10, %c0_11], %12 {strides = array<i32>} : memref<8x256xf32, #tpu.memory_space<vmem>>, vector<8x256xf32>,
    } else {
    }
    %c0 = arith.constant 0 : index
    %c0_1 = arith.constant 0 : index
    %3 = vector.load %arg7[%c0, %c0_1] : memref<8x256xf32, #tpu.memory_space<vmem>>, vector<8x256xf32>
    %c0_2 = arith.constant 0 : index
    %c0_3 = arith.constant 0 : index
    %4 = vector.load %arg2[%c0_2, %c0_3] : memref<8x384xbf16, #tpu.memory_space<vmem>>, vector<8x384xbf16>
    %c0_4 = arith.constant 0 : index
    %c0_5 = arith.constant 0 : index
    %5 = vector.load %arg3[%c0_4, %c0_5] : memref<384x256xbf16, #tpu.memory_space<vmem>>, vector<384x256xbf16>
    %cst = arith.constant dense<0.000000e+00> : vector<8x256xf32>
    %6 = tpu.matmul %4, %5, %cst {dimension_numbers = #tpu.dot_dimension_numbers<[1], [0], [0], [1], [0, 0, 1, 1], [], []>} : vector<8x384xbf16>, vector<384x256xbf16>, vector<8x256xf32> -> vector<8x256xf32>
    %7 = arith.addf %3, %6 : vector<8x256xf32>
    %c0_6 = arith.constant 0 : index
    %c0_7 = arith.constant 0 : index
    %8 = vector.load %arg7[%c0_6, %c0_7] : memref<8x256xf32, #tpu.memory_space<vmem>>, vector<8x256xf32>
    tpu.vector_store %arg7[%c0_6, %c0_7], %7 {strides = array<i32>} : memref<8x256xf32, #tpu.memory_space<vmem>>, vector<8x256xf32>,
    %c2_i32 = arith.constant 2 : i32
    %9 = arith.cmpi eq, %arg1, %c2_i32 : i32
    %10 = arith.extui %9 : i1 to i32
    %c0_i32_8 = arith.constant 0 : i32
    %11 = arith.cmpi ne, %10, %c0_i32_8 : i32
    scf.if %11 {
      %c0_9 = arith.constant 0 : index
      %c0_10 = arith.constant 0 : index
      %12 = vector.load %arg7[%c0_9, %c0_10] : memref<8x256xf32, #tpu.memory_space<vmem>>, vector<8x256xf32>
      %c0_11 = arith.constant 0 : index
      %c0_12 = arith.constant 0 : index
      %13 = vector.load %arg4[%c0_11, %c0_12] : memref<1x256xf32, #tpu.memory_space<vmem>>, vector<1x256xf32>
      %14 = vector.broadcast %13 : vector<1x256xf32> to vector<8x256xf32>
      %15 = arith.mulf %12, %14 : vector<8x256xf32>
      %c0_13 = arith.constant 0 : index
      %c0_14 = arith.constant 0 : index
      %16 = vector.load %arg5[%c0_13, %c0_14] : memref<1x256xf32, #tpu.memory_space<vmem>>, vector<1x256xf32>
      %17 = vector.broadcast %16 : vector<1x256xf32> to vector<8x256xf32>
      %18 = arith.addf %15, %17 : vector<8x256xf32>
      %cst_15 = arith.constant 0.000000e+00 : f32
      %19 = vector.broadcast %cst_15 : f32 to vector<8x256xf32>
      %20 = arith.maximumf %18, %19 : vector<8x256xf32>
      %21 = arith.truncf %20 : vector<8x256xf32> to vector<8x256xbf16>
      %c0_16 = arith.constant 0 : index
      %c0_17 = arith.constant 0 : index
      %22 = vector.load %arg6[%c0_16, %c0_17] : memref<8x256xbf16, #tpu.memory_space<vmem>>, vector<8x256xbf16>
      tpu.vector_store %arg6[%c0_16, %c0_17], %21 {strides = array<i32>} : memref<8x256xbf16, #tpu.memory_space<vmem>>, vector<8x256xbf16>,
    } else {
    }
    return
  }
  func.func @transform_0(%arg0: i32, %arg1: i32) -> (i32, i32) {
    %c0_i32 = arith.constant 0 : i32
    return %arg0, %arg1 : i32, i32
  }
  func.func @transform_1(%arg0: i32, %arg1: i32) -> (i32, i32) {
    %c0_i32 = arith.constant 0 : i32
    %c0_i32_0 = arith.constant 0 : i32
    return %arg1, %c0_i32 : i32, i32
  }
  func.func @transform_2(%arg0: i32, %arg1: i32) -> (i32, i32) {
    %c0_i32 = arith.constant 0 : i32
    %c0_i32_0 = arith.constant 0 : i32
    %c0_i32_1 = arith.constant 0 : i32
    return %c0_i32, %c0_i32_0 : i32, i32
  }
  func.func @transform_3(%arg0: i32, %arg1: i32) -> (i32, i32) {
    %c0_i32 = arith.constant 0 : i32
    %c0_i32_0 = arith.constant 0 : i32
    %c0_i32_1 = arith.constant 0 : i32
    return %c0_i32, %c0_i32_0 : i32, i32
  }
  func.func @transform_4(%arg0: i32, %arg1: i32) -> (i32, i32) {
    %c0_i32 = arith.constant 0 : i32
    %c0_i32_0 = arith.constant 0 : i32
    return %arg0, %c0_i32 : i32, i32
  }
}

module attributes {stable_mosaic.version = 11 : i64} {
  func.func @kernel(%arg0: i32, %arg1: i32, %arg2: memref<8x768xbf16, #tpu.memory_space<vmem>>, %arg3: memref<768x256xbf16, #tpu.memory_space<vmem>>, %arg4: memref<1x256xf32, #tpu.memory_space<vmem>>, %arg5: memref<1x256xf32, #tpu.memory_space<vmem>>, %arg6: memref<8x128xbf16, #tpu.memory_space<vmem>>, %arg7: memref<128x256xbf16, #tpu.memory_space<vmem>>, %arg8: memref<1x256xf32, #tpu.memory_space<vmem>>, %arg9: memref<1x256xf32, #tpu.memory_space<vmem>>, %arg10: memref<8x256xbf16, #tpu.memory_space<vmem>>, %arg11: memref<8x256xf32, #tpu.memory_space<vmem>>) attributes {dimension_semantics = [#tpu.dimension_semantics<parallel>, #tpu.dimension_semantics<arbitrary>], iteration_bounds = array<i64: 1, 3>, scalar_prefetch = 0 : i64, scratch_operands = 1 : i64, tpu.core_type = #tpu.core_type<tc>, window_params = [{transform_indices = @transform_0, window_bounds = array<i64: 8, 768>}, {transform_indices = @transform_1, window_bounds = array<i64: 768, 256>}, {pipeline_mode = #tpu.pipeline_mode<synchronous>, transform_indices = @transform_2, window_bounds = array<i64: 1, 256>}, {pipeline_mode = #tpu.pipeline_mode<synchronous>, transform_indices = @transform_3, window_bounds = array<i64: 1, 256>}, {transform_indices = @transform_4, window_bounds = array<i64: 8, 128>}, {pipeline_mode = #tpu.pipeline_mode<synchronous>, transform_indices = @transform_5, window_bounds = array<i64: 128, 256>}, {pipeline_mode = #tpu.pipeline_mode<synchronous>, transform_indices = @transform_6, window_bounds = array<i64: 1, 256>}, {pipeline_mode = #tpu.pipeline_mode<synchronous>, transform_indices = @transform_7, window_bounds = array<i64: 1, 256>}, {transform_indices = @transform_8, window_bounds = array<i64: 8, 256>}]} {
    %c0_i32 = arith.constant 0 : i32
    %0 = arith.cmpi eq, %arg1, %c0_i32 : i32
    %1 = arith.extui %0 : i1 to i32
    %c0_i32_0 = arith.constant 0 : i32
    %2 = arith.cmpi ne, %1, %c0_i32_0 : i32
    scf.if %2 {
      %cst_9 = arith.constant 0.000000e+00 : f32
      %12 = vector.broadcast %cst_9 : f32 to vector<8x256xf32>
      %c0_10 = arith.constant 0 : index
      %c0_11 = arith.constant 0 : index
      %13 = vector.load %arg11[%c0_10, %c0_11] : memref<8x256xf32, #tpu.memory_space<vmem>>, vector<8x256xf32>
      tpu.vector_store %arg11[%c0_10, %c0_11], %12 {strides = array<i32>} : memref<8x256xf32, #tpu.memory_space<vmem>>, vector<8x256xf32>,
    } else {
    }
    %c0 = arith.constant 0 : index
    %c0_1 = arith.constant 0 : index
    %3 = vector.load %arg11[%c0, %c0_1] : memref<8x256xf32, #tpu.memory_space<vmem>>, vector<8x256xf32>
    %c0_2 = arith.constant 0 : index
    %c0_3 = arith.constant 0 : index
    %4 = vector.load %arg2[%c0_2, %c0_3] : memref<8x768xbf16, #tpu.memory_space<vmem>>, vector<8x768xbf16>
    %c0_4 = arith.constant 0 : index
    %c0_5 = arith.constant 0 : index
    %5 = vector.load %arg3[%c0_4, %c0_5] : memref<768x256xbf16, #tpu.memory_space<vmem>>, vector<768x256xbf16>
    %cst = arith.constant dense<0.000000e+00> : vector<8x256xf32>
    %6 = tpu.matmul %4, %5, %cst {dimension_numbers = #tpu.dot_dimension_numbers<[1], [0], [0], [1], [0, 0, 1, 1], [], []>} : vector<8x768xbf16>, vector<768x256xbf16>, vector<8x256xf32> -> vector<8x256xf32>
    %7 = arith.addf %3, %6 : vector<8x256xf32>
    %c0_6 = arith.constant 0 : index
    %c0_7 = arith.constant 0 : index
    %8 = vector.load %arg11[%c0_6, %c0_7] : memref<8x256xf32, #tpu.memory_space<vmem>>, vector<8x256xf32>
    tpu.vector_store %arg11[%c0_6, %c0_7], %7 {strides = array<i32>} : memref<8x256xf32, #tpu.memory_space<vmem>>, vector<8x256xf32>,
    %c2_i32 = arith.constant 2 : i32
    %9 = arith.cmpi eq, %arg1, %c2_i32 : i32
    %10 = arith.extui %9 : i1 to i32
    %c0_i32_8 = arith.constant 0 : i32
    %11 = arith.cmpi ne, %10, %c0_i32_8 : i32
    scf.if %11 {
      %c0_9 = arith.constant 0 : index
      %c0_10 = arith.constant 0 : index
      %12 = vector.load %arg11[%c0_9, %c0_10] : memref<8x256xf32, #tpu.memory_space<vmem>>, vector<8x256xf32>
      %c0_11 = arith.constant 0 : index
      %c0_12 = arith.constant 0 : index
      %13 = vector.load %arg4[%c0_11, %c0_12] : memref<1x256xf32, #tpu.memory_space<vmem>>, vector<1x256xf32>
      %14 = vector.broadcast %13 : vector<1x256xf32> to vector<8x256xf32>
      %15 = arith.mulf %12, %14 : vector<8x256xf32>
      %c0_13 = arith.constant 0 : index
      %c0_14 = arith.constant 0 : index
      %16 = vector.load %arg5[%c0_13, %c0_14] : memref<1x256xf32, #tpu.memory_space<vmem>>, vector<1x256xf32>
      %17 = vector.broadcast %16 : vector<1x256xf32> to vector<8x256xf32>
      %18 = arith.addf %15, %17 : vector<8x256xf32>
      %c0_15 = arith.constant 0 : index
      %c0_16 = arith.constant 0 : index
      %19 = vector.load %arg6[%c0_15, %c0_16] : memref<8x128xbf16, #tpu.memory_space<vmem>>, vector<8x128xbf16>
      %c0_17 = arith.constant 0 : index
      %c0_18 = arith.constant 0 : index
      %20 = vector.load %arg7[%c0_17, %c0_18] : memref<128x256xbf16, #tpu.memory_space<vmem>>, vector<128x256xbf16>
      %cst_19 = arith.constant dense<0.000000e+00> : vector<8x256xf32>
      %21 = tpu.matmul %19, %20, %cst_19 {dimension_numbers = #tpu.dot_dimension_numbers<[1], [0], [0], [1], [0, 0, 1, 1], [], []>} : vector<8x128xbf16>, vector<128x256xbf16>, vector<8x256xf32> -> vector<8x256xf32>
      %c0_20 = arith.constant 0 : index
      %c0_21 = arith.constant 0 : index
      %22 = vector.load %arg8[%c0_20, %c0_21] : memref<1x256xf32, #tpu.memory_space<vmem>>, vector<1x256xf32>
      %23 = vector.broadcast %22 : vector<1x256xf32> to vector<8x256xf32>
      %24 = arith.mulf %21, %23 : vector<8x256xf32>
      %25 = arith.addf %18, %24 : vector<8x256xf32>
      %c0_22 = arith.constant 0 : index
      %c0_23 = arith.constant 0 : index
      %26 = vector.load %arg9[%c0_22, %c0_23] : memref<1x256xf32, #tpu.memory_space<vmem>>, vector<1x256xf32>
      %27 = vector.broadcast %26 : vector<1x256xf32> to vector<8x256xf32>
      %28 = arith.addf %25, %27 : vector<8x256xf32>
      %cst_24 = arith.constant 0.000000e+00 : f32
      %29 = vector.broadcast %cst_24 : f32 to vector<8x256xf32>
      %30 = arith.maximumf %28, %29 : vector<8x256xf32>
      %31 = arith.truncf %30 : vector<8x256xf32> to vector<8x256xbf16>
      %c0_25 = arith.constant 0 : index
      %c0_26 = arith.constant 0 : index
      %32 = vector.load %arg10[%c0_25, %c0_26] : memref<8x256xbf16, #tpu.memory_space<vmem>>, vector<8x256xbf16>
      tpu.vector_store %arg10[%c0_25, %c0_26], %31 {strides = array<i32>} : memref<8x256xbf16, #tpu.memory_space<vmem>>, vector<8x256xbf16>,
    } else {
    }
    return
  }
  func.func @transform_0(%arg0: i32, %arg1: i32) -> (i32, i32) {
    %c0_i32 = arith.constant 0 : i32
    return %arg0, %arg1 : i32, i32
  }
  func.func @transform_1(%arg0: i32, %arg1: i32) -> (i32, i32) {
    %c0_i32 = arith.constant 0 : i32
    %c0_i32_0 = arith.constant 0 : i32
    return %arg1, %c0_i32 : i32, i32
  }
  func.func @transform_2(%arg0: i32, %arg1: i32) -> (i32, i32) {
    %c0_i32 = arith.constant 0 : i32
    %c0_i32_0 = arith.constant 0 : i32
    %c0_i32_1 = arith.constant 0 : i32
    return %c0_i32, %c0_i32_0 : i32, i32
  }
  func.func @transform_3(%arg0: i32, %arg1: i32) -> (i32, i32) {
    %c0_i32 = arith.constant 0 : i32
    %c0_i32_0 = arith.constant 0 : i32
    %c0_i32_1 = arith.constant 0 : i32
    return %c0_i32, %c0_i32_0 : i32, i32
  }
  func.func @transform_4(%arg0: i32, %arg1: i32) -> (i32, i32) {
    %c0_i32 = arith.constant 0 : i32
    %c0_i32_0 = arith.constant 0 : i32
    return %arg0, %c0_i32 : i32, i32
  }
  func.func @transform_5(%arg0: i32, %arg1: i32) -> (i32, i32) {
    %c0_i32 = arith.constant 0 : i32
    %c0_i32_0 = arith.constant 0 : i32
    %c0_i32_1 = arith.constant 0 : i32
    return %c0_i32, %c0_i32_0 : i32, i32
  }
  func.func @transform_6(%arg0: i32, %arg1: i32) -> (i32, i32) {
    %c0_i32 = arith.constant 0 : i32
    %c0_i32_0 = arith.constant 0 : i32
    %c0_i32_1 = arith.constant 0 : i32
    return %c0_i32, %c0_i32_0 : i32, i32
  }
  func.func @transform_7(%arg0: i32, %arg1: i32) -> (i32, i32) {
    %c0_i32 = arith.constant 0 : i32
    %c0_i32_0 = arith.constant 0 : i32
    %c0_i32_1 = arith.constant 0 : i32
    return %c0_i32, %c0_i32_0 : i32, i32
  }
  func.func @transform_8(%arg0: i32, %arg1: i32) -> (i32, i32) {
    %c0_i32 = arith.constant 0 : i32
    %c0_i32_0 = arith.constant 0 : i32
    return %arg0, %c0_i32 : i32, i32
  }
}

module attributes {stable_mosaic.version = 11 : i64} {
  func.func @kernel(%arg0: i32, %arg1: i32, %arg2: memref<2x768xbf16, #tpu.memory_space<vmem>>, %arg3: memref<768x512xbf16, #tpu.memory_space<vmem>>, %arg4: memref<1x512xf32, #tpu.memory_space<vmem>>, %arg5: memref<1x512xf32, #tpu.memory_space<vmem>>, %arg6: memref<2x512xbf16, #tpu.memory_space<vmem>>, %arg7: memref<2x512xf32, #tpu.memory_space<vmem>>) attributes {dimension_semantics = [#tpu.dimension_semantics<parallel>, #tpu.dimension_semantics<arbitrary>], iteration_bounds = array<i64: 1, 3>, scalar_prefetch = 0 : i64, scratch_operands = 1 : i64, tpu.core_type = #tpu.core_type<tc>, window_params = [{transform_indices = @transform_0, window_bounds = array<i64: 2, 768>}, {transform_indices = @transform_1, window_bounds = array<i64: 768, 512>}, {pipeline_mode = #tpu.pipeline_mode<synchronous>, transform_indices = @transform_2, window_bounds = array<i64: 1, 512>}, {pipeline_mode = #tpu.pipeline_mode<synchronous>, transform_indices = @transform_3, window_bounds = array<i64: 1, 512>}, {transform_indices = @transform_4, window_bounds = array<i64: 2, 512>}]} {
    %c0_i32 = arith.constant 0 : i32
    %0 = arith.cmpi eq, %arg1, %c0_i32 : i32
    %1 = arith.extui %0 : i1 to i32
    %c0_i32_0 = arith.constant 0 : i32
    %2 = arith.cmpi ne, %1, %c0_i32_0 : i32
    scf.if %2 {
      %cst_9 = arith.constant 0.000000e+00 : f32
      %12 = vector.broadcast %cst_9 : f32 to vector<2x512xf32>
      %c0_10 = arith.constant 0 : index
      %c0_11 = arith.constant 0 : index
      %13 = vector.load %arg7[%c0_10, %c0_11] : memref<2x512xf32, #tpu.memory_space<vmem>>, vector<2x512xf32>
      tpu.vector_store %arg7[%c0_10, %c0_11], %12 {strides = array<i32>} : memref<2x512xf32, #tpu.memory_space<vmem>>, vector<2x512xf32>,
    } else {
    }
    %c0 = arith.constant 0 : index
    %c0_1 = arith.constant 0 : index
    %3 = vector.load %arg7[%c0, %c0_1] : memref<2x512xf32, #tpu.memory_space<vmem>>, vector<2x512xf32>
    %c0_2 = arith.constant 0 : index
    %c0_3 = arith.constant 0 : index
    %4 = vector.load %arg2[%c0_2, %c0_3] : memref<2x768xbf16, #tpu.memory_space<vmem>>, vector<2x768xbf16>
    %c0_4 = arith.constant 0 : index
    %c0_5 = arith.constant 0 : index
    %5 = vector.load %arg3[%c0_4, %c0_5] : memref<768x512xbf16, #tpu.memory_space<vmem>>, vector<768x512xbf16>
    %cst = arith.constant dense<0.000000e+00> : vector<2x512xf32>
    %6 = tpu.matmul %4, %5, %cst {dimension_numbers = #tpu.dot_dimension_numbers<[1], [0], [0], [1], [0, 0, 1, 1], [], []>} : vector<2x768xbf16>, vector<768x512xbf16>, vector<2x512xf32> -> vector<2x512xf32>
    %7 = arith.addf %3, %6 : vector<2x512xf32>
    %c0_6 = arith.constant 0 : index
    %c0_7 = arith.constant 0 : index
    %8 = vector.load %arg7[%c0_6, %c0_7] : memref<2x512xf32, #tpu.memory_space<vmem>>, vector<2x512xf32>
    tpu.vector_store %arg7[%c0_6, %c0_7], %7 {strides = array<i32>} : memref<2x512xf32, #tpu.memory_space<vmem>>, vector<2x512xf32>,
    %c2_i32 = arith.constant 2 : i32
    %9 = arith.cmpi eq, %arg1, %c2_i32 : i32
    %10 = arith.extui %9 : i1 to i32
    %c0_i32_8 = arith.constant 0 : i32
    %11 = arith.cmpi ne, %10, %c0_i32_8 : i32
    scf.if %11 {
      %c0_9 = arith.constant 0 : index
      %c0_10 = arith.constant 0 : index
      %12 = vector.load %arg7[%c0_9, %c0_10] : memref<2x512xf32, #tpu.memory_space<vmem>>, vector<2x512xf32>
      %c0_11 = arith.constant 0 : index
      %c0_12 = arith.constant 0 : index
      %13 = vector.load %arg4[%c0_11, %c0_12] : memref<1x512xf32, #tpu.memory_space<vmem>>, vector<1x512xf32>
      %14 = vector.broadcast %13 : vector<1x512xf32> to vector<2x512xf32>
      %15 = arith.mulf %12, %14 : vector<2x512xf32>
      %c0_13 = arith.constant 0 : index
      %c0_14 = arith.constant 0 : index
      %16 = vector.load %arg5[%c0_13, %c0_14] : memref<1x512xf32, #tpu.memory_space<vmem>>, vector<1x512xf32>
      %17 = vector.broadcast %16 : vector<1x512xf32> to vector<2x512xf32>
      %18 = arith.addf %15, %17 : vector<2x512xf32>
      %cst_15 = arith.constant 0.000000e+00 : f32
      %19 = vector.broadcast %cst_15 : f32 to vector<2x512xf32>
      %20 = arith.maximumf %18, %19 : vector<2x512xf32>
      %21 = arith.truncf %20 : vector<2x512xf32> to vector<2x512xbf16>
      %c0_16 = arith.constant 0 : index
      %c0_17 = arith.constant 0 : index
      %22 = vector.load %arg6[%c0_16, %c0_17] : memref<2x512xbf16, #tpu.memory_space<vmem>>, vector<2x512xbf16>
      tpu.vector_store %arg6[%c0_16, %c0_17], %21 {strides = array<i32>} : memref<2x512xbf16, #tpu.memory_space<vmem>>, vector<2x512xbf16>,
    } else {
    }
    return
  }
  func.func @transform_0(%arg0: i32, %arg1: i32) -> (i32, i32) {
    %c0_i32 = arith.constant 0 : i32
    return %arg0, %arg1 : i32, i32
  }
  func.func @transform_1(%arg0: i32, %arg1: i32) -> (i32, i32) {
    %c0_i32 = arith.constant 0 : i32
    %c0_i32_0 = arith.constant 0 : i32
    return %arg1, %c0_i32 : i32, i32
  }
  func.func @transform_2(%arg0: i32, %arg1: i32) -> (i32, i32) {
    %c0_i32 = arith.constant 0 : i32
    %c0_i32_0 = arith.constant 0 : i32
    %c0_i32_1 = arith.constant 0 : i32
    return %c0_i32, %c0_i32_0 : i32, i32
  }
  func.func @transform_3(%arg0: i32, %arg1: i32) -> (i32, i32) {
    %c0_i32 = arith.constant 0 : i32
    %c0_i32_0 = arith.constant 0 : i32
    %c0_i32_1 = arith.constant 0 : i32
    return %c0_i32, %c0_i32_0 : i32, i32
  }
  func.func @transform_4(%arg0: i32, %arg1: i32) -> (i32, i32) {
    %c0_i32 = arith.constant 0 : i32
    %c0_i32_0 = arith.constant 0 : i32
    return %arg0, %c0_i32 : i32, i32
  }
}

module attributes {stable_mosaic.version = 11 : i64} {
  func.func @kernel(%arg0: i32, %arg1: i32, %arg2: memref<2x768xbf16, #tpu.memory_space<vmem>>, %arg3: memref<768x512xbf16, #tpu.memory_space<vmem>>, %arg4: memref<1x512xf32, #tpu.memory_space<vmem>>, %arg5: memref<1x512xf32, #tpu.memory_space<vmem>>, %arg6: memref<2x256xbf16, #tpu.memory_space<vmem>>, %arg7: memref<256x512xbf16, #tpu.memory_space<vmem>>, %arg8: memref<1x512xf32, #tpu.memory_space<vmem>>, %arg9: memref<1x512xf32, #tpu.memory_space<vmem>>, %arg10: memref<2x512xbf16, #tpu.memory_space<vmem>>, %arg11: memref<2x512xf32, #tpu.memory_space<vmem>>) attributes {dimension_semantics = [#tpu.dimension_semantics<parallel>, #tpu.dimension_semantics<arbitrary>], iteration_bounds = array<i64: 1, 6>, scalar_prefetch = 0 : i64, scratch_operands = 1 : i64, tpu.core_type = #tpu.core_type<tc>, window_params = [{transform_indices = @transform_0, window_bounds = array<i64: 2, 768>}, {transform_indices = @transform_1, window_bounds = array<i64: 768, 512>}, {pipeline_mode = #tpu.pipeline_mode<synchronous>, transform_indices = @transform_2, window_bounds = array<i64: 1, 512>}, {pipeline_mode = #tpu.pipeline_mode<synchronous>, transform_indices = @transform_3, window_bounds = array<i64: 1, 512>}, {transform_indices = @transform_4, window_bounds = array<i64: 2, 256>}, {pipeline_mode = #tpu.pipeline_mode<synchronous>, transform_indices = @transform_5, window_bounds = array<i64: 256, 512>}, {pipeline_mode = #tpu.pipeline_mode<synchronous>, transform_indices = @transform_6, window_bounds = array<i64: 1, 512>}, {pipeline_mode = #tpu.pipeline_mode<synchronous>, transform_indices = @transform_7, window_bounds = array<i64: 1, 512>}, {transform_indices = @transform_8, window_bounds = array<i64: 2, 512>}]} {
    %c0_i32 = arith.constant 0 : i32
    %0 = arith.cmpi eq, %arg1, %c0_i32 : i32
    %1 = arith.extui %0 : i1 to i32
    %c0_i32_0 = arith.constant 0 : i32
    %2 = arith.cmpi ne, %1, %c0_i32_0 : i32
    scf.if %2 {
      %cst_9 = arith.constant 0.000000e+00 : f32
      %12 = vector.broadcast %cst_9 : f32 to vector<2x512xf32>
      %c0_10 = arith.constant 0 : index
      %c0_11 = arith.constant 0 : index
      %13 = vector.load %arg11[%c0_10, %c0_11] : memref<2x512xf32, #tpu.memory_space<vmem>>, vector<2x512xf32>
      tpu.vector_store %arg11[%c0_10, %c0_11], %12 {strides = array<i32>} : memref<2x512xf32, #tpu.memory_space<vmem>>, vector<2x512xf32>,
    } else {
    }
    %c0 = arith.constant 0 : index
    %c0_1 = arith.constant 0 : index
    %3 = vector.load %arg11[%c0, %c0_1] : memref<2x512xf32, #tpu.memory_space<vmem>>, vector<2x512xf32>
    %c0_2 = arith.constant 0 : index
    %c0_3 = arith.constant 0 : index
    %4 = vector.load %arg2[%c0_2, %c0_3] : memref<2x768xbf16, #tpu.memory_space<vmem>>, vector<2x768xbf16>
    %c0_4 = arith.constant 0 : index
    %c0_5 = arith.constant 0 : index
    %5 = vector.load %arg3[%c0_4, %c0_5] : memref<768x512xbf16, #tpu.memory_space<vmem>>, vector<768x512xbf16>
    %cst = arith.constant dense<0.000000e+00> : vector<2x512xf32>
    %6 = tpu.matmul %4, %5, %cst {dimension_numbers = #tpu.dot_dimension_numbers<[1], [0], [0], [1], [0, 0, 1, 1], [], []>} : vector<2x768xbf16>, vector<768x512xbf16>, vector<2x512xf32> -> vector<2x512xf32>
    %7 = arith.addf %3, %6 : vector<2x512xf32>
    %c0_6 = arith.constant 0 : index
    %c0_7 = arith.constant 0 : index
    %8 = vector.load %arg11[%c0_6, %c0_7] : memref<2x512xf32, #tpu.memory_space<vmem>>, vector<2x512xf32>
    tpu.vector_store %arg11[%c0_6, %c0_7], %7 {strides = array<i32>} : memref<2x512xf32, #tpu.memory_space<vmem>>, vector<2x512xf32>,
    %c5_i32 = arith.constant 5 : i32
    %9 = arith.cmpi eq, %arg1, %c5_i32 : i32
    %10 = arith.extui %9 : i1 to i32
    %c0_i32_8 = arith.constant 0 : i32
    %11 = arith.cmpi ne, %10, %c0_i32_8 : i32
    scf.if %11 {
      %c0_9 = arith.constant 0 : index
      %c0_10 = arith.constant 0 : index
      %12 = vector.load %arg11[%c0_9, %c0_10] : memref<2x512xf32, #tpu.memory_space<vmem>>, vector<2x512xf32>
      %c0_11 = arith.constant 0 : index
      %c0_12 = arith.constant 0 : index
      %13 = vector.load %arg4[%c0_11, %c0_12] : memref<1x512xf32, #tpu.memory_space<vmem>>, vector<1x512xf32>
      %14 = vector.broadcast %13 : vector<1x512xf32> to vector<2x512xf32>
      %15 = arith.mulf %12, %14 : vector<2x512xf32>
      %c0_13 = arith.constant 0 : index
      %c0_14 = arith.constant 0 : index
      %16 = vector.load %arg5[%c0_13, %c0_14] : memref<1x512xf32, #tpu.memory_space<vmem>>, vector<1x512xf32>
      %17 = vector.broadcast %16 : vector<1x512xf32> to vector<2x512xf32>
      %18 = arith.addf %15, %17 : vector<2x512xf32>
      %c0_15 = arith.constant 0 : index
      %c0_16 = arith.constant 0 : index
      %19 = vector.load %arg6[%c0_15, %c0_16] : memref<2x256xbf16, #tpu.memory_space<vmem>>, vector<2x256xbf16>
      %c0_17 = arith.constant 0 : index
      %c0_18 = arith.constant 0 : index
      %20 = vector.load %arg7[%c0_17, %c0_18] : memref<256x512xbf16, #tpu.memory_space<vmem>>, vector<256x512xbf16>
      %cst_19 = arith.constant dense<0.000000e+00> : vector<2x512xf32>
      %21 = tpu.matmul %19, %20, %cst_19 {dimension_numbers = #tpu.dot_dimension_numbers<[1], [0], [0], [1], [0, 0, 1, 1], [], []>} : vector<2x256xbf16>, vector<256x512xbf16>, vector<2x512xf32> -> vector<2x512xf32>
      %c0_20 = arith.constant 0 : index
      %c0_21 = arith.constant 0 : index
      %22 = vector.load %arg8[%c0_20, %c0_21] : memref<1x512xf32, #tpu.memory_space<vmem>>, vector<1x512xf32>
      %23 = vector.broadcast %22 : vector<1x512xf32> to vector<2x512xf32>
      %24 = arith.mulf %21, %23 : vector<2x512xf32>
      %25 = arith.addf %18, %24 : vector<2x512xf32>
      %c0_22 = arith.constant 0 : index
      %c0_23 = arith.constant 0 : index
      %26 = vector.load %arg9[%c0_22, %c0_23] : memref<1x512xf32, #tpu.memory_space<vmem>>, vector<1x512xf32>
      %27 = vector.broadcast %26 : vector<1x512xf32> to vector<2x512xf32>
      %28 = arith.addf %25, %27 : vector<2x512xf32>
      %cst_24 = arith.constant 0.000000e+00 : f32
      %29 = vector.broadcast %cst_24 : f32 to vector<2x512xf32>
      %30 = arith.maximumf %28, %29 : vector<2x512xf32>
      %31 = arith.truncf %30 : vector<2x512xf32> to vector<2x512xbf16>
      %c0_25 = arith.constant 0 : index
      %c0_26 = arith.constant 0 : index
      %32 = vector.load %arg10[%c0_25, %c0_26] : memref<2x512xbf16, #tpu.memory_space<vmem>>, vector<2x512xbf16>
      tpu.vector_store %arg10[%c0_25, %c0_26], %31 {strides = array<i32>} : memref<2x512xbf16, #tpu.memory_space<vmem>>, vector<2x512xbf16>,
    } else {
    }
    return
  }
  func.func @transform_0(%arg0: i32, %arg1: i32) -> (i32, i32) {
    %c0_i32 = arith.constant 0 : i32
    return %arg0, %arg1 : i32, i32
  }
  func.func @transform_1(%arg0: i32, %arg1: i32) -> (i32, i32) {
    %c0_i32 = arith.constant 0 : i32
    %c0_i32_0 = arith.constant 0 : i32
    return %arg1, %c0_i32 : i32, i32
  }
  func.func @transform_2(%arg0: i32, %arg1: i32) -> (i32, i32) {
    %c0_i32 = arith.constant 0 : i32
    %c0_i32_0 = arith.constant 0 : i32
    %c0_i32_1 = arith.constant 0 : i32
    return %c0_i32, %c0_i32_0 : i32, i32
  }
  func.func @transform_3(%arg0: i32, %arg1: i32) -> (i32, i32) {
    %c0_i32 = arith.constant 0 : i32
    %c0_i32_0 = arith.constant 0 : i32
    %c0_i32_1 = arith.constant 0 : i32
    return %c0_i32, %c0_i32_0 : i32, i32
  }
  func.func @transform_4(%arg0: i32, %arg1: i32) -> (i32, i32) {
    %c0_i32 = arith.constant 0 : i32
    %c0_i32_0 = arith.constant 0 : i32
    return %arg0, %c0_i32 : i32, i32
  }
  func.func @transform_5(%arg0: i32, %arg1: i32) -> (i32, i32) {
    %c0_i32 = arith.constant 0 : i32
    %c0_i32_0 = arith.constant 0 : i32
    %c0_i32_1 = arith.constant 0 : i32
    return %c0_i32, %c0_i32_0 : i32, i32
  }
  func.func @transform_6(%arg0: i32, %arg1: i32) -> (i32, i32) {
    %c0_i32 = arith.constant 0 : i32
    %c0_i32_0 = arith.constant 0 : i32
    %c0_i32_1 = arith.constant 0 : i32
    return %c0_i32, %c0_i32_0 : i32, i32
  }
  func.func @transform_7(%arg0: i32, %arg1: i32) -> (i32, i32) {
    %c0_i32 = arith.constant 0 : i32
    %c0_i32_0 = arith.constant 0 : i32
    %c0_i32_1 = arith.constant 0 : i32
    return %c0_i32, %c0_i32_0 : i32, i32
  }
  func.func @transform_8(%arg0: i32, %arg1: i32) -> (i32, i32) {
    %c0_i32 = arith.constant 0 : i32
    %c0_i32_0 = arith.constant 0 : i32
    return %arg0, %c0_i32 : i32, i32
  }
}

module attributes {stable_mosaic.version = 11 : i64} {
  func.func @_avgpool_fc_kernel(%arg0: memref<2x1x512xbf16, #tpu.memory_space<vmem>>, %arg1: memref<512x128xbf16, #tpu.memory_space<vmem>>, %arg2: memref<1x128xf32, #tpu.memory_space<vmem>>, %arg3: memref<2x128xf32, #tpu.memory_space<vmem>>) attributes {dimension_semantics = [], scalar_prefetch = 0 : i64, scratch_operands = 0 : i64, tpu.core_type = #tpu.core_type<tc>} {
    %c0 = arith.constant 0 : index
    %c0_0 = arith.constant 0 : index
    %c0_1 = arith.constant 0 : index
    %0 = vector.load %arg0[%c0, %c0_0, %c0_1] : memref<2x1x512xbf16, #tpu.memory_space<vmem>>, vector<2x1x512xbf16>
    %1 = arith.extf %0 : vector<2x1x512xbf16> to vector<2x1x512xf32>
    %cst = arith.constant dense<0.000000e+00> : vector<2x512xf32>
    %2 = vector.multi_reduction <add>, %1, %cst [1] : vector<2x1x512xf32> to vector<2x512xf32>
    %cst_2 = arith.constant 1.000000e+00 : f32
    %3 = vector.broadcast %cst_2 : f32 to vector<2x512xf32>
    %4 = arith.divf %2, %3 : vector<2x512xf32>
    %5 = arith.truncf %4 : vector<2x512xf32> to vector<2x512xbf16>
    %c0_3 = arith.constant 0 : index
    %c0_4 = arith.constant 0 : index
    %6 = vector.load %arg1[%c0_3, %c0_4] : memref<512x128xbf16, #tpu.memory_space<vmem>>, vector<512x128xbf16>
    %cst_5 = arith.constant dense<0.000000e+00> : vector<2x128xf32>
    %7 = tpu.matmul %5, %6, %cst_5 {dimension_numbers = #tpu.dot_dimension_numbers<[1], [0], [0], [1], [0, 0, 1, 1], [], []>} : vector<2x512xbf16>, vector<512x128xbf16>, vector<2x128xf32> -> vector<2x128xf32>
    %c0_6 = arith.constant 0 : index
    %c0_7 = arith.constant 0 : index
    %8 = vector.load %arg2[%c0_6, %c0_7] : memref<1x128xf32, #tpu.memory_space<vmem>>, vector<1x128xf32>
    %9 = vector.broadcast %8 : vector<1x128xf32> to vector<2x128xf32>
    %10 = arith.addf %7, %9 : vector<2x128xf32>
    %c0_8 = arith.constant 0 : index
    %c0_9 = arith.constant 0 : index
    %11 = vector.load %arg3[%c0_8, %c0_9] : memref<2x128xf32, #tpu.memory_space<vmem>>, vector<2x128xf32>
    tpu.vector_store %arg3[%c0_8, %c0_9], %10 {strides = array<i32>} : memref<2x128xf32, #tpu.memory_space<vmem>>, vector<2x128xf32>,
    return
  }
}

</mosaic_0001>

<bundles_post_ra>
// kernel: _lambda_.12
= control target key start
LH: loop header
LB: loop body
LE: loop exit
PB: predicated region body
PF: predicated region fallthrough
CT: control target
= control target key end

     0   :  { %s1657_s15 = smov 0   ;;  %s1659_s16 = smov 0   ;;  %s1980_s0 = inlined_call_operand.vmem [shape: bf16[512,256], index: 0, kind: input, shape index: {}]   ;;  %s1981_s1 = inlined_call_operand.vmem [shape: bf16[256,64], index: 1, kind: input, shape index: {}]   ;;  %s1982_s2 = inlined_call_operand.vmem [shape: f32[1,64], index: 2, kind: input, shape index: {}]   ;;  %s1983_s3 = inlined_call_operand.vmem [shape: f32[1,64], index: 3, kind: input, shape index: {}]   ;;  %s1984_s4 = inlined_call_operand.vmem [shape: bf16[512,64], index: 4, kind: output, shape index: {}]  }
   0x1   :  { %s1661_s17 = smov 0  }
   0x2 LB: > { %s26_s18 = sadd.s32 1, %s1625_s16  ;;  %p1267_p0 = scmp.ge.s32.totalorder %s1629_s17, 1  ;;  %s1629_s17 = sphi %s1661_s17, %s14_s17   ;;  %s1625_s16 = sphi %s1659_s16, %s1986_s16   ;;  %s1621_s15 = sphi %s1657_s15, %s1985_s15  }
   0x3   : > { %p28_p1 = scmp.ge.s32.totalorder %s26_s18, 2  ;;  %p194_p2 = scmp.lt.s32.totalorder %s1629_s17, 3 }
   0x5   : > { %s1988_s18 = smov (%p28_p1, %s26_s18), 0  ;;  %p195_p3 = pnand %p1267_p0, %p194_p2 }
   0x6   : > { %v1543_v0 = vld [vmem:[%s1981_s1 + $0x40] sm:$0xff] (!%p195_p3)   ;;  %s1268_s21 = sshll.u32 (!%p195_p3), %s1621_s15, 5  ;;  %v1545_v2 = vld [vmem:[%s1981_s1 + $0x48] sm:$0xff] (!%p195_p3)   ;;  %v1547_v4 = vld [vmem:[%s1981_s1 + $0x50] sm:$0xff] (!%p195_p3)   ;;  %vm259_vm0 = vcmask (!%p195_p3), 523264   ;;  %v1631_v48 = vmov (!%p195_p3), 0.0  }
   0x7   : > { %198 = sbr.rel (%p195_p3) target bundleno = 333 (0x14d), region = 36  ;;  %v1544_v1 = vld [vmem:[%s1981_s1] sm:$0xff] (!%p195_p3)   ;;  %1390 = vmatprep.subr.bf16.mxu0 (!%p195_p3), %v1543_v0  ;;  %1502 = vmatprep.subr.bf16.mxu1 (!%p195_p3), %v1543_v0  ;;  %v1546_v3 = vld [vmem:[%s1981_s1 + $0x8] sm:$0xff] (!%p195_p3)   ;;  %p232_p4 = scmp.lt.s32.totalorder (!%p195_p3), %s1268_s21, 63  ;;  %v1548_v5 = vld [vmem:[%s1981_s1 + $0x10] sm:$0xff] (!%p195_p3)   ;;  %260 = vst.msk [vmem:[#allocation2] sm:$0xff] (!%p195_p3), %vm259_vm0, %v1631_v48 }
   0x8   : > { %1391 = vmatpush3.bf16.msra.mxu0 (!%p195_p3), %v1544_v1  ;;  %1510 = vmatpush3.bf16.msra.mxu1 (!%p195_p3), %v1544_v1  ;;  %v1549_v6 = vld [vmem:[%s1981_s1 + $0x58] sm:$0xff] (!%p195_p3)   ;;  %v1551_v8 = vld [vmem:[%s1981_s1 + $0x60] sm:$0xff] (!%p195_p3)   ;;  %v1553_v10 = vld [vmem:[%s1981_s1 + $0x68] sm:$0xff] (!%p195_p3)   ;;  %261 = vst.msk [vmem:[#allocation2 + $0x8] sm:$0xff] (!%p195_p3), %vm259_vm0, %v1631_v48  ;;  %vm1143_vm1 = vcmask (!%p195_p3), 519168  }
   0x9   : > { %1392 = vmatprep.subr.bf16.mxu0 (!%p195_p3), %v1545_v2  ;;  %1503 = vmatprep.subr.bf16.mxu1 (!%p195_p3), %v1545_v2  ;;  %v1550_v7 = vld [vmem:[%s1981_s1 + $0x18] sm:$0xff] (!%p195_p3)   ;;  %v1552_v9 = vld [vmem:[%s1981_s1 + $0x20] sm:$0xff] (!%p195_p3)   ;;  %v1554_v13 = vld [vmem:[%s1981_s1 + $0x28] sm:$0xff] (!%p195_p3)   ;;  %262 = vst.msk [vmem:[#allocation2 + $0x10] sm:$0xff] (!%p195_p3), %vm259_vm0, %v1631_v48 }
   0xa   : > { %v1555_v14 = vld [vmem:[%s1981_s1 + $0x70] sm:$0xff] (!%p195_p3)   ;;  %v1557_v16 = vld [vmem:[%s1981_s1 + $0x78] sm:$0xff] (!%p195_p3)   ;;  %263 = vst.msk [vmem:[#allocation2 + $0x18] sm:$0xff] (!%p195_p3), %vm259_vm0, %v1631_v48  ;;  %264 = vst.msk [vmem:[#allocation2 + $0x20] sm:$0xff] (!%p195_p3), %vm259_vm0, %v1631_v48 }
   0xb   : > { %v1556_v15 = vld [vmem:[%s1981_s1 + $0x30] sm:$0xff] (!%p195_p3)   ;;  %v1558_v17 = vld [vmem:[%s1981_s1 + $0x38] sm:$0xff] (!%p195_p3)   ;;  %265 = vst.msk [vmem:[#allocation2 + $0x28] sm:$0xff] (!%p195_p3), %vm259_vm0, %v1631_v48  ;;  %266 = vst.msk [vmem:[#allocation2 + $0x30] sm:$0xff] (!%p195_p3), %vm259_vm0, %v1631_v48 }
   0xc   : > { %1393 = vmatpush3.bf16.msra.mxu0 (!%p195_p3), %v1546_v3  ;;  %1511 = vmatpush3.bf16.msra.mxu1 (!%p195_p3), %v1546_v3  ;;  %267 = vst.msk [vmem:[#allocation2 + $0x38] sm:$0xff] (!%p195_p3), %vm259_vm0, %v1631_v48  ;;  %268 = vst.msk [vmem:[#allocation2 + $0x40] sm:$0xff] (!%p195_p3), %vm259_vm0, %v1631_v48 }
   0xd   : > { %1394 = vmatprep.subr.bf16.mxu0 (!%p195_p3), %v1547_v4  ;;  %1504 = vmatprep.subr.bf16.mxu1 (!%p195_p3), %v1547_v4  ;;  %269 = vst.msk [vmem:[#allocation2 + $0x48] sm:$0xff] (!%p195_p3), %vm259_vm0, %v1631_v48  ;;  %270 = vst.msk [vmem:[#allocation2 + $0x50] sm:$0xff] (!%p195_p3), %vm259_vm0, %v1631_v48 }
   0xe   : > { %s1990_s21 = smov (!%p232_p4, %s1268_s21), 63  ;;  %271 = vst.msk [vmem:[#allocation2 + $0x58] sm:$0xff] %vm259_vm0, %v1631_v48  ;;  %272 = vst.msk [vmem:[#allocation2 + $0x60] sm:$0xff] %vm259_vm0, %v1631_v48  ;;  %v292_v51 = vld [vmem:[#allocation2] sm:$0xff] }
   0xf   : > { %s1357_s10 = sshll.u32 %s1990_s21, 3  ;;  %273 = vst.msk [vmem:[#allocation2 + $0x68] sm:$0xff] %vm259_vm0, %v1631_v48  ;;  %274 = vst.msk [vmem:[#allocation2 + $0x70] sm:$0xff] %vm259_vm0, %v1631_v48  ;;  %v293_v59 = vld [vmem:[#allocation2 + $0x8] sm:$0xff]  ;;  %s1272_s12 = sshll.u32 %s1990_s21, 2 }
  0x10   : > { %1395 = vmatpush3.bf16.msra.mxu0 %v1548_v5  ;;  %1512 = vmatpush3.bf16.msra.mxu1 %v1548_v5  ;;  %s1708_s15 = scalar_lea.vmem %s1980_s0, %s1357_s10  ;;  %275 = vst.msk [vmem:[#allocation2 + $0x78] sm:$0xff] %vm259_vm0, %v1631_v48  ;;  %276 = vst.msk [vmem:[#allocation2 + $0x80] sm:$0xff] %vm259_vm0, %v1631_v48  ;;  %s1825_s14 = scalar_lea.vmem %s1984_s4, %s1272_s12 }
  0x11   : > { %1396 = vmatprep.subr.bf16.mxu0 %v1549_v6  ;;  %1505 = vmatprep.subr.bf16.mxu1 %v1549_v6  ;;  %v1561_v11 = vld [vmem:[%s1708_s15 + $0x4] ss:$8 sps:$4 sm:$0xff]   ;;  %v1559_v18 = vld [vmem:[%s1708_s15] ss:$8 sps:$4 sm:$0xff]   ;;  %v1565_v20 = vld [vmem:[%s1708_s15 + $0x14] ss:$8 sps:$4 sm:$0xff]  }
  0x12   : > { %v1564_v12 = vld [vmem:[%s1708_s15 + $0x84] ss:$8 sps:$4 sm:$0xff]   ;;  %676 = vmatprep.mubr.bf16.mxu0 %v1561_v11  ;;  %v1562_v19 = vld [vmem:[%s1708_s15 + $0x80] ss:$8 sps:$4 sm:$0xff]   ;;  %v1567_v21 = vld [vmem:[%s1708_s15 + $0x94] ss:$8 sps:$4 sm:$0xff]  }
  0x13   : > { %740 = vmatprep.mubr.bf16.mxu1 %v1564_v12  ;;  %v1569_v22 = vld [vmem:[%s1708_s15 + $0x10] ss:$8 sps:$4 sm:$0xff]   ;;  %v1571_v24 = vld [vmem:[%s1708_s15 + $0x24] ss:$8 sps:$4 sm:$0xff]   ;;  %v1575_v26 = vld [vmem:[%s1708_s15 + $0x20] ss:$8 sps:$4 sm:$0xff]  }
  0x14   : > { %1397 = vmatpush3.bf16.msra.mxu0 %v1550_v7  ;;  %1513 = vmatpush3.bf16.msra.mxu1 %v1550_v7  ;;  %v1570_v23 = vld [vmem:[%s1708_s15 + $0x90] ss:$8 sps:$4 sm:$0xff]   ;;  %v1573_v25 = vld [vmem:[%s1708_s15 + $0xa4] ss:$8 sps:$4 sm:$0xff]   ;;  %v1576_v27 = vld [vmem:[%s1708_s15 + $0xa0] ss:$8 sps:$4 sm:$0xff]  }
  0x15   : > { %1398 = vmatprep.subr.bf16.mxu0 %v1551_v8  ;;  %1506 = vmatprep.subr.bf16.mxu1 %v1551_v8  ;;  %v1577_v28 = vld [vmem:[%s1708_s15 + $0x34] ss:$8 sps:$4 sm:$0xff]   ;;  %v1581_v30 = vld [vmem:[%s1708_s15 + $0x30] ss:$8 sps:$4 sm:$0xff]   ;;  %v1583_v32 = vld [vmem:[%s1708_s15 + $0x44] ss:$8 sps:$4 sm:$0xff]  }
  0x16   : > { %v1579_v29 = vld [vmem:[%s1708_s15 + $0xb4] ss:$8 sps:$4 sm:$0xff]   ;;  %v1582_v31 = vld [vmem:[%s1708_s15 + $0xb0] ss:$8 sps:$4 sm:$0xff]   ;;  %v1585_v33 = vld [vmem:[%s1708_s15 + $0xc4] ss:$8 sps:$4 sm:$0xff]  }
  0x17   : > { %v1587_v34 = vld [vmem:[%s1708_s15 + $0x40] ss:$8 sps:$4 sm:$0xff]   ;;  %v1589_v36 = vld [vmem:[%s1708_s15 + $0x54] ss:$8 sps:$4 sm:$0xff]   ;;  %v1593_v38 = vld [vmem:[%s1708_s15 + $0x50] ss:$8 sps:$4 sm:$0xff]  }
  0x18   : > { %1399 = vmatpush3.bf16.msra.mxu0 %v1552_v9  ;;  %1514 = vmatpush3.bf16.msra.mxu1 %v1552_v9  ;;  %v1588_v35 = vld [vmem:[%s1708_s15 + $0xc0] ss:$8 sps:$4 sm:$0xff]   ;;  %v1591_v37 = vld [vmem:[%s1708_s15 + $0xd4] ss:$8 sps:$4 sm:$0xff]   ;;  %v1594_v39 = vld [vmem:[%s1708_s15 + $0xd0] ss:$8 sps:$4 sm:$0xff]  }
  0x19   : > { %1400 = vmatprep.subr.bf16.mxu0 %v1553_v10  ;;  %1507 = vmatprep.subr.bf16.mxu1 %v1553_v10  ;;  %v1595_v40 = vld [vmem:[%s1708_s15 + $0x64] ss:$8 sps:$4 sm:$0xff]   ;;  %v1599_v42 = vld [vmem:[%s1708_s15 + $0x60] ss:$8 sps:$4 sm:$0xff]   ;;  %v1601_v44 = vld [vmem:[%s1708_s15 + $0x74] ss:$8 sps:$4 sm:$0xff]  }
  0x1a   : > { %v1597_v41 = vld [vmem:[%s1708_s15 + $0xe4] ss:$8 sps:$4 sm:$0xff]   ;;  %v1600_v43 = vld [vmem:[%s1708_s15 + $0xe0] ss:$8 sps:$4 sm:$0xff]   ;;  %v1603_v45 = vld [vmem:[%s1708_s15 + $0xf4] ss:$8 sps:$4 sm:$0xff]  }
  0x1b   : > { %v1605_v46 = vld [vmem:[%s1708_s15 + $0x70] ss:$8 sps:$4 sm:$0xff]   ;;  %277 = vst.msk [vmem:[#allocation2 + $0x88] sm:$0xff] %vm259_vm0, %v1631_v48  ;;  %278 = vst.msk [vmem:[#allocation2 + $0x90] sm:$0xff] %vm259_vm0, %v1631_v48  ;;  %v308_v53 = vld [vmem:[#allocation2 + $0x80] sm:$0xff] }
  0x1c   : > { %1401 = vmatpush3.bf16.msra.mxu0 %v1554_v13  ;;  %1515 = vmatpush3.bf16.msra.mxu1 %v1554_v13  ;;  %v1606_v47 = vld [vmem:[%s1708_s15 + $0xf0] ss:$8 sps:$4 sm:$0xff]   ;;  %279 = vst.msk [vmem:[#allocation2 + $0x98] sm:$0xff] %vm259_vm0, %v1631_v48  ;;  %280 = vst.msk [vmem:[#allocation2 + $0xa0] sm:$0xff] %vm259_vm0, %v1631_v48 }
  0x1d   : > { %1402 = vmatprep.subr.bf16.mxu0 %v1555_v14  ;;  %1508 = vmatprep.subr.bf16.mxu1 %v1555_v14  ;;  %281 = vst.msk [vmem:[#allocation2 + $0xa8] sm:$0xff] %vm259_vm0, %v1631_v48  ;;  %282 = vst.msk [vmem:[#allocation2 + $0xb0] sm:$0xff] %vm259_vm0, %v1631_v48  ;;  %v294_v7 = vld [vmem:[#allocation2 + $0x10] sm:$0xff] }
  0x1e   : > { %283 = vst.msk [vmem:[#allocation2 + $0xb8] sm:$0xff] %vm259_vm0, %v1631_v48  ;;  %284 = vst.msk [vmem:[#allocation2 + $0xc0] sm:$0xff] %vm259_vm0, %v1631_v48 }
  0x1f   : > { %285 = vst.msk [vmem:[#allocation2 + $0xc8] sm:$0xff] %vm259_vm0, %v1631_v48  ;;  %286 = vst.msk [vmem:[#allocation2 + $0xd0] sm:$0xff] %vm259_vm0, %v1631_v48 }
  0x20   : > { %1403 = vmatpush3.bf16.msra.mxu0 %v1556_v15  ;;  %1516 = vmatpush3.bf16.msra.mxu1 %v1556_v15  ;;  %287 = vst.msk [vmem:[#allocation2 + $0xd8] sm:$0xff] %vm259_vm0, %v1631_v48  ;;  %288 = vst.msk [vmem:[#allocation2 + $0xe0] sm:$0xff] %vm259_vm0, %v1631_v48  ;;  %v1802_v15 = vld [vmem:[%s1982_s2] ss:$0 sm:$0xff] }
  0x21   : > { %1404 = vmatprep.subr.bf16.mxu0 %v1557_v16  ;;  %1509 = vmatprep.subr.bf16.mxu1 %v1557_v16  ;;  %289 = vst.msk [vmem:[#allocation2 + $0xe8] sm:$0xff] %vm259_vm0, %v1631_v48  ;;  %290 = vst.msk [vmem:[#allocation2 + $0xf0] sm:$0xff] %vm259_vm0, %v1631_v48  ;;  %v295_v16 = vld [vmem:[#allocation2 + $0x18] sm:$0xff] }
  0x22   : > { %291 = vst.msk [vmem:[#allocation2 + $0xf8] sm:$0xff] %vm259_vm0, %v1631_v48  ;;  %v309_v61 = vld [vmem:[#allocation2 + $0x88] sm:$0xff]  ;;  %v310_v9 = vld [vmem:[#allocation2 + $0x90] sm:$0xff] }
  0x24   : > { %1405 = vmatpush3.bf16.msra.mxu0 %v1558_v17  ;;  %1517 = vmatpush3.bf16.msra.mxu1 %v1558_v17 }
  0x27   : > { %677 = vmatmul.mubr.bf16.vlgmr.msra.gmra.mrb[0].mxu0 %v1559_v18  ;;  %741 = vmatmul.mubr.bf16.vlgmr.msra.gmra.mrb[0].mxu1 %v1562_v19  ;;  %v311_v18 = vld [vmem:[#allocation2 + $0x98] sm:$0xff] }
  0x28   : > { %684 = vmatprep.mubr.bf16.mxu0 %v1565_v20  ;;  %748 = vmatprep.mubr.bf16.mxu1 %v1567_v21 }
  0x2f   : > { %685 = vmatmul.mubr.bf16.gmra.mrb[4].mxu0 %v1569_v22  ;;  %749 = vmatmul.mubr.bf16.gmra.mrb[4].mxu1 %v1570_v23 }
  0x30   : > { %692 = vmatprep.mubr.bf16.mxu0 %v1571_v24  ;;  %756 = vmatprep.mubr.bf16.mxu1 %v1573_v25  ;;  %v1807_v25 = vld [vmem:[%s1983_s3] ss:$0 sm:$0xff] }
  0x37   : > { %693 = vmatmul.mubr.bf16.gmra.mrb[8].mxu0 %v1575_v26  ;;  %757 = vmatmul.mubr.bf16.gmra.mrb[8].mxu1 %v1576_v27 }
  0x38   : > { %700 = vmatprep.mubr.bf16.mxu0 %v1577_v28  ;;  %764 = vmatprep.mubr.bf16.mxu1 %v1579_v29 }
  0x3f   : > { %701 = vmatmul.mubr.bf16.gmra.mrb[12].mxu0 %v1581_v30  ;;  %765 = vmatmul.mubr.bf16.gmra.mrb[12].mxu1 %v1582_v31 }
  0x40   : > { %708 = vmatprep.mubr.bf16.mxu0 %v1583_v32  ;;  %772 = vmatprep.mubr.bf16.mxu1 %v1585_v33 }
  0x47   : > { %709 = vmatmul.mubr.bf16.gmra.mrb[16].mxu0 %v1587_v34  ;;  %773 = vmatmul.mubr.bf16.gmra.mrb[16].mxu1 %v1588_v35 }
  0x48   : > { %716 = vmatprep.mubr.bf16.mxu0 %v1589_v36  ;;  %780 = vmatprep.mubr.bf16.mxu1 %v1591_v37 }
  0x4f   : > { %717 = vmatmul.mubr.bf16.gmra.mrb[20].mxu0 %v1593_v38  ;;  %781 = vmatmul.mubr.bf16.gmra.mrb[20].mxu1 %v1594_v39 }
  0x50   : > { %724 = vmatprep.mubr.bf16.mxu0 %v1595_v40  ;;  %788 = vmatprep.mubr.bf16.mxu1 %v1597_v41 }
  0x57   : > { %725 = vmatmul.mubr.bf16.gmra.mrb[24].mxu0 %v1599_v42  ;;  %789 = vmatmul.mubr.bf16.gmra.mrb[24].mxu1 %v1600_v43 }
  0x58   : > { %732 = vmatprep.mubr.bf16.mxu0 %v1601_v44  ;;  %796 = vmatprep.mubr.bf16.mxu1 %v1603_v45  ;;  %v296_v45 = vld [vmem:[#allocation2 + $0x20] sm:$0xff] }
  0x5f   : > { %733 = vmatmul.mubr.bf16.gmra.mrb[28].mxu0 %v1605_v46  ;;  %797 = vmatmul.mubr.bf16.gmra.mrb[28].mxu1 %v1606_v47  ;;  %v312_v46 = vld [vmem:[#allocation2 + $0xa0] sm:$0xff] }
  0xfa   : > { %v1406_v49 = vpop.f32.mrb[0].mxu0  ;;  %v1454_v50 = vpop.f32.mrb[0].mxu1 }
  0xfb   : > { %v1407_v52 = vpop.f32.mrb[1].mxu0  ;;  %v1455_v54 = vpop.f32.mrb[1].mxu1 }
  0xfc   : > { %v1408_v55 = vadd.f32 %v1407_v52, %v1406_v49  ;;  %v1456_v56 = vadd.f32 %v1455_v54, %v1454_v50  ;;  %v1409_v57 = vpop.f32.mrb[2].mxu0  ;;  %v1457_v58 = vpop.f32.mrb[2].mxu1 }
  0xfd   : > { %v1410_v60 = vpop.f32.mrb[3].mxu0  ;;  %v1458_v62 = vpop.f32.mrb[3].mxu1 }
  0xfe   : > { %v805_v63 = vadd.f32 %v1408_v55, %v292_v51  ;;  %v821_v0 = vadd.f32 %v1456_v56, %v308_v53  ;;  %v1411_v1 = vadd.f32 %v1410_v60, %v1409_v57  ;;  %v1459_v2 = vadd.f32 %v1458_v62, %v1457_v58  ;;  %v297_v57 = vld [vmem:[#allocation2 + $0x28] sm:$0xff] }
  0xff   : > { %v313_v58 = vld [vmem:[#allocation2 + $0xa8] sm:$0xff] }
 0x100   : > { %838 = vst.msk [vmem:[#allocation2] sm:$0xff] %vm259_vm0, %v805_v63  ;;  %854 = vst.msk [vmem:[#allocation2 + $0x80] sm:$0xff] %vm259_vm0, %v821_v0  ;;  %v806_v3 = vadd.f32 %v1411_v1, %v293_v59  ;;  %v822_v4 = vadd.f32 %v1459_v2, %v309_v61 }
 0x102   : > { %839 = vst.msk [vmem:[#allocation2 + $0x8] sm:$0xff] %vm259_vm0, %v806_v3  ;;  %855 = vst.msk [vmem:[#allocation2 + $0x88] sm:$0xff] %vm259_vm0, %v822_v4  ;;  %v1412_v5 = vpop.f32.mrb[4].mxu0  ;;  %v1460_v6 = vpop.f32.mrb[4].mxu1 }
 0x103   : > { %v1413_v8 = vpop.f32.mrb[5].mxu0  ;;  %v1461_v10 = vpop.f32.mrb[5].mxu1 }
 0x104   : > { %v1414_v11 = vadd.f32 %v1413_v8, %v1412_v5  ;;  %v1462_v12 = vadd.f32 %v1461_v10, %v1460_v6  ;;  %v1415_v13 = vpop.f32.mrb[6].mxu0  ;;  %v1463_v14 = vpop.f32.mrb[6].mxu1 }
 0x105   : > { %v1416_v17 = vpop.f32.mrb[7].mxu0  ;;  %v1464_v19 = vpop.f32.mrb[7].mxu1 }
 0x106   : > { %v807_v20 = vadd.f32 %v1414_v11, %v294_v7  ;;  %v823_v21 = vadd.f32 %v1462_v12, %v310_v9  ;;  %v1417_v22 = vadd.f32 %v1416_v17, %v1415_v13  ;;  %v1465_v23 = vadd.f32 %v1464_v19, %v1463_v14 }
 0x107   : > { %v873_v24 = vld [vmem:[#allocation2] sm:$0xff] }
 0x108   : > { %v889_v26 = vld [vmem:[#allocation2 + $0x80] sm:$0xff]  ;;  %v912_v27 = vmul.f32 %v1802_v15, %v873_v24  ;;  %840 = vst.msk [vmem:[#allocation2 + $0x10] sm:$0xff] %vm259_vm0, %v807_v20  ;;  %856 = vst.msk [vmem:[#allocation2 + $0x90] sm:$0xff] %vm259_vm0, %v823_v21  ;;  %v808_v29 = vadd.f32 %v1417_v22, %v295_v16  ;;  %v824_v30 = vadd.f32 %v1465_v23, %v311_v18  ;;  %v298_v22 = vld [vmem:[#allocation2 + $0x30] sm:$0xff] }
 0x109   : > { %v928_v28 = vmul.f32 %v1802_v15, %v889_v26  ;;  %v874_v31 = vld [vmem:[#allocation2 + $0x8] sm:$0xff]  ;;  %v314_v23 = vld [vmem:[#allocation2 + $0xb0] sm:$0xff] }
 0x10a   : > { %v890_v32 = vld [vmem:[#allocation2 + $0x88] sm:$0xff]  ;;  %v951_v33 = vadd.f32 %v1807_v25, %v912_v27  ;;  %v913_v35 = vmul.f32 %v1802_v15, %v874_v31  ;;  %841 = vst.msk [vmem:[#allocation2 + $0x18] sm:$0xff] %vm259_vm0, %v808_v29  ;;  %857 = vst.msk [vmem:[#allocation2 + $0x98] sm:$0xff] %vm259_vm0, %v824_v30  ;;  %v1418_v37 = vpop.f32.mrb[8].mxu0  ;;  %v1466_v38 = vpop.f32.mrb[8].mxu1 }
 0x10b   : > { %v967_v34 = vadd.f32 %v1807_v25, %v928_v28  ;;  %v929_v36 = vmul.f32 %v1802_v15, %v890_v32  ;;  %v1419_v39 = vpop.f32.mrb[9].mxu0  ;;  %v1467_v40 = vpop.f32.mrb[9].mxu1 }
 0x10c   : > { %v983_v41 = vmax.f32 %v951_v33, 0.0  ;;  %v952_v43 = vadd.f32 %v1807_v25, %v913_v35  ;;  %v1421_v47 = vpop.f32.mrb[10].mxu0  ;;  %v1469_v48 = vpop.f32.mrb[10].mxu1  ;;  %v1420_v49 = vadd.f32 %v1419_v39, %v1418_v37  ;;  %v1468_v50 = vadd.f32 %v1467_v40, %v1466_v38  ;;  %v299_v35 = vld [vmem:[#allocation2 + $0x38] sm:$0xff] }
 0x10d   : > { %v999_v42 = vmax.f32 %v967_v34, 0.0  ;;  %v968_v44 = vadd.f32 %v1807_v25, %v929_v36  ;;  %v1422_v51 = vpop.f32.mrb[11].mxu0  ;;  %v1470_v52 = vpop.f32.mrb[11].mxu1  ;;  %v315_v36 = vld [vmem:[#allocation2 + $0xb8] sm:$0xff] }
 0x10e   : > { %v1358_v53 = vpack.c.bf16 %v983_v41, %v983_v41  ;;  %v984_v55 = vmax.f32 %v952_v43, 0.0  ;;  %v809_v61 = vadd.f32 %v1420_v49, %v296_v45  ;;  %v825_v62 = vadd.f32 %v1468_v50, %v312_v46 }
 0x10f   : > { %v1374_v54 = vpack.c.bf16 %v999_v42, %v999_v42  ;;  %v1000_v56 = vmax.f32 %v968_v44, 0.0  ;;  %v875_v59 = vld [vmem:[#allocation2 + $0x10] sm:$0xff]  ;;  %v1423_v63 = vadd.f32 %v1422_v51, %v1421_v47  ;;  %v1471_v0 = vadd.f32 %v1470_v52, %v1469_v48 }
 0x110   : > { %v891_v60 = vld [vmem:[#allocation2 + $0x90] sm:$0xff]  ;;  %1144 = vst.msk [vmem:[%s1825_s14] sm:$0xf] %vm1143_vm1, %v1358_v53  ;;  %v1359_v1 = vpack.c.bf16 %v984_v55, %v984_v55  ;;  %v914_v3 = vmul.f32 %v1802_v15, %v875_v59  ;;  %v316_v59 = vld [vmem:[#allocation2 + $0xc0] sm:$0xff] }
 0x111   : > { %1160 = vst.msk [vmem:[%s1825_s14 + $0x40] sm:$0xf] %vm1143_vm1, %v1374_v54  ;;  %v1375_v2 = vpack.c.bf16 %v1000_v56, %v1000_v56  ;;  %v930_v4 = vmul.f32 %v1802_v15, %v891_v60  ;;  %v876_v5 = vld [vmem:[#allocation2 + $0x18] sm:$0xff]  ;;  %v810_v7 = vadd.f32 %v1423_v63, %v297_v57  ;;  %v826_v8 = vadd.f32 %v1471_v0, %v313_v58  ;;  %v300_v57 = vld [vmem:[#allocation2 + $0x40] sm:$0xff] }
 0x112   : > { %v892_v6 = vld [vmem:[#allocation2 + $0x98] sm:$0xff]  ;;  %842 = vst.msk [vmem:[#allocation2 + $0x20] sm:$0xff] %vm259_vm0, %v809_v61  ;;  %858 = vst.msk [vmem:[#allocation2 + $0xa0] sm:$0xff] %vm259_vm0, %v825_v62  ;;  %v953_v9 = vadd.f32 %v1807_v25, %v914_v3  ;;  %v915_v11 = vmul.f32 %v1802_v15, %v876_v5  ;;  %v1424_v13 = vpop.f32.mrb[12].mxu0  ;;  %v1472_v14 = vpop.f32.mrb[12].mxu1  ;;  %v301_v5 = vld [vmem:[#allocation2 + $0x48] sm:$0xff] }
 0x113   : > { %1145 = vst.msk [vmem:[%s1825_s14 + $0x4] sm:$0xf] %vm1143_vm1, %v1359_v1  ;;  %1161 = vst.msk [vmem:[%s1825_s14 + $0x44] sm:$0xf] %vm1143_vm1, %v1375_v2  ;;  %v969_v10 = vadd.f32 %v1807_v25, %v930_v4  ;;  %v931_v12 = vmul.f32 %v1802_v15, %v892_v6  ;;  %v1425_v16 = vpop.f32.mrb[13].mxu0  ;;  %v1473_v17 = vpop.f32.mrb[13].mxu1 }
 0x114   : > { %843 = vst.msk [vmem:[#allocation2 + $0x28] sm:$0xff] %vm259_vm0, %v810_v7  ;;  %859 = vst.msk [vmem:[#allocation2 + $0xa8] sm:$0xff] %vm259_vm0, %v826_v8  ;;  %v985_v18 = vmax.f32 %v953_v9, 0.0  ;;  %v954_v20 = vadd.f32 %v1807_v25, %v915_v11  ;;  %v1427_v24 = vpop.f32.mrb[14].mxu0  ;;  %v1475_v26 = vpop.f32.mrb[14].mxu1  ;;  %v1426_v27 = vadd.f32 %v1425_v16, %v1424_v13  ;;  %v1474_v28 = vadd.f32 %v1473_v17, %v1472_v14  ;;  %v317_v7 = vld [vmem:[#allocation2 + $0xc8] sm:$0xff] }
 0x115   : > { %v1001_v19 = vmax.f32 %v969_v10, 0.0  ;;  %v970_v21 = vadd.f32 %v1807_v25, %v931_v12  ;;  %v1428_v29 = vpop.f32.mrb[15].mxu0  ;;  %v1476_v30 = vpop.f32.mrb[15].mxu1 }
 0x116   : > { %v1360_v31 = vpack.c.bf16 %v985_v18, %v985_v18  ;;  %v986_v33 = vmax.f32 %v954_v20, 0.0  ;;  %v811_v37 = vadd.f32 %v1426_v27, %v298_v22  ;;  %v827_v38 = vadd.f32 %v1474_v28, %v314_v23 }
 0x117   : > { %v1376_v32 = vpack.c.bf16 %v1001_v19, %v1001_v19  ;;  %v1002_v34 = vmax.f32 %v970_v21, 0.0  ;;  %v1429_v39 = vadd.f32 %v1428_v29, %v1427_v24  ;;  %v1477_v40 = vadd.f32 %v1476_v30, %v1475_v26 }
 0x118   : > { %1146 = vst.msk [vmem:[%s1825_s14 + $0x8] sm:$0xf] %vm1143_vm1, %v1360_v31  ;;  %v1361_v41 = vpack.c.bf16 %v986_v33, %v986_v33 }
 0x119   : > { %1162 = vst.msk [vmem:[%s1825_s14 + $0x48] sm:$0xf] %vm1143_vm1, %v1376_v32  ;;  %v1377_v42 = vpack.c.bf16 %v1002_v34, %v1002_v34  ;;  %v877_v43 = vld [vmem:[#allocation2 + $0x20] sm:$0xff]  ;;  %v812_v47 = vadd.f32 %v1429_v39, %v299_v35  ;;  %v828_v48 = vadd.f32 %v1477_v40, %v315_v36  ;;  %v302_v35 = vld [vmem:[#allocation2 + $0x50] sm:$0xff] }
 0x11a   : > { %v893_v44 = vld [vmem:[#allocation2 + $0xa0] sm:$0xff]  ;;  %v916_v45 = vmul.f32 %v1802_v15, %v877_v43  ;;  %844 = vst.msk [vmem:[#allocation2 + $0x30] sm:$0xff] %vm259_vm0, %v811_v37  ;;  %860 = vst.msk [vmem:[#allocation2 + $0xb0] sm:$0xff] %vm259_vm0, %v827_v38  ;;  %v1430_v51 = vpop.f32.mrb[16].mxu0  ;;  %v1478_v52 = vpop.f32.mrb[16].mxu1  ;;  %v318_v37 = vld [vmem:[#allocation2 + $0xd0] sm:$0xff] }
 0x11b   : > { %v932_v46 = vmul.f32 %v1802_v15, %v893_v44  ;;  %1147 = vst.msk [vmem:[%s1825_s14 + $0xc] sm:$0xf] %vm1143_vm1, %v1361_v41  ;;  %1163 = vst.msk [vmem:[%s1825_s14 + $0x4c] sm:$0xf] %vm1143_vm1, %v1377_v42  ;;  %v878_v49 = vld [vmem:[#allocation2 + $0x28] sm:$0xff]  ;;  %v1431_v58 = vpop.f32.mrb[17].mxu0 }
 0x11c   : > { %v894_v50 = vld [vmem:[#allocation2 + $0xa8] sm:$0xff]  ;;  %v955_v53 = vadd.f32 %v1807_v25, %v916_v45  ;;  %v917_v55 = vmul.f32 %v1802_v15, %v878_v49  ;;  %845 = vst.msk [vmem:[#allocation2 + $0x38] sm:$0xff] %vm259_vm0, %v812_v47  ;;  %861 = vst.msk [vmem:[#allocation2 + $0xb8] sm:$0xff] %vm259_vm0, %v828_v48  ;;  %v1479_v60 = vpop.f32.mrb[17].mxu1  ;;  %v1432_v61 = vadd.f32 %v1431_v58, %v1430_v51  ;;  %v1433_v63 = vpop.f32.mrb[18].mxu0  ;;  %v303_v47 = vld [vmem:[#allocation2 + $0x58] sm:$0xff] }
 0x11d   : > { %v971_v54 = vadd.f32 %v1807_v25, %v932_v46  ;;  %v933_v56 = vmul.f32 %v1802_v15, %v894_v50  ;;  %v1480_v62 = vadd.f32 %v1479_v60, %v1478_v52  ;;  %v1481_v0 = vpop.f32.mrb[18].mxu1  ;;  %v1434_v6 = vpop.f32.mrb[19].mxu0  ;;  %v319_v49 = vld [vmem:[#allocation2 + $0xd8] sm:$0xff] }
 0x11e   : > { %v987_v1 = vmax.f32 %v955_v53, 0.0  ;;  %v956_v3 = vadd.f32 %v1807_v25, %v917_v55  ;;  %v1482_v8 = vpop.f32.mrb[19].mxu1  ;;  %v813_v9 = vadd.f32 %v1432_v61, %v300_v57  ;;  %v1435_v11 = vadd.f32 %v1434_v6, %v1433_v63 }
 0x11f   : > { %v1003_v2 = vmax.f32 %v971_v54, 0.0  ;;  %v972_v4 = vadd.f32 %v1807_v25, %v933_v56  ;;  %v829_v10 = vadd.f32 %v1480_v62, %v316_v59  ;;  %v1483_v12 = vadd.f32 %v1482_v8, %v1481_v0 }
 0x120   : > { %v1362_v13 = vpack.c.bf16 %v987_v1, %v987_v1  ;;  %v988_v16 = vmax.f32 %v956_v3, 0.0  ;;  %846 = vst.msk [vmem:[#allocation2 + $0x40] sm:$0xff] %vm259_vm0, %v813_v9  ;;  %v814_v20 = vadd.f32 %v1435_v11, %v301_v5 }
 0x121   : > { %v1378_v14 = vpack.c.bf16 %v1003_v2, %v1003_v2  ;;  %v1004_v17 = vmax.f32 %v972_v4, 0.0  ;;  %v879_v18 = vld [vmem:[#allocation2 + $0x30] sm:$0xff]  ;;  %862 = vst.msk [vmem:[#allocation2 + $0xc0] sm:$0xff] %vm259_vm0, %v829_v10  ;;  %v830_v21 = vadd.f32 %v1483_v12, %v317_v7 }
 0x122   : > { %v895_v19 = vld [vmem:[#allocation2 + $0xb0] sm:$0xff]  ;;  %1148 = vst.msk [vmem:[%s1825_s14 + $0x10] sm:$0xf] %vm1143_vm1, %v1362_v13  ;;  %v1363_v22 = vpack.c.bf16 %v988_v16, %v988_v16  ;;  %v918_v24 = vmul.f32 %v1802_v15, %v879_v18  ;;  %v1436_v29 = vpop.f32.mrb[20].mxu0  ;;  %v1484_v30 = vpop.f32.mrb[20].mxu1  ;;  %v304_v18 = vld [vmem:[#allocation2 + $0x60] sm:$0xff] }
 0x123   : > { %1164 = vst.msk [vmem:[%s1825_s14 + $0x50] sm:$0xf] %vm1143_vm1, %v1378_v14  ;;  %v1379_v23 = vpack.c.bf16 %v1004_v17, %v1004_v17  ;;  %v934_v26 = vmul.f32 %v1802_v15, %v895_v19  ;;  %v880_v27 = vld [vmem:[#allocation2 + $0x38] sm:$0xff]  ;;  %v1437_v36 = vpop.f32.mrb[21].mxu0  ;;  %v1485_v38 = vpop.f32.mrb[21].mxu1  ;;  %v320_v19 = vld [vmem:[#allocation2 + $0xe0] sm:$0xff] }
 0x124   : > { %v896_v28 = vld [vmem:[#allocation2 + $0xb8] sm:$0xff]  ;;  %847 = vst.msk [vmem:[#allocation2 + $0x48] sm:$0xff] %vm259_vm0, %v814_v20  ;;  %863 = vst.msk [vmem:[#allocation2 + $0xc8] sm:$0xff] %vm259_vm0, %v830_v21  ;;  %v957_v31 = vadd.f32 %v1807_v25, %v918_v24  ;;  %v919_v33 = vmul.f32 %v1802_v15, %v880_v27  ;;  %v1438_v39 = vadd.f32 %v1437_v36, %v1436_v29  ;;  %v1439_v41 = vpop.f32.mrb[22].mxu0  ;;  %v1487_v42 = vpop.f32.mrb[22].mxu1 }
 0x125   : > { %1149 = vst.msk [vmem:[%s1825_s14 + $0x14] sm:$0xf] %vm1143_vm1, %v1363_v22  ;;  %1165 = vst.msk [vmem:[%s1825_s14 + $0x54] sm:$0xf] %vm1143_vm1, %v1379_v23  ;;  %v973_v32 = vadd.f32 %v1807_v25, %v934_v26  ;;  %v935_v34 = vmul.f32 %v1802_v15, %v896_v28  ;;  %v1486_v40 = vadd.f32 %v1485_v38, %v1484_v30  ;;  %v1440_v48 = vpop.f32.mrb[23].mxu0  ;;  %v1488_v50 = vpop.f32.mrb[23].mxu1 }
 0x126   : > { %v989_v43 = vmax.f32 %v957_v31, 0.0  ;;  %v958_v45 = vadd.f32 %v1807_v25, %v919_v33  ;;  %v815_v51 = vadd.f32 %v1438_v39, %v302_v35  ;;  %v1441_v53 = vadd.f32 %v1440_v48, %v1439_v41  ;;  %v305_v31 = vld [vmem:[#allocation2 + $0x68] sm:$0xff] }
 0x127   : > { %v1005_v44 = vmax.f32 %v973_v32, 0.0  ;;  %v974_v46 = vadd.f32 %v1807_v25, %v935_v34  ;;  %v831_v52 = vadd.f32 %v1486_v40, %v318_v37  ;;  %v1489_v54 = vadd.f32 %v1488_v50, %v1487_v42  ;;  %v881_v59 = vld [vmem:[#allocation2 + $0x40] sm:$0xff]  ;;  %v321_v32 = vld [vmem:[#allocation2 + $0xe8] sm:$0xff] }
 0x128   : > { %v1364_v55 = vpack.c.bf16 %v989_v43, %v989_v43  ;;  %v990_v57 = vmax.f32 %v958_v45, 0.0  ;;  %v897_v60 = vld [vmem:[#allocation2 + $0xc0] sm:$0xff]  ;;  %v920_v61 = vmul.f32 %v1802_v15, %v881_v59  ;;  %848 = vst.msk [vmem:[#allocation2 + $0x50] sm:$0xff] %vm259_vm0, %v815_v51  ;;  %v816_v63 = vadd.f32 %v1441_v53, %v303_v47  ;;  %v306_v59 = vld [vmem:[#allocation2 + $0x70] sm:$0xff] }
 0x129   : > { %v1380_v56 = vpack.c.bf16 %v1005_v44, %v1005_v44  ;;  %v1006_v58 = vmax.f32 %v974_v46, 0.0  ;;  %v936_v62 = vmul.f32 %v1802_v15, %v897_v60  ;;  %864 = vst.msk [vmem:[#allocation2 + $0xd0] sm:$0xff] %vm259_vm0, %v831_v52  ;;  %v832_v0 = vadd.f32 %v1489_v54, %v319_v49  ;;  %v322_v60 = vld [vmem:[#allocation2 + $0xf0] sm:$0xff] }
 0x12a   : > { %1150 = vst.msk [vmem:[%s1825_s14 + $0x18] sm:$0xf] %vm1143_vm1, %v1364_v55  ;;  %v1365_v1 = vpack.c.bf16 %v990_v57, %v990_v57  ;;  %v959_v5 = vadd.f32 %v1807_v25, %v920_v61  ;;  %v1442_v9 = vpop.f32.mrb[24].mxu0  ;;  %v1490_v10 = vpop.f32.mrb[24].mxu1 }
 0x12b   : > { %1166 = vst.msk [vmem:[%s1825_s14 + $0x58] sm:$0xf] %vm1143_vm1, %v1380_v56  ;;  %v1381_v2 = vpack.c.bf16 %v1006_v58, %v1006_v58  ;;  %v882_v3 = vld [vmem:[#allocation2 + $0x48] sm:$0xff]  ;;  %v975_v6 = vadd.f32 %v1807_v25, %v936_v62  ;;  %v1443_v11 = vpop.f32.mrb[25].mxu0  ;;  %v1491_v12 = vpop.f32.mrb[25].mxu1 }
 0x12c   : > { %v898_v4 = vld [vmem:[#allocation2 + $0xc8] sm:$0xff]  ;;  %v921_v7 = vmul.f32 %v1802_v15, %v882_v3  ;;  %849 = vst.msk [vmem:[#allocation2 + $0x58] sm:$0xff] %vm259_vm0, %v816_v63  ;;  %865 = vst.msk [vmem:[#allocation2 + $0xd8] sm:$0xff] %vm259_vm0, %v832_v0  ;;  %v991_v13 = vmax.f32 %v959_v5, 0.0  ;;  %v1445_v20 = vpop.f32.mrb[26].mxu0  ;;  %v1493_v21 = vpop.f32.mrb[26].mxu1  ;;  %v1444_v22 = vadd.f32 %v1443_v11, %v1442_v9  ;;  %v1492_v23 = vadd.f32 %v1491_v12, %v1490_v10 }
 0x12d   : > { %v937_v8 = vmul.f32 %v1802_v15, %v898_v4  ;;  %1151 = vst.msk [vmem:[%s1825_s14 + $0x1c] sm:$0xf] %vm1143_vm1, %v1365_v1  ;;  %1167 = vst.msk [vmem:[%s1825_s14 + $0x5c] sm:$0xf] %vm1143_vm1, %v1381_v2  ;;  %v1007_v14 = vmax.f32 %v975_v6, 0.0  ;;  %v1446_v24 = vpop.f32.mrb[27].mxu0 }
 0x12e   : > { %v960_v16 = vadd.f32 %v1807_v25, %v921_v7  ;;  %v1494_v26 = vpop.f32.mrb[27].mxu1  ;;  %v1366_v27 = vpack.c.bf16 %v991_v13, %v991_v13  ;;  %v817_v35 = vadd.f32 %v1444_v22, %v304_v18  ;;  %v833_v36 = vadd.f32 %v1492_v23, %v320_v19  ;;  %v307_v7 = vld [vmem:[#allocation2 + $0x78] sm:$0xff] }
 0x12f   : > { %v976_v17 = vadd.f32 %v1807_v25, %v937_v8  ;;  %v1382_v28 = vpack.c.bf16 %v1007_v14, %v1007_v14  ;;  %v883_v33 = vld [vmem:[#allocation2 + $0x50] sm:$0xff]  ;;  %v1447_v37 = vadd.f32 %v1446_v24, %v1445_v20  ;;  %v1495_v38 = vadd.f32 %v1494_v26, %v1493_v21  ;;  %v323_v8 = vld [vmem:[#allocation2 + $0xf8] sm:$0xff] }
 0x130   : > { %v992_v29 = vmax.f32 %v960_v16, 0.0  ;;  %v899_v34 = vld [vmem:[#allocation2 + $0xd0] sm:$0xff]  ;;  %1152 = vst.msk [vmem:[%s1825_s14 + $0x20] sm:$0xf] %vm1143_vm1, %v1366_v27  ;;  %v922_v41 = vmul.f32 %v1802_v15, %v883_v33 }
 0x131   : > { %v1008_v30 = vmax.f32 %v976_v17, 0.0  ;;  %1168 = vst.msk [vmem:[%s1825_s14 + $0x60] sm:$0xf] %vm1143_vm1, %v1382_v28  ;;  %v938_v42 = vmul.f32 %v1802_v15, %v899_v34  ;;  %v818_v45 = vadd.f32 %v1447_v37, %v305_v31  ;;  %v834_v46 = vadd.f32 %v1495_v38, %v321_v32 }
 0x132   : > { %v1367_v39 = vpack.c.bf16 %v992_v29, %v992_v29  ;;  %850 = vst.msk [vmem:[#allocation2 + $0x60] sm:$0xff] %vm259_vm0, %v817_v35  ;;  %866 = vst.msk [vmem:[#allocation2 + $0xe0] sm:$0xff] %vm259_vm0, %v833_v36  ;;  %v961_v47 = vadd.f32 %v1807_v25, %v922_v41  ;;  %v1448_v51 = vpop.f32.mrb[28].mxu0  ;;  %v1496_v52 = vpop.f32.mrb[28].mxu1 }
 0x133   : > { %v1383_v40 = vpack.c.bf16 %v1008_v30, %v1008_v30  ;;  %v884_v43 = vld [vmem:[#allocation2 + $0x58] sm:$0xff]  ;;  %v977_v48 = vadd.f32 %v1807_v25, %v938_v42  ;;  %851 = vst.msk [vmem:[#allocation2 + $0x68] sm:$0xff] %vm259_vm0, %v818_v45  ;;  %867 = vst.msk [vmem:[#allocation2 + $0xe8] sm:$0xff] %vm259_vm0, %v834_v46  ;;  %v1449_v53 = vpop.f32.mrb[29].mxu0  ;;  %v1497_v54 = vpop.f32.mrb[29].mxu1 }
 0x134   : > { %v900_v44 = vld [vmem:[#allocation2 + $0xd8] sm:$0xff]  ;;  %1153 = vst.msk [vmem:[%s1825_s14 + $0x24] sm:$0xf] %vm1143_vm1, %v1367_v39  ;;  %v923_v49 = vmul.f32 %v1802_v15, %v884_v43  ;;  %v993_v55 = vmax.f32 %v961_v47, 0.0  ;;  %v1451_v61 = vpop.f32.mrb[30].mxu0  ;;  %v1499_v62 = vpop.f32.mrb[30].mxu1  ;;  %v1450_v63 = vadd.f32 %v1449_v53, %v1448_v51  ;;  %v1498_v0 = vadd.f32 %v1497_v54, %v1496_v52 }
 0x135   : > { %1169 = vst.msk [vmem:[%s1825_s14 + $0x64] sm:$0xf] %vm1143_vm1, %v1383_v40  ;;  %v939_v50 = vmul.f32 %v1802_v15, %v900_v44  ;;  %v1009_v56 = vmax.f32 %v977_v48, 0.0  ;;  %v1452_v1 = vpop.f32.mrb[31].mxu0  ;;  %v1500_v2 = vpop.f32.mrb[31].mxu1 }
 0x136   : > { %v962_v57 = vadd.f32 %v1807_v25, %v923_v49  ;;  %v1368_v3 = vpack.c.bf16 %v993_v55, %v993_v55  ;;  %v819_v9 = vadd.f32 %v1450_v63, %v306_v59  ;;  %v835_v10 = vadd.f32 %v1498_v0, %v322_v60 }
 0x137   : > { %v978_v58 = vadd.f32 %v1807_v25, %v939_v50  ;;  %v1384_v4 = vpack.c.bf16 %v1009_v56, %v1009_v56  ;;  %v1453_v11 = vadd.f32 %v1452_v1, %v1451_v61  ;;  %v1501_v12 = vadd.f32 %v1500_v2, %v1499_v62 }
 0x138   : > { %v994_v5 = vmax.f32 %v962_v57, 0.0  ;;  %1154 = vst.msk [vmem:[%s1825_s14 + $0x28] sm:$0xf] %vm1143_vm1, %v1368_v3 }
 0x139   : > { %v1010_v6 = vmax.f32 %v978_v58, 0.0  ;;  %1170 = vst.msk [vmem:[%s1825_s14 + $0x68] sm:$0xf] %vm1143_vm1, %v1384_v4  ;;  %v885_v16 = vld [vmem:[#allocation2 + $0x60] sm:$0xff]  ;;  %v820_v20 = vadd.f32 %v1453_v11, %v307_v7  ;;  %v836_v21 = vadd.f32 %v1501_v12, %v323_v8 }
 0x13a   : > { %v1369_v13 = vpack.c.bf16 %v994_v5, %v994_v5  ;;  %v901_v17 = vld [vmem:[#allocation2 + $0xe0] sm:$0xff]  ;;  %v924_v18 = vmul.f32 %v1802_v15, %v885_v16  ;;  %852 = vst.msk [vmem:[#allocation2 + $0x70] sm:$0xff] %vm259_vm0, %v819_v9  ;;  %868 = vst.msk [vmem:[#allocation2 + $0xf0] sm:$0xff] %vm259_vm0, %v835_v10  ;;  %v886_v22 = vld [vmem:[#allocation2 + $0x68] sm:$0xff] }
 0x13b   : > { %v1385_v14 = vpack.c.bf16 %v1010_v6, %v1010_v6  ;;  %v940_v19 = vmul.f32 %v1802_v15, %v901_v17  ;;  %v902_v23 = vld [vmem:[#allocation2 + $0xe8] sm:$0xff]  ;;  %v925_v27 = vmul.f32 %v1802_v15, %v886_v22  ;;  %853 = vst.msk [vmem:[#allocation2 + $0x78] sm:$0xff] %vm259_vm0, %v820_v20  ;;  %869 = vst.msk [vmem:[#allocation2 + $0xf8] sm:$0xff] %vm259_vm0, %v836_v21 }
 0x13c   : > { %1155 = vst.msk [vmem:[%s1825_s14 + $0x2c] sm:$0xf] %vm1143_vm1, %v1369_v13  ;;  %v963_v24 = vadd.f32 %v1807_v25, %v924_v18  ;;  %v941_v28 = vmul.f32 %v1802_v15, %v902_v23 }
 0x13d   : > { %1171 = vst.msk [vmem:[%s1825_s14 + $0x6c] sm:$0xf] %vm1143_vm1, %v1385_v14  ;;  %v979_v26 = vadd.f32 %v1807_v25, %v940_v19  ;;  %v964_v31 = vadd.f32 %v1807_v25, %v925_v27 }
 0x13e   : > { %v995_v29 = vmax.f32 %v963_v24, 0.0  ;;  %v980_v32 = vadd.f32 %v1807_v25, %v941_v28 }
 0x13f   : > { %v1011_v30 = vmax.f32 %v979_v26, 0.0  ;;  %v996_v35 = vmax.f32 %v964_v31, 0.0 }
 0x140   : > { %v1370_v33 = vpack.c.bf16 %v995_v29, %v995_v29  ;;  %v1012_v36 = vmax.f32 %v980_v32, 0.0 }
 0x141   : > { %v1386_v34 = vpack.c.bf16 %v1011_v30, %v1011_v30  ;;  %v887_v37 = vld [vmem:[#allocation2 + $0x70] sm:$0xff]  ;;  %v1371_v39 = vpack.c.bf16 %v996_v35, %v996_v35 }
 0x142   : > { %v903_v38 = vld [vmem:[#allocation2 + $0xf0] sm:$0xff]  ;;  %1156 = vst.msk [vmem:[%s1825_s14 + $0x30] sm:$0xf] %vm1143_vm1, %v1370_v33  ;;  %v1387_v40 = vpack.c.bf16 %v1012_v36, %v1012_v36  ;;  %v926_v41 = vmul.f32 %v1802_v15, %v887_v37  ;;  %v888_v43 = vld [vmem:[#allocation2 + $0x78] sm:$0xff] }
 0x143   : > { %1172 = vst.msk [vmem:[%s1825_s14 + $0x70] sm:$0xf] %vm1143_vm1, %v1386_v34  ;;  %v942_v42 = vmul.f32 %v1802_v15, %v903_v38  ;;  %v904_v44 = vld [vmem:[#allocation2 + $0xf8] sm:$0xff]  ;;  %1157 = vst.msk [vmem:[%s1825_s14 + $0x34] sm:$0xf] %vm1143_vm1, %v1371_v39  ;;  %v927_v47 = vmul.f32 %v1802_v15, %v888_v43 }
 0x144   : > { %1173 = vst.msk [vmem:[%s1825_s14 + $0x74] sm:$0xf] %vm1143_vm1, %v1387_v40  ;;  %v965_v45 = vadd.f32 %v1807_v25, %v926_v41  ;;  %v943_v48 = vmul.f32 %v1802_v15, %v904_v44 }
 0x145   : > { %v981_v46 = vadd.f32 %v1807_v25, %v942_v42  ;;  %v966_v51 = vadd.f32 %v1807_v25, %v927_v47 }
 0x146   : > { %v997_v49 = vmax.f32 %v965_v45, 0.0  ;;  %v982_v52 = vadd.f32 %v1807_v25, %v943_v48 }
 0x147   : > { %v1013_v50 = vmax.f32 %v981_v46, 0.0  ;;  %v998_v55 = vmax.f32 %v966_v51, 0.0 }
 0x148   : > { %v1372_v53 = vpack.c.bf16 %v997_v49, %v997_v49  ;;  %v1014_v56 = vmax.f32 %v982_v52, 0.0 }
 0x149   : > { %v1388_v54 = vpack.c.bf16 %v1013_v50, %v1013_v50  ;;  %v1373_v57 = vpack.c.bf16 %v998_v55, %v998_v55 }
 0x14a   : > { %1158 = vst.msk [vmem:[%s1825_s14 + $0x38] sm:$0xf] %vm1143_vm1, %v1372_v53  ;;  %v1389_v58 = vpack.c.bf16 %v1014_v56, %v1014_v56 }
 0x14b   : > { %1174 = vst.msk [vmem:[%s1825_s14 + $0x78] sm:$0xf] %vm1143_vm1, %v1388_v54  ;;  %1159 = vst.msk [vmem:[%s1825_s14 + $0x3c] sm:$0xf] %vm1143_vm1, %v1373_v57 }
 0x14c   : > { %1175 = vst.msk [vmem:[%s1825_s14 + $0x7c] sm:$0xf] %vm1143_vm1, %v1389_v58 }
 0x14d PF: > { %s14_s17 = sadd.s32 1, %s1629_s17   ;;  %s1985_s15 = smov %s1625_s16 }
 0x14e   : > { %p11_p5 = scmp.ge.s32.totalorder %s14_s17, 4   ;;  %s1986_s16 = smov %s1988_s18 }
 0x150   :  { %13 = sbr.rel (!%p11_p5) target bundleno = 2 (0x2), region = 77 }

// kernel: _lambda_.13
= control target key start
LH: loop header
LB: loop body
LE: loop exit
PB: predicated region body
PF: predicated region fallthrough
CT: control target
= control target key end

     0   :  { %vm110_vm0 = vsmask.f32 3328  ;;  %vm111_vm1 = vsmask.f32 7440  ;;  %vm1167_vm2 = vcmask 1042432   ;;  %vm1168_vm3 = vcmask 1046532   ;;  %s2798_s0 = inlined_call_operand.vmem [shape: bf16[2,18,18,64], index: 0, kind: input, shape index: {}]   ;;  %s2799_s1 = inlined_call_operand.vmem [shape: bf16[2,8,16,64], index: 1, kind: output, shape index: {}]  }
   0x1   :  { %v8_v0 = vld [vmem:[%s2798_s0] sm:$0xf]  ;;  %v1730_v1 = vld [vmem:[%s2798_s0 + $0x4] sm:$0xf]  ;;  %v11_v2 = vld [vmem:[%s2798_s0 + $0xc] sm:$0xf] }
   0x2   :  { %v1738_v3 = vld [vmem:[%s2798_s0 + $0x10] sm:$0xf]  ;;  %v14_v4 = vld [vmem:[%s2798_s0 + $0x18] sm:$0xf]  ;;  %v114_v5 = vshrl.u32 %v8_v0, 16  ;;  %v117_v6 = vshll.u32 %v8_v0, 16  ;;  %vm1754_vm4 = vmor %vm1167_vm2, %vm1168_vm3 }
   0x3   :  { %v123_v7 = vshll.u32 %v1730_v1, 16  ;;  %v138_v8 = vshrl.u32 %v11_v2, 16  ;;  %v1747_v9 = vld [vmem:[%s2798_s0 + $0x1c] sm:$0xf]  ;;  %v141_v10 = vshll.u32 %v11_v2, 16  ;;  %v147_v11 = vshll.u32 %v1738_v3, 16  ;;  %vm1762_vm5 = vmor %vm110_vm0, %vm111_vm1 }
   0x4   :  { %v162_v12 = vshrl.u32 %v14_v4, 16  ;;  %v165_v13 = vshll.u32 %v14_v4, 16  ;;  %v116_v14 = vrot.slane %v114_v5, 4  ;;  %v119_v15 = vrot.slane %v117_v6, 5  ;;  %v10_v32 = vld [vmem:[%s2798_s0 + $0x8] sm:$0x1] }
   0x5   :  { %v125_v16 = vrot.slane %v123_v7, 5  ;;  %v140_v17 = vrot.slane %v138_v8, 4  ;;  %v143_v18 = vrot.slane %v141_v10, 5  ;;  %v1750_v19 = vrot.slane %v147_v11, 5  ;;  %v13_v42 = vld [vmem:[%s2798_s0 + $0x14] sm:$0x1] }
   0x6   :  { %v164_v20 = vrot.slane %v162_v12, 4  ;;  %v167_v21 = vrot.slane %v165_v13, 5  ;;  %v120_v23 = vor.u32 %v119_v15, %v116_v14  ;;  %v171_v24 = vshll.u32 %v1747_v9, 16  ;;  %v16_v49 = vld [vmem:[%s2798_s0 + $0x20] sm:$0x1] }
   0x7   :  { %v1652_v25 = vrot.slane %v8_v0, 9  ;;  %v1172_v26 = vrot.slane %v1730_v1, 5  ;;  %v144_v28 = vor.u32 %v143_v18, %v140_v17  ;;  %v1653_v30 = vrot.slane %v11_v2, 9  ;;  %v59_v13 = vld [vmem:[%s2798_s0 + $0xd8] sm:$0xf] }
   0x8   :  { %v168_v29 = vor.u32 %v167_v21, %v164_v20  ;;  %v1179_v31 = vrot.slane %v1738_v3, 5  ;;  %v121_v33 = vrot.slane %v120_v23, 4  ;;  %v173_v34 = vrot.slane %v171_v24, 5  ;;  %v1802_v14 = vld [vmem:[%s2798_s0 + $0xdc] sm:$0xf] }
   0x9   :  { %v1173_v35 = vsel %vm1754_vm4, %v1652_v25, %v1172_v26  ;;  %v1654_v36 = vrot.slane %v14_v4, 9  ;;  %v145_v37 = vrot.slane %v144_v28, 4  ;;  %v1186_v40 = vrot.slane %v1747_v9, 5 }
   0xa   :  { %v169_v38 = vrot.slane %v168_v29, 4  ;;  %v1180_v39 = vsel %vm1754_vm4, %v1653_v30, %v1179_v31  ;;  %v126_v41 = vsel %vm1762_vm5, %v121_v33, %v125_v16  ;;  %vm1552_vm6 = vcmask 519168   ;;  %v65_v33 = vld [vmem:[%s2798_s0 + $0xf0] sm:$0xf] }
   0xb   :  { %v127_v43 = vshrl.u32 %v1730_v1, 16  ;;  %v133_v44 = vshll.u32 %v10_v32, 16  ;;  %v150_v45 = vsel %vm1762_vm5, %v145_v37, %v1750_v19  ;;  %v997_v47 = vmax.bf16 %v126_v41, %v8_v0 }
   0xc   :  { %v174_v46 = vsel %vm1762_vm5, %v169_v38, %v173_v34  ;;  %v1187_v48 = vsel %vm1754_vm4, %v1654_v36, %v1186_v40  ;;  %v999_v50 = vmax.bf16 %v150_v45, %v11_v2  ;;  %v151_v55 = vshrl.u32 %v1738_v3, 16  ;;  %v1839_v38 = vld [vmem:[%s2798_s0 + $0xf4] sm:$0xf] }
   0xd   :  { %v1001_v51 = vmax.bf16 %v174_v46, %v14_v4  ;;  %v129_v52 = vrot.slane %v127_v43, 4  ;;  %v135_v53 = vrot.slane %v133_v44, 5  ;;  %v1476_v54 = vmax.bf16 %v1173_v35, %v997_v47 }
   0xe   :  { %v157_v56 = vshll.u32 %v13_v42, 16  ;;  %v175_v57 = vshrl.u32 %v1747_v9, 16  ;;  %v1478_v58 = vmax.bf16 %v1180_v39, %v999_v50  ;;  %v181_v61 = vshll.u32 %v16_v49, 16 }
   0xf   :  { %v1793_v59 = vmax.bf16 %v1187_v48, %v1001_v51  ;;  %v130_v60 = vor.u32 %v129_v52, %v125_v16  ;;  %v153_v62 = vrot.slane %v151_v55, 4  ;;  %v1174_v5 = vrot.slane %v1172_v26, 4 }
  0x10   :  { %v159_v63 = vrot.slane %v157_v56, 5  ;;  %v177_v0 = vrot.slane %v175_v57, 4  ;;  %v1544_v6 = vmax.bf16 %v1478_v58, %v1476_v54  ;;  %v183_v4 = vrot.slane %v181_v61, 5 }
  0x11   :  { %v131_v2 = vrot.slane %v130_v60, 4  ;;  %v1175_v7 = vrot.slane %v10_v32, 5  ;;  %v154_v8 = vor.u32 %v153_v62, %v1750_v19  ;;  %v1181_v11 = vrot.slane %v1179_v31, 4  ;;  %v62_v19 = vld [vmem:[%s2798_s0 + $0xe4] sm:$0xf] }
  0x12   :  { %v178_v10 = vor.u32 %v177_v0, %v173_v34  ;;  %v1182_v12 = vrot.slane %v13_v42, 5  ;;  %v1548_v15 = vmax.bf16 %v1544_v6, %v1793_v59  ;;  %v1188_v18 = vrot.slane %v1186_v40, 4  ;;  %v1827_v32 = vld [vmem:[%s2798_s0 + $0xe8] sm:$0xf] }
  0x13   :  { %v136_v16 = vsel %vm1762_vm5, %v131_v2, %v135_v53  ;;  %v1176_v17 = vsel %vm1754_vm4, %v1174_v5, %v1175_v7  ;;  %v155_v20 = vrot.slane %v154_v8, 4  ;;  %v1189_v25 = vrot.slane %v16_v49, 5 }
  0x14   :  { %v179_v21 = vrot.slane %v178_v10, 4  ;;  %v998_v23 = vmax.bf16 %v136_v16, %v1730_v1  ;;  %v1183_v24 = vsel %vm1754_vm4, %v1181_v11, %v1182_v12  ;;  %1553 = vst.msk [vmem:[%s2799_s1] sm:$0xf] %vm1552_vm6, %v1548_v15  ;;  %v522_v26 = vshrl.u32 %v59_v13, 16  ;;  %v64_v11 = vld [vmem:[%s2798_s0 + $0xec] sm:$0x1] }
  0x15   :  { %v525_v28 = vshll.u32 %v59_v13, 16  ;;  %v531_v29 = vshll.u32 %v1802_v14, 16  ;;  %v160_v30 = vsel %vm1762_vm5, %v155_v20, %v159_v63  ;;  %v546_v34 = vshrl.u32 %v62_v19, 16  ;;  %v61_v63 = vld [vmem:[%s2798_s0 + $0xe0] sm:$0x1] }
  0x16   :  { %v184_v31 = vsel %vm1762_vm5, %v179_v21, %v183_v4  ;;  %v1477_v1 = vmax.bf16 %v1176_v17, %v998_v23  ;;  %v1000_v35 = vmax.bf16 %v160_v30, %v1738_v3  ;;  %v1190_v37 = vsel %vm1754_vm4, %v1188_v18, %v1189_v25  ;;  %v67_v21 = vld [vmem:[%s2798_s0 + $0xf8] sm:$0x1] }
  0x17   :  { %v1002_v36 = vmax.bf16 %v184_v31, %v1747_v9  ;;  %v524_v39 = vrot.slane %v522_v26, 4  ;;  %v527_v40 = vrot.slane %v525_v28, 5  ;;  %v533_v41 = vrot.slane %v531_v29, 5 }
  0x18   :  { %v548_v42 = vrot.slane %v546_v34, 4  ;;  %v549_v43 = vshll.u32 %v62_v19, 16  ;;  %v1479_v44 = vmax.bf16 %v1183_v24, %v1000_v35  ;;  %v555_v3 = vshll.u32 %v1827_v32, 16 }
  0x19   :  { %v1841_v45 = vmax.bf16 %v1190_v37, %v1002_v36  ;;  %v570_v46 = vshrl.u32 %v65_v33, 16  ;;  %v528_v9 = vor.u32 %v527_v40, %v524_v39  ;;  %v573_v48 = vshll.u32 %v65_v33, 16 }
  0x1a   :  { %v551_v47 = vrot.slane %v549_v43, 5  ;;  %v579_v49 = vshll.u32 %v1839_v38, 16  ;;  %v1545_v50 = vmax.bf16 %v1479_v44, %v1477_v1  ;;  %v557_v51 = vrot.slane %v555_v3, 5 }
  0x1b   :  { %v572_v52 = vrot.slane %v570_v46, 4  ;;  %v1669_v53 = vrot.slane %v59_v13, 9  ;;  %v529_v54 = vrot.slane %v528_v9, 4  ;;  %v575_v56 = vrot.slane %v573_v48, 5 }
  0x1c   :  { %v552_v55 = vor.u32 %v551_v47, %v548_v42  ;;  %v581_v57 = vrot.slane %v579_v49, 5  ;;  %v1549_v58 = vmax.bf16 %v1545_v50, %v1841_v45  ;;  %v1291_v60 = vrot.slane %v1802_v14, 5 }
  0x1d   :  { %v1670_v61 = vrot.slane %v62_v19, 9  ;;  %v1298_v62 = vrot.slane %v1827_v32, 5  ;;  %v534_v0 = vsel %vm1762_vm5, %v529_v54, %v533_v41  ;;  %v576_v6 = vor.u32 %v575_v56, %v572_v52  ;;  %v20_v54 = vld [vmem:[%s2798_s0 + $0x30] sm:$0xf] }
  0x1e   :  { %v553_v5 = vrot.slane %v552_v55, 4  ;;  %v1671_v2 = vrot.slane %v65_v33, 9  ;;  %1554 = vst.msk [vmem:[%s2799_s1 + $0x4] sm:$0xf] %vm1552_vm6, %v1549_v58  ;;  %v1031_v4 = vmax.bf16 %v534_v0, %v59_v13  ;;  %v1292_v7 = vsel %vm1754_vm4, %v1669_v53, %v1291_v60  ;;  %v1890_v53 = vld [vmem:[%s2798_s0 + $0x28] sm:$0xf] }
  0x1f   :  { %v1299_v8 = vsel %vm1754_vm4, %v1670_v61, %v1298_v62  ;;  %v1305_v10 = vrot.slane %v1839_v38, 5  ;;  %v577_v15 = vrot.slane %v576_v6, 4  ;;  %v535_v16 = vshrl.u32 %v1802_v14, 16 }
  0x20   :  { %v558_v12 = vsel %vm1762_vm5, %v553_v5, %v557_v51  ;;  %v541_v17 = vshll.u32 %v61_v63, 16  ;;  %v1510_v20 = vmax.bf16 %v1292_v7, %v1031_v4  ;;  %v559_v23 = vshrl.u32 %v1827_v32, 16 }
  0x21   :  { %v1033_v13 = vmax.bf16 %v558_v12, %v62_v19  ;;  %v1306_v18 = vsel %vm1754_vm4, %v1671_v2, %v1305_v10  ;;  %v582_v24 = vsel %vm1762_vm5, %v577_v15, %v581_v57  ;;  %v537_v25 = vrot.slane %v535_v16, 4 }
  0x22   :  { %v543_v26 = vrot.slane %v541_v17, 5  ;;  %v565_v28 = vshll.u32 %v64_v11, 16  ;;  %v1035_v29 = vmax.bf16 %v582_v24, %v65_v33  ;;  %v561_v31 = vrot.slane %v559_v23, 4 }
  0x23   :  { %v1512_v30 = vmax.bf16 %v1299_v8, %v1033_v13  ;;  %v583_v19 = vshrl.u32 %v1839_v38, 16  ;;  %v538_v1 = vor.u32 %v537_v25, %v533_v41  ;;  %v589_v35 = vshll.u32 %v67_v21, 16  ;;  %v17_v41 = vld [vmem:[%s2798_s0 + $0x24] sm:$0xf]  ;;  %v22_v25 = vld [vmem:[%s2798_s0 + $0x38] sm:$0x1] }
  0x24   :  { %v567_v34 = vrot.slane %v565_v28, 5  ;;  %v1293_v36 = vrot.slane %v1291_v60, 4  ;;  %v1877_v37 = vmax.bf16 %v1306_v18, %v1035_v29  ;;  %v562_v40 = vor.u32 %v561_v31, %v557_v51 }
  0x25   :  { %v1546_v39 = vmax.bf16 %v1512_v30, %v1510_v20  ;;  %v585_v42 = vrot.slane %v583_v19, 4  ;;  %v539_v43 = vrot.slane %v538_v1, 4  ;;  %v591_v44 = vrot.slane %v589_v35, 5  ;;  %v19_v20 = vld [vmem:[%s2798_s0 + $0x2c] sm:$0x1] }
  0x26   :  { %v1294_v3 = vrot.slane %v61_v63, 5  ;;  %v1300_v46 = vrot.slane %v1298_v62, 4  ;;  %v563_v33 = vrot.slane %v562_v40, 4  ;;  %v1301_v48 = vrot.slane %v64_v11, 5  ;;  %v1910_v62 = vld [vmem:[%s2798_s0 + $0x34] sm:$0xf] }
  0x27   :  { %v1550_v9 = vmax.bf16 %v1546_v39, %v1877_v37  ;;  %v586_v47 = vor.u32 %v585_v42, %v581_v57  ;;  %v544_v49 = vsel %vm1762_vm5, %v539_v43, %v543_v26  ;;  %v1307_v51 = vrot.slane %v1305_v10, 4 }
  0x28   :  { %v1295_v50 = vsel %vm1754_vm4, %v1293_v36, %v1294_v3  ;;  %v1308_v52 = vrot.slane %v67_v21, 5  ;;  %v568_v55 = vsel %vm1762_vm5, %v563_v33, %v567_v34  ;;  %v1032_v57 = vmax.bf16 %v544_v49, %v1802_v14 }
  0x29   :  { %1555 = vst.msk [vmem:[%s2799_s1 + $0x40] sm:$0xf] %vm1552_vm6, %v1550_v9  ;;  %v587_v56 = vrot.slane %v586_v47, 4  ;;  %v1302_v58 = vsel %vm1754_vm4, %v1300_v46, %v1301_v48  ;;  %v1034_v60 = vmax.bf16 %v568_v55, %v1827_v32  ;;  %v186_v63 = vshrl.u32 %v17_v41, 16  ;;  %v68_v48 = vld [vmem:[%s2798_s0 + $0xfc] sm:$0xf] }
  0x2a   :  { %v1309_v61 = vsel %vm1754_vm4, %v1307_v51, %v1308_v52  ;;  %v189_v0 = vshll.u32 %v17_v41, 16  ;;  %v1511_v6 = vmax.bf16 %v1295_v50, %v1032_v57  ;;  %v195_v14 = vshll.u32 %v1890_v53, 16 }
  0x2b   :  { %v592_v5 = vsel %vm1762_vm5, %v587_v56, %v591_v44  ;;  %v210_v2 = vshrl.u32 %v20_v54, 16  ;;  %v1513_v32 = vmax.bf16 %v1302_v58, %v1034_v60  ;;  %v188_v7 = vrot.slane %v186_v63, 4  ;;  %v71_v63 = vld [vmem:[%s2798_s0 + $0x108] sm:$0xf] }
  0x2c   :  { %v1036_v4 = vmax.bf16 %v592_v5, %v1839_v38  ;;  %v191_v8 = vrot.slane %v189_v0, 5  ;;  %v197_v10 = vrot.slane %v195_v14, 5  ;;  %v213_v12 = vshll.u32 %v20_v54, 16 }
  0x2d   :  { %v212_v11 = vrot.slane %v210_v2, 4  ;;  %v219_v15 = vshll.u32 %v1910_v62, 16  ;;  %v1547_v17 = vmax.bf16 %v1513_v32, %v1511_v6  ;;  %v1655_v18 = vrot.slane %v17_v41, 9  ;;  %v1965_v2 = vld [vmem:[%s2798_s0 + $0x10c] sm:$0xf] }
  0x2e   :  { %v1917_v16 = vmax.bf16 %v1309_v61, %v1036_v4  ;;  %v192_v13 = vor.u32 %v191_v8, %v188_v7  ;;  %v215_v21 = vrot.slane %v213_v12, 5  ;;  %v1193_v38 = vrot.slane %v1890_v53, 5 }
  0x2f   :  { %v221_v23 = vrot.slane %v219_v15, 5  ;;  %v1656_v24 = vrot.slane %v20_v54, 9  ;;  %v1200_v29 = vrot.slane %v1910_v62, 5  ;;  %v199_v30 = vshrl.u32 %v1890_v53, 16 }
  0x30   :  { %v1551_v26 = vmax.bf16 %v1547_v17, %v1917_v16  ;;  %v193_v28 = vrot.slane %v192_v13, 4  ;;  %v216_v31 = vor.u32 %v215_v21, %v212_v11  ;;  %v1194_v19 = vsel %vm1754_vm4, %v1655_v18, %v1193_v38 }
  0x31   :  { %v205_v1 = vshll.u32 %v19_v20, 16  ;;  %v223_v34 = vshrl.u32 %v1910_v62, 16  ;;  %v1201_v36 = vsel %vm1754_vm4, %v1656_v24, %v1200_v29  ;;  %v201_v39 = vrot.slane %v199_v30, 4 }
  0x32   :  { %1556 = vst.msk [vmem:[%s2799_s1 + $0x44] sm:$0xf] %vm1552_vm6, %v1551_v26  ;;  %v198_v35 = vsel %vm1762_vm5, %v193_v28, %v197_v10  ;;  %v229_v40 = vshll.u32 %v22_v25, 16  ;;  %v217_v42 = vrot.slane %v216_v31, 4  ;;  %v1195_v33 = vrot.slane %v1193_v38, 4 }
  0x33   :  { %v1003_v43 = vmax.bf16 %v198_v35, %v17_v41  ;;  %v207_v44 = vrot.slane %v205_v1, 5  ;;  %v225_v3 = vrot.slane %v223_v34, 4  ;;  %v202_v46 = vor.u32 %v201_v39, %v197_v10  ;;  %v1948_v41 = vld [vmem:[%s2798_s0 + $0x100] sm:$0xf] }
  0x34   :  { %v231_v9 = vrot.slane %v229_v40, 5  ;;  %v1196_v47 = vrot.slane %v19_v20, 5  ;;  %v222_v49 = vsel %vm1762_vm5, %v217_v42, %v221_v23  ;;  %v1202_v52 = vrot.slane %v1200_v29, 4 }
  0x35   :  { %v1482_v50 = vmax.bf16 %v1194_v19, %v1003_v43  ;;  %v226_v51 = vor.u32 %v225_v3, %v221_v23  ;;  %v1005_v55 = vmax.bf16 %v222_v49, %v20_v54  ;;  %v203_v56 = vrot.slane %v202_v46, 4  ;;  %v73_v19 = vld [vmem:[%s2798_s0 + $0x110] sm:$0x1] }
  0x36   :  { %v1197_v57 = vsel %vm1754_vm4, %v1195_v33, %v1196_v47  ;;  %v1203_v58 = vrot.slane %v22_v25, 5  ;;  %v594_v0 = vshrl.u32 %v68_v48, 16  ;;  %v597_v5 = vshll.u32 %v68_v48, 16 }
  0x37   :  { %v1557_v60 = vmax.bf16 %v1482_v50, %v1793_v59  ;;  %v227_v61 = vrot.slane %v226_v51, 4  ;;  %v1956_v6 = vmax.bf16 %v1201_v36, %v1005_v55  ;;  %v208_v14 = vsel %vm1762_vm5, %v203_v56, %v207_v44 }
  0x38   :  { %v1204_v54 = vsel %vm1754_vm4, %v1202_v52, %v1203_v58  ;;  %v603_v59 = vshll.u32 %v1948_v41, 16  ;;  %v1004_v32 = vmax.bf16 %v208_v14, %v1890_v53  ;;  %v596_v7 = vrot.slane %v594_v0, 4 }
  0x39   :  { %v232_v4 = vsel %vm1762_vm5, %v227_v61, %v231_v9  ;;  %v599_v8 = vrot.slane %v597_v5, 5  ;;  %v1561_v10 = vmax.bf16 %v1557_v60, %v1956_v6  ;;  %v618_v15 = vshrl.u32 %v71_v63, 16  ;;  %v26_v5 = vld [vmem:[%s2798_s0 + $0x48] sm:$0xf] }
  0x3a   :  { %v1006_v11 = vmax.bf16 %v232_v4, %v1910_v62  ;;  %v605_v12 = vrot.slane %v603_v59, 5  ;;  %v1483_v17 = vmax.bf16 %v1197_v57, %v1004_v32  ;;  %v621_v18 = vshll.u32 %v71_v63, 16  ;;  %v70_v62 = vld [vmem:[%s2798_s0 + $0x104] sm:$0x1]  ;;  %v2010_v57 = vld [vmem:[%s2798_s0 + $0x40] sm:$0xf] }
  0x3b   :  { %v600_v13 = vor.u32 %v599_v8, %v596_v7  ;;  %v627_v20 = vshll.u32 %v1965_v2, 16  ;;  %1686 = vst.msk [vmem:[%s2799_s1 + $0x8] sm:$0xf] %vm1552_vm6, %v1561_v10  ;;  %v620_v53 = vrot.slane %v618_v15, 4  ;;  %v1672_v23 = vrot.slane %v68_v48, 9 }
  0x3c   :  { %v1978_v21 = vmax.bf16 %v1204_v54, %v1006_v11  ;;  %v1312_v38 = vrot.slane %v1948_v41, 5  ;;  %v1558_v24 = vmax.bf16 %v1483_v17, %v1841_v45  ;;  %v623_v26 = vrot.slane %v621_v18, 5  ;;  %v2029_v10 = vld [vmem:[%s2798_s0 + $0x4c] sm:$0xf] }
  0x3d   :  { %v601_v25 = vrot.slane %v600_v13, 4  ;;  %v629_v28 = vrot.slane %v627_v20, 5  ;;  %v1673_v30 = vrot.slane %v71_v63, 9  ;;  %v1319_v31 = vrot.slane %v1965_v2, 5 }
  0x3e   :  { %v1313_v29 = vsel %vm1754_vm4, %v1672_v23, %v1312_v38  ;;  %v607_v1 = vshrl.u32 %v1948_v41, 16  ;;  %v1562_v34 = vmax.bf16 %v1558_v24, %v1978_v21  ;;  %v624_v35 = vor.u32 %v623_v26, %v620_v53 }
  0x3f   :  { %v606_v45 = vsel %vm1762_vm5, %v601_v25, %v605_v12  ;;  %v613_v36 = vshll.u32 %v70_v62, 16  ;;  %v1320_v40 = vsel %vm1754_vm4, %v1673_v30, %v1319_v31  ;;  %v631_v43 = vshrl.u32 %v1965_v2, 16 }
  0x40   :  { %v1037_v39 = vmax.bf16 %v606_v45, %v68_v48  ;;  %v609_v42 = vrot.slane %v607_v1, 4  ;;  %1687 = vst.msk [vmem:[%s2799_s1 + $0xc] sm:$0xf] %vm1552_vm6, %v1562_v34  ;;  %v625_v44 = vrot.slane %v624_v35, 4  ;;  %v637_v46 = vshll.u32 %v73_v19, 16 }
  0x41   :  { %v615_v3 = vrot.slane %v613_v36, 5  ;;  %v1314_v9 = vrot.slane %v1312_v38, 4  ;;  %v633_v49 = vrot.slane %v631_v43, 4  ;;  %v1315_v50 = vrot.slane %v70_v62, 5  ;;  %v23_v48 = vld [vmem:[%s2798_s0 + $0x3c] sm:$0xf] }
  0x42   :  { %v1516_v33 = vmax.bf16 %v1313_v29, %v1037_v39  ;;  %v610_v47 = vor.u32 %v609_v42, %v605_v12  ;;  %v630_v51 = vsel %vm1762_vm5, %v625_v44, %v629_v28  ;;  %v639_v52 = vrot.slane %v637_v46, 5  ;;  %v28_v35 = vld [vmem:[%s2798_s0 + $0x50] sm:$0x1] }
  0x43   :  { %v1321_v55 = vrot.slane %v1319_v31, 4  ;;  %v1322_v56 = vrot.slane %v73_v19, 5  ;;  %v1039_v58 = vmax.bf16 %v630_v51, %v71_v63  ;;  %v634_v0 = vor.u32 %v633_v49, %v629_v28  ;;  %v25_v28 = vld [vmem:[%s2798_s0 + $0x44] sm:$0x1] }
  0x44   :  { %v1559_v60 = vmax.bf16 %v1516_v33, %v1877_v37  ;;  %v611_v61 = vrot.slane %v610_v47, 4  ;;  %v1316_v14 = vsel %vm1754_vm4, %v1314_v9, %v1315_v50  ;;  %v234_v59 = vshrl.u32 %v23_v48, 16 }
  0x45   :  { %v1323_v54 = vsel %vm1754_vm4, %v1321_v55, %v1322_v56  ;;  %v237_v4 = vshll.u32 %v23_v48, 16  ;;  %v2020_v32 = vmax.bf16 %v1320_v40, %v1039_v58  ;;  %v635_v37 = vrot.slane %v634_v0, 4  ;;  %v2077_v0 = vld [vmem:[%s2798_s0 + $0x120] sm:$0xf] }
  0x46   :  { %v616_v63 = vsel %vm1762_vm5, %v611_v61, %v615_v3  ;;  %v243_v7 = vshll.u32 %v2010_v57, 16  ;;  %v236_v11 = vrot.slane %v234_v59, 4  ;;  %v258_v15 = vshrl.u32 %v26_v5, 16  ;;  %v2072_v61 = vld [vmem:[%s2798_s0 + $0x118] sm:$0xf] }
  0x47   :  { %v1038_v8 = vmax.bf16 %v616_v63, %v1948_v41  ;;  %v239_v12 = vrot.slane %v237_v4, 5  ;;  %v1563_v17 = vmax.bf16 %v1559_v60, %v2020_v32  ;;  %v640_v13 = vsel %vm1762_vm5, %v635_v37, %v639_v52  ;;  %v74_v52 = vld [vmem:[%s2798_s0 + $0x114] sm:$0xf] }
  0x48   :  { %v245_v18 = vrot.slane %v243_v7, 5  ;;  %v261_v20 = vshll.u32 %v26_v5, 16  ;;  %v1040_v53 = vmax.bf16 %v640_v13, %v1965_v2  ;;  %v260_v41 = vrot.slane %v258_v15, 4 }
  0x49   :  { %v1517_v23 = vmax.bf16 %v1316_v14, %v1038_v8  ;;  %v240_v38 = vor.u32 %v239_v12, %v236_v11  ;;  %1688 = vst.msk [vmem:[%s2799_s1 + $0x48] sm:$0xf] %vm1552_vm6, %v1563_v17  ;;  %v267_v24 = vshll.u32 %v2029_v10, 16  ;;  %v1657_v25 = vrot.slane %v23_v48, 9  ;;  %v2089_v12 = vld [vmem:[%s2798_s0 + $0x124] sm:$0xf] }
  0x4a   :  { %v263_v62 = vrot.slane %v261_v20, 5  ;;  %v1207_v26 = vrot.slane %v2010_v57, 5  ;;  %v2044_v29 = vmax.bf16 %v1323_v54, %v1040_v53  ;;  %v1658_v31 = vrot.slane %v26_v5, 9 }
  0x4b   :  { %v1560_v2 = vmax.bf16 %v1517_v23, %v1917_v16  ;;  %v241_v30 = vrot.slane %v240_v38, 4  ;;  %v269_v1 = vrot.slane %v267_v24, 5  ;;  %v1214_v45 = vrot.slane %v2029_v10, 5 }
  0x4c   :  { %v264_v19 = vor.u32 %v263_v62, %v260_v41  ;;  %v1208_v34 = vsel %vm1754_vm4, %v1657_v25, %v1207_v26  ;;  %v247_v16 = vshrl.u32 %v2010_v57, 16  ;;  %v253_v40 = vshll.u32 %v25_v28, 16 }
  0x4d   :  { %v1564_v36 = vmax.bf16 %v1560_v2, %v2044_v29  ;;  %v246_v39 = vsel %vm1762_vm5, %v241_v30, %v245_v18  ;;  %v1215_v44 = vsel %vm1754_vm4, %v1658_v31, %v1214_v45  ;;  %v271_v3 = vshrl.u32 %v2029_v10, 16  ;;  %v76_v31 = vld [vmem:[%s2798_s0 + $0x11c] sm:$0x1] }
  0x4e   :  { %v265_v42 = vrot.slane %v264_v19, 4  ;;  %v1007_v43 = vmax.bf16 %v246_v39, %v23_v48  ;;  %v249_v46 = vrot.slane %v247_v16, 4  ;;  %v255_v9 = vrot.slane %v253_v40, 5  ;;  %v79_v39 = vld [vmem:[%s2798_s0 + $0x128] sm:$0x1] }
  0x4f   :  { %1689 = vst.msk [vmem:[%s2799_s1 + $0x4c] sm:$0xf] %vm1552_vm6, %v1564_v36  ;;  %v277_v33 = vshll.u32 %v28_v35, 16  ;;  %v1209_v47 = vrot.slane %v1207_v26, 4  ;;  %v273_v51 = vrot.slane %v271_v3, 4  ;;  %v1210_v48 = vrot.slane %v25_v28, 5 }
  0x50   :  { %v270_v49 = vsel %vm1762_vm5, %v265_v42, %v269_v1  ;;  %v1486_v50 = vmax.bf16 %v1208_v34, %v1007_v43  ;;  %v250_v56 = vor.u32 %v249_v46, %v245_v18  ;;  %v1216_v60 = vrot.slane %v1214_v45, 4 }
  0x51   :  { %v1009_v55 = vmax.bf16 %v270_v49, %v26_v5  ;;  %v279_v58 = vrot.slane %v277_v33, 5  ;;  %v274_v54 = vor.u32 %v273_v51, %v269_v1  ;;  %v1211_v59 = vsel %vm1754_vm4, %v1209_v47, %v1210_v48 }
  0x52   :  { %v1570_v14 = vmax.bf16 %v1486_v50, %v1956_v6  ;;  %v1217_v5 = vrot.slane %v28_v35, 5  ;;  %v251_v63 = vrot.slane %v250_v56, 4  ;;  %v642_v37 = vshrl.u32 %v74_v52, 16 }
  0x53   :  { %v2082_v4 = vmax.bf16 %v1215_v44, %v1009_v55  ;;  %v645_v7 = vshll.u32 %v74_v52, 16  ;;  %v275_v8 = vrot.slane %v274_v54, 4  ;;  %v651_v6 = vshll.u32 %v2072_v61, 16 }
  0x54   :  { %v1218_v11 = vsel %vm1754_vm4, %v1216_v60, %v1217_v5  ;;  %v666_v15 = vshrl.u32 %v2077_v0, 16  ;;  %v256_v13 = vsel %vm1762_vm5, %v251_v63, %v255_v9  ;;  %v644_v18 = vrot.slane %v642_v37, 4  ;;  %v2144_v5 = vld [vmem:[%s2798_s0 + $0x60] sm:$0xf] }
  0x55   :  { %v1574_v17 = vmax.bf16 %v1570_v14, %v2082_v4  ;;  %v647_v20 = vrot.slane %v645_v7, 5  ;;  %v280_v53 = vsel %vm1762_vm5, %v275_v8, %v279_v58  ;;  %v1008_v23 = vmax.bf16 %v256_v13, %v2010_v57 }
  0x56   :  { %v653_v38 = vrot.slane %v651_v6, 5  ;;  %v668_v41 = vrot.slane %v666_v15, 4  ;;  %v1010_v62 = vmax.bf16 %v280_v53, %v2029_v10  ;;  %v669_v25 = vshll.u32 %v2077_v0, 16 }
  0x57   :  { %1690 = vst.msk [vmem:[%s2799_s1 + $0x10] sm:$0xf] %vm1552_vm6, %v1574_v17  ;;  %v648_v24 = vor.u32 %v647_v20, %v644_v18  ;;  %v675_v26 = vshll.u32 %v2089_v12, 16  ;;  %v1487_v28 = vmax.bf16 %v1211_v59, %v1008_v23  ;;  %v1674_v2 = vrot.slane %v74_v52, 9  ;;  %v2139_v59 = vld [vmem:[%s2798_s0 + $0x58] sm:$0xf] }
  0x58   :  { %v1326_v30 = vrot.slane %v2072_v61, 5  ;;  %v1675_v57 = vrot.slane %v2077_v0, 9  ;;  %v2111_v19 = vmax.bf16 %v1218_v11, %v1010_v62  ;;  %v671_v34 = vrot.slane %v669_v25, 5  ;;  %v2157_v20 = vld [vmem:[%s2798_s0 + $0x64] sm:$0xf] }
  0x59   :  { %v649_v1 = vrot.slane %v648_v24, 4  ;;  %v677_v10 = vrot.slane %v675_v26, 5  ;;  %v1571_v45 = vmax.bf16 %v1487_v28, %v1978_v21  ;;  %v1333_v36 = vrot.slane %v2089_v12, 5 }
  0x5a   :  { %v1327_v35 = vsel %vm1754_vm4, %v1674_v2, %v1326_v30  ;;  %v655_v16 = vshrl.u32 %v2072_v61, 16  ;;  %v672_v42 = vor.u32 %v671_v34, %v668_v41  ;;  %v661_v43 = vshll.u32 %v76_v31, 16 }
  0x5b   :  { %v654_v40 = vsel %vm1762_vm5, %v649_v1, %v653_v38  ;;  %v679_v44 = vshrl.u32 %v2089_v12, 16  ;;  %v1575_v21 = vmax.bf16 %v1571_v45, %v2111_v19  ;;  %v1334_v46 = vsel %vm1754_vm4, %v1675_v57, %v1333_v36 }
  0x5c   :  { %v1041_v3 = vmax.bf16 %v654_v40, %v74_v52  ;;  %v657_v9 = vrot.slane %v655_v16, 4  ;;  %v673_v33 = vrot.slane %v672_v42, 4  ;;  %v663_v47 = vrot.slane %v661_v43, 5  ;;  %v29_v52 = vld [vmem:[%s2798_s0 + $0x54] sm:$0xf] }
  0x5d   :  { %v681_v49 = vrot.slane %v679_v44, 4  ;;  %v685_v50 = vshll.u32 %v79_v39, 16  ;;  %1691 = vst.msk [vmem:[%s2799_s1 + $0x14] sm:$0xf] %vm1552_vm6, %v1575_v21  ;;  %v1328_v55 = vrot.slane %v1326_v30, 4  ;;  %v1329_v56 = vrot.slane %v76_v31, 5 }
  0x5e   :  { %v1520_v51 = vmax.bf16 %v1327_v35, %v1041_v3  ;;  %v658_v48 = vor.u32 %v657_v9, %v653_v38  ;;  %v678_v58 = vsel %vm1762_vm5, %v673_v33, %v677_v10  ;;  %v1335_v54 = vrot.slane %v1333_v36, 4 }
  0x5f   :  { %v682_v60 = vor.u32 %v681_v49, %v677_v10  ;;  %v687_v14 = vrot.slane %v685_v50, 5  ;;  %v1043_v63 = vmax.bf16 %v678_v58, %v2077_v0  ;;  %v1330_v8 = vsel %vm1754_vm4, %v1328_v55, %v1329_v56 }
  0x60   :  { %v1572_v37 = vmax.bf16 %v1520_v51, %v2020_v32  ;;  %v659_v7 = vrot.slane %v658_v48, 4  ;;  %v1336_v6 = vrot.slane %v79_v39, 5  ;;  %v282_v15 = vshrl.u32 %v29_v52, 16  ;;  %v34_v39 = vld [vmem:[%s2798_s0 + $0x68] sm:$0x1] }
  0x61   :  { %v683_v11 = vrot.slane %v682_v60, 4  ;;  %v285_v17 = vshll.u32 %v29_v52, 16  ;;  %v2150_v13 = vmax.bf16 %v1334_v46, %v1043_v63  ;;  %v291_v32 = vshll.u32 %v2139_v59, 16 }
  0x62   :  { %v664_v18 = vsel %vm1762_vm5, %v659_v7, %v663_v47  ;;  %v306_v0 = vshrl.u32 %v2144_v5, 16  ;;  %v1337_v38 = vsel %vm1754_vm4, %v1335_v54, %v1336_v6  ;;  %v284_v41 = vrot.slane %v282_v15, 4 }
  0x63   :  { %v688_v53 = vsel %vm1762_vm5, %v683_v11, %v687_v14  ;;  %v1042_v23 = vmax.bf16 %v664_v18, %v2072_v61  ;;  %v1576_v62 = vmax.bf16 %v1572_v37, %v2150_v13  ;;  %v287_v25 = vrot.slane %v285_v17, 5  ;;  %v80_v14 = vld [vmem:[%s2798_s0 + $0x12c] sm:$0xf] }
  0x64   :  { %v1044_v24 = vmax.bf16 %v688_v53, %v2089_v12  ;;  %v293_v26 = vrot.slane %v291_v32, 5  ;;  %v308_v2 = vrot.slane %v306_v0, 4  ;;  %v309_v30 = vshll.u32 %v2144_v5, 16  ;;  %v31_v12 = vld [vmem:[%s2798_s0 + $0x5c] sm:$0x1] }
  0x65   :  { %v1521_v28 = vmax.bf16 %v1330_v8, %v1042_v23  ;;  %v315_v57 = vshll.u32 %v2157_v20, 16  ;;  %1692 = vst.msk [vmem:[%s2799_s1 + $0x50] sm:$0xf] %vm1552_vm6, %v1576_v62  ;;  %v288_v31 = vor.u32 %v287_v25, %v284_v41  ;;  %v1659_v1 = vrot.slane %v29_v52, 9  ;;  %v83_v32 = vld [vmem:[%s2798_s0 + $0x138] sm:$0xf] }
  0x66   :  { %v2174_v61 = vmax.bf16 %v1337_v38, %v1044_v24  ;;  %v1221_v34 = vrot.slane %v2139_v59, 5  ;;  %v311_v45 = vrot.slane %v309_v30, 5  ;;  %v1660_v36 = vrot.slane %v2144_v5, 9  ;;  %v2225_v41 = vld [vmem:[%s2798_s0 + $0x13c] sm:$0xf] }
  0x67   :  { %v1573_v10 = vmax.bf16 %v1521_v28, %v2044_v29  ;;  %v317_v35 = vrot.slane %v315_v57, 5  ;;  %v289_v16 = vrot.slane %v288_v31, 4  ;;  %v1228_v42 = vrot.slane %v2157_v20, 5 }
  0x68   :  { %v1222_v40 = vsel %vm1754_vm4, %v1659_v1, %v1221_v34  ;;  %v295_v43 = vshrl.u32 %v2139_v59, 16  ;;  %v312_v21 = vor.u32 %v311_v45, %v308_v2  ;;  %v301_v29 = vshll.u32 %v31_v12, 16 }
  0x69   :  { %v1577_v44 = vmax.bf16 %v1573_v10, %v2174_v61  ;;  %v319_v3 = vshrl.u32 %v2157_v20, 16  ;;  %v294_v46 = vsel %vm1762_vm5, %v289_v16, %v293_v26  ;;  %v1229_v9 = vsel %vm1754_vm4, %v1660_v36, %v1228_v42 }
  0x6a   :  { %v297_v33 = vrot.slane %v295_v43, 4  ;;  %v325_v47 = vshll.u32 %v34_v39, 16  ;;  %v313_v49 = vrot.slane %v312_v21, 4  ;;  %v1011_v50 = vmax.bf16 %v294_v46, %v29_v52  ;;  %v2207_v52 = vld [vmem:[%s2798_s0 + $0x130] sm:$0xf] }
  0x6b   :  { %1693 = vst.msk [vmem:[%s2799_s1 + $0x54] sm:$0xf] %vm1552_vm6, %v1577_v44  ;;  %v303_v51 = vrot.slane %v301_v29, 5  ;;  %v321_v48 = vrot.slane %v319_v3, 4  ;;  %v1223_v58 = vrot.slane %v1221_v34, 4  ;;  %v1224_v60 = vrot.slane %v31_v12, 5 }
  0x6c   :  { %v298_v55 = vor.u32 %v297_v33, %v293_v26  ;;  %v327_v56 = vrot.slane %v325_v47, 5  ;;  %v318_v54 = vsel %vm1762_vm5, %v313_v49, %v317_v35  ;;  %v1490_v63 = vmax.bf16 %v1222_v40, %v1011_v50  ;;  %v85_v21 = vld [vmem:[%s2798_s0 + $0x140] sm:$0x1] }
  0x6d   :  { %v322_v37 = vor.u32 %v321_v48, %v317_v35  ;;  %v1230_v7 = vrot.slane %v1228_v42, 4  ;;  %v1013_v8 = vmax.bf16 %v318_v54, %v2144_v5  ;;  %v1225_v6 = vsel %vm1754_vm4, %v1223_v58, %v1224_v60 }
  0x6e   :  { %v299_v11 = vrot.slane %v298_v55, 4  ;;  %v1231_v15 = vrot.slane %v34_v39, 5  ;;  %v1583_v17 = vmax.bf16 %v1490_v63, %v2082_v4  ;;  %v690_v0 = vshrl.u32 %v80_v14, 16 }
  0x6f   :  { %v323_v18 = vrot.slane %v322_v37, 4  ;;  %v693_v53 = vshll.u32 %v80_v14, 16  ;;  %v2216_v23 = vmax.bf16 %v1229_v9, %v1013_v8  ;;  %v699_v4 = vshll.u32 %v2207_v52, 16 }
  0x70   :  { %v304_v38 = vsel %vm1762_vm5, %v299_v11, %v303_v51  ;;  %v1232_v5 = vsel %vm1754_vm4, %v1230_v7, %v1231_v15  ;;  %v692_v25 = vrot.slane %v690_v0, 4  ;;  %v714_v57 = vshrl.u32 %v83_v32, 16 }
  0x71   :  { %v328_v62 = vsel %vm1762_vm5, %v323_v18, %v327_v56  ;;  %v1012_v24 = vmax.bf16 %v304_v38, %v2139_v59  ;;  %v695_v26 = vrot.slane %v693_v53, 5  ;;  %v1587_v28 = vmax.bf16 %v1583_v17, %v2216_v23  ;;  %v38_v53 = vld [vmem:[%s2798_s0 + $0x78] sm:$0xf] }
  0x72   :  { %v1014_v2 = vmax.bf16 %v328_v62, %v2157_v20  ;;  %v701_v30 = vrot.slane %v699_v4, 5  ;;  %v717_v34 = vshll.u32 %v83_v32, 16  ;;  %v723_v12 = vshll.u32 %v2225_v41, 16  ;;  %v82_v20 = vld [vmem:[%s2798_s0 + $0x134] sm:$0x1] }
  0x73   :  { %v1491_v31 = vmax.bf16 %v1225_v6, %v1012_v24  ;;  %v696_v1 = vor.u32 %v695_v26, %v692_v25  ;;  %1694 = vst.msk [vmem:[%s2799_s1 + $0x18] sm:$0xf] %vm1552_vm6, %v1587_v28  ;;  %v716_v59 = vrot.slane %v714_v57, 4  ;;  %v1676_v45 = vrot.slane %v80_v14, 9  ;;  %v2270_v6 = vld [vmem:[%s2798_s0 + $0x70] sm:$0xf] }
  0x74   :  { %v2238_v10 = vmax.bf16 %v1232_v5, %v1014_v2  ;;  %v1340_v35 = vrot.slane %v2207_v52, 5  ;;  %v719_v16 = vrot.slane %v717_v34, 5  ;;  %v725_v40 = vrot.slane %v723_v12, 5  ;;  %v2289_v28 = vld [vmem:[%s2798_s0 + $0x7c] sm:$0xf] }
  0x75   :  { %v1584_v36 = vmax.bf16 %v1491_v31, %v2111_v19  ;;  %v697_v39 = vrot.slane %v696_v1, 4  ;;  %v1677_v43 = vrot.slane %v83_v32, 9  ;;  %v1347_v44 = vrot.slane %v2225_v41, 5 }
  0x76   :  { %v1341_v42 = vsel %vm1754_vm4, %v1676_v45, %v1340_v35  ;;  %v703_v29 = vshrl.u32 %v2207_v52, 16  ;;  %v720_v46 = vor.u32 %v719_v16, %v716_v59  ;;  %v709_v9 = vshll.u32 %v82_v20, 16 }
  0x77   :  { %v1588_v3 = vmax.bf16 %v1584_v36, %v2238_v10  ;;  %v702_v19 = vsel %vm1762_vm5, %v697_v39, %v701_v30  ;;  %v1348_v47 = vsel %vm1754_vm4, %v1677_v43, %v1347_v44  ;;  %v727_v50 = vshrl.u32 %v2225_v41, 16 }
  0x78   :  { %v1045_v33 = vmax.bf16 %v702_v19, %v80_v14  ;;  %v705_v49 = vrot.slane %v703_v29, 4  ;;  %v721_v51 = vrot.slane %v720_v46, 4  ;;  %v711_v48 = vrot.slane %v709_v9, 5  ;;  %v35_v14 = vld [vmem:[%s2798_s0 + $0x6c] sm:$0xf] }
  0x79   :  { %1695 = vst.msk [vmem:[%s2799_s1 + $0x1c] sm:$0xf] %vm1552_vm6, %v1588_v3  ;;  %v733_v55 = vshll.u32 %v85_v21, 16  ;;  %v1342_v56 = vrot.slane %v1340_v35, 4  ;;  %v729_v54 = vrot.slane %v727_v50, 4  ;;  %v1343_v63 = vrot.slane %v82_v20, 5 }
  0x7a   :  { %v1524_v58 = vmax.bf16 %v1341_v42, %v1045_v33  ;;  %v706_v60 = vor.u32 %v705_v49, %v701_v30  ;;  %v726_v37 = vsel %vm1762_vm5, %v721_v51, %v725_v40  ;;  %v1349_v8 = vrot.slane %v1347_v44, 4  ;;  %v40_v46 = vld [vmem:[%s2798_s0 + $0x80] sm:$0x1] }
  0x7b   :  { %v735_v7 = vrot.slane %v733_v55, 5  ;;  %v1350_v11 = vrot.slane %v85_v21, 5  ;;  %v1047_v15 = vmax.bf16 %v726_v37, %v83_v32  ;;  %v730_v0 = vor.u32 %v729_v54, %v725_v40  ;;  %v37_v40 = vld [vmem:[%s2798_s0 + $0x74] sm:$0x1] }
  0x7c   :  { %v1585_v17 = vmax.bf16 %v1524_v58, %v2150_v13  ;;  %v707_v18 = vrot.slane %v706_v60, 4  ;;  %v1344_v38 = vsel %vm1754_vm4, %v1342_v56, %v1343_v63  ;;  %v330_v4 = vshrl.u32 %v35_v14, 16 }
  0x7d   :  { %v1351_v5 = vsel %vm1754_vm4, %v1349_v8, %v1350_v11  ;;  %v333_v62 = vshll.u32 %v35_v14, 16  ;;  %v2280_v24 = vmax.bf16 %v1348_v47, %v1047_v15  ;;  %v731_v13 = vrot.slane %v730_v0, 4  ;;  %v2337_v0 = vld [vmem:[%s2798_s0 + $0x150] sm:$0xf] }
  0x7e   :  { %v712_v32 = vsel %vm1762_vm5, %v707_v18, %v711_v48  ;;  %v339_v25 = vshll.u32 %v2270_v6, 16  ;;  %v332_v2 = vrot.slane %v330_v4, 4  ;;  %v354_v57 = vshrl.u32 %v38_v53, 16  ;;  %v2332_v18 = vld [vmem:[%s2798_s0 + $0x148] sm:$0xf] }
  0x7f   :  { %v1046_v26 = vmax.bf16 %v712_v32, %v2207_v52  ;;  %v335_v30 = vrot.slane %v333_v62, 5  ;;  %v1589_v31 = vmax.bf16 %v1585_v17, %v2280_v24  ;;  %v736_v1 = vsel %vm1762_vm5, %v731_v13, %v735_v7  ;;  %v86_v7 = vld [vmem:[%s2798_s0 + $0x144] sm:$0xf] }
  0x80   :  { %v341_v34 = vrot.slane %v339_v25, 5  ;;  %v357_v12 = vshll.u32 %v38_v53, 16  ;;  %v1048_v59 = vmax.bf16 %v736_v1, %v2225_v41  ;;  %v356_v52 = vrot.slane %v354_v57, 4 }
  0x81   :  { %v1525_v45 = vmax.bf16 %v1344_v38, %v1046_v26  ;;  %v336_v35 = vor.u32 %v335_v30, %v332_v2  ;;  %1696 = vst.msk [vmem:[%s2799_s1 + $0x58] sm:$0xf] %vm1552_vm6, %v1589_v31  ;;  %v363_v36 = vshll.u32 %v2289_v28, 16  ;;  %v1661_v39 = vrot.slane %v35_v14, 9  ;;  %v2349_v30 = vld [vmem:[%s2798_s0 + $0x154] sm:$0xf] }
  0x82   :  { %v359_v20 = vrot.slane %v357_v12, 5  ;;  %v1235_v16 = vrot.slane %v2270_v6, 5  ;;  %v2304_v42 = vmax.bf16 %v1351_v5, %v1048_v59  ;;  %v1662_v44 = vrot.slane %v38_v53, 9 }
  0x83   :  { %v1586_v41 = vmax.bf16 %v1525_v45, %v2174_v61  ;;  %v337_v43 = vrot.slane %v336_v35, 4  ;;  %v365_v29 = vrot.slane %v363_v36, 5  ;;  %v1242_v19 = vrot.slane %v2289_v28, 5 }
  0x84   :  { %v360_v21 = vor.u32 %v359_v20, %v356_v52  ;;  %v1236_v3 = vsel %vm1754_vm4, %v1661_v39, %v1235_v16  ;;  %v343_v61 = vshrl.u32 %v2270_v6, 16  ;;  %v349_v47 = vshll.u32 %v37_v40, 16 }
  0x85   :  { %v1590_v9 = vmax.bf16 %v1586_v41, %v2304_v42  ;;  %v342_v33 = vsel %vm1762_vm5, %v337_v43, %v341_v34  ;;  %v1243_v51 = vsel %vm1754_vm4, %v1662_v44, %v1242_v19  ;;  %v367_v48 = vshrl.u32 %v2289_v28, 16  ;;  %v88_v44 = vld [vmem:[%s2798_s0 + $0x14c] sm:$0x1] }
  0x86   :  { %v361_v49 = vrot.slane %v360_v21, 4  ;;  %v1015_v50 = vmax.bf16 %v342_v33, %v35_v14  ;;  %v345_v55 = vrot.slane %v343_v61, 4  ;;  %v351_v56 = vrot.slane %v349_v47, 5  ;;  %v91_v33 = vld [vmem:[%s2798_s0 + $0x158] sm:$0x1] }
  0x87   :  { %1697 = vst.msk [vmem:[%s2799_s1 + $0x5c] sm:$0xf] %vm1552_vm6, %v1590_v9  ;;  %v373_v58 = vshll.u32 %v40_v46, 16  ;;  %v1237_v60 = vrot.slane %v1235_v16, 4  ;;  %v369_v37 = vrot.slane %v367_v48, 4  ;;  %v1238_v14 = vrot.slane %v37_v40, 5 }
  0x88   :  { %v366_v54 = vsel %vm1762_vm5, %v361_v49, %v365_v29  ;;  %v1494_v63 = vmax.bf16 %v1236_v3, %v1015_v50  ;;  %v346_v11 = vor.u32 %v345_v55, %v341_v34  ;;  %v1244_v17 = vrot.slane %v1242_v19, 4 }
  0x89   :  { %v1017_v8 = vmax.bf16 %v366_v54, %v38_v53  ;;  %v375_v15 = vrot.slane %v373_v58, 5  ;;  %v370_v5 = vor.u32 %v369_v37, %v365_v29  ;;  %v1239_v4 = vsel %vm1754_vm4, %v1237_v60, %v1238_v14 }
  0x8a   :  { %v1596_v38 = vmax.bf16 %v1494_v63, %v2216_v23  ;;  %v1245_v53 = vrot.slane %v40_v46, 5  ;;  %v347_v32 = vrot.slane %v346_v11, 4  ;;  %v738_v13 = vshrl.u32 %v86_v7, 16 }
  0x8b   :  { %v2342_v62 = vmax.bf16 %v1243_v51, %v1017_v8  ;;  %v741_v25 = vshll.u32 %v86_v7, 16  ;;  %v371_v26 = vrot.slane %v370_v5, 4  ;;  %v747_v23 = vshll.u32 %v2332_v18, 16 }
  0x8c   :  { %v1246_v2 = vsel %vm1754_vm4, %v1244_v17, %v1245_v53  ;;  %v762_v57 = vshrl.u32 %v2337_v0, 16  ;;  %v352_v1 = vsel %vm1762_vm5, %v347_v32, %v351_v56  ;;  %v740_v34 = vrot.slane %v738_v13, 4  ;;  %v2404_v53 = vld [vmem:[%s2798_s0 + $0x90] sm:$0xf] }
  0x8d   :  { %v1600_v31 = vmax.bf16 %v1596_v38, %v2342_v62  ;;  %v743_v12 = vrot.slane %v741_v25, 5  ;;  %v376_v59 = vsel %vm1762_vm5, %v371_v26, %v375_v15  ;;  %v1016_v45 = vmax.bf16 %v352_v1, %v2270_v6 }
  0x8e   :  { %v749_v35 = vrot.slane %v747_v23, 5  ;;  %v764_v52 = vrot.slane %v762_v57, 4  ;;  %v1018_v20 = vmax.bf16 %v376_v59, %v2289_v28  ;;  %v765_v39 = vshll.u32 %v2337_v0, 16 }
  0x8f   :  { %1698 = vst.msk [vmem:[%s2799_s1 + $0x20] sm:$0xf] %vm1552_vm6, %v1600_v31  ;;  %v744_v36 = vor.u32 %v743_v12, %v740_v34  ;;  %v771_v16 = vshll.u32 %v2349_v30, 16  ;;  %v1495_v40 = vmax.bf16 %v1239_v4, %v1016_v45  ;;  %v1678_v41 = vrot.slane %v86_v7, 9  ;;  %v2399_v4 = vld [vmem:[%s2798_s0 + $0x88] sm:$0xf] }
  0x90   :  { %v1354_v43 = vrot.slane %v2332_v18, 5  ;;  %v1679_v6 = vrot.slane %v2337_v0, 9  ;;  %v2371_v21 = vmax.bf16 %v1246_v2, %v1018_v20  ;;  %v767_v3 = vrot.slane %v765_v39, 5  ;;  %v2417_v12 = vld [vmem:[%s2798_s0 + $0x94] sm:$0xf] }
  0x91   :  { %v745_v29 = vrot.slane %v744_v36, 4  ;;  %v773_v28 = vrot.slane %v771_v16, 5  ;;  %v1597_v19 = vmax.bf16 %v1495_v40, %v2238_v10  ;;  %v1361_v9 = vrot.slane %v2349_v30, 5 }
  0x92   :  { %v1355_v46 = vsel %vm1754_vm4, %v1678_v41, %v1354_v43  ;;  %v751_v61 = vshrl.u32 %v2332_v18, 16  ;;  %v768_v49 = vor.u32 %v767_v3, %v764_v52  ;;  %v757_v50 = vshll.u32 %v88_v44, 16 }
  0x93   :  { %v750_v47 = vsel %vm1762_vm5, %v745_v29, %v749_v35  ;;  %v775_v51 = vshrl.u32 %v2349_v30, 16  ;;  %v1601_v10 = vmax.bf16 %v1597_v19, %v2371_v21  ;;  %v1362_v55 = vsel %vm1754_vm4, %v1679_v6, %v1361_v9 }
  0x94   :  { %v1049_v48 = vmax.bf16 %v750_v47, %v86_v7  ;;  %v753_v56 = vrot.slane %v751_v61, 4  ;;  %v769_v58 = vrot.slane %v768_v49, 4  ;;  %v759_v60 = vrot.slane %v757_v50, 5  ;;  %v41_v7 = vld [vmem:[%s2798_s0 + $0x84] sm:$0xf] }
  0x95   :  { %v777_v54 = vrot.slane %v775_v51, 4  ;;  %v781_v63 = vshll.u32 %v91_v33, 16  ;;  %1699 = vst.msk [vmem:[%s2799_s1 + $0x24] sm:$0xf] %vm1552_vm6, %v1601_v10  ;;  %v1356_v8 = vrot.slane %v1354_v43, 4  ;;  %v1357_v11 = vrot.slane %v88_v44, 5 }
  0x96   :  { %v1528_v37 = vmax.bf16 %v1355_v46, %v1049_v48  ;;  %v754_v14 = vor.u32 %v753_v56, %v749_v35  ;;  %v774_v15 = vsel %vm1762_vm5, %v769_v58, %v773_v28  ;;  %v1363_v5 = vrot.slane %v1361_v9, 4 }
  0x97   :  { %v778_v17 = vor.u32 %v777_v54, %v773_v28  ;;  %v783_v38 = vrot.slane %v781_v63, 5  ;;  %v1051_v32 = vmax.bf16 %v774_v15, %v2337_v0  ;;  %v1358_v26 = vsel %vm1754_vm4, %v1356_v8, %v1357_v11 }
  0x98   :  { %v1598_v13 = vmax.bf16 %v1528_v37, %v2280_v24  ;;  %v755_v25 = vrot.slane %v754_v14, 4  ;;  %v1364_v23 = vrot.slane %v91_v33, 5  ;;  %v378_v57 = vshrl.u32 %v41_v7, 16  ;;  %v46_v33 = vld [vmem:[%s2798_s0 + $0x98] sm:$0x1] }
  0x99   :  { %v779_v2 = vrot.slane %v778_v17, 4  ;;  %v381_v31 = vshll.u32 %v41_v7, 16  ;;  %v2410_v1 = vmax.bf16 %v1362_v55, %v1051_v32  ;;  %v387_v24 = vshll.u32 %v2399_v4, 16 }
  0x9a   :  { %v760_v34 = vsel %vm1762_vm5, %v755_v25, %v759_v60  ;;  %v402_v0 = vshrl.u32 %v2404_v53, 16  ;;  %v1365_v35 = vsel %vm1754_vm4, %v1363_v5, %v1364_v23  ;;  %v380_v52 = vrot.slane %v378_v57, 4 }
  0x9b   :  { %v784_v59 = vsel %vm1762_vm5, %v779_v2, %v783_v38  ;;  %v1050_v45 = vmax.bf16 %v760_v34, %v2332_v18  ;;  %v1602_v20 = vmax.bf16 %v1598_v13, %v2410_v1  ;;  %v383_v39 = vrot.slane %v381_v31, 5  ;;  %v92_v38 = vld [vmem:[%s2798_s0 + $0x15c] sm:$0xf] }
  0x9c   :  { %v1052_v36 = vmax.bf16 %v784_v59, %v2349_v30  ;;  %v389_v16 = vrot.slane %v387_v24, 5  ;;  %v404_v41 = vrot.slane %v402_v0, 4  ;;  %v405_v43 = vshll.u32 %v2404_v53, 16  ;;  %v43_v30 = vld [vmem:[%s2798_s0 + $0x8c] sm:$0x1] }
  0x9d   :  { %v1529_v40 = vmax.bf16 %v1358_v26, %v1050_v45  ;;  %v411_v6 = vshll.u32 %v2417_v12, 16  ;;  %1700 = vst.msk [vmem:[%s2799_s1 + $0x60] sm:$0xf] %vm1552_vm6, %v1602_v20  ;;  %v384_v44 = vor.u32 %v383_v39, %v380_v52  ;;  %v1663_v29 = vrot.slane %v41_v7, 9  ;;  %v95_v24 = vld [vmem:[%s2798_s0 + $0x168] sm:$0xf] }
  0x9e   :  { %v2434_v18 = vmax.bf16 %v1365_v35, %v1052_v36  ;;  %v1249_v3 = vrot.slane %v2399_v4, 5  ;;  %v407_v19 = vrot.slane %v405_v43, 5  ;;  %v1664_v9 = vrot.slane %v2404_v53, 9  ;;  %v2485_v52 = vld [vmem:[%s2798_s0 + $0x16c] sm:$0xf] }
  0x9f   :  { %v1599_v28 = vmax.bf16 %v1529_v40, %v2304_v42  ;;  %v413_v46 = vrot.slane %v411_v6, 5  ;;  %v385_v61 = vrot.slane %v384_v44, 4  ;;  %v1256_v49 = vrot.slane %v2417_v12, 5 }
  0xa0   :  { %v1250_v47 = vsel %vm1754_vm4, %v1663_v29, %v1249_v3  ;;  %v391_v50 = vshrl.u32 %v2399_v4, 16  ;;  %v408_v10 = vor.u32 %v407_v19, %v404_v41  ;;  %v397_v42 = vshll.u32 %v43_v30, 16 }
  0xa1   :  { %v1603_v51 = vmax.bf16 %v1599_v28, %v2434_v18  ;;  %v415_v48 = vshrl.u32 %v2417_v12, 16  ;;  %v390_v55 = vsel %vm1762_vm5, %v385_v61, %v389_v16  ;;  %v1257_v56 = vsel %vm1754_vm4, %v1664_v9, %v1256_v49 }
  0xa2   :  { %v393_v58 = vrot.slane %v391_v50, 4  ;;  %v421_v60 = vshll.u32 %v46_v33, 16  ;;  %v409_v54 = vrot.slane %v408_v10, 4  ;;  %v1019_v63 = vmax.bf16 %v390_v55, %v41_v7  ;;  %v2467_v7 = vld [vmem:[%s2798_s0 + $0x160] sm:$0xf] }
  0xa3   :  { %1701 = vst.msk [vmem:[%s2799_s1 + $0x64] sm:$0xf] %vm1552_vm6, %v1603_v51  ;;  %v399_v37 = vrot.slane %v397_v42, 5  ;;  %v417_v14 = vrot.slane %v415_v48, 4  ;;  %v1251_v15 = vrot.slane %v1249_v3, 4  ;;  %v1252_v17 = vrot.slane %v43_v30, 5 }
  0xa4   :  { %v394_v8 = vor.u32 %v393_v58, %v389_v16  ;;  %v423_v11 = vrot.slane %v421_v60, 5  ;;  %v414_v5 = vsel %vm1762_vm5, %v409_v54, %v413_v46  ;;  %v1498_v32 = vmax.bf16 %v1250_v47, %v1019_v63  ;;  %v97_v10 = vld [vmem:[%s2798_s0 + $0x170] sm:$0x1] }
  0xa5   :  { %v418_v13 = vor.u32 %v417_v14, %v413_v46  ;;  %v1258_v25 = vrot.slane %v1256_v49, 4  ;;  %v1021_v26 = vmax.bf16 %v414_v5, %v2404_v53  ;;  %v1253_v23 = vsel %vm1754_vm4, %v1251_v15, %v1252_v17 }
  0xa6   :  { %v395_v2 = vrot.slane %v394_v8, 4  ;;  %v1259_v57 = vrot.slane %v46_v33, 5  ;;  %v1609_v31 = vmax.bf16 %v1498_v32, %v2342_v62  ;;  %v786_v0 = vshrl.u32 %v92_v38, 16 }
  0xa7   :  { %v419_v34 = vrot.slane %v418_v13, 4  ;;  %v789_v59 = vshll.u32 %v92_v38, 16  ;;  %v2476_v45 = vmax.bf16 %v1257_v56, %v1021_v26  ;;  %v795_v62 = vshll.u32 %v2467_v7, 16 }
  0xa8   :  { %v400_v35 = vsel %vm1762_vm5, %v395_v2, %v399_v37  ;;  %v1260_v53 = vsel %vm1754_vm4, %v1258_v25, %v1259_v57  ;;  %v788_v39 = vrot.slane %v786_v0, 4  ;;  %v810_v6 = vshrl.u32 %v95_v24, 16 }
  0xa9   :  { %v424_v20 = vsel %vm1762_vm5, %v419_v34, %v423_v11  ;;  %v1020_v36 = vmax.bf16 %v400_v35, %v2399_v4  ;;  %v791_v16 = vrot.slane %v789_v59, 5  ;;  %v1613_v40 = vmax.bf16 %v1609_v31, %v2476_v45  ;;  %v50_v59 = vld [vmem:[%s2798_s0 + $0xa8] sm:$0xf] }
  0xaa   :  { %v1022_v41 = vmax.bf16 %v424_v20, %v2417_v12  ;;  %v797_v43 = vrot.slane %v795_v62, 5  ;;  %v813_v3 = vshll.u32 %v95_v24, 16  ;;  %v819_v30 = vshll.u32 %v2485_v52, 16  ;;  %v94_v12 = vld [vmem:[%s2798_s0 + $0x164] sm:$0x1] }
  0xab   :  { %v1499_v44 = vmax.bf16 %v1253_v23, %v1020_v36  ;;  %v792_v29 = vor.u32 %v791_v16, %v788_v39  ;;  %1702 = vst.msk [vmem:[%s2799_s1 + $0x28] sm:$0xf] %vm1552_vm6, %v1613_v40  ;;  %v812_v4 = vrot.slane %v810_v6, 4  ;;  %v1680_v19 = vrot.slane %v92_v38, 9  ;;  %v2530_v23 = vld [vmem:[%s2798_s0 + $0xa0] sm:$0xf] }
  0xac   :  { %v2498_v28 = vmax.bf16 %v1260_v53, %v1022_v41  ;;  %v1368_v46 = vrot.slane %v2467_v7, 5  ;;  %v815_v61 = vrot.slane %v813_v3, 5  ;;  %v821_v47 = vrot.slane %v819_v30, 5  ;;  %v2549_v40 = vld [vmem:[%s2798_s0 + $0xac] sm:$0xf] }
  0xad   :  { %v1610_v9 = vmax.bf16 %v1499_v44, %v2371_v21  ;;  %v793_v33 = vrot.slane %v792_v29, 4  ;;  %v1681_v50 = vrot.slane %v95_v24, 9  ;;  %v1375_v51 = vrot.slane %v2485_v52, 5 }
  0xae   :  { %v1369_v49 = vsel %vm1754_vm4, %v1680_v19, %v1368_v46  ;;  %v799_v42 = vshrl.u32 %v2467_v7, 16  ;;  %v816_v55 = vor.u32 %v815_v61, %v812_v4  ;;  %v805_v56 = vshll.u32 %v94_v12, 16 }
  0xaf   :  { %v1614_v48 = vmax.bf16 %v1610_v9, %v2498_v28  ;;  %v798_v21 = vsel %vm1762_vm5, %v793_v33, %v797_v43  ;;  %v1376_v60 = vsel %vm1754_vm4, %v1681_v50, %v1375_v51  ;;  %v823_v63 = vshrl.u32 %v2485_v52, 16 }
  0xb0   :  { %v1053_v58 = vmax.bf16 %v798_v21, %v92_v38  ;;  %v801_v54 = vrot.slane %v799_v42, 4  ;;  %v817_v37 = vrot.slane %v816_v55, 4  ;;  %v807_v14 = vrot.slane %v805_v56, 5  ;;  %v47_v38 = vld [vmem:[%s2798_s0 + $0x9c] sm:$0xf] }
  0xb1   :  { %1703 = vst.msk [vmem:[%s2799_s1 + $0x2c] sm:$0xf] %vm1552_vm6, %v1614_v48  ;;  %v829_v8 = vshll.u32 %v97_v10, 16  ;;  %v1370_v11 = vrot.slane %v1368_v46, 4  ;;  %v825_v5 = vrot.slane %v823_v63, 4  ;;  %v1371_v32 = vrot.slane %v94_v12, 5 }
  0xb2   :  { %v1532_v15 = vmax.bf16 %v1369_v49, %v1053_v58  ;;  %v802_v17 = vor.u32 %v801_v54, %v797_v43  ;;  %v822_v13 = vsel %vm1762_vm5, %v817_v37, %v821_v47  ;;  %v1377_v26 = vrot.slane %v1375_v51, 4  ;;  %v52_v55 = vld [vmem:[%s2798_s0 + $0xb0] sm:$0x1] }
  0xb3   :  { %v831_v25 = vrot.slane %v829_v8, 5  ;;  %v1378_v2 = vrot.slane %v97_v10, 5  ;;  %v1055_v57 = vmax.bf16 %v822_v13, %v95_v24  ;;  %v826_v0 = vor.u32 %v825_v5, %v821_v47  ;;  %v49_v47 = vld [vmem:[%s2798_s0 + $0xa4] sm:$0x1] }
  0xb4   :  { %v1611_v31 = vmax.bf16 %v1532_v15, %v2410_v1  ;;  %v803_v34 = vrot.slane %v802_v17, 4  ;;  %v1372_v35 = vsel %vm1754_vm4, %v1370_v11, %v1371_v32  ;;  %v426_v62 = vshrl.u32 %v47_v38, 16 }
  0xb5   :  { %v1379_v53 = vsel %vm1754_vm4, %v1377_v26, %v1378_v2  ;;  %v429_v20 = vshll.u32 %v47_v38, 16  ;;  %v2540_v36 = vmax.bf16 %v1376_v60, %v1055_v57  ;;  %v827_v1 = vrot.slane %v826_v0, 4  ;;  %v2597_v0 = vld [vmem:[%s2798_s0 + $0x180] sm:$0xf] }
  0xb6   :  { %v808_v24 = vsel %vm1762_vm5, %v803_v34, %v807_v14  ;;  %v435_v39 = vshll.u32 %v2530_v23, 16  ;;  %v428_v41 = vrot.slane %v426_v62, 4  ;;  %v450_v6 = vshrl.u32 %v50_v59, 16  ;;  %v2592_v34 = vld [vmem:[%s2798_s0 + $0x178] sm:$0xf] }
  0xb7   :  { %v1054_v16 = vmax.bf16 %v808_v24, %v2467_v7  ;;  %v431_v43 = vrot.slane %v429_v20, 5  ;;  %v1615_v44 = vmax.bf16 %v1611_v31, %v2540_v36  ;;  %v832_v29 = vsel %vm1762_vm5, %v827_v1, %v831_v25  ;;  %v98_v25 = vld [vmem:[%s2798_s0 + $0x174] sm:$0xf] }
  0xb8   :  { %v437_v3 = vrot.slane %v435_v39, 5  ;;  %v453_v30 = vshll.u32 %v50_v59, 16  ;;  %v1056_v4 = vmax.bf16 %v832_v29, %v2485_v52  ;;  %v452_v7 = vrot.slane %v450_v6, 4 }
  0xb9   :  { %v1533_v19 = vmax.bf16 %v1372_v35, %v1054_v16  ;;  %v432_v46 = vor.u32 %v431_v43, %v428_v41  ;;  %1704 = vst.msk [vmem:[%s2799_s1 + $0x68] sm:$0xf] %vm1552_vm6, %v1615_v44  ;;  %v459_v9 = vshll.u32 %v2549_v40, 16  ;;  %v1665_v33 = vrot.slane %v47_v38, 9  ;;  %v2609_v43 = vld [vmem:[%s2798_s0 + $0x184] sm:$0xf] }
  0xba   :  { %v455_v12 = vrot.slane %v453_v30, 5  ;;  %v1263_v61 = vrot.slane %v2530_v23, 5  ;;  %v2564_v49 = vmax.bf16 %v1379_v53, %v1056_v4  ;;  %v1666_v51 = vrot.slane %v50_v59, 9 }
  0xbb   :  { %v1612_v52 = vmax.bf16 %v1533_v19, %v2434_v18  ;;  %v433_v50 = vrot.slane %v432_v46, 4  ;;  %v461_v42 = vrot.slane %v459_v9, 5  ;;  %v1270_v21 = vrot.slane %v2549_v40, 5 }
  0xbc   :  { %v456_v10 = vor.u32 %v455_v12, %v452_v7  ;;  %v1264_v48 = vsel %vm1754_vm4, %v1665_v33, %v1263_v61  ;;  %v439_v18 = vshrl.u32 %v2530_v23, 16  ;;  %v445_v60 = vshll.u32 %v49_v47, 16 }
  0xbd   :  { %v1616_v56 = vmax.bf16 %v1612_v52, %v2564_v49  ;;  %v438_v58 = vsel %vm1762_vm5, %v433_v50, %v437_v3  ;;  %v1271_v37 = vsel %vm1754_vm4, %v1666_v51, %v1270_v21  ;;  %v463_v14 = vshrl.u32 %v2549_v40, 16  ;;  %v100_v51 = vld [vmem:[%s2798_s0 + $0x17c] sm:$0x1] }
  0xbe   :  { %v457_v54 = vrot.slane %v456_v10, 4  ;;  %v1023_v63 = vmax.bf16 %v438_v58, %v47_v38  ;;  %v441_v8 = vrot.slane %v439_v18, 4  ;;  %v447_v11 = vrot.slane %v445_v60, 5  ;;  %v103_v58 = vld [vmem:[%s2798_s0 + $0x188] sm:$0x1] }
  0xbf   :  { %1705 = vst.msk [vmem:[%s2799_s1 + $0x6c] sm:$0xf] %vm1552_vm6, %v1616_v56  ;;  %v469_v15 = vshll.u32 %v52_v55, 16  ;;  %v1265_v17 = vrot.slane %v1263_v61, 4  ;;  %v465_v13 = vrot.slane %v463_v14, 4  ;;  %v1266_v38 = vrot.slane %v49_v47, 5 }
  0xc0   :  { %v462_v5 = vsel %vm1762_vm5, %v457_v54, %v461_v42  ;;  %v1502_v32 = vmax.bf16 %v1264_v48, %v1023_v63  ;;  %v442_v2 = vor.u32 %v441_v8, %v437_v3  ;;  %v1272_v31 = vrot.slane %v1270_v21, 4 }
  0xc1   :  { %v1025_v26 = vmax.bf16 %v462_v5, %v50_v59  ;;  %v471_v57 = vrot.slane %v469_v15, 5  ;;  %v466_v53 = vor.u32 %v465_v13, %v461_v42  ;;  %v1267_v62 = vsel %vm1754_vm4, %v1265_v17, %v1266_v38 }
  0xc2   :  { %v1622_v35 = vmax.bf16 %v1502_v32, %v2476_v45  ;;  %v1273_v59 = vrot.slane %v52_v55, 5  ;;  %v443_v24 = vrot.slane %v442_v2, 4  ;;  %v834_v1 = vshrl.u32 %v98_v25, 16 }
  0xc3   :  { %v2602_v20 = vmax.bf16 %v1271_v37, %v1025_v26  ;;  %v837_v39 = vshll.u32 %v98_v25, 16  ;;  %v467_v16 = vrot.slane %v466_v53, 4  ;;  %v843_v45 = vshll.u32 %v2592_v34, 16 }
  0xc4   :  { %v1274_v41 = vsel %vm1754_vm4, %v1272_v31, %v1273_v59  ;;  %v858_v6 = vshrl.u32 %v2597_v0, 16  ;;  %v448_v29 = vsel %vm1762_vm5, %v443_v24, %v447_v11  ;;  %v836_v3 = vrot.slane %v834_v1, 4  ;;  %v2664_v59 = vld [vmem:[%s2798_s0 + $0xc0] sm:$0xf] }
  0xc5   :  { %v1626_v44 = vmax.bf16 %v1622_v35, %v2602_v20  ;;  %v839_v30 = vrot.slane %v837_v39, 5  ;;  %v472_v4 = vsel %vm1762_vm5, %v467_v16, %v471_v57  ;;  %v1024_v19 = vmax.bf16 %v448_v29, %v2530_v23 }
  0xc6   :  { %v845_v46 = vrot.slane %v843_v45, 5  ;;  %v860_v7 = vrot.slane %v858_v6, 4  ;;  %v1026_v12 = vmax.bf16 %v472_v4, %v2549_v40  ;;  %v861_v33 = vshll.u32 %v2597_v0, 16 }
  0xc7   :  { %1706 = vst.msk [vmem:[%s2799_s1 + $0x30] sm:$0xf] %vm1552_vm6, %v1626_v44  ;;  %v840_v9 = vor.u32 %v839_v30, %v836_v3  ;;  %v867_v61 = vshll.u32 %v2609_v43, 16  ;;  %v1503_v47 = vmax.bf16 %v1267_v62, %v1024_v19  ;;  %v1682_v52 = vrot.slane %v98_v25, 9  ;;  %v2659_v62 = vld [vmem:[%s2798_s0 + $0xb8] sm:$0xf] }
  0xc8   :  { %v1382_v50 = vrot.slane %v2592_v34, 5  ;;  %v1683_v23 = vrot.slane %v2597_v0, 9  ;;  %v2631_v10 = vmax.bf16 %v1274_v41, %v1026_v12  ;;  %v863_v48 = vrot.slane %v861_v33, 5  ;;  %v2677_v30 = vld [vmem:[%s2798_s0 + $0xc4] sm:$0xf] }
  0xc9   :  { %v841_v42 = vrot.slane %v840_v9, 4  ;;  %v869_v40 = vrot.slane %v867_v61, 5  ;;  %v1623_v21 = vmax.bf16 %v1503_v47, %v2498_v28  ;;  %v1389_v56 = vrot.slane %v2609_v43, 5 }
  0xca   :  { %v1383_v55 = vsel %vm1754_vm4, %v1682_v52, %v1382_v50  ;;  %v847_v18 = vshrl.u32 %v2592_v34, 16  ;;  %v864_v54 = vor.u32 %v863_v48, %v860_v7  ;;  %v853_v63 = vshll.u32 %v100_v51, 16 }
  0xcb   :  { %v846_v60 = vsel %vm1762_vm5, %v841_v42, %v845_v46  ;;  %v871_v37 = vshrl.u32 %v2609_v43, 16  ;;  %v1627_v28 = vmax.bf16 %v1623_v21, %v2631_v10  ;;  %v1390_v8 = vsel %vm1754_vm4, %v1683_v23, %v1389_v56 }
  0xcc   :  { %v1057_v14 = vmax.bf16 %v846_v60, %v98_v25  ;;  %v849_v11 = vrot.slane %v847_v18, 4  ;;  %v865_v15 = vrot.slane %v864_v54, 4  ;;  %v855_v17 = vrot.slane %v853_v63, 5  ;;  %v53_v25 = vld [vmem:[%s2798_s0 + $0xb4] sm:$0xf] }
  0xcd   :  { %v873_v5 = vrot.slane %v871_v37, 4  ;;  %v877_v32 = vshll.u32 %v103_v58, 16  ;;  %1707 = vst.msk [vmem:[%s2799_s1 + $0x34] sm:$0xf] %vm1552_vm6, %v1627_v28  ;;  %v1384_v26 = vrot.slane %v1382_v50, 4  ;;  %v1385_v2 = vrot.slane %v100_v51, 5 }
  0xce   :  { %v1536_v13 = vmax.bf16 %v1383_v55, %v1057_v14  ;;  %v850_v38 = vor.u32 %v849_v11, %v845_v46  ;;  %v870_v57 = vsel %vm1762_vm5, %v865_v15, %v869_v40  ;;  %v1391_v53 = vrot.slane %v1389_v56, 4 }
  0xcf   :  { %v874_v31 = vor.u32 %v873_v5, %v869_v40  ;;  %v879_v35 = vrot.slane %v877_v32, 5  ;;  %v1059_v24 = vmax.bf16 %v870_v57, %v2597_v0  ;;  %v1386_v16 = vsel %vm1754_vm4, %v1384_v26, %v1385_v2 }
  0xd0   :  { %v1624_v1 = vmax.bf16 %v1536_v13, %v2540_v36  ;;  %v851_v39 = vrot.slane %v850_v38, 4  ;;  %v1392_v45 = vrot.slane %v103_v58, 5  ;;  %v474_v6 = vshrl.u32 %v53_v25, 16  ;;  %v58_v58 = vld [vmem:[%s2798_s0 + $0xc8] sm:$0x1] }
  0xd1   :  { %v875_v41 = vrot.slane %v874_v31, 4  ;;  %v477_v44 = vshll.u32 %v53_v25, 16  ;;  %v2670_v29 = vmax.bf16 %v1390_v8, %v1059_v24  ;;  %v483_v36 = vshll.u32 %v2659_v62, 16 }
  0xd2   :  { %v856_v3 = vsel %vm1762_vm5, %v851_v39, %v855_v17  ;;  %v498_v0 = vshrl.u32 %v2664_v59, 16  ;;  %v1393_v46 = vsel %vm1754_vm4, %v1391_v53, %v1392_v45  ;;  %v476_v7 = vrot.slane %v474_v6, 4 }
  0xd3   :  { %v880_v4 = vsel %vm1762_vm5, %v875_v41, %v879_v35  ;;  %v1058_v19 = vmax.bf16 %v856_v3, %v2592_v34  ;;  %v1628_v12 = vmax.bf16 %v1624_v1, %v2670_v29  ;;  %v479_v33 = vrot.slane %v477_v44, 5  ;;  %v104_v35 = vld [vmem:[%s2798_s0 + $0x18c] sm:$0xf] }
  0xd4   :  { %v1060_v9 = vmax.bf16 %v880_v4, %v2609_v43  ;;  %v485_v61 = vrot.slane %v483_v36, 5  ;;  %v500_v52 = vrot.slane %v498_v0, 4  ;;  %v501_v50 = vshll.u32 %v2664_v59, 16  ;;  %v55_v43 = vld [vmem:[%s2798_s0 + $0xbc] sm:$0x1] }
  0xd5   :  { %v1537_v47 = vmax.bf16 %v1386_v16, %v1058_v19  ;;  %v507_v23 = vshll.u32 %v2677_v30, 16  ;;  %1708 = vst.msk [vmem:[%s2799_s1 + $0x70] sm:$0xf] %vm1552_vm6, %v1628_v12  ;;  %v480_v51 = vor.u32 %v479_v33, %v476_v7  ;;  %v1667_v42 = vrot.slane %v53_v25, 9  ;;  %v107_v36 = vld [vmem:[%s2798_s0 + $0x198] sm:$0xf] }
  0xd6   :  { %v2694_v34 = vmax.bf16 %v1393_v46, %v1060_v9  ;;  %v1277_v48 = vrot.slane %v2659_v62, 5  ;;  %v503_v21 = vrot.slane %v501_v50, 5  ;;  %v1668_v56 = vrot.slane %v2664_v59, 9  ;;  %v2743_v7 = vld [vmem:[%s2798_s0 + $0x19c] sm:$0xf] }
  0xd7   :  { %v1625_v40 = vmax.bf16 %v1537_v47, %v2564_v49  ;;  %v509_v55 = vrot.slane %v507_v23, 5  ;;  %v481_v18 = vrot.slane %v480_v51, 4  ;;  %v1284_v54 = vrot.slane %v2677_v30, 5 }
  0xd8   :  { %v1278_v60 = vsel %vm1754_vm4, %v1667_v42, %v1277_v48  ;;  %v487_v63 = vshrl.u32 %v2659_v62, 16  ;;  %v504_v28 = vor.u32 %v503_v21, %v500_v52  ;;  %v493_v49 = vshll.u32 %v55_v43, 16 }
  0xd9   :  { %v1629_v37 = vmax.bf16 %v1625_v40, %v2694_v34  ;;  %v511_v14 = vshrl.u32 %v2677_v30, 16  ;;  %v486_v8 = vsel %vm1762_vm5, %v481_v18, %v485_v61  ;;  %v1285_v11 = vsel %vm1754_vm4, %v1668_v56, %v1284_v54 }
  0xda   :  { %v489_v15 = vrot.slane %v487_v63, 4  ;;  %v517_v17 = vshll.u32 %v58_v58, 16  ;;  %v505_v5 = vrot.slane %v504_v28, 4  ;;  %v1027_v32 = vmax.bf16 %v486_v8, %v53_v25  ;;  %v2727_v25 = vld [vmem:[%s2798_s0 + $0x190] sm:$0xf] }
  0xdb   :  { %1709 = vst.msk [vmem:[%s2799_s1 + $0x74] sm:$0xf] %vm1552_vm6, %v1629_v37  ;;  %v495_v13 = vrot.slane %v493_v49, 5  ;;  %v513_v38 = vrot.slane %v511_v14, 4  ;;  %v1279_v57 = vrot.slane %v1277_v48, 4  ;;  %v1280_v31 = vrot.slane %v55_v43, 5 }
  0xdc   :  { %v490_v26 = vor.u32 %v489_v15, %v485_v61  ;;  %v519_v2 = vrot.slane %v517_v17, 5  ;;  %v510_v53 = vsel %vm1762_vm5, %v505_v5, %v509_v55  ;;  %v1506_v24 = vmax.bf16 %v1278_v60, %v1027_v32  ;;  %v109_v28 = vld [vmem:[%s2798_s0 + $0x1a0] sm:$0x1] }
  0xdd   :  { %v514_v1 = vor.u32 %v513_v38, %v509_v55  ;;  %v1286_v39 = vrot.slane %v1284_v54, 4  ;;  %v1029_v16 = vmax.bf16 %v510_v53, %v2664_v59  ;;  %v1281_v45 = vsel %vm1754_vm4, %v1279_v57, %v1280_v31 }
  0xde   :  { %v491_v41 = vrot.slane %v490_v26, 4  ;;  %v1287_v6 = vrot.slane %v58_v58, 5  ;;  %v1635_v44 = vmax.bf16 %v1506_v24, %v2602_v20  ;;  %v882_v0 = vshrl.u32 %v104_v35, 16 }
  0xdf   :  { %v515_v3 = vrot.slane %v514_v1, 4  ;;  %v885_v4 = vshll.u32 %v104_v35, 16  ;;  %v1508_v19 = vmax.bf16 %v1285_v11, %v1029_v16  ;;  %v891_v20 = vshll.u32 %v2727_v25, 16 }
  0xe0   :  { %v496_v46 = vsel %vm1762_vm5, %v491_v41, %v495_v13  ;;  %v1288_v59 = vsel %vm1754_vm4, %v1286_v39, %v1287_v6  ;;  %v884_v33 = vrot.slane %v882_v0, 4  ;;  %v906_v23 = vshrl.u32 %v107_v36, 16 }
  0xe1   :  { %v520_v12 = vsel %vm1762_vm5, %v515_v3, %v519_v2  ;;  %v1028_v9 = vmax.bf16 %v496_v46, %v2659_v62  ;;  %v887_v61 = vrot.slane %v885_v4, 5  ;;  %v1639_v47 = vmax.bf16 %v1635_v44, %v1508_v19 }
  0xe2   :  { %v1030_v52 = vmax.bf16 %v520_v12, %v2677_v30  ;;  %v893_v50 = vrot.slane %v891_v20, 5  ;;  %v909_v48 = vshll.u32 %v107_v36, 16  ;;  %v915_v43 = vshll.u32 %v2743_v7, 16  ;;  %v106_v30 = vld [vmem:[%s2798_s0 + $0x194] sm:$0x1] }
  0xe3   :  { %v1507_v51 = vmax.bf16 %v1281_v45, %v1028_v9  ;;  %v888_v42 = vor.u32 %v887_v61, %v884_v33  ;;  %1710 = vst.msk [vmem:[%s2799_s1 + $0x38] sm:$0xf] %vm1552_vm6, %v1639_v47  ;;  %v908_v21 = vrot.slane %v906_v23, 4  ;;  %v1684_v62 = vrot.slane %v104_v35, 9 }
  0xe4   :  { %v1509_v40 = vmax.bf16 %v1288_v59, %v1030_v52  ;;  %v1396_v55 = vrot.slane %v2727_v25, 5  ;;  %v911_v18 = vrot.slane %v909_v48, 5  ;;  %v917_v60 = vrot.slane %v915_v43, 5 }
  0xe5   :  { %v1636_v56 = vmax.bf16 %v1507_v51, %v2631_v10  ;;  %v889_v58 = vrot.slane %v888_v42, 4  ;;  %v1685_v63 = vrot.slane %v107_v36, 9  ;;  %v1403_v37 = vrot.slane %v2743_v7, 5 }
  0xe6   :  { %v1397_v54 = vsel %vm1754_vm4, %v1684_v62, %v1396_v55  ;;  %v895_v49 = vshrl.u32 %v2727_v25, 16  ;;  %v912_v10 = vor.u32 %v911_v18, %v908_v21  ;;  %v901_v11 = vshll.u32 %v106_v30, 16 }
  0xe7   :  { %v1640_v14 = vmax.bf16 %v1636_v56, %v1509_v40  ;;  %v894_v8 = vsel %vm1762_vm5, %v889_v58, %v893_v50  ;;  %v1404_v17 = vsel %vm1754_vm4, %v1685_v63, %v1403_v37  ;;  %v919_v32 = vshrl.u32 %v2743_v7, 16 }
  0xe8   :  { %v1061_v15 = vmax.bf16 %v894_v8, %v104_v35  ;;  %v897_v5 = vrot.slane %v895_v49, 4  ;;  %v913_v13 = vrot.slane %v912_v10, 4  ;;  %v903_v38 = vrot.slane %v901_v11, 5 }
  0xe9   :  { %1711 = vst.msk [vmem:[%s2799_s1 + $0x3c] sm:$0xf] %vm1552_vm6, %v1640_v14  ;;  %v925_v26 = vshll.u32 %v109_v28, 16  ;;  %v1398_v2 = vrot.slane %v1396_v55, 4  ;;  %v921_v53 = vrot.slane %v919_v32, 4  ;;  %v1399_v24 = vrot.slane %v106_v30, 5 }
  0xea   :  { %v1540_v57 = vmax.bf16 %v1397_v54, %v1061_v15  ;;  %v898_v31 = vor.u32 %v897_v5, %v893_v50  ;;  %v918_v35 = vsel %vm1762_vm5, %v913_v13, %v917_v60  ;;  %v1405_v39 = vrot.slane %v1403_v37, 4 }
  0xeb   :  { %v927_v1 = vrot.slane %v925_v26, 5  ;;  %v1406_v16 = vrot.slane %v109_v28, 5  ;;  %v1063_v41 = vmax.bf16 %v918_v35, %v107_v36  ;;  %v922_v44 = vor.u32 %v921_v53, %v917_v60 }
  0xec   :  { %v1637_v45 = vmax.bf16 %v1540_v57, %v2670_v29  ;;  %v899_v6 = vrot.slane %v898_v31, 4  ;;  %v1400_v19 = vsel %vm1754_vm4, %v1398_v2, %v1399_v24 }
  0xed   :  { %v1542_v3 = vmax.bf16 %v1404_v17, %v1063_v41  ;;  %v923_v4 = vrot.slane %v922_v44, 4  ;;  %v1407_v36 = vsel %vm1754_vm4, %v1405_v39, %v1406_v16 }
  0xee   :  { %v904_v0 = vsel %vm1762_vm5, %v899_v6, %v903_v38 }
  0xef   :  { %v1062_v46 = vmax.bf16 %v904_v0, %v2727_v25  ;;  %v1641_v59 = vmax.bf16 %v1637_v45, %v1542_v3  ;;  %v928_v20 = vsel %vm1762_vm5, %v923_v4, %v927_v1 }
  0xf0   :  { %v1064_v29 = vmax.bf16 %v928_v20, %v2743_v7 }
  0xf1   :  { %v1541_v12 = vmax.bf16 %v1400_v19, %v1062_v46  ;;  %1712 = vst.msk [vmem:[%s2799_s1 + $0x78] sm:$0xf] %vm1552_vm6, %v1641_v59 }
  0xf2   :  { %v1543_v9 = vmax.bf16 %v1407_v36, %v1064_v29 }
  0xf3   :  { %v1638_v33 = vmax.bf16 %v1541_v12, %v2694_v34 }
  0xf5   :  { %v1642_v61 = vmax.bf16 %v1638_v33, %v1543_v9 }
  0xf7   :  { %1713 = vst.msk [vmem:[%s2799_s1 + $0x7c] sm:$0xf] %vm1552_vm6, %v1642_v61 }

// kernel: _lambda_.14
= control target key start
LH: loop header
LB: loop body
LE: loop exit
PB: predicated region body
PF: predicated region fallthrough
CT: control target
= control target key end

     0   :  { %vm22_vm0 = vcmask 523264   ;;  %vm1100_vm1 = vcmask 519168   ;;  %s1964_s1 = inlined_call_operand.vmem [shape: bf16[640,64], index: 1, kind: input, shape index: {}]   ;;  %s1965_s0 = inlined_call_operand.vmem [shape: bf16[128,640], index: 0, kind: input, shape index: {}]   ;;  %s1966_s2 = inlined_call_operand.vmem [shape: f32[1,64], index: 2, kind: input, shape index: {}]   ;;  %s1967_s3 = inlined_call_operand.vmem [shape: f32[1,64], index: 3, kind: input, shape index: {}]   ;;  %s1968_s4 = inlined_call_operand.vmem [shape: bf16[128,64], index: 4, kind: output, shape index: {}]  }
   0x1   :  { %v1428_v0 = vld [vmem:[%s1964_s1 + $0x40] sm:$0xff]   ;;  %v1432_v4 = vld [vmem:[%s1964_s1 + $0x48] sm:$0xff]   ;;  %v1436_v8 = vld [vmem:[%s1964_s1 + $0x50] sm:$0xff]  }
   0x2   :  { %v1429_v1 = vld [vmem:[%s1964_s1 + $0xc0] sm:$0xff]   ;;  %1235 = vmatprep.subr.bf16.mxu0 %v1428_v0  ;;  %v1433_v5 = vld [vmem:[%s1964_s1 + $0xc8] sm:$0xff]   ;;  %v1437_v9 = vld [vmem:[%s1964_s1 + $0xd0] sm:$0xff]  }
   0x3   :  { %v1430_v2 = vld [vmem:[%s1964_s1] sm:$0xff]   ;;  %1299 = vmatprep.subr.bf16.mxu1 %v1429_v1  ;;  %v1434_v6 = vld [vmem:[%s1964_s1 + $0x8] sm:$0xff]   ;;  %v1438_v10 = vld [vmem:[%s1964_s1 + $0x10] sm:$0xff]  }
   0x4   :  { %v1431_v3 = vld [vmem:[%s1964_s1 + $0x80] sm:$0xff]   ;;  %1236 = vmatpush3.bf16.msra.mxu0 %v1430_v2  ;;  %v1435_v7 = vld [vmem:[%s1964_s1 + $0x88] sm:$0xff]   ;;  %v1439_v11 = vld [vmem:[%s1964_s1 + $0x90] sm:$0xff]  }
   0x5   :  { %1300 = vmatpush3.bf16.msra.mxu1 %v1431_v3  ;;  %1237 = vmatprep.subr.bf16.mxu0 %v1432_v4  ;;  %v1440_v12 = vld [vmem:[%s1964_s1 + $0x58] sm:$0xff]   ;;  %v1444_v16 = vld [vmem:[%s1964_s1 + $0x60] sm:$0xff]   ;;  %v1448_v20 = vld [vmem:[%s1964_s1 + $0x68] sm:$0xff]  }
   0x6   :  { %1301 = vmatprep.subr.bf16.mxu1 %v1433_v5  ;;  %v1441_v13 = vld [vmem:[%s1964_s1 + $0xd8] sm:$0xff]   ;;  %v1445_v17 = vld [vmem:[%s1964_s1 + $0xe0] sm:$0xff]   ;;  %v1449_v21 = vld [vmem:[%s1964_s1 + $0xe8] sm:$0xff]  }
   0x7   :  { %v1442_v14 = vld [vmem:[%s1964_s1 + $0x18] sm:$0xff]   ;;  %v1446_v18 = vld [vmem:[%s1964_s1 + $0x20] sm:$0xff]   ;;  %v1450_v22 = vld [vmem:[%s1964_s1 + $0x28] sm:$0xff]  }
   0x8   :  { %1238 = vmatpush3.bf16.msra.mxu0 %v1434_v6  ;;  %v1443_v15 = vld [vmem:[%s1964_s1 + $0x98] sm:$0xff]   ;;  %v1447_v19 = vld [vmem:[%s1964_s1 + $0xa0] sm:$0xff]   ;;  %v1451_v23 = vld [vmem:[%s1964_s1 + $0xa8] sm:$0xff]  }
   0x9   :  { %1302 = vmatpush3.bf16.msra.mxu1 %v1435_v7  ;;  %1239 = vmatprep.subr.bf16.mxu0 %v1436_v8  ;;  %v1452_v24 = vld [vmem:[%s1964_s1 + $0x70] sm:$0xff]   ;;  %v1456_v28 = vld [vmem:[%s1964_s1 + $0x78] sm:$0xff]   ;;  %v1465_v35 = vld [vmem:[%s1965_s0 + $0xc] ss:$20 sps:$4 sm:$0xff]  }
   0xa   :  { %1303 = vmatprep.subr.bf16.mxu1 %v1437_v9  ;;  %v1453_v25 = vld [vmem:[%s1964_s1 + $0xf0] sm:$0xff]   ;;  %v1457_v29 = vld [vmem:[%s1964_s1 + $0xf8] sm:$0xff]   ;;  %v1466_v36 = vld [vmem:[%s1964_s1 + $0x100] sm:$0xff]   ;;  %760 = vmatprep.mubr.bf16.mxu1 %v1465_v35 }
   0xb   :  { %v1454_v26 = vld [vmem:[%s1964_s1 + $0x30] sm:$0xff]   ;;  %v1458_v30 = vld [vmem:[%s1964_s1 + $0x38] sm:$0xff]   ;;  %v1467_v37 = vld [vmem:[%s1965_s0 + $0x2c] ss:$20 sps:$4 sm:$0xff]  }
   0xc   :  { %1240 = vmatpush3.bf16.msra.mxu0 %v1438_v10  ;;  %v1455_v27 = vld [vmem:[%s1964_s1 + $0xb0] sm:$0xff]   ;;  %v1459_v31 = vld [vmem:[%s1964_s1 + $0xb8] sm:$0xff]   ;;  %v1473_v39 = vld [vmem:[%s1964_s1 + $0x108] sm:$0xff]  }
   0xd   :  { %1304 = vmatpush3.bf16.msra.mxu1 %v1439_v11  ;;  %1241 = vmatprep.subr.bf16.mxu0 %v1440_v12  ;;  %v1460_v32 = vld [vmem:[%s1965_s0] ss:$20 sps:$4 sm:$0xff]   ;;  %v1462_v33 = vld [vmem:[%s1965_s0 + $0x4] ss:$20 sps:$4 sm:$0xff]   ;;  %v1463_v34 = vld [vmem:[%s1965_s0 + $0x8] ss:$20 sps:$4 sm:$0xff]  }
   0xe   :  { %1305 = vmatprep.subr.bf16.mxu1 %v1441_v13  ;;  %663 = vmatprep.mubr.bf16.mxu0 %v1462_v33  ;;  %v1469_v38 = vld [vmem:[%s1965_s0 + $0x34] ss:$20 sps:$4 sm:$0xff]   ;;  %v1472_v41 = vld [vmem:[%s1965_s0 + $0x30] ss:$20 sps:$4 sm:$0xff]   ;;  %v1487_v45 = vld [vmem:[%s1964_s1 + $0x118] sm:$0xff]  }
   0xf   :  { %v1471_v40 = vld [vmem:[%s1965_s0 + $0x28] ss:$20 sps:$4 sm:$0xff]   ;;  %v1480_v44 = vld [vmem:[%s1964_s1 + $0x110] sm:$0xff]   ;;  %v1479_v47 = vld [vmem:[%s1965_s0 + $0x58] ss:$20 sps:$4 sm:$0xff]  }
  0x10   :  { %1242 = vmatpush3.bf16.msra.mxu0 %v1442_v14  ;;  %v1474_v42 = vld [vmem:[%s1965_s0 + $0x54] ss:$20 sps:$4 sm:$0xff]   ;;  %v1476_v43 = vld [vmem:[%s1965_s0 + $0x5c] ss:$20 sps:$4 sm:$0xff]   ;;  %v1483_v49 = vld [vmem:[%s1965_s0 + $0x84] ss:$20 sps:$4 sm:$0xff]  }
  0x11   :  { %1306 = vmatpush3.bf16.msra.mxu1 %v1443_v15  ;;  %1243 = vmatprep.subr.bf16.mxu0 %v1444_v16  ;;  %v1478_v46 = vld [vmem:[%s1965_s0 + $0x50] ss:$20 sps:$4 sm:$0xff]   ;;  %v1501_v51 = vld [vmem:[%s1964_s1 + $0x128] sm:$0xff]   ;;  %v1486_v53 = vld [vmem:[%s1965_s0 + $0x80] ss:$20 sps:$4 sm:$0xff]   ;;  %v1524_v16 = vmov 0.0  }
  0x12   :  { %1307 = vmatprep.subr.bf16.mxu1 %v1445_v17  ;;  %v1481_v48 = vld [vmem:[%s1965_s0 + $0x7c] ss:$20 sps:$4 sm:$0xff]   ;;  %v1494_v50 = vld [vmem:[%s1964_s1 + $0x120] sm:$0xff]   ;;  %v1485_v52 = vld [vmem:[%s1965_s0 + $0x78] ss:$20 sps:$4 sm:$0xff]   ;;  %25 = vst.msk [vmem:[#allocation2 + $0x10] sm:$0xff] %vm22_vm0, %v1524_v16 }
  0x13   :  { %v1488_v54 = vld [vmem:[%s1965_s0 + $0xa4] ss:$20 sps:$4 sm:$0xff]   ;;  %v1508_v55 = vld [vmem:[%s1964_s1 + $0x130] sm:$0xff]   ;;  %v1490_v56 = vld [vmem:[%s1965_s0 + $0xac] ss:$20 sps:$4 sm:$0xff]   ;;  %23 = vst.msk [vmem:[#allocation2] sm:$0xff] %vm22_vm0, %v1524_v16 }
  0x14   :  { %1244 = vmatpush3.bf16.msra.mxu0 %v1446_v18  ;;  %v1515_v57 = vld [vmem:[%s1964_s1 + $0x138] sm:$0xff]   ;;  %v1492_v58 = vld [vmem:[%s1965_s0 + $0xa0] ss:$20 sps:$4 sm:$0xff]   ;;  %v1500_v63 = vld [vmem:[%s1965_s0 + $0xd0] ss:$20 sps:$4 sm:$0xff]   ;;  %24 = vst.msk [vmem:[#allocation2 + $0x8] sm:$0xff] %vm22_vm0, %v1524_v16 }
  0x15   :  { %1308 = vmatpush3.bf16.msra.mxu1 %v1447_v19  ;;  %1245 = vmatprep.subr.bf16.mxu0 %v1448_v20  ;;  %v1493_v59 = vld [vmem:[%s1965_s0 + $0xa8] ss:$20 sps:$4 sm:$0xff]   ;;  %v1495_v60 = vld [vmem:[%s1965_s0 + $0xcc] ss:$20 sps:$4 sm:$0xff]   ;;  %v1506_v2 = vld [vmem:[%s1965_s0 + $0xf0] ss:$20 sps:$4 sm:$0xff]  }
  0x16   :  { %1309 = vmatprep.subr.bf16.mxu1 %v1449_v21  ;;  %v1497_v61 = vld [vmem:[%s1965_s0 + $0xd4] ss:$20 sps:$4 sm:$0xff]   ;;  %v1504_v1 = vld [vmem:[%s1965_s0 + $0xfc] ss:$20 sps:$4 sm:$0xff]   ;;  %v1507_v3 = vld [vmem:[%s1965_s0 + $0xf8] ss:$20 sps:$4 sm:$0xff]  }
  0x17   :  { %v1499_v62 = vld [vmem:[%s1965_s0 + $0xc8] ss:$20 sps:$4 sm:$0xff]   ;;  %v1511_v5 = vld [vmem:[%s1965_s0 + $0x124] ss:$20 sps:$4 sm:$0xff]   ;;  %v1514_v7 = vld [vmem:[%s1965_s0 + $0x120] ss:$20 sps:$4 sm:$0xff]  }
  0x18   :  { %1246 = vmatpush3.bf16.msra.mxu0 %v1450_v22  ;;  %v1502_v0 = vld [vmem:[%s1965_s0 + $0xf4] ss:$20 sps:$4 sm:$0xff]   ;;  %v1509_v4 = vld [vmem:[%s1965_s0 + $0x11c] ss:$20 sps:$4 sm:$0xff]   ;;  %v1513_v6 = vld [vmem:[%s1965_s0 + $0x118] ss:$20 sps:$4 sm:$0xff]  }
  0x19   :  { %1310 = vmatpush3.bf16.msra.mxu1 %v1451_v23  ;;  %1247 = vmatprep.subr.bf16.mxu0 %v1452_v24  ;;  %v1516_v8 = vld [vmem:[%s1965_s0 + $0x10] ss:$20 sps:$4 sm:$0xff]   ;;  %v1518_v10 = vld [vmem:[%s1965_s0 + $0x38] ss:$20 sps:$4 sm:$0xff]   ;;  %v1520_v12 = vld [vmem:[%s1965_s0 + $0x60] ss:$20 sps:$4 sm:$0xff]  }
  0x1a   :  { %1311 = vmatprep.subr.bf16.mxu1 %v1453_v25  ;;  %v1517_v9 = vld [vmem:[%s1965_s0 + $0xb0] ss:$20 sps:$4 sm:$0xff]   ;;  %v1519_v11 = vld [vmem:[%s1965_s0 + $0xd8] ss:$20 sps:$4 sm:$0xff]   ;;  %v1521_v13 = vld [vmem:[%s1965_s0 + $0x100] ss:$20 sps:$4 sm:$0xff]  }
  0x1b   :  { %v1522_v14 = vld [vmem:[%s1965_s0 + $0x88] ss:$20 sps:$4 sm:$0xff]   ;;  %26 = vst.msk [vmem:[#allocation2 + $0x18] sm:$0xff] %vm22_vm0, %v1524_v16  ;;  %27 = vst.msk [vmem:[#allocation2 + $0x20] sm:$0xff] %vm22_vm0, %v1524_v16 }
  0x1c   :  { %1248 = vmatpush3.bf16.msra.mxu0 %v1454_v26  ;;  %v1523_v15 = vld [vmem:[%s1965_s0 + $0x128] ss:$20 sps:$4 sm:$0xff]   ;;  %28 = vst.msk [vmem:[#allocation2 + $0x28] sm:$0xff] %vm22_vm0, %v1524_v16  ;;  %29 = vst.msk [vmem:[#allocation2 + $0x30] sm:$0xff] %vm22_vm0, %v1524_v16 }
  0x1d   :  { %1312 = vmatpush3.bf16.msra.mxu1 %v1455_v27  ;;  %1249 = vmatprep.subr.bf16.mxu0 %v1456_v28  ;;  %30 = vst.msk [vmem:[#allocation2 + $0x38] sm:$0xff] %vm22_vm0, %v1524_v16  ;;  %31 = vst.msk [vmem:[#allocation2 + $0x40] sm:$0xff] %vm22_vm0, %v1524_v16 }
  0x1e   :  { %1313 = vmatprep.subr.bf16.mxu1 %v1457_v29  ;;  %32 = vst.msk [vmem:[#allocation2 + $0x48] sm:$0xff] %vm22_vm0, %v1524_v16  ;;  %33 = vst.msk [vmem:[#allocation2 + $0x50] sm:$0xff] %vm22_vm0, %v1524_v16 }
  0x1f   :  { %34 = vst.msk [vmem:[#allocation2 + $0x58] sm:$0xff] %vm22_vm0, %v1524_v16  ;;  %35 = vst.msk [vmem:[#allocation2 + $0x60] sm:$0xff] %vm22_vm0, %v1524_v16 }
  0x20   :  { %1250 = vmatpush3.bf16.msra.mxu0 %v1458_v30  ;;  %36 = vst.msk [vmem:[#allocation2 + $0x68] sm:$0xff] %vm22_vm0, %v1524_v16  ;;  %37 = vst.msk [vmem:[#allocation2 + $0x70] sm:$0xff] %vm22_vm0, %v1524_v16 }
  0x21   :  { %1314 = vmatpush3.bf16.msra.mxu1 %v1459_v31  ;;  %1379 = vmatprep.subr.bf16.mxu0 %v1466_v36  ;;  %38 = vst.msk [vmem:[#allocation2 + $0x78] sm:$0xff] %vm22_vm0, %v1524_v16 }
  0x22   :  { %1411 = vmatprep.subr.bf16.mxu1 %v1466_v36 }
  0x23   :  { %664 = vmatmul.mubr.bf16.vlgmr.msra.gmra.mrb[0].mxu0 %v1460_v32 }
  0x24   :  { %761 = vmatmul.mubr.bf16.vlgmr.msra.gmra.mrb[0].mxu1 %v1463_v34  ;;  %1380 = vmatpush3.bf16.msra.mxu0 %v1466_v36 }
  0x25   :  { %1419 = vmatpush3.bf16.msra.mxu1 %v1466_v36  ;;  %671 = vmatprep.mubr.bf16.mxu0 %v1467_v37 }
  0x26   :  { %768 = vmatprep.mubr.bf16.mxu1 %v1469_v38  ;;  %1381 = vmatprep.subr.bf16.mxu0 %v1473_v39 }
  0x27   :  { %1412 = vmatprep.subr.bf16.mxu1 %v1473_v39 }
  0x28   :  { %1382 = vmatpush3.bf16.msra.mxu0 %v1473_v39 }
  0x29   :  { %1420 = vmatpush3.bf16.msra.mxu1 %v1473_v39  ;;  %1383 = vmatprep.subr.bf16.mxu0 %v1480_v44 }
  0x2a   :  { %1413 = vmatprep.subr.bf16.mxu1 %v1480_v44 }
  0x2b   :  { %672 = vmatmul.mubr.bf16.gmra.mrb[4].mxu0 %v1471_v40 }
  0x2c   :  { %769 = vmatmul.mubr.bf16.gmra.mrb[4].mxu1 %v1472_v41  ;;  %679 = vmatprep.mubr.bf16.mxu0 %v1474_v42 }
  0x2d   :  { %776 = vmatprep.mubr.bf16.mxu1 %v1476_v43  ;;  %1384 = vmatpush3.bf16.msra.mxu0 %v1480_v44 }
  0x2e   :  { %1421 = vmatpush3.bf16.msra.mxu1 %v1480_v44  ;;  %1385 = vmatprep.subr.bf16.mxu0 %v1487_v45 }
  0x2f   :  { %1414 = vmatprep.subr.bf16.mxu1 %v1487_v45 }
  0x31   :  { %1386 = vmatpush3.bf16.msra.mxu0 %v1487_v45 }
  0x32   :  { %1422 = vmatpush3.bf16.msra.mxu1 %v1487_v45  ;;  %1387 = vmatprep.subr.bf16.mxu0 %v1494_v50 }
  0x33   :  { %680 = vmatmul.mubr.bf16.gmra.mrb[8].mxu0 %v1478_v46  ;;  %1415 = vmatprep.subr.bf16.mxu1 %v1494_v50 }
  0x34   :  { %777 = vmatmul.mubr.bf16.gmra.mrb[8].mxu1 %v1479_v47  ;;  %687 = vmatprep.mubr.bf16.mxu0 %v1481_v48 }
  0x35   :  { %784 = vmatprep.mubr.bf16.mxu1 %v1483_v49  ;;  %1388 = vmatpush3.bf16.msra.mxu0 %v1494_v50 }
  0x36   :  { %1423 = vmatpush3.bf16.msra.mxu1 %v1494_v50  ;;  %1389 = vmatprep.subr.bf16.mxu0 %v1501_v51 }
  0x37   :  { %1416 = vmatprep.subr.bf16.mxu1 %v1501_v51 }
  0x39   :  { %1390 = vmatpush3.bf16.msra.mxu0 %v1501_v51 }
  0x3a   :  { %1424 = vmatpush3.bf16.msra.mxu1 %v1501_v51  ;;  %1391 = vmatprep.subr.bf16.mxu0 %v1508_v55 }
  0x3b   :  { %688 = vmatmul.mubr.bf16.gmra.mrb[12].mxu0 %v1485_v52  ;;  %1417 = vmatprep.subr.bf16.mxu1 %v1508_v55 }
  0x3c   :  { %785 = vmatmul.mubr.bf16.gmra.mrb[12].mxu1 %v1486_v53  ;;  %695 = vmatprep.mubr.bf16.mxu0 %v1488_v54 }
  0x3d   :  { %792 = vmatprep.mubr.bf16.mxu1 %v1490_v56  ;;  %1392 = vmatpush3.bf16.msra.mxu0 %v1508_v55 }
  0x3e   :  { %1425 = vmatpush3.bf16.msra.mxu1 %v1508_v55  ;;  %1393 = vmatprep.subr.bf16.mxu0 %v1515_v57 }
  0x3f   :  { %1418 = vmatprep.subr.bf16.mxu1 %v1515_v57 }
  0x41   :  { %1394 = vmatpush3.bf16.msra.mxu0 %v1515_v57 }
  0x42   :  { %1426 = vmatpush3.bf16.msra.mxu1 %v1515_v57 }
  0x43   :  { %696 = vmatmul.mubr.bf16.gmra.mrb[16].mxu0 %v1492_v58 }
  0x44   :  { %793 = vmatmul.mubr.bf16.gmra.mrb[16].mxu1 %v1493_v59  ;;  %703 = vmatprep.mubr.bf16.mxu0 %v1495_v60 }
  0x45   :  { %800 = vmatprep.mubr.bf16.mxu1 %v1497_v61 }
  0x4b   :  { %704 = vmatmul.mubr.bf16.gmra.mrb[20].mxu0 %v1499_v62 }
  0x4c   :  { %801 = vmatmul.mubr.bf16.gmra.mrb[20].mxu1 %v1500_v63  ;;  %711 = vmatprep.mubr.bf16.mxu0 %v1502_v0 }
  0x4d   :  { %808 = vmatprep.mubr.bf16.mxu1 %v1504_v1 }
  0x53   :  { %712 = vmatmul.mubr.bf16.gmra.mrb[24].mxu0 %v1506_v2 }
  0x54   :  { %809 = vmatmul.mubr.bf16.gmra.mrb[24].mxu1 %v1507_v3  ;;  %719 = vmatprep.mubr.bf16.mxu0 %v1509_v4 }
  0x55   :  { %816 = vmatprep.mubr.bf16.mxu1 %v1511_v5 }
  0x5b   :  { %720 = vmatmul.mubr.bf16.gmra.mrb[28].mxu0 %v1513_v6 }
  0x5c   :  { %817 = vmatmul.mubr.bf16.gmra.mrb[28].mxu1 %v1514_v7  ;;  %1395 = vmatprep.mubr.bf16.mxu0 %v1516_v8 }
  0x5d   :  { %1403 = vmatprep.mubr.bf16.mxu1 %v1517_v9 }
  0x63   :  { %1396 = vmatmul.mubr.bf16.vlgmr.msra.gmra.mrb[32].mxu0 %v1518_v10 }
  0x64   :  { %1404 = vmatmul.mubr.bf16.vlgmr.msra.gmra.mrb[32].mxu1 %v1519_v11  ;;  %1399 = vmatprep.mubr.bf16.mxu0 %v1520_v12 }
  0x65   :  { %1407 = vmatprep.mubr.bf16.mxu1 %v1521_v13 }
  0x6b   :  { %1400 = vmatmul.mubr.bf16.gmra.mrb[36].mxu0 %v1522_v14 }
  0x6c   :  { %1408 = vmatmul.mubr.bf16.gmra.mrb[36].mxu1 %v1523_v15 }
  0xf6   :  { %v1251_v17 = vpop.f32.mrb[0].mxu0 }
  0xf7   :  { %v1315_v18 = vpop.f32.mrb[0].mxu1  ;;  %v1252_v19 = vpop.f32.mrb[1].mxu0 }
  0xf8   :  { %v1253_v20 = vadd.f32 %v1252_v19, %v1251_v17  ;;  %v1316_v21 = vpop.f32.mrb[1].mxu1  ;;  %v1254_v22 = vpop.f32.mrb[2].mxu0 }
  0xf9   :  { %v1317_v23 = vadd.f32 %v1316_v21, %v1315_v18  ;;  %v1318_v24 = vpop.f32.mrb[2].mxu1  ;;  %v1255_v25 = vpop.f32.mrb[3].mxu0 }
  0xfa   :  { %v1256_v26 = vadd.f32 %v1255_v25, %v1254_v22  ;;  %v1319_v27 = vpop.f32.mrb[3].mxu1 }
  0xfb   :  { %v1320_v28 = vadd.f32 %v1319_v27, %v1318_v24  ;;  %v1806_v29 = vadd.f32 %v1317_v23, %v1253_v20 }
  0xfd   :  { %v1808_v30 = vadd.f32 %v1320_v28, %v1256_v26 }
  0xfe   :  { %v1257_v31 = vpop.f32.mrb[4].mxu0 }
  0xff   :  { %v1321_v32 = vpop.f32.mrb[4].mxu1  ;;  %v1258_v33 = vpop.f32.mrb[5].mxu0 }
 0x100   :  { %v1259_v34 = vadd.f32 %v1258_v33, %v1257_v31  ;;  %v1322_v35 = vpop.f32.mrb[5].mxu1  ;;  %v1260_v36 = vpop.f32.mrb[6].mxu0 }
 0x101   :  { %v1323_v37 = vadd.f32 %v1322_v35, %v1321_v32  ;;  %v1324_v38 = vpop.f32.mrb[6].mxu1  ;;  %v1261_v39 = vpop.f32.mrb[7].mxu0 }
 0x102   :  { %v1262_v40 = vadd.f32 %v1261_v39, %v1260_v36  ;;  %v1325_v41 = vpop.f32.mrb[7].mxu1 }
 0x103   :  { %v1326_v42 = vadd.f32 %v1325_v41, %v1324_v38  ;;  %v1810_v43 = vadd.f32 %v1323_v37, %v1259_v34 }
 0x105   :  { %v1812_v44 = vadd.f32 %v1326_v42, %v1262_v40 }
 0x106   :  { %v1263_v45 = vpop.f32.mrb[8].mxu0 }
 0x107   :  { %v1327_v46 = vpop.f32.mrb[8].mxu1  ;;  %v1264_v47 = vpop.f32.mrb[9].mxu0 }
 0x108   :  { %v1265_v48 = vadd.f32 %v1264_v47, %v1263_v45  ;;  %v1328_v49 = vpop.f32.mrb[9].mxu1  ;;  %v1266_v50 = vpop.f32.mrb[10].mxu0 }
 0x109   :  { %v1329_v51 = vadd.f32 %v1328_v49, %v1327_v46  ;;  %v1330_v52 = vpop.f32.mrb[10].mxu1  ;;  %v1267_v53 = vpop.f32.mrb[11].mxu0 }
 0x10a   :  { %v1268_v54 = vadd.f32 %v1267_v53, %v1266_v50  ;;  %v1331_v55 = vpop.f32.mrb[11].mxu1 }
 0x10b   :  { %v1332_v56 = vadd.f32 %v1331_v55, %v1330_v52  ;;  %v1814_v57 = vadd.f32 %v1329_v51, %v1265_v48 }
 0x10d   :  { %v1816_v58 = vadd.f32 %v1332_v56, %v1268_v54 }
 0x10e   :  { %v1269_v59 = vpop.f32.mrb[12].mxu0 }
 0x10f   :  { %v1333_v60 = vpop.f32.mrb[12].mxu1  ;;  %v1270_v61 = vpop.f32.mrb[13].mxu0 }
 0x110   :  { %v1271_v62 = vadd.f32 %v1270_v61, %v1269_v59  ;;  %v1334_v63 = vpop.f32.mrb[13].mxu1  ;;  %v1272_v0 = vpop.f32.mrb[14].mxu0 }
 0x111   :  { %v1335_v1 = vadd.f32 %v1334_v63, %v1333_v60  ;;  %v1336_v2 = vpop.f32.mrb[14].mxu1  ;;  %v1273_v3 = vpop.f32.mrb[15].mxu0 }
 0x112   :  { %v1274_v4 = vadd.f32 %v1273_v3, %v1272_v0  ;;  %v1337_v5 = vpop.f32.mrb[15].mxu1 }
 0x113   :  { %v1338_v6 = vadd.f32 %v1337_v5, %v1336_v2  ;;  %v1818_v7 = vadd.f32 %v1335_v1, %v1271_v62 }
 0x115   :  { %v1820_v8 = vadd.f32 %v1338_v6, %v1274_v4 }
 0x116   :  { %v1275_v9 = vpop.f32.mrb[16].mxu0 }
 0x117   :  { %v1339_v10 = vpop.f32.mrb[16].mxu1  ;;  %v1276_v11 = vpop.f32.mrb[17].mxu0 }
 0x118   :  { %v1277_v12 = vadd.f32 %v1276_v11, %v1275_v9  ;;  %v1340_v13 = vpop.f32.mrb[17].mxu1  ;;  %v1278_v14 = vpop.f32.mrb[18].mxu0  ;;  %v41_v9 = vld [vmem:[#allocation2 + $0x10] sm:$0xff] }
 0x119   :  { %v1341_v15 = vadd.f32 %v1340_v13, %v1339_v10  ;;  %v1342_v16 = vpop.f32.mrb[18].mxu1  ;;  %v1279_v17 = vpop.f32.mrb[19].mxu0 }
 0x11a   :  { %v1280_v18 = vadd.f32 %v1279_v17, %v1278_v14  ;;  %v1343_v19 = vpop.f32.mrb[19].mxu1  ;;  %v39_v14 = vld [vmem:[#allocation2] sm:$0xff] }
 0x11b   :  { %v1344_v20 = vadd.f32 %v1343_v19, %v1342_v16  ;;  %v795_v21 = vadd.f32 %v1341_v15, %v1277_v12  ;;  %v49_v12 = vld [vmem:[#allocation2 + $0x50] sm:$0xff] }
 0x11d   :  { %v1822_v22 = vadd.f32 %v1344_v20, %v1280_v18  ;;  %v47_v18 = vld [vmem:[#allocation2 + $0x40] sm:$0xff]  ;;  %v42_v20 = vld [vmem:[#allocation2 + $0x18] sm:$0xff] }
 0x11e   :  { %v1281_v23 = vpop.f32.mrb[20].mxu0 }
 0x11f   :  { %v1345_v24 = vpop.f32.mrb[20].mxu1  ;;  %v1282_v25 = vpop.f32.mrb[21].mxu0 }
 0x120   :  { %v1283_v26 = vadd.f32 %v1282_v25, %v1281_v23  ;;  %v1346_v27 = vpop.f32.mrb[21].mxu1  ;;  %v1284_v28 = vpop.f32.mrb[22].mxu0 }
 0x121   :  { %v1347_v31 = vadd.f32 %v1346_v27, %v1345_v24  ;;  %v1348_v32 = vpop.f32.mrb[22].mxu1  ;;  %v1285_v33 = vpop.f32.mrb[23].mxu0  ;;  %v50_v27 = vld [vmem:[#allocation2 + $0x58] sm:$0xff] }
 0x122   :  { %v1286_v34 = vadd.f32 %v1285_v33, %v1284_v28  ;;  %v1349_v35 = vpop.f32.mrb[23].mxu1 }
 0x123   :  { %v1350_v36 = vadd.f32 %v1349_v35, %v1348_v32  ;;  %v803_v37 = vadd.f32 %v1347_v31, %v1283_v26  ;;  %v40_v31 = vld [vmem:[#allocation2 + $0x8] sm:$0xff] }
 0x125   :  { %v806_v38 = vadd.f32 %v1350_v36, %v1286_v34  ;;  %v48_v36 = vld [vmem:[#allocation2 + $0x48] sm:$0xff] }
 0x126   :  { %v1287_v39 = vpop.f32.mrb[24].mxu0 }
 0x127   :  { %v1351_v40 = vpop.f32.mrb[24].mxu1  ;;  %v1288_v41 = vpop.f32.mrb[25].mxu0 }
 0x128   :  { %v1289_v42 = vadd.f32 %v1288_v41, %v1287_v39  ;;  %v1352_v45 = vpop.f32.mrb[25].mxu1  ;;  %v1290_v46 = vpop.f32.mrb[26].mxu0 }
 0x129   :  { %v1353_v47 = vadd.f32 %v1352_v45, %v1351_v40  ;;  %v1354_v48 = vpop.f32.mrb[26].mxu1  ;;  %v1291_v49 = vpop.f32.mrb[27].mxu0 }
 0x12a   :  { %v1292_v50 = vadd.f32 %v1291_v49, %v1290_v46  ;;  %v1355_v51 = vpop.f32.mrb[27].mxu1  ;;  %v43_v46 = vld [vmem:[#allocation2 + $0x20] sm:$0xff] }
 0x12b   :  { %v1356_v52 = vadd.f32 %v1355_v51, %v1354_v48  ;;  %v1824_v53 = vadd.f32 %v1353_v47, %v1289_v42  ;;  %v53_v42 = vld [vmem:[#allocation2 + $0x70] sm:$0xff]  ;;  %v1847_v48 = vld [vmem:[%s1966_s2] ss:$0 sm:$0xff] }
 0x12c   :  { %v51_v51 = vld [vmem:[#allocation2 + $0x60] sm:$0xff] }
 0x12d   :  { %v1826_v54 = vadd.f32 %v1356_v52, %v1292_v50 }
 0x12e   :  { %v1293_v55 = vpop.f32.mrb[28].mxu0 }
 0x12f   :  { %v1357_v56 = vpop.f32.mrb[28].mxu1  ;;  %v1294_v59 = vpop.f32.mrb[29].mxu0 }
 0x130   :  { %v1295_v60 = vadd.f32 %v1294_v59, %v1293_v55  ;;  %v1358_v61 = vpop.f32.mrb[29].mxu1  ;;  %v1296_v62 = vpop.f32.mrb[30].mxu0  ;;  %v46_v55 = vld [vmem:[#allocation2 + $0x38] sm:$0xff] }
 0x131   :  { %v1359_v63 = vadd.f32 %v1358_v61, %v1357_v56  ;;  %v1360_v0 = vpop.f32.mrb[30].mxu1  ;;  %v1297_v1 = vpop.f32.mrb[31].mxu0  ;;  %v54_v61 = vld [vmem:[#allocation2 + $0x78] sm:$0xff] }
 0x132   :  { %v1298_v2 = vadd.f32 %v1297_v1, %v1296_v62  ;;  %v1361_v3 = vpop.f32.mrb[31].mxu1 }
 0x133   :  { %v1362_v4 = vadd.f32 %v1361_v3, %v1360_v0  ;;  %v819_v5 = vadd.f32 %v1359_v63, %v1295_v60  ;;  %v44_v63 = vld [vmem:[#allocation2 + $0x28] sm:$0xff] }
 0x135   :  { %v1828_v6 = vadd.f32 %v1362_v4, %v1298_v2  ;;  %v1855_v2 = vld [vmem:[%s1967_s3] ss:$0 sm:$0xff] }
 0x136   :  { %v1397_v10 = vpop.f32.mrb[32].mxu0 }
 0x137   :  { %v868_v11 = vadd.f32 %v1397_v10, %v1810_v43  ;;  %v1405_v13 = vpop.f32.mrb[32].mxu1  ;;  %v859_v15 = vpop.f32.mrb[33].mxu0 }
 0x138   :  { %v900_v16 = vadd.f32 %v1405_v13, %v803_v37  ;;  %v860_v17 = vadd.f32 %v859_v15, %v1806_v29  ;;  %v891_v19 = vpop.f32.mrb[33].mxu1  ;;  %v1398_v23 = vpop.f32.mrb[34].mxu0 }
 0x139   :  { %v924_v24 = vadd.f32 %v868_v11, %v41_v9  ;;  %v892_v25 = vadd.f32 %v891_v19, %v795_v21  ;;  %v871_v26 = vadd.f32 %v1398_v23, %v1812_v44  ;;  %v1406_v28 = vpop.f32.mrb[34].mxu1  ;;  %v862_v32 = vpop.f32.mrb[35].mxu0  ;;  %v52_v9 = vld [vmem:[#allocation2 + $0x68] sm:$0xff] }
 0x13a   :  { %v932_v43 = vadd.f32 %v900_v16, %v49_v12  ;;  %v922_v33 = vadd.f32 %v860_v17, %v39_v14  ;;  %v903_v34 = vadd.f32 %v1406_v28, %v806_v38  ;;  %v863_v35 = vadd.f32 %v862_v32, %v1808_v30  ;;  %v894_v37 = vpop.f32.mrb[35].mxu1  ;;  %v45_v30 = vld [vmem:[#allocation2 + $0x30] sm:$0xff] }
 0x13b   :  { %941 = vst.msk [vmem:[#allocation2 + $0x10] sm:$0xff] %vm22_vm0, %v924_v24  ;;  %v930_v29 = vadd.f32 %v892_v25, %v47_v18  ;;  %v925_v39 = vadd.f32 %v871_v26, %v42_v20  ;;  %v895_v40 = vadd.f32 %v894_v37, %v1822_v22 }
 0x13c   :  { %949 = vst.msk [vmem:[#allocation2 + $0x50] sm:$0xff] %vm22_vm0, %v932_v43  ;;  %939 = vst.msk [vmem:[#allocation2] sm:$0xff] %vm22_vm0, %v922_v33  ;;  %v933_v44 = vadd.f32 %v903_v34, %v50_v27  ;;  %v923_v21 = vadd.f32 %v863_v35, %v40_v31 }
 0x13d   :  { %947 = vst.msk [vmem:[#allocation2 + $0x40] sm:$0xff] %vm22_vm0, %v930_v29  ;;  %942 = vst.msk [vmem:[#allocation2 + $0x18] sm:$0xff] %vm22_vm0, %v925_v39  ;;  %v931_v38 = vadd.f32 %v895_v40, %v48_v36 }
 0x13e   :  { %950 = vst.msk [vmem:[#allocation2 + $0x58] sm:$0xff] %vm22_vm0, %v933_v44  ;;  %940 = vst.msk [vmem:[#allocation2 + $0x8] sm:$0xff] %vm22_vm0, %v923_v21  ;;  %v1401_v41 = vpop.f32.mrb[36].mxu0 }
 0x13f   :  { %948 = vst.msk [vmem:[#allocation2 + $0x48] sm:$0xff] %vm22_vm0, %v931_v38  ;;  %v884_v22 = vadd.f32 %v1401_v41, %v1818_v7  ;;  %v1409_v45 = vpop.f32.mrb[36].mxu1  ;;  %v875_v47 = vpop.f32.mrb[37].mxu0 }
 0x140   :  { %v916_v49 = vadd.f32 %v1409_v45, %v819_v5  ;;  %v876_v50 = vadd.f32 %v875_v47, %v1814_v57  ;;  %v907_v52 = vpop.f32.mrb[37].mxu1  ;;  %v1402_v56 = vpop.f32.mrb[38].mxu0 }
 0x141   :  { %v928_v59 = vadd.f32 %v884_v22, %v45_v30  ;;  %v908_v7 = vadd.f32 %v907_v52, %v1824_v53  ;;  %v887_v60 = vadd.f32 %v1402_v56, %v1820_v8  ;;  %v1410_v62 = vpop.f32.mrb[38].mxu1  ;;  %v878_v0 = vpop.f32.mrb[39].mxu0 }
 0x142   :  { %v960_v1 = vld [vmem:[#allocation2 + $0x10] sm:$0xff]  ;;  %v936_v57 = vadd.f32 %v916_v49, %v53_v42  ;;  %v926_v3 = vadd.f32 %v876_v50, %v43_v46  ;;  %v919_v4 = vadd.f32 %v1410_v62, %v1828_v6  ;;  %v879_v5 = vadd.f32 %v878_v0, %v1816_v58  ;;  %v910_v53 = vpop.f32.mrb[39].mxu1 }
 0x143   :  { %v983_v8 = vmul.f32 %v1847_v48, %v960_v1  ;;  %v968_v10 = vld [vmem:[#allocation2 + $0x50] sm:$0xff]  ;;  %v958_v11 = vld [vmem:[#allocation2] sm:$0xff]  ;;  %945 = vst.msk [vmem:[#allocation2 + $0x30] sm:$0xff] %vm22_vm0, %v928_v59  ;;  %v934_v12 = vadd.f32 %v908_v7, %v51_v51  ;;  %v929_v13 = vadd.f32 %v887_v60, %v46_v55  ;;  %v911_v14 = vadd.f32 %v910_v53, %v1826_v54 }
 0x144   :  { %v991_v15 = vmul.f32 %v1847_v48, %v968_v10  ;;  %v981_v16 = vmul.f32 %v1847_v48, %v958_v11  ;;  %v966_v17 = vld [vmem:[#allocation2 + $0x40] sm:$0xff]  ;;  %v961_v6 = vld [vmem:[#allocation2 + $0x18] sm:$0xff]  ;;  %953 = vst.msk [vmem:[#allocation2 + $0x70] sm:$0xff] %vm22_vm0, %v936_v57  ;;  %943 = vst.msk [vmem:[#allocation2 + $0x20] sm:$0xff] %vm22_vm0, %v926_v3  ;;  %v937_v58 = vadd.f32 %v919_v4, %v54_v61 }
 0x145   :  { %v927_v18 = vadd.f32 %v879_v5, %v44_v63  ;;  %v1006_v19 = vadd.f32 %v1855_v2, %v983_v8  ;;  %v989_v20 = vmul.f32 %v1847_v48, %v966_v17  ;;  %v984_v23 = vmul.f32 %v1847_v48, %v961_v6  ;;  %v969_v24 = vld [vmem:[#allocation2 + $0x58] sm:$0xff]  ;;  %v959_v54 = vld [vmem:[#allocation2 + $0x8] sm:$0xff]  ;;  %951 = vst.msk [vmem:[#allocation2 + $0x60] sm:$0xff] %vm22_vm0, %v934_v12 }
 0x146   :  { %946 = vst.msk [vmem:[#allocation2 + $0x38] sm:$0xff] %vm22_vm0, %v929_v13  ;;  %v935_v25 = vadd.f32 %v911_v14, %v52_v9  ;;  %v1014_v26 = vadd.f32 %v1855_v2, %v991_v15  ;;  %v1004_v27 = vadd.f32 %v1855_v2, %v981_v16  ;;  %v992_v28 = vmul.f32 %v1847_v48, %v969_v24  ;;  %v967_v32 = vld [vmem:[#allocation2 + $0x48] sm:$0xff] }
 0x147   :  { %v982_v31 = vmul.f32 %v1847_v48, %v959_v54  ;;  %954 = vst.msk [vmem:[#allocation2 + $0x78] sm:$0xff] %vm22_vm0, %v937_v58  ;;  %944 = vst.msk [vmem:[#allocation2 + $0x28] sm:$0xff] %vm22_vm0, %v927_v18  ;;  %v1022_v43 = vmax.f32 %v1006_v19, 0.0  ;;  %v1012_v33 = vadd.f32 %v1855_v2, %v989_v20  ;;  %v1007_v34 = vadd.f32 %v1855_v2, %v984_v23 }
 0x148   :  { %v990_v35 = vmul.f32 %v1847_v48, %v967_v32  ;;  %952 = vst.msk [vmem:[#allocation2 + $0x68] sm:$0xff] %vm22_vm0, %v935_v25  ;;  %v1030_v36 = vmax.f32 %v1014_v26, 0.0  ;;  %v1020_v37 = vmax.f32 %v1004_v27, 0.0  ;;  %v1015_v29 = vadd.f32 %v1855_v2, %v992_v28 }
 0x149   :  { %v1005_v39 = vadd.f32 %v1855_v2, %v982_v31  ;;  %v1221_v40 = vpack.c.bf16 %v1022_v43, %v1022_v43  ;;  %v1028_v44 = vmax.f32 %v1012_v33, 0.0  ;;  %v1023_v21 = vmax.f32 %v1007_v34, 0.0 }
 0x14a   :  { %v1013_v38 = vadd.f32 %v1855_v2, %v990_v35  ;;  %v1229_v30 = vpack.c.bf16 %v1030_v36, %v1030_v36  ;;  %v1219_v41 = vpack.c.bf16 %v1020_v37, %v1020_v37  ;;  %v1031_v22 = vmax.f32 %v1015_v29, 0.0  ;;  %v964_v45 = vld [vmem:[#allocation2 + $0x30] sm:$0xff] }
 0x14b   :  { %v1021_v42 = vmax.f32 %v1005_v39, 0.0  ;;  %1103 = vst.msk [vmem:[%s1968_s4 + $0x8] sm:$0xf] %vm1100_vm1, %v1221_v40  ;;  %v1227_v46 = vpack.c.bf16 %v1028_v44, %v1028_v44  ;;  %v1222_v47 = vpack.c.bf16 %v1023_v21, %v1023_v21  ;;  %v987_v50 = vmul.f32 %v1847_v48, %v964_v45  ;;  %v972_v51 = vld [vmem:[#allocation2 + $0x70] sm:$0xff]  ;;  %v962_v52 = vld [vmem:[#allocation2 + $0x20] sm:$0xff] }
 0x14c   :  { %v1029_v49 = vmax.f32 %v1013_v38, 0.0  ;;  %1111 = vst.msk [vmem:[%s1968_s4 + $0x28] sm:$0xf] %vm1100_vm1, %v1229_v30  ;;  %1101 = vst.msk [vmem:[%s1968_s4] sm:$0xf] %vm1100_vm1, %v1219_v41  ;;  %v1230_v55 = vpack.c.bf16 %v1031_v22, %v1031_v22  ;;  %v995_v59 = vmul.f32 %v1847_v48, %v972_v51  ;;  %v985_v7 = vmul.f32 %v1847_v48, %v962_v52  ;;  %v970_v60 = vld [vmem:[#allocation2 + $0x60] sm:$0xff] }
 0x14d   :  { %v1220_v56 = vpack.c.bf16 %v1021_v42, %v1021_v42  ;;  %v965_v61 = vld [vmem:[#allocation2 + $0x38] sm:$0xff]  ;;  %1109 = vst.msk [vmem:[%s1968_s4 + $0x20] sm:$0xf] %vm1100_vm1, %v1227_v46  ;;  %1104 = vst.msk [vmem:[%s1968_s4 + $0xc] sm:$0xf] %vm1100_vm1, %v1222_v47  ;;  %v1010_v63 = vadd.f32 %v1855_v2, %v987_v50  ;;  %v993_v0 = vmul.f32 %v1847_v48, %v970_v60 }
 0x14e   :  { %v1228_v62 = vpack.c.bf16 %v1029_v49, %v1029_v49  ;;  %v988_v1 = vmul.f32 %v1847_v48, %v965_v61  ;;  %v973_v57 = vld [vmem:[#allocation2 + $0x78] sm:$0xff]  ;;  %v963_v3 = vld [vmem:[#allocation2 + $0x28] sm:$0xff]  ;;  %1112 = vst.msk [vmem:[%s1968_s4 + $0x2c] sm:$0xf] %vm1100_vm1, %v1230_v55  ;;  %v1018_v4 = vadd.f32 %v1855_v2, %v995_v59  ;;  %v1008_v5 = vadd.f32 %v1855_v2, %v985_v7 }
 0x14f   :  { %1102 = vst.msk [vmem:[%s1968_s4 + $0x4] sm:$0xf] %vm1100_vm1, %v1220_v56  ;;  %v996_v9 = vmul.f32 %v1847_v48, %v973_v57  ;;  %v986_v53 = vmul.f32 %v1847_v48, %v963_v3  ;;  %v971_v8 = vld [vmem:[#allocation2 + $0x68] sm:$0xff]  ;;  %v1026_v10 = vmax.f32 %v1010_v63, 0.0  ;;  %v1016_v11 = vadd.f32 %v1855_v2, %v993_v0 }
 0x150   :  { %1110 = vst.msk [vmem:[%s1968_s4 + $0x24] sm:$0xf] %vm1100_vm1, %v1228_v62  ;;  %v1011_v12 = vadd.f32 %v1855_v2, %v988_v1  ;;  %v994_v13 = vmul.f32 %v1847_v48, %v971_v8  ;;  %v1034_v14 = vmax.f32 %v1018_v4, 0.0  ;;  %v1024_v15 = vmax.f32 %v1008_v5, 0.0 }
 0x151   :  { %v1019_v16 = vadd.f32 %v1855_v2, %v996_v9  ;;  %v1009_v17 = vadd.f32 %v1855_v2, %v986_v53  ;;  %v1225_v6 = vpack.c.bf16 %v1026_v10, %v1026_v10  ;;  %v1032_v58 = vmax.f32 %v1016_v11, 0.0 }
 0x152   :  { %v1027_v18 = vmax.f32 %v1011_v12, 0.0  ;;  %v1017_v19 = vadd.f32 %v1855_v2, %v994_v13  ;;  %v1233_v20 = vpack.c.bf16 %v1034_v14, %v1034_v14  ;;  %v1223_v23 = vpack.c.bf16 %v1024_v15, %v1024_v15 }
 0x153   :  { %v1035_v24 = vmax.f32 %v1019_v16, 0.0  ;;  %v1025_v54 = vmax.f32 %v1009_v17, 0.0  ;;  %1107 = vst.msk [vmem:[%s1968_s4 + $0x18] sm:$0xf] %vm1100_vm1, %v1225_v6  ;;  %v1231_v48 = vpack.c.bf16 %v1032_v58, %v1032_v58 }
 0x154   :  { %v1226_v25 = vpack.c.bf16 %v1027_v18, %v1027_v18  ;;  %v1033_v26 = vmax.f32 %v1017_v19, 0.0  ;;  %1115 = vst.msk [vmem:[%s1968_s4 + $0x38] sm:$0xf] %vm1100_vm1, %v1233_v20  ;;  %1105 = vst.msk [vmem:[%s1968_s4 + $0x10] sm:$0xf] %vm1100_vm1, %v1223_v23 }
 0x155   :  { %v1234_v2 = vpack.c.bf16 %v1035_v24, %v1035_v24  ;;  %v1224_v27 = vpack.c.bf16 %v1025_v54, %v1025_v54  ;;  %1113 = vst.msk [vmem:[%s1968_s4 + $0x30] sm:$0xf] %vm1100_vm1, %v1231_v48 }
 0x156   :  { %1108 = vst.msk [vmem:[%s1968_s4 + $0x1c] sm:$0xf] %vm1100_vm1, %v1226_v25  ;;  %v1232_v28 = vpack.c.bf16 %v1033_v26, %v1033_v26 }
 0x157   :  { %1116 = vst.msk [vmem:[%s1968_s4 + $0x3c] sm:$0xf] %vm1100_vm1, %v1234_v2  ;;  %1106 = vst.msk [vmem:[%s1968_s4 + $0x14] sm:$0xf] %vm1100_vm1, %v1224_v27 }
 0x158   :  { %1114 = vst.msk [vmem:[%s1968_s4 + $0x34] sm:$0xf] %vm1100_vm1, %v1232_v28 }

// kernel: _lambda_.15
= control target key start
LH: loop header
LB: loop body
LE: loop exit
PB: predicated region body
PF: predicated region fallthrough
CT: control target
= control target key end

     0   :  { %vm25_vm0 = vcmask 523264   ;;  %vm1151_vm1 = vcmask 519168   ;;  %s2153_s1 = inlined_call_operand.vmem [shape: bf16[640,64], index: 1, kind: input, shape index: {}]   ;;  %s2154_s0 = inlined_call_operand.vmem [shape: bf16[128,640], index: 0, kind: input, shape index: {}]   ;;  %s2155_s4 = inlined_call_operand.vmem [shape: bf16[128,64], index: 4, kind: input, shape index: {}]   ;;  %s2156_s2 = inlined_call_operand.vmem [shape: f32[1,64], index: 2, kind: input, shape index: {}]   ;;  %s2157_s3 = inlined_call_operand.vmem [shape: f32[1,64], index: 3, kind: input, shape index: {}]   ;;  %s2158_s5 = inlined_call_operand.vmem [shape: bf16[128,64], index: 5, kind: output, shape index: {}]  }
   0x1   :  { %v1518_v0 = vld [vmem:[%s2153_s1 + $0x40] sm:$0xff]   ;;  %v1522_v4 = vld [vmem:[%s2153_s1 + $0x48] sm:$0xff]   ;;  %v1526_v8 = vld [vmem:[%s2153_s1 + $0x50] sm:$0xff]  }
   0x2   :  { %v1519_v1 = vld [vmem:[%s2153_s1 + $0xc0] sm:$0xff]   ;;  %1325 = vmatprep.subr.bf16.mxu0 %v1518_v0  ;;  %v1523_v5 = vld [vmem:[%s2153_s1 + $0xc8] sm:$0xff]   ;;  %v1527_v9 = vld [vmem:[%s2153_s1 + $0xd0] sm:$0xff]  }
   0x3   :  { %v1520_v2 = vld [vmem:[%s2153_s1] sm:$0xff]   ;;  %1389 = vmatprep.subr.bf16.mxu1 %v1519_v1  ;;  %v1524_v6 = vld [vmem:[%s2153_s1 + $0x8] sm:$0xff]   ;;  %v1528_v10 = vld [vmem:[%s2153_s1 + $0x10] sm:$0xff]  }
   0x4   :  { %v1521_v3 = vld [vmem:[%s2153_s1 + $0x80] sm:$0xff]   ;;  %1326 = vmatpush3.bf16.msra.mxu0 %v1520_v2  ;;  %v1525_v7 = vld [vmem:[%s2153_s1 + $0x88] sm:$0xff]   ;;  %v1529_v11 = vld [vmem:[%s2153_s1 + $0x90] sm:$0xff]  }
   0x5   :  { %1390 = vmatpush3.bf16.msra.mxu1 %v1521_v3  ;;  %1327 = vmatprep.subr.bf16.mxu0 %v1522_v4  ;;  %v1530_v12 = vld [vmem:[%s2153_s1 + $0x58] sm:$0xff]   ;;  %v1534_v16 = vld [vmem:[%s2153_s1 + $0x60] sm:$0xff]   ;;  %v1538_v20 = vld [vmem:[%s2153_s1 + $0x68] sm:$0xff]  }
   0x6   :  { %1391 = vmatprep.subr.bf16.mxu1 %v1523_v5  ;;  %v1531_v13 = vld [vmem:[%s2153_s1 + $0xd8] sm:$0xff]   ;;  %v1535_v17 = vld [vmem:[%s2153_s1 + $0xe0] sm:$0xff]   ;;  %v1539_v21 = vld [vmem:[%s2153_s1 + $0xe8] sm:$0xff]  }
   0x7   :  { %v1532_v14 = vld [vmem:[%s2153_s1 + $0x18] sm:$0xff]   ;;  %v1536_v18 = vld [vmem:[%s2153_s1 + $0x20] sm:$0xff]   ;;  %v1540_v22 = vld [vmem:[%s2153_s1 + $0x28] sm:$0xff]  }
   0x8   :  { %1328 = vmatpush3.bf16.msra.mxu0 %v1524_v6  ;;  %v1533_v15 = vld [vmem:[%s2153_s1 + $0x98] sm:$0xff]   ;;  %v1537_v19 = vld [vmem:[%s2153_s1 + $0xa0] sm:$0xff]   ;;  %v1541_v23 = vld [vmem:[%s2153_s1 + $0xa8] sm:$0xff]  }
   0x9   :  { %1392 = vmatpush3.bf16.msra.mxu1 %v1525_v7  ;;  %1329 = vmatprep.subr.bf16.mxu0 %v1526_v8  ;;  %v1542_v24 = vld [vmem:[%s2153_s1 + $0x70] sm:$0xff]   ;;  %v1546_v28 = vld [vmem:[%s2153_s1 + $0x78] sm:$0xff]   ;;  %v1555_v35 = vld [vmem:[%s2154_s0 + $0xc] ss:$20 sps:$4 sm:$0xff]  }
   0xa   :  { %1393 = vmatprep.subr.bf16.mxu1 %v1527_v9  ;;  %v1543_v25 = vld [vmem:[%s2153_s1 + $0xf0] sm:$0xff]   ;;  %v1547_v29 = vld [vmem:[%s2153_s1 + $0xf8] sm:$0xff]   ;;  %v1556_v36 = vld [vmem:[%s2153_s1 + $0x100] sm:$0xff]   ;;  %763 = vmatprep.mubr.bf16.mxu1 %v1555_v35 }
   0xb   :  { %v1544_v26 = vld [vmem:[%s2153_s1 + $0x30] sm:$0xff]   ;;  %v1548_v30 = vld [vmem:[%s2153_s1 + $0x38] sm:$0xff]   ;;  %v1557_v37 = vld [vmem:[%s2154_s0 + $0x2c] ss:$20 sps:$4 sm:$0xff]  }
   0xc   :  { %1330 = vmatpush3.bf16.msra.mxu0 %v1528_v10  ;;  %v1545_v27 = vld [vmem:[%s2153_s1 + $0xb0] sm:$0xff]   ;;  %v1549_v31 = vld [vmem:[%s2153_s1 + $0xb8] sm:$0xff]   ;;  %v1563_v39 = vld [vmem:[%s2153_s1 + $0x108] sm:$0xff]  }
   0xd   :  { %1394 = vmatpush3.bf16.msra.mxu1 %v1529_v11  ;;  %1331 = vmatprep.subr.bf16.mxu0 %v1530_v12  ;;  %v1550_v32 = vld [vmem:[%s2154_s0] ss:$20 sps:$4 sm:$0xff]   ;;  %v1552_v33 = vld [vmem:[%s2154_s0 + $0x4] ss:$20 sps:$4 sm:$0xff]   ;;  %v1553_v34 = vld [vmem:[%s2154_s0 + $0x8] ss:$20 sps:$4 sm:$0xff]  }
   0xe   :  { %1395 = vmatprep.subr.bf16.mxu1 %v1531_v13  ;;  %666 = vmatprep.mubr.bf16.mxu0 %v1552_v33  ;;  %v1559_v38 = vld [vmem:[%s2154_s0 + $0x34] ss:$20 sps:$4 sm:$0xff]   ;;  %v1562_v41 = vld [vmem:[%s2154_s0 + $0x30] ss:$20 sps:$4 sm:$0xff]   ;;  %v1577_v45 = vld [vmem:[%s2153_s1 + $0x118] sm:$0xff]  }
   0xf   :  { %v1561_v40 = vld [vmem:[%s2154_s0 + $0x28] ss:$20 sps:$4 sm:$0xff]   ;;  %v1570_v44 = vld [vmem:[%s2153_s1 + $0x110] sm:$0xff]   ;;  %v1569_v47 = vld [vmem:[%s2154_s0 + $0x58] ss:$20 sps:$4 sm:$0xff]  }
  0x10   :  { %1332 = vmatpush3.bf16.msra.mxu0 %v1532_v14  ;;  %v1564_v42 = vld [vmem:[%s2154_s0 + $0x54] ss:$20 sps:$4 sm:$0xff]   ;;  %v1566_v43 = vld [vmem:[%s2154_s0 + $0x5c] ss:$20 sps:$4 sm:$0xff]   ;;  %v1573_v49 = vld [vmem:[%s2154_s0 + $0x84] ss:$20 sps:$4 sm:$0xff]  }
  0x11   :  { %1396 = vmatpush3.bf16.msra.mxu1 %v1533_v15  ;;  %1333 = vmatprep.subr.bf16.mxu0 %v1534_v16  ;;  %v1568_v46 = vld [vmem:[%s2154_s0 + $0x50] ss:$20 sps:$4 sm:$0xff]   ;;  %v1591_v51 = vld [vmem:[%s2153_s1 + $0x128] sm:$0xff]   ;;  %v1576_v53 = vld [vmem:[%s2154_s0 + $0x80] ss:$20 sps:$4 sm:$0xff]   ;;  %v1614_v16 = vmov 0.0  }
  0x12   :  { %1397 = vmatprep.subr.bf16.mxu1 %v1535_v17  ;;  %v1571_v48 = vld [vmem:[%s2154_s0 + $0x7c] ss:$20 sps:$4 sm:$0xff]   ;;  %v1584_v50 = vld [vmem:[%s2153_s1 + $0x120] sm:$0xff]   ;;  %v1575_v52 = vld [vmem:[%s2154_s0 + $0x78] ss:$20 sps:$4 sm:$0xff]   ;;  %28 = vst.msk [vmem:[#allocation2 + $0x10] sm:$0xff] %vm25_vm0, %v1614_v16 }
  0x13   :  { %v1578_v54 = vld [vmem:[%s2154_s0 + $0xa4] ss:$20 sps:$4 sm:$0xff]   ;;  %v1598_v55 = vld [vmem:[%s2153_s1 + $0x130] sm:$0xff]   ;;  %v1580_v56 = vld [vmem:[%s2154_s0 + $0xac] ss:$20 sps:$4 sm:$0xff]   ;;  %26 = vst.msk [vmem:[#allocation2] sm:$0xff] %vm25_vm0, %v1614_v16 }
  0x14   :  { %1334 = vmatpush3.bf16.msra.mxu0 %v1536_v18  ;;  %v1605_v57 = vld [vmem:[%s2153_s1 + $0x138] sm:$0xff]   ;;  %v1582_v58 = vld [vmem:[%s2154_s0 + $0xa0] ss:$20 sps:$4 sm:$0xff]   ;;  %v1590_v63 = vld [vmem:[%s2154_s0 + $0xd0] ss:$20 sps:$4 sm:$0xff]   ;;  %27 = vst.msk [vmem:[#allocation2 + $0x8] sm:$0xff] %vm25_vm0, %v1614_v16 }
  0x15   :  { %1398 = vmatpush3.bf16.msra.mxu1 %v1537_v19  ;;  %1335 = vmatprep.subr.bf16.mxu0 %v1538_v20  ;;  %v1583_v59 = vld [vmem:[%s2154_s0 + $0xa8] ss:$20 sps:$4 sm:$0xff]   ;;  %v1585_v60 = vld [vmem:[%s2154_s0 + $0xcc] ss:$20 sps:$4 sm:$0xff]   ;;  %v1596_v2 = vld [vmem:[%s2154_s0 + $0xf0] ss:$20 sps:$4 sm:$0xff]  }
  0x16   :  { %1399 = vmatprep.subr.bf16.mxu1 %v1539_v21  ;;  %v1587_v61 = vld [vmem:[%s2154_s0 + $0xd4] ss:$20 sps:$4 sm:$0xff]   ;;  %v1594_v1 = vld [vmem:[%s2154_s0 + $0xfc] ss:$20 sps:$4 sm:$0xff]   ;;  %v1597_v3 = vld [vmem:[%s2154_s0 + $0xf8] ss:$20 sps:$4 sm:$0xff]  }
  0x17   :  { %v1589_v62 = vld [vmem:[%s2154_s0 + $0xc8] ss:$20 sps:$4 sm:$0xff]   ;;  %v1601_v5 = vld [vmem:[%s2154_s0 + $0x124] ss:$20 sps:$4 sm:$0xff]   ;;  %v1604_v7 = vld [vmem:[%s2154_s0 + $0x120] ss:$20 sps:$4 sm:$0xff]  }
  0x18   :  { %1336 = vmatpush3.bf16.msra.mxu0 %v1540_v22  ;;  %v1592_v0 = vld [vmem:[%s2154_s0 + $0xf4] ss:$20 sps:$4 sm:$0xff]   ;;  %v1599_v4 = vld [vmem:[%s2154_s0 + $0x11c] ss:$20 sps:$4 sm:$0xff]   ;;  %v1603_v6 = vld [vmem:[%s2154_s0 + $0x118] ss:$20 sps:$4 sm:$0xff]  }
  0x19   :  { %1400 = vmatpush3.bf16.msra.mxu1 %v1541_v23  ;;  %1337 = vmatprep.subr.bf16.mxu0 %v1542_v24  ;;  %v1606_v8 = vld [vmem:[%s2154_s0 + $0x10] ss:$20 sps:$4 sm:$0xff]   ;;  %v1608_v10 = vld [vmem:[%s2154_s0 + $0x38] ss:$20 sps:$4 sm:$0xff]   ;;  %v1610_v12 = vld [vmem:[%s2154_s0 + $0x60] ss:$20 sps:$4 sm:$0xff]  }
  0x1a   :  { %1401 = vmatprep.subr.bf16.mxu1 %v1543_v25  ;;  %v1607_v9 = vld [vmem:[%s2154_s0 + $0xb0] ss:$20 sps:$4 sm:$0xff]   ;;  %v1609_v11 = vld [vmem:[%s2154_s0 + $0xd8] ss:$20 sps:$4 sm:$0xff]   ;;  %v1611_v13 = vld [vmem:[%s2154_s0 + $0x100] ss:$20 sps:$4 sm:$0xff]  }
  0x1b   :  { %v1612_v14 = vld [vmem:[%s2154_s0 + $0x88] ss:$20 sps:$4 sm:$0xff]   ;;  %29 = vst.msk [vmem:[#allocation2 + $0x18] sm:$0xff] %vm25_vm0, %v1614_v16  ;;  %30 = vst.msk [vmem:[#allocation2 + $0x20] sm:$0xff] %vm25_vm0, %v1614_v16 }
  0x1c   :  { %1338 = vmatpush3.bf16.msra.mxu0 %v1544_v26  ;;  %v1613_v15 = vld [vmem:[%s2154_s0 + $0x128] ss:$20 sps:$4 sm:$0xff]   ;;  %31 = vst.msk [vmem:[#allocation2 + $0x28] sm:$0xff] %vm25_vm0, %v1614_v16  ;;  %32 = vst.msk [vmem:[#allocation2 + $0x30] sm:$0xff] %vm25_vm0, %v1614_v16 }
  0x1d   :  { %1402 = vmatpush3.bf16.msra.mxu1 %v1545_v27  ;;  %1339 = vmatprep.subr.bf16.mxu0 %v1546_v28  ;;  %33 = vst.msk [vmem:[#allocation2 + $0x38] sm:$0xff] %vm25_vm0, %v1614_v16  ;;  %34 = vst.msk [vmem:[#allocation2 + $0x40] sm:$0xff] %vm25_vm0, %v1614_v16 }
  0x1e   :  { %1403 = vmatprep.subr.bf16.mxu1 %v1547_v29  ;;  %35 = vst.msk [vmem:[#allocation2 + $0x48] sm:$0xff] %vm25_vm0, %v1614_v16  ;;  %36 = vst.msk [vmem:[#allocation2 + $0x50] sm:$0xff] %vm25_vm0, %v1614_v16 }
  0x1f   :  { %37 = vst.msk [vmem:[#allocation2 + $0x58] sm:$0xff] %vm25_vm0, %v1614_v16  ;;  %38 = vst.msk [vmem:[#allocation2 + $0x60] sm:$0xff] %vm25_vm0, %v1614_v16 }
  0x20   :  { %1340 = vmatpush3.bf16.msra.mxu0 %v1548_v30  ;;  %39 = vst.msk [vmem:[#allocation2 + $0x68] sm:$0xff] %vm25_vm0, %v1614_v16  ;;  %40 = vst.msk [vmem:[#allocation2 + $0x70] sm:$0xff] %vm25_vm0, %v1614_v16 }
  0x21   :  { %1404 = vmatpush3.bf16.msra.mxu1 %v1549_v31  ;;  %1469 = vmatprep.subr.bf16.mxu0 %v1556_v36  ;;  %41 = vst.msk [vmem:[#allocation2 + $0x78] sm:$0xff] %vm25_vm0, %v1614_v16 }
  0x22   :  { %1501 = vmatprep.subr.bf16.mxu1 %v1556_v36 }
  0x23   :  { %667 = vmatmul.mubr.bf16.vlgmr.msra.gmra.mrb[0].mxu0 %v1550_v32 }
  0x24   :  { %764 = vmatmul.mubr.bf16.vlgmr.msra.gmra.mrb[0].mxu1 %v1553_v34  ;;  %1470 = vmatpush3.bf16.msra.mxu0 %v1556_v36 }
  0x25   :  { %1509 = vmatpush3.bf16.msra.mxu1 %v1556_v36  ;;  %674 = vmatprep.mubr.bf16.mxu0 %v1557_v37 }
  0x26   :  { %771 = vmatprep.mubr.bf16.mxu1 %v1559_v38  ;;  %1471 = vmatprep.subr.bf16.mxu0 %v1563_v39 }
  0x27   :  { %1502 = vmatprep.subr.bf16.mxu1 %v1563_v39 }
  0x28   :  { %1472 = vmatpush3.bf16.msra.mxu0 %v1563_v39 }
  0x29   :  { %1510 = vmatpush3.bf16.msra.mxu1 %v1563_v39  ;;  %1473 = vmatprep.subr.bf16.mxu0 %v1570_v44 }
  0x2a   :  { %1503 = vmatprep.subr.bf16.mxu1 %v1570_v44 }
  0x2b   :  { %675 = vmatmul.mubr.bf16.gmra.mrb[4].mxu0 %v1561_v40 }
  0x2c   :  { %772 = vmatmul.mubr.bf16.gmra.mrb[4].mxu1 %v1562_v41  ;;  %682 = vmatprep.mubr.bf16.mxu0 %v1564_v42 }
  0x2d   :  { %779 = vmatprep.mubr.bf16.mxu1 %v1566_v43  ;;  %1474 = vmatpush3.bf16.msra.mxu0 %v1570_v44 }
  0x2e   :  { %1511 = vmatpush3.bf16.msra.mxu1 %v1570_v44  ;;  %1475 = vmatprep.subr.bf16.mxu0 %v1577_v45 }
  0x2f   :  { %1504 = vmatprep.subr.bf16.mxu1 %v1577_v45 }
  0x31   :  { %1476 = vmatpush3.bf16.msra.mxu0 %v1577_v45 }
  0x32   :  { %1512 = vmatpush3.bf16.msra.mxu1 %v1577_v45  ;;  %1477 = vmatprep.subr.bf16.mxu0 %v1584_v50 }
  0x33   :  { %683 = vmatmul.mubr.bf16.gmra.mrb[8].mxu0 %v1568_v46  ;;  %1505 = vmatprep.subr.bf16.mxu1 %v1584_v50 }
  0x34   :  { %780 = vmatmul.mubr.bf16.gmra.mrb[8].mxu1 %v1569_v47  ;;  %690 = vmatprep.mubr.bf16.mxu0 %v1571_v48 }
  0x35   :  { %787 = vmatprep.mubr.bf16.mxu1 %v1573_v49  ;;  %1478 = vmatpush3.bf16.msra.mxu0 %v1584_v50 }
  0x36   :  { %1513 = vmatpush3.bf16.msra.mxu1 %v1584_v50  ;;  %1479 = vmatprep.subr.bf16.mxu0 %v1591_v51 }
  0x37   :  { %1506 = vmatprep.subr.bf16.mxu1 %v1591_v51 }
  0x39   :  { %1480 = vmatpush3.bf16.msra.mxu0 %v1591_v51 }
  0x3a   :  { %1514 = vmatpush3.bf16.msra.mxu1 %v1591_v51  ;;  %1481 = vmatprep.subr.bf16.mxu0 %v1598_v55 }
  0x3b   :  { %691 = vmatmul.mubr.bf16.gmra.mrb[12].mxu0 %v1575_v52  ;;  %1507 = vmatprep.subr.bf16.mxu1 %v1598_v55 }
  0x3c   :  { %788 = vmatmul.mubr.bf16.gmra.mrb[12].mxu1 %v1576_v53  ;;  %698 = vmatprep.mubr.bf16.mxu0 %v1578_v54 }
  0x3d   :  { %795 = vmatprep.mubr.bf16.mxu1 %v1580_v56  ;;  %1482 = vmatpush3.bf16.msra.mxu0 %v1598_v55 }
  0x3e   :  { %1515 = vmatpush3.bf16.msra.mxu1 %v1598_v55  ;;  %1483 = vmatprep.subr.bf16.mxu0 %v1605_v57 }
  0x3f   :  { %1508 = vmatprep.subr.bf16.mxu1 %v1605_v57 }
  0x41   :  { %1484 = vmatpush3.bf16.msra.mxu0 %v1605_v57 }
  0x42   :  { %1516 = vmatpush3.bf16.msra.mxu1 %v1605_v57 }
  0x43   :  { %699 = vmatmul.mubr.bf16.gmra.mrb[16].mxu0 %v1582_v58 }
  0x44   :  { %796 = vmatmul.mubr.bf16.gmra.mrb[16].mxu1 %v1583_v59  ;;  %706 = vmatprep.mubr.bf16.mxu0 %v1585_v60 }
  0x45   :  { %803 = vmatprep.mubr.bf16.mxu1 %v1587_v61 }
  0x4b   :  { %707 = vmatmul.mubr.bf16.gmra.mrb[20].mxu0 %v1589_v62 }
  0x4c   :  { %804 = vmatmul.mubr.bf16.gmra.mrb[20].mxu1 %v1590_v63  ;;  %714 = vmatprep.mubr.bf16.mxu0 %v1592_v0 }
  0x4d   :  { %811 = vmatprep.mubr.bf16.mxu1 %v1594_v1 }
  0x53   :  { %715 = vmatmul.mubr.bf16.gmra.mrb[24].mxu0 %v1596_v2 }
  0x54   :  { %812 = vmatmul.mubr.bf16.gmra.mrb[24].mxu1 %v1597_v3  ;;  %722 = vmatprep.mubr.bf16.mxu0 %v1599_v4 }
  0x55   :  { %819 = vmatprep.mubr.bf16.mxu1 %v1601_v5 }
  0x5b   :  { %723 = vmatmul.mubr.bf16.gmra.mrb[28].mxu0 %v1603_v6 }
  0x5c   :  { %820 = vmatmul.mubr.bf16.gmra.mrb[28].mxu1 %v1604_v7  ;;  %1485 = vmatprep.mubr.bf16.mxu0 %v1606_v8 }
  0x5d   :  { %1493 = vmatprep.mubr.bf16.mxu1 %v1607_v9 }
  0x63   :  { %1486 = vmatmul.mubr.bf16.vlgmr.msra.gmra.mrb[32].mxu0 %v1608_v10 }
  0x64   :  { %1494 = vmatmul.mubr.bf16.vlgmr.msra.gmra.mrb[32].mxu1 %v1609_v11  ;;  %1489 = vmatprep.mubr.bf16.mxu0 %v1610_v12 }
  0x65   :  { %1497 = vmatprep.mubr.bf16.mxu1 %v1611_v13 }
  0x6b   :  { %1490 = vmatmul.mubr.bf16.gmra.mrb[36].mxu0 %v1612_v14 }
  0x6c   :  { %1498 = vmatmul.mubr.bf16.gmra.mrb[36].mxu1 %v1613_v15 }
  0xf6   :  { %v1341_v17 = vpop.f32.mrb[0].mxu0 }
  0xf7   :  { %v1405_v18 = vpop.f32.mrb[0].mxu1  ;;  %v1342_v19 = vpop.f32.mrb[1].mxu0 }
  0xf8   :  { %v1343_v20 = vadd.f32 %v1342_v19, %v1341_v17  ;;  %v1406_v21 = vpop.f32.mrb[1].mxu1  ;;  %v1344_v22 = vpop.f32.mrb[2].mxu0 }
  0xf9   :  { %v1407_v23 = vadd.f32 %v1406_v21, %v1405_v18  ;;  %v1408_v24 = vpop.f32.mrb[2].mxu1  ;;  %v1345_v25 = vpop.f32.mrb[3].mxu0 }
  0xfa   :  { %v1346_v26 = vadd.f32 %v1345_v25, %v1344_v22  ;;  %v1409_v27 = vpop.f32.mrb[3].mxu1 }
  0xfb   :  { %v1410_v28 = vadd.f32 %v1409_v27, %v1408_v24  ;;  %v1901_v29 = vadd.f32 %v1407_v23, %v1343_v20 }
  0xfd   :  { %v1903_v30 = vadd.f32 %v1410_v28, %v1346_v26 }
  0xfe   :  { %v1347_v31 = vpop.f32.mrb[4].mxu0 }
  0xff   :  { %v1411_v32 = vpop.f32.mrb[4].mxu1  ;;  %v1348_v33 = vpop.f32.mrb[5].mxu0 }
 0x100   :  { %v1349_v34 = vadd.f32 %v1348_v33, %v1347_v31  ;;  %v1412_v35 = vpop.f32.mrb[5].mxu1  ;;  %v1350_v36 = vpop.f32.mrb[6].mxu0 }
 0x101   :  { %v1413_v37 = vadd.f32 %v1412_v35, %v1411_v32  ;;  %v1414_v38 = vpop.f32.mrb[6].mxu1  ;;  %v1351_v39 = vpop.f32.mrb[7].mxu0 }
 0x102   :  { %v1352_v40 = vadd.f32 %v1351_v39, %v1350_v36  ;;  %v1415_v41 = vpop.f32.mrb[7].mxu1 }
 0x103   :  { %v1416_v42 = vadd.f32 %v1415_v41, %v1414_v38  ;;  %v1905_v43 = vadd.f32 %v1413_v37, %v1349_v34 }
 0x105   :  { %v1907_v44 = vadd.f32 %v1416_v42, %v1352_v40 }
 0x106   :  { %v1353_v45 = vpop.f32.mrb[8].mxu0 }
 0x107   :  { %v1417_v46 = vpop.f32.mrb[8].mxu1  ;;  %v1354_v47 = vpop.f32.mrb[9].mxu0 }
 0x108   :  { %v1355_v48 = vadd.f32 %v1354_v47, %v1353_v45  ;;  %v1418_v49 = vpop.f32.mrb[9].mxu1  ;;  %v1356_v50 = vpop.f32.mrb[10].mxu0 }
 0x109   :  { %v1419_v51 = vadd.f32 %v1418_v49, %v1417_v46  ;;  %v1420_v52 = vpop.f32.mrb[10].mxu1  ;;  %v1357_v53 = vpop.f32.mrb[11].mxu0 }
 0x10a   :  { %v1358_v54 = vadd.f32 %v1357_v53, %v1356_v50  ;;  %v1421_v55 = vpop.f32.mrb[11].mxu1 }
 0x10b   :  { %v1422_v56 = vadd.f32 %v1421_v55, %v1420_v52  ;;  %v1909_v57 = vadd.f32 %v1419_v51, %v1355_v48 }
 0x10d   :  { %v1911_v58 = vadd.f32 %v1422_v56, %v1358_v54 }
 0x10e   :  { %v1359_v59 = vpop.f32.mrb[12].mxu0 }
 0x10f   :  { %v1423_v60 = vpop.f32.mrb[12].mxu1  ;;  %v1360_v61 = vpop.f32.mrb[13].mxu0 }
 0x110   :  { %v1361_v62 = vadd.f32 %v1360_v61, %v1359_v59  ;;  %v1424_v63 = vpop.f32.mrb[13].mxu1  ;;  %v1362_v0 = vpop.f32.mrb[14].mxu0 }
 0x111   :  { %v1425_v1 = vadd.f32 %v1424_v63, %v1423_v60  ;;  %v1426_v2 = vpop.f32.mrb[14].mxu1  ;;  %v1363_v3 = vpop.f32.mrb[15].mxu0 }
 0x112   :  { %v1364_v4 = vadd.f32 %v1363_v3, %v1362_v0  ;;  %v1427_v5 = vpop.f32.mrb[15].mxu1 }
 0x113   :  { %v1428_v6 = vadd.f32 %v1427_v5, %v1426_v2  ;;  %v1913_v7 = vadd.f32 %v1425_v1, %v1361_v62 }
 0x115   :  { %v1915_v8 = vadd.f32 %v1428_v6, %v1364_v4 }
 0x116   :  { %v1365_v9 = vpop.f32.mrb[16].mxu0 }
 0x117   :  { %v1429_v10 = vpop.f32.mrb[16].mxu1  ;;  %v1366_v11 = vpop.f32.mrb[17].mxu0 }
 0x118   :  { %v1367_v12 = vadd.f32 %v1366_v11, %v1365_v9  ;;  %v1430_v13 = vpop.f32.mrb[17].mxu1  ;;  %v1368_v14 = vpop.f32.mrb[18].mxu0  ;;  %v44_v9 = vld [vmem:[#allocation2 + $0x10] sm:$0xff] }
 0x119   :  { %v1431_v15 = vadd.f32 %v1430_v13, %v1429_v10  ;;  %v1432_v16 = vpop.f32.mrb[18].mxu1  ;;  %v1369_v17 = vpop.f32.mrb[19].mxu0 }
 0x11a   :  { %v1370_v18 = vadd.f32 %v1369_v17, %v1368_v14  ;;  %v1433_v19 = vpop.f32.mrb[19].mxu1  ;;  %v42_v14 = vld [vmem:[#allocation2] sm:$0xff]  ;;  %v1933_v17 = vld [vmem:[%s2155_s4 + $0x8] sm:$0xff]  }
 0x11b   :  { %v1434_v20 = vadd.f32 %v1433_v19, %v1432_v16  ;;  %v1917_v21 = vadd.f32 %v1431_v15, %v1367_v12  ;;  %v52_v12 = vld [vmem:[#allocation2 + $0x50] sm:$0xff]  ;;  %v50_v16 = vld [vmem:[#allocation2 + $0x40] sm:$0xff] }
 0x11d   :  { %v1919_v22 = vadd.f32 %v1434_v20, %v1370_v18 }
 0x11e   :  { %v1371_v23 = vpop.f32.mrb[20].mxu0 }
 0x11f   :  { %v1435_v24 = vpop.f32.mrb[20].mxu1  ;;  %v1372_v25 = vpop.f32.mrb[21].mxu0 }
 0x120   :  { %v1373_v26 = vadd.f32 %v1372_v25, %v1371_v23  ;;  %v1436_v27 = vpop.f32.mrb[21].mxu1  ;;  %v1374_v28 = vpop.f32.mrb[22].mxu0  ;;  %v45_v23 = vld [vmem:[#allocation2 + $0x18] sm:$0xff] }
 0x121   :  { %v1437_v31 = vadd.f32 %v1436_v27, %v1435_v24  ;;  %v1438_v32 = vpop.f32.mrb[22].mxu1  ;;  %v1375_v33 = vpop.f32.mrb[23].mxu0  ;;  %v53_v25 = vld [vmem:[#allocation2 + $0x58] sm:$0xff]  ;;  %v1944_v27 = vld [vmem:[%s2155_s4] sm:$0xff]  }
 0x122   :  { %v1376_v34 = vadd.f32 %v1375_v33, %v1374_v28  ;;  %v1439_v35 = vpop.f32.mrb[23].mxu1 }
 0x123   :  { %v1440_v36 = vadd.f32 %v1439_v35, %v1438_v32  ;;  %v806_v37 = vadd.f32 %v1437_v31, %v1373_v26  ;;  %v43_v32 = vld [vmem:[#allocation2 + $0x8] sm:$0xff] }
 0x125   :  { %v809_v38 = vadd.f32 %v1440_v36, %v1376_v34  ;;  %v1951_v36 = vld [vmem:[%s2155_s4 + $0x20] sm:$0xff]  }
 0x126   :  { %v1377_v39 = vpop.f32.mrb[24].mxu0 }
 0x127   :  { %v1441_v40 = vpop.f32.mrb[24].mxu1  ;;  %v1378_v41 = vpop.f32.mrb[25].mxu0 }
 0x128   :  { %v1379_v42 = vadd.f32 %v1378_v41, %v1377_v39  ;;  %v1442_v45 = vpop.f32.mrb[25].mxu1  ;;  %v1380_v46 = vpop.f32.mrb[26].mxu0 }
 0x129   :  { %v1443_v47 = vadd.f32 %v1442_v45, %v1441_v40  ;;  %v1444_v48 = vpop.f32.mrb[26].mxu1  ;;  %v1381_v49 = vpop.f32.mrb[27].mxu0  ;;  %v51_v40 = vld [vmem:[#allocation2 + $0x48] sm:$0xff] }
 0x12a   :  { %v1382_v50 = vadd.f32 %v1381_v49, %v1380_v46  ;;  %v1445_v51 = vpop.f32.mrb[27].mxu1  ;;  %v1960_v46 = vld [vmem:[%s2155_s4 + $0x18] sm:$0xff]   ;;  %v1974_v49 = vld [vmem:[%s2155_s4 + $0x10] sm:$0xff]  }
 0x12b   :  { %v1446_v52 = vadd.f32 %v1445_v51, %v1444_v48  ;;  %v1921_v53 = vadd.f32 %v1443_v47, %v1379_v42  ;;  %v1288_v47 = vunpack.c.l.bf16 %v1944_v27  ;;  %v1304_v51 = vunpack.c.l.bf16 %v1951_v36 }
 0x12d   :  { %v1923_v54 = vadd.f32 %v1446_v52, %v1382_v50  ;;  %v1979_v50 = vld [vmem:[%s2155_s4 + $0x30] sm:$0xff]   ;;  %v1293_v52 = vunpack.c.h.bf16 %v1933_v17 }
 0x12e   :  { %v1383_v55 = vpop.f32.mrb[28].mxu0 }
 0x12f   :  { %v1447_v56 = vpop.f32.mrb[28].mxu1  ;;  %v1384_v59 = vpop.f32.mrb[29].mxu0 }
 0x130   :  { %v1385_v60 = vadd.f32 %v1384_v59, %v1383_v55  ;;  %v1448_v61 = vpop.f32.mrb[29].mxu1  ;;  %v1386_v62 = vpop.f32.mrb[30].mxu0  ;;  %v1289_v59 = vunpack.c.h.bf16 %v1944_v27 }
 0x131   :  { %v1449_v63 = vadd.f32 %v1448_v61, %v1447_v56  ;;  %v1450_v0 = vpop.f32.mrb[30].mxu1  ;;  %v1387_v1 = vpop.f32.mrb[31].mxu0  ;;  %v48_v61 = vld [vmem:[#allocation2 + $0x30] sm:$0xff] }
 0x132   :  { %v1388_v2 = vadd.f32 %v1387_v1, %v1386_v62  ;;  %v1451_v3 = vpop.f32.mrb[31].mxu1 }
 0x133   :  { %v1452_v4 = vadd.f32 %v1451_v3, %v1450_v0  ;;  %v1925_v5 = vadd.f32 %v1449_v63, %v1385_v60  ;;  %v1305_v60 = vunpack.c.h.bf16 %v1951_v36  ;;  %v1300_v63 = vunpack.c.l.bf16 %v1960_v46 }
 0x135   :  { %v1927_v6 = vadd.f32 %v1452_v4, %v1388_v2  ;;  %v56_v2 = vld [vmem:[#allocation2 + $0x70] sm:$0xff]  ;;  %v46_v4 = vld [vmem:[#allocation2 + $0x20] sm:$0xff] }
 0x136   :  { %v1487_v10 = vpop.f32.mrb[32].mxu0 }
 0x137   :  { %v871_v11 = vadd.f32 %v1487_v10, %v1905_v43  ;;  %v1495_v13 = vpop.f32.mrb[32].mxu1  ;;  %v862_v15 = vpop.f32.mrb[33].mxu0  ;;  %v1939_v43 = vld [vmem:[%s2155_s4 + $0x28] sm:$0xff]   ;;  %v1296_v10 = vunpack.c.l.bf16 %v1974_v49 }
 0x138   :  { %v903_v18 = vadd.f32 %v1495_v13, %v806_v37  ;;  %v863_v19 = vadd.f32 %v862_v15, %v1901_v29  ;;  %v894_v20 = vpop.f32.mrb[33].mxu1  ;;  %v1488_v24 = vpop.f32.mrb[34].mxu0  ;;  %v1309_v55 = vunpack.c.h.bf16 %v1939_v43  ;;  %v2000_v13 = vld [vmem:[%s2156_s2] ss:$0 sm:$0xff] }
 0x139   :  { %v927_v26 = vadd.f32 %v871_v11, %v44_v9  ;;  %v895_v28 = vadd.f32 %v894_v20, %v1917_v21  ;;  %v874_v31 = vadd.f32 %v1488_v24, %v1907_v44  ;;  %v1496_v29 = vpop.f32.mrb[34].mxu1  ;;  %v865_v33 = vpop.f32.mrb[35].mxu0  ;;  %v1292_v21 = vunpack.c.l.bf16 %v1933_v17 }
 0x13a   :  { %v935_v34 = vadd.f32 %v903_v18, %v52_v12  ;;  %v925_v35 = vadd.f32 %v863_v19, %v42_v14  ;;  %v906_v37 = vadd.f32 %v1496_v29, %v809_v38  ;;  %v866_v39 = vadd.f32 %v865_v33, %v1903_v30  ;;  %v897_v41 = vpop.f32.mrb[35].mxu1  ;;  %v1965_v38 = vld [vmem:[%s2155_s4 + $0x38] sm:$0xff]   ;;  %v47_v29 = vld [vmem:[#allocation2 + $0x28] sm:$0xff]  ;;  %v2012_v33 = vld [vmem:[%s2157_s3] ss:$0 sm:$0xff] }
 0x13b   :  { %944 = vst.msk [vmem:[#allocation2 + $0x10] sm:$0xff] %vm25_vm0, %v927_v26  ;;  %v933_v44 = vadd.f32 %v895_v28, %v50_v16  ;;  %v928_v42 = vadd.f32 %v874_v31, %v45_v23  ;;  %v898_v45 = vadd.f32 %v897_v41, %v1919_v22  ;;  %v1308_v30 = vunpack.c.l.bf16 %v1939_v43  ;;  %v49_v18 = vld [vmem:[#allocation2 + $0x38] sm:$0xff] }
 0x13c   :  { %952 = vst.msk [vmem:[#allocation2 + $0x50] sm:$0xff] %vm25_vm0, %v935_v34  ;;  %942 = vst.msk [vmem:[#allocation2] sm:$0xff] %vm25_vm0, %v925_v35  ;;  %v936_v48 = vadd.f32 %v906_v37, %v53_v25  ;;  %v926_v22 = vadd.f32 %v866_v39, %v43_v32  ;;  %v1316_v0 = vunpack.c.l.bf16 %v1965_v38  ;;  %v1312_v11 = vunpack.c.l.bf16 %v1979_v50  ;;  %v57_v28 = vld [vmem:[#allocation2 + $0x78] sm:$0xff] }
 0x13d   :  { %950 = vst.msk [vmem:[#allocation2 + $0x40] sm:$0xff] %vm25_vm0, %v933_v44  ;;  %945 = vst.msk [vmem:[#allocation2 + $0x18] sm:$0xff] %vm25_vm0, %v928_v42  ;;  %v934_v56 = vadd.f32 %v898_v45, %v51_v40  ;;  %v1301_v12 = vunpack.c.h.bf16 %v1960_v46  ;;  %v1317_v20 = vunpack.c.h.bf16 %v1965_v38  ;;  %v1297_v23 = vunpack.c.h.bf16 %v1974_v49 }
 0x13e   :  { %953 = vst.msk [vmem:[#allocation2 + $0x58] sm:$0xff] %vm25_vm0, %v936_v48  ;;  %943 = vst.msk [vmem:[#allocation2 + $0x8] sm:$0xff] %vm25_vm0, %v926_v22  ;;  %v1491_v62 = vpop.f32.mrb[36].mxu0 }
 0x13f   :  { %951 = vst.msk [vmem:[#allocation2 + $0x48] sm:$0xff] %vm25_vm0, %v934_v56  ;;  %v887_v1 = vadd.f32 %v1491_v62, %v1913_v7  ;;  %v1499_v3 = vpop.f32.mrb[36].mxu1  ;;  %v878_v9 = vpop.f32.mrb[37].mxu0  ;;  %v54_v7 = vld [vmem:[#allocation2 + $0x60] sm:$0xff] }
 0x140   :  { %v919_v14 = vadd.f32 %v1499_v3, %v1925_v5  ;;  %v879_v15 = vadd.f32 %v878_v9, %v1909_v57  ;;  %v910_v16 = vpop.f32.mrb[37].mxu1  ;;  %v1492_v19 = vpop.f32.mrb[38].mxu0  ;;  %v1313_v5 = vunpack.c.h.bf16 %v1979_v50 }
 0x141   :  { %v931_v24 = vadd.f32 %v887_v1, %v48_v61  ;;  %v911_v25 = vadd.f32 %v910_v16, %v1921_v53  ;;  %v890_v26 = vadd.f32 %v1492_v19, %v1915_v8  ;;  %v1500_v31 = vpop.f32.mrb[38].mxu1  ;;  %v881_v32 = vpop.f32.mrb[39].mxu0  ;;  %v55_v8 = vld [vmem:[#allocation2 + $0x68] sm:$0xff] }
 0x142   :  { %v963_v57 = vld [vmem:[#allocation2 + $0x10] sm:$0xff]  ;;  %v939_v34 = vadd.f32 %v919_v14, %v56_v2  ;;  %v929_v35 = vadd.f32 %v879_v15, %v46_v4  ;;  %v922_v37 = vadd.f32 %v1500_v31, %v1927_v6  ;;  %v882_v53 = vadd.f32 %v881_v32, %v1911_v58  ;;  %v913_v39 = vpop.f32.mrb[39].mxu1 }
 0x143   :  { %v986_v40 = vmul.f32 %v2000_v13, %v963_v57  ;;  %v971_v41 = vld [vmem:[#allocation2 + $0x50] sm:$0xff]  ;;  %v961_v44 = vld [vmem:[#allocation2] sm:$0xff]  ;;  %948 = vst.msk [vmem:[#allocation2 + $0x30] sm:$0xff] %vm25_vm0, %v931_v24  ;;  %v937_v42 = vadd.f32 %v911_v25, %v54_v7  ;;  %v932_v45 = vadd.f32 %v890_v26, %v49_v18  ;;  %v914_v48 = vadd.f32 %v913_v39, %v1923_v54 }
 0x144   :  { %v994_v22 = vmul.f32 %v2000_v13, %v971_v41  ;;  %v984_v56 = vmul.f32 %v2000_v13, %v961_v44  ;;  %v969_v61 = vld [vmem:[#allocation2 + $0x40] sm:$0xff]  ;;  %v964_v6 = vld [vmem:[#allocation2 + $0x18] sm:$0xff]  ;;  %956 = vst.msk [vmem:[#allocation2 + $0x70] sm:$0xff] %vm25_vm0, %v939_v34  ;;  %946 = vst.msk [vmem:[#allocation2 + $0x20] sm:$0xff] %vm25_vm0, %v929_v35  ;;  %v940_v58 = vadd.f32 %v922_v37, %v57_v28 }
 0x145   :  { %v930_v62 = vadd.f32 %v882_v53, %v47_v29  ;;  %v1009_v1 = vadd.f32 %v2012_v33, %v986_v40  ;;  %v992_v2 = vmul.f32 %v2000_v13, %v969_v61  ;;  %v987_v3 = vmul.f32 %v2000_v13, %v964_v6  ;;  %v972_v4 = vld [vmem:[#allocation2 + $0x58] sm:$0xff]  ;;  %v962_v54 = vld [vmem:[#allocation2 + $0x8] sm:$0xff]  ;;  %954 = vst.msk [vmem:[#allocation2 + $0x60] sm:$0xff] %vm25_vm0, %v937_v42 }
 0x146   :  { %949 = vst.msk [vmem:[#allocation2 + $0x38] sm:$0xff] %vm25_vm0, %v932_v45  ;;  %v938_v9 = vadd.f32 %v914_v48, %v55_v8  ;;  %v1017_v14 = vadd.f32 %v2012_v33, %v994_v22  ;;  %v1007_v15 = vadd.f32 %v2012_v33, %v984_v56  ;;  %v995_v7 = vmul.f32 %v2000_v13, %v972_v4  ;;  %v970_v18 = vld [vmem:[#allocation2 + $0x48] sm:$0xff] }
 0x147   :  { %v985_v16 = vmul.f32 %v2000_v13, %v962_v54  ;;  %957 = vst.msk [vmem:[#allocation2 + $0x78] sm:$0xff] %vm25_vm0, %v940_v58  ;;  %947 = vst.msk [vmem:[#allocation2 + $0x28] sm:$0xff] %vm25_vm0, %v930_v62  ;;  %v1057_v19 = vadd.f32 %v1292_v21, %v1009_v1  ;;  %v1015_v24 = vadd.f32 %v2012_v33, %v992_v2 }
 0x148   :  { %v1010_v25 = vadd.f32 %v2012_v33, %v987_v3  ;;  %v993_v26 = vmul.f32 %v2000_v13, %v970_v18  ;;  %955 = vst.msk [vmem:[#allocation2 + $0x68] sm:$0xff] %vm25_vm0, %v938_v9  ;;  %v1065_v28 = vadd.f32 %v1308_v30, %v1017_v14  ;;  %v1055_v31 = vadd.f32 %v1288_v47, %v1007_v15 }
 0x149   :  { %v1018_v29 = vadd.f32 %v2012_v33, %v995_v7  ;;  %v1008_v32 = vadd.f32 %v2012_v33, %v985_v16  ;;  %v1073_v57 = vmax.f32 %v1057_v19, 0.0  ;;  %v1063_v21 = vadd.f32 %v1304_v51, %v1015_v24 }
 0x14a   :  { %v1058_v34 = vadd.f32 %v1293_v52, %v1010_v25  ;;  %v1016_v35 = vadd.f32 %v2012_v33, %v993_v26  ;;  %v1081_v37 = vmax.f32 %v1065_v28, 0.0  ;;  %v1071_v53 = vmax.f32 %v1055_v31, 0.0  ;;  %v967_v8 = vld [vmem:[#allocation2 + $0x30] sm:$0xff] }
 0x14b   :  { %v1066_v30 = vadd.f32 %v1309_v55, %v1018_v29  ;;  %v1056_v47 = vadd.f32 %v1289_v59, %v1008_v32  ;;  %v1272_v39 = vpack.c.bf16 %v1073_v57, %v1073_v57  ;;  %v1079_v40 = vmax.f32 %v1063_v21, 0.0  ;;  %v975_v44 = vld [vmem:[#allocation2 + $0x70] sm:$0xff]  ;;  %v965_v17 = vld [vmem:[#allocation2 + $0x20] sm:$0xff] }
 0x14c   :  { %v1074_v41 = vmax.f32 %v1058_v34, 0.0  ;;  %v1064_v51 = vadd.f32 %v1305_v60, %v1016_v35  ;;  %v1280_v52 = vpack.c.bf16 %v1081_v37, %v1081_v37  ;;  %v1270_v42 = vpack.c.bf16 %v1071_v53, %v1071_v53  ;;  %v973_v22 = vld [vmem:[#allocation2 + $0x60] sm:$0xff] }
 0x14d   :  { %v1082_v45 = vmax.f32 %v1066_v30, 0.0  ;;  %v1072_v48 = vmax.f32 %v1056_v47, 0.0  ;;  %v968_v56 = vld [vmem:[#allocation2 + $0x38] sm:$0xff]  ;;  %1154 = vst.msk [vmem:[%s2158_s5 + $0x8] sm:$0xf] %vm1151_vm1, %v1272_v39  ;;  %v1278_v43 = vpack.c.bf16 %v1079_v40, %v1079_v40  ;;  %v990_v59 = vmul.f32 %v2000_v13, %v967_v8 }
 0x14e   :  { %v1273_v27 = vpack.c.bf16 %v1074_v41, %v1074_v41  ;;  %v1080_v55 = vmax.f32 %v1064_v51, 0.0  ;;  %v976_v36 = vld [vmem:[#allocation2 + $0x78] sm:$0xff]  ;;  %v966_v60 = vld [vmem:[#allocation2 + $0x28] sm:$0xff]  ;;  %1162 = vst.msk [vmem:[%s2158_s5 + $0x28] sm:$0xf] %vm1151_vm1, %v1280_v52  ;;  %v998_v58 = vmul.f32 %v2000_v13, %v975_v44  ;;  %v988_v62 = vmul.f32 %v2000_v13, %v965_v17 }
 0x14f   :  { %1152 = vst.msk [vmem:[%s2158_s5] sm:$0xf] %vm1151_vm1, %v1270_v42  ;;  %v1281_v61 = vpack.c.bf16 %v1082_v45, %v1082_v45  ;;  %v1271_v6 = vpack.c.bf16 %v1072_v48, %v1072_v48  ;;  %v974_v1 = vld [vmem:[#allocation2 + $0x68] sm:$0xff]  ;;  %1160 = vst.msk [vmem:[%s2158_s5 + $0x20] sm:$0xf] %vm1151_vm1, %v1278_v43  ;;  %v1013_v3 = vadd.f32 %v2012_v33, %v990_v59 }
 0x150   :  { %1155 = vst.msk [vmem:[%s2158_s5 + $0xc] sm:$0xf] %vm1151_vm1, %v1273_v27  ;;  %v1279_v2 = vpack.c.bf16 %v1080_v55, %v1080_v55  ;;  %v996_v4 = vmul.f32 %v2000_v13, %v973_v22  ;;  %v991_v54 = vmul.f32 %v2000_v13, %v968_v56  ;;  %v1021_v9 = vadd.f32 %v2012_v33, %v998_v58 }
 0x151   :  { %1163 = vst.msk [vmem:[%s2158_s5 + $0x2c] sm:$0xf] %vm1151_vm1, %v1281_v61  ;;  %1153 = vst.msk [vmem:[%s2158_s5 + $0x4] sm:$0xf] %vm1151_vm1, %v1271_v6  ;;  %v1011_v14 = vadd.f32 %v2012_v33, %v988_v62  ;;  %v999_v15 = vmul.f32 %v2000_v13, %v976_v36  ;;  %v989_v7 = vmul.f32 %v2000_v13, %v966_v60 }
 0x152   :  { %1161 = vst.msk [vmem:[%s2158_s5 + $0x24] sm:$0xf] %vm1151_vm1, %v1279_v2  ;;  %v1061_v16 = vadd.f32 %v1300_v63, %v1013_v3  ;;  %v1019_v18 = vadd.f32 %v2012_v33, %v996_v4  ;;  %v1014_v19 = vadd.f32 %v2012_v33, %v991_v54  ;;  %v997_v24 = vmul.f32 %v2000_v13, %v974_v1 }
 0x153   :  { %v1069_v25 = vadd.f32 %v1316_v0, %v1021_v9  ;;  %v1059_v26 = vadd.f32 %v1296_v10, %v1011_v14  ;;  %v1022_v28 = vadd.f32 %v2012_v33, %v999_v15  ;;  %v1012_v31 = vadd.f32 %v2012_v33, %v989_v7 }
 0x154   :  { %v1077_v29 = vmax.f32 %v1061_v16, 0.0  ;;  %v1067_v63 = vadd.f32 %v1312_v11, %v1019_v18  ;;  %v1062_v32 = vadd.f32 %v1301_v12, %v1014_v19  ;;  %v1020_v57 = vadd.f32 %v2012_v33, %v997_v24 }
 0x155   :  { %v1085_v13 = vmax.f32 %v1069_v25, 0.0  ;;  %v1075_v21 = vmax.f32 %v1059_v26, 0.0  ;;  %v1070_v0 = vadd.f32 %v1317_v20, %v1022_v28  ;;  %v1060_v10 = vadd.f32 %v1297_v23, %v1012_v31 }
 0x156   :  { %v1276_v34 = vpack.c.bf16 %v1077_v29, %v1077_v29  ;;  %v1083_v35 = vmax.f32 %v1067_v63, 0.0  ;;  %v1078_v37 = vmax.f32 %v1062_v32, 0.0  ;;  %v1068_v53 = vadd.f32 %v1313_v5, %v1020_v57 }
 0x157   :  { %v1284_v11 = vpack.c.bf16 %v1085_v13, %v1085_v13  ;;  %v1274_v30 = vpack.c.bf16 %v1075_v21, %v1075_v21  ;;  %v1086_v46 = vmax.f32 %v1070_v0, 0.0  ;;  %v1076_v12 = vmax.f32 %v1060_v10, 0.0 }
 0x158   :  { %1158 = vst.msk [vmem:[%s2158_s5 + $0x18] sm:$0xf] %vm1151_vm1, %v1276_v34  ;;  %v1282_v38 = vpack.c.bf16 %v1083_v35, %v1083_v35  ;;  %v1277_v20 = vpack.c.bf16 %v1078_v37, %v1078_v37  ;;  %v1084_v33 = vmax.f32 %v1068_v53, 0.0 }
 0x159   :  { %1166 = vst.msk [vmem:[%s2158_s5 + $0x38] sm:$0xf] %vm1151_vm1, %v1284_v11  ;;  %1156 = vst.msk [vmem:[%s2158_s5 + $0x10] sm:$0xf] %vm1151_vm1, %v1274_v30  ;;  %v1285_v49 = vpack.c.bf16 %v1086_v46, %v1086_v46  ;;  %v1275_v50 = vpack.c.bf16 %v1076_v12, %v1076_v12 }
 0x15a   :  { %1164 = vst.msk [vmem:[%s2158_s5 + $0x30] sm:$0xf] %vm1151_vm1, %v1282_v38  ;;  %1159 = vst.msk [vmem:[%s2158_s5 + $0x1c] sm:$0xf] %vm1151_vm1, %v1277_v20  ;;  %v1283_v23 = vpack.c.bf16 %v1084_v33, %v1084_v33 }
 0x15b   :  { %1167 = vst.msk [vmem:[%s2158_s5 + $0x3c] sm:$0xf] %vm1151_vm1, %v1285_v49  ;;  %1157 = vst.msk [vmem:[%s2158_s5 + $0x14] sm:$0xf] %vm1151_vm1, %v1275_v50 }
 0x15c   :  { %1165 = vst.msk [vmem:[%s2158_s5 + $0x34] sm:$0xf] %vm1151_vm1, %v1283_v23 }

// kernel: _lambda_.16
= control target key start
LH: loop header
LB: loop body
LE: loop exit
PB: predicated region body
PF: predicated region fallthrough
CT: control target
= control target key end

     0   :  { %s1024_s1 = inlined_call_operand.vmem [shape: bf16[640,128], index: 1, kind: input, shape index: {}]   ;;  %s1025_s0 = inlined_call_operand.vmem [shape: bf16[32,640], index: 0, kind: input, shape index: {}]   ;;  %s1026_s2 = inlined_call_operand.vmem [shape: f32[1,128], index: 2, kind: input, shape index: {}]   ;;  %s1027_s3 = inlined_call_operand.vmem [shape: f32[1,128], index: 3, kind: input, shape index: {}]   ;;  %s1028_s4 = inlined_call_operand.vmem [shape: bf16[32,128], index: 4, kind: output, shape index: {}]  }
   0x1   :  { %v783_v0 = vld [vmem:[%s1024_s1 + $0x40] sm:$0xff]   ;;  %v787_v4 = vld [vmem:[%s1024_s1 + $0x48] sm:$0xff]   ;;  %v791_v8 = vld [vmem:[%s1024_s1 + $0x50] sm:$0xff]  }
   0x2   :  { %v784_v1 = vld [vmem:[%s1024_s1 + $0xc0] sm:$0xff]   ;;  %697 = vmatprep.subr.bf16.mxu0 %v783_v0  ;;  %v788_v5 = vld [vmem:[%s1024_s1 + $0xc8] sm:$0xff]   ;;  %v792_v9 = vld [vmem:[%s1024_s1 + $0xd0] sm:$0xff]  }
   0x3   :  { %v785_v2 = vld [vmem:[%s1024_s1] sm:$0xff]   ;;  %725 = vmatprep.subr.bf16.mxu1 %v784_v1  ;;  %v789_v6 = vld [vmem:[%s1024_s1 + $0x8] sm:$0xff]   ;;  %v793_v10 = vld [vmem:[%s1024_s1 + $0x10] sm:$0xff]  }
   0x4   :  { %v786_v3 = vld [vmem:[%s1024_s1 + $0x80] sm:$0xff]   ;;  %698 = vmatpush3.bf16.msra.mxu0 %v785_v2  ;;  %v790_v7 = vld [vmem:[%s1024_s1 + $0x88] sm:$0xff]   ;;  %v794_v11 = vld [vmem:[%s1024_s1 + $0x90] sm:$0xff]  }
   0x5   :  { %726 = vmatpush3.bf16.msra.mxu1 %v786_v3  ;;  %699 = vmatprep.subr.bf16.mxu0 %v787_v4  ;;  %v795_v12 = vld [vmem:[%s1024_s1 + $0x58] sm:$0xff]   ;;  %v799_v16 = vld [vmem:[%s1024_s1 + $0x60] sm:$0xff]   ;;  %v803_v20 = vld [vmem:[%s1024_s1 + $0x68] sm:$0xff]  }
   0x6   :  { %727 = vmatprep.subr.bf16.mxu1 %v788_v5  ;;  %v796_v13 = vld [vmem:[%s1024_s1 + $0xd8] sm:$0xff]   ;;  %v800_v17 = vld [vmem:[%s1024_s1 + $0xe0] sm:$0xff]   ;;  %v804_v21 = vld [vmem:[%s1024_s1 + $0xe8] sm:$0xff]  }
   0x7   :  { %v797_v14 = vld [vmem:[%s1024_s1 + $0x18] sm:$0xff]   ;;  %v801_v18 = vld [vmem:[%s1024_s1 + $0x20] sm:$0xff]   ;;  %v805_v22 = vld [vmem:[%s1024_s1 + $0x28] sm:$0xff]  }
   0x8   :  { %700 = vmatpush3.bf16.msra.mxu0 %v789_v6  ;;  %v798_v15 = vld [vmem:[%s1024_s1 + $0x98] sm:$0xff]   ;;  %v802_v19 = vld [vmem:[%s1024_s1 + $0xa0] sm:$0xff]   ;;  %v806_v23 = vld [vmem:[%s1024_s1 + $0xa8] sm:$0xff]  }
   0x9   :  { %728 = vmatpush3.bf16.msra.mxu1 %v790_v7  ;;  %701 = vmatprep.subr.bf16.mxu0 %v791_v8  ;;  %v807_v24 = vld [vmem:[%s1024_s1 + $0x70] sm:$0xff]   ;;  %v811_v28 = vld [vmem:[%s1024_s1 + $0x78] sm:$0xff]   ;;  %v820_v35 = vld [vmem:[%s1025_s0 + $0xc] ss:$20 sps:$4 sm:$0xff]  }
   0xa   :  { %729 = vmatprep.subr.bf16.mxu1 %v792_v9  ;;  %v808_v25 = vld [vmem:[%s1024_s1 + $0xf0] sm:$0xff]   ;;  %v812_v29 = vld [vmem:[%s1024_s1 + $0xf8] sm:$0xff]   ;;  %v821_v36 = vld [vmem:[%s1024_s1 + $0x100] sm:$0xff]   ;;  %495 = vmatprep.mubr.bf16.mxu1 %v820_v35 }
   0xb   :  { %v809_v26 = vld [vmem:[%s1024_s1 + $0x30] sm:$0xff]   ;;  %v813_v30 = vld [vmem:[%s1024_s1 + $0x38] sm:$0xff]   ;;  %v822_v37 = vld [vmem:[%s1024_s1 + $0x108] sm:$0xff]  }
   0xc   :  { %702 = vmatpush3.bf16.msra.mxu0 %v793_v10  ;;  %v810_v27 = vld [vmem:[%s1024_s1 + $0xb0] sm:$0xff]   ;;  %v814_v31 = vld [vmem:[%s1024_s1 + $0xb8] sm:$0xff]   ;;  %v826_v39 = vld [vmem:[%s1025_s0 + $0x2c] ss:$20 sps:$4 sm:$0xff]  }
   0xd   :  { %730 = vmatpush3.bf16.msra.mxu1 %v794_v11  ;;  %703 = vmatprep.subr.bf16.mxu0 %v795_v12  ;;  %v815_v32 = vld [vmem:[%s1025_s0] ss:$20 sps:$4 sm:$0xff]   ;;  %v817_v33 = vld [vmem:[%s1025_s0 + $0x4] ss:$20 sps:$4 sm:$0xff]   ;;  %v818_v34 = vld [vmem:[%s1025_s0 + $0x8] ss:$20 sps:$4 sm:$0xff]  }
   0xe   :  { %731 = vmatprep.subr.bf16.mxu1 %v796_v13  ;;  %446 = vmatprep.mubr.bf16.mxu0 %v817_v33  ;;  %v823_v38 = vld [vmem:[%s1024_s1 + $0x110] sm:$0xff]   ;;  %v824_v41 = vld [vmem:[%s1024_s1 + $0x118] sm:$0xff]   ;;  %v825_v45 = vld [vmem:[%s1024_s1 + $0x120] sm:$0xff]  }
   0xf   :  { %v828_v40 = vld [vmem:[%s1025_s0 + $0x34] ss:$20 sps:$4 sm:$0xff]   ;;  %v832_v43 = vld [vmem:[%s1025_s0 + $0x30] ss:$20 sps:$4 sm:$0xff]   ;;  %v834_v48 = vld [vmem:[%s1024_s1 + $0x138] sm:$0xff]  }
  0x10   :  { %704 = vmatpush3.bf16.msra.mxu0 %v797_v14  ;;  %v831_v42 = vld [vmem:[%s1025_s0 + $0x28] ss:$20 sps:$4 sm:$0xff]   ;;  %v835_v44 = vld [vmem:[%s1025_s0 + $0x10] ss:$20 sps:$4 sm:$0xff]   ;;  %v836_v49 = vld [vmem:[%s1025_s0 + $0x38] ss:$20 sps:$4 sm:$0xff]  }
  0x11   :  { %732 = vmatpush3.bf16.msra.mxu1 %v798_v15  ;;  %705 = vmatprep.subr.bf16.mxu0 %v799_v16  ;;  %v830_v46 = vld [vmem:[%s1024_s1 + $0x128] sm:$0xff]   ;;  %v833_v47 = vld [vmem:[%s1024_s1 + $0x130] sm:$0xff]   ;;  %v676_v15 = vld [vmem:[%s1026_s2] ss:$0 sm:$0xff] }
  0x12   :  { %733 = vmatprep.subr.bf16.mxu1 %v800_v17 }
  0x14   :  { %706 = vmatpush3.bf16.msra.mxu0 %v801_v18  ;;  %v677_v18 = vld [vmem:[%s1027_s3] ss:$0 sm:$0xff] }
  0x15   :  { %734 = vmatpush3.bf16.msra.mxu1 %v802_v19  ;;  %707 = vmatprep.subr.bf16.mxu0 %v803_v20 }
  0x16   :  { %735 = vmatprep.subr.bf16.mxu1 %v804_v21 }
  0x18   :  { %708 = vmatpush3.bf16.msra.mxu0 %v805_v22 }
  0x19   :  { %736 = vmatpush3.bf16.msra.mxu1 %v806_v23  ;;  %709 = vmatprep.subr.bf16.mxu0 %v807_v24 }
  0x1a   :  { %737 = vmatprep.subr.bf16.mxu1 %v808_v25 }
  0x1c   :  { %710 = vmatpush3.bf16.msra.mxu0 %v809_v26 }
  0x1d   :  { %738 = vmatpush3.bf16.msra.mxu1 %v810_v27  ;;  %711 = vmatprep.subr.bf16.mxu0 %v811_v28 }
  0x1e   :  { %739 = vmatprep.subr.bf16.mxu1 %v812_v29 }
  0x20   :  { %712 = vmatpush3.bf16.msra.mxu0 %v813_v30 }
  0x21   :  { %740 = vmatpush3.bf16.msra.mxu1 %v814_v31  ;;  %763 = vmatprep.subr.bf16.mxu0 %v821_v36 }
  0x23   :  { %447 = vmatmul.mubr.bf16.vlgmr.msra.gmra.mrb[0].mxu0 %v815_v32 }
  0x24   :  { %496 = vmatmul.mubr.bf16.vlgmr.msra.gmra.mrb[0].mxu1 %v818_v34  ;;  %764 = vmatpush3.bf16.msra.mxu0 %v821_v36 }
  0x25   :  { %765 = vmatprep.subr.bf16.mxu0 %v822_v37  ;;  %454 = vmatprep.mubr.bf16.mxu0 %v826_v39 }
  0x26   :  { %503 = vmatprep.mubr.bf16.mxu1 %v828_v40 }
  0x28   :  { %766 = vmatpush3.bf16.msra.mxu0 %v822_v37 }
  0x29   :  { %767 = vmatprep.subr.bf16.mxu0 %v823_v38 }
  0x2b   :  { %455 = vmatmul.mubr.bf16.gmra.mrb[4].mxu0 %v831_v42 }
  0x2c   :  { %504 = vmatmul.mubr.bf16.gmra.mrb[4].mxu1 %v832_v43  ;;  %768 = vmatpush3.bf16.msra.mxu0 %v823_v38 }
  0x2d   :  { %769 = vmatprep.subr.bf16.mxu0 %v824_v41  ;;  %779 = vmatprep.mubr.bf16.mxu0 %v835_v44 }
  0x30   :  { %770 = vmatpush3.bf16.msra.mxu0 %v824_v41 }
  0x31   :  { %771 = vmatprep.subr.bf16.mxu0 %v825_v45 }
  0x34   :  { %772 = vmatpush3.bf16.msra.mxu0 %v825_v45 }
  0x35   :  { %773 = vmatprep.subr.bf16.mxu0 %v830_v46 }
  0x38   :  { %774 = vmatpush3.bf16.msra.mxu0 %v830_v46 }
  0x39   :  { %775 = vmatprep.subr.bf16.mxu0 %v833_v47 }
  0x3c   :  { %776 = vmatpush3.bf16.msra.mxu0 %v833_v47 }
  0x3d   :  { %777 = vmatprep.subr.bf16.mxu0 %v834_v48 }
  0x40   :  { %778 = vmatpush3.bf16.msra.mxu0 %v834_v48 }
  0x43   :  { %780 = vmatmul.mubr.bf16.vlgmr.msra.gmra.mrb[8].mxu0 %v836_v49 }
  0xf6   :  { %v713_v50 = vpop.f32.mrb[0].mxu0 }
  0xf7   :  { %v741_v51 = vpop.f32.mrb[0].mxu1  ;;  %v714_v52 = vpop.f32.mrb[1].mxu0 }
  0xf8   :  { %v715_v53 = vadd.f32 %v714_v52, %v713_v50  ;;  %v742_v54 = vpop.f32.mrb[1].mxu1  ;;  %v716_v55 = vpop.f32.mrb[2].mxu0 }
  0xf9   :  { %v743_v56 = vadd.f32 %v742_v54, %v741_v51  ;;  %v744_v57 = vpop.f32.mrb[2].mxu1  ;;  %v717_v58 = vpop.f32.mrb[3].mxu0 }
  0xfa   :  { %v718_v59 = vadd.f32 %v717_v58, %v716_v55  ;;  %v745_v60 = vpop.f32.mrb[3].mxu1 }
  0xfb   :  { %v746_v61 = vadd.f32 %v745_v60, %v744_v57  ;;  %v498_v62 = vadd.f32 %v743_v56, %v715_v53 }
  0xfd   :  { %v501_v63 = vadd.f32 %v746_v61, %v718_v59 }
  0xfe   :  { %v719_v0 = vpop.f32.mrb[4].mxu0 }
  0xff   :  { %v747_v1 = vpop.f32.mrb[4].mxu1  ;;  %v720_v2 = vpop.f32.mrb[5].mxu0 }
 0x100   :  { %v721_v3 = vadd.f32 %v720_v2, %v719_v0  ;;  %v748_v4 = vpop.f32.mrb[5].mxu1  ;;  %v722_v5 = vpop.f32.mrb[6].mxu0 }
 0x101   :  { %v749_v6 = vadd.f32 %v748_v4, %v747_v1  ;;  %v750_v7 = vpop.f32.mrb[6].mxu1  ;;  %v723_v8 = vpop.f32.mrb[7].mxu0 }
 0x102   :  { %v724_v9 = vadd.f32 %v723_v8, %v722_v5  ;;  %v751_v10 = vpop.f32.mrb[7].mxu1 }
 0x103   :  { %v752_v11 = vadd.f32 %v751_v10, %v750_v7  ;;  %v506_v12 = vadd.f32 %v749_v6, %v721_v3 }
 0x105   :  { %v509_v13 = vadd.f32 %v752_v11, %v724_v9 }
 0x116   :  { %v781_v14 = vpop.f32.mrb[8].mxu0 }
 0x117   :  { %v555_v16 = vadd.f32 %v781_v14, %v506_v12  ;;  %v546_v17 = vpop.f32.mrb[9].mxu0 }
 0x118   :  { %v547_v19 = vadd.f32 %v546_v17, %v498_v62  ;;  %v782_v20 = vpop.f32.mrb[10].mxu0 }
 0x119   :  { %v585_v21 = vmul.f32 %v676_v15, %v555_v16  ;;  %v558_v22 = vadd.f32 %v782_v20, %v509_v13  ;;  %v549_v23 = vpop.f32.mrb[11].mxu0 }
 0x11a   :  { %v583_v24 = vmul.f32 %v676_v15, %v547_v19  ;;  %v550_v25 = vadd.f32 %v549_v23, %v501_v63 }
 0x11b   :  { %v596_v26 = vadd.f32 %v677_v18, %v585_v21  ;;  %v586_v27 = vmul.f32 %v676_v15, %v558_v22 }
 0x11c   :  { %v594_v28 = vadd.f32 %v677_v18, %v583_v24  ;;  %v584_v29 = vmul.f32 %v676_v15, %v550_v25 }
 0x11d   :  { %v597_v30 = vadd.f32 %v677_v18, %v586_v27  ;;  %v600_v32 = vmax.f32 %v596_v26, 0.0 }
 0x11e   :  { %v595_v31 = vadd.f32 %v677_v18, %v584_v29  ;;  %v598_v34 = vmax.f32 %v594_v28, 0.0 }
 0x11f   :  { %v601_v33 = vmax.f32 %v597_v30, 0.0 }
 0x120   :  { %v599_v35 = vmax.f32 %v595_v31, 0.0 }
 0x121   :  { %v694_v36 = vpack.c.bf16 %v601_v33, %v600_v32 }
 0x122   :  { %v689_v37 = vpack.c.bf16 %v599_v35, %v598_v34 }
 0x123   :  { %696 = vst [vmem:[%s1028_s4 + $0x8] sm:$0xff] %v694_v36  }
 0x124   :  { %690 = vst [vmem:[%s1028_s4] sm:$0xff] %v689_v37  }

// kernel: _lambda_.17
= control target key start
LH: loop header
LB: loop body
LE: loop exit
PB: predicated region body
PF: predicated region fallthrough
CT: control target
= control target key end

     0   :  { %s1374_s27 = smov 0   ;;  %s1376_s28 = smov 0   ;;  %s1511_s0 = inlined_call_operand.vmem [shape: bf16[32,1152], index: 0, kind: input, shape index: {}]   ;;  %s1512_s1 = inlined_call_operand.vmem [shape: bf16[1152,128], index: 1, kind: input, shape index: {}]   ;;  %s1513_s2 = inlined_call_operand.vmem [shape: f32[1,128], index: 2, kind: input, shape index: {}]   ;;  %s1514_s3 = inlined_call_operand.vmem [shape: f32[1,128], index: 3, kind: input, shape index: {}]   ;;  %s1515_s4 = inlined_call_operand.vmem [shape: bf16[32,64], index: 4, kind: input, shape index: {}]   ;;  %s1516_s5 = inlined_call_operand.vmem [shape: bf16[64,128], index: 5, kind: input, shape index: {}]   ;;  %s1517_s6 = inlined_call_operand.vmem [shape: f32[1,128], index: 6, kind: input, shape index: {}]   ;;  %s1518_s7 = inlined_call_operand.vmem [shape: f32[1,128], index: 7, kind: input, shape index: {}]   ;;  %s1519_s8 = inlined_call_operand.vmem [shape: bf16[32,128], index: 8, kind: output, shape index: {}]  }
   0x1   :  { %s1378_s29 = smov 0   ;;  %s1380_s30 = smov 0  }
   0x2   :  { %s1382_s9 = smov 0  }
   0x3 LB: > { %s27_s10 = sadd.s32 1, %s1322_s30  ;;  %p46_p1 = scmp.ne.s32.totalorder %s1314_s28, %s1310_s27  ;;  %s1326_s9 = sphi %s1382_s9, %s18_s9   ;;  %s1322_s30 = sphi %s1380_s30, %s1523_s30   ;;  %s1318_s29 = sphi %s1378_s29, %s1522_s29   ;;  %s1314_s28 = sphi %s1376_s28, %s1521_s28   ;;  %s1310_s27 = sphi %s1374_s27, %s1520_s27  }
   0x4   : > { %p28_p0 = scmp.ge.s32.totalorder %s27_s10, 3  ;;  %p47_p2 = scmp.eq.s32.totalorder %s1326_s9, 0 }
   0x5   : > { %s39_s12 = sadd.s32 1, %s1314_s28  ;;  %p1051_p5 = scmp.ge.s32.totalorder %s1326_s9, 3 }
   0x6   : > { %s1525_s10 = smov (%p28_p0, %s27_s10), 0  ;;  %p48_p3 = por %p47_p2, %p46_p1 }
   0x7   : > { %s35_s11 = ssub.s32 %s1322_s30, %s1525_s10  ;;  %279 = sbr.rel (%p1051_p5) target bundleno = 23 (0x17), region = 40 }
   0x8   : > { %p37_p4 = scmp.eq.s32.totalorder %s35_s11, 0 }
   0xa   : > { %s1409_s13 = scalar_select %p37_p4, %s1314_s28, %s39_s12  }
   0xe   : > { %282 = sbr.rel (!%p48_p3) target bundleno = 23 (0x17), region = 44  ;;  %s284_s14 = sand.u32 (%p48_p3), 1, %s1314_s28  }
   0xf   : > { %s1115_s15 = smul.u32 (%p48_p3), 12, %s1322_s30 }
  0x10   : > { %s1207_s16 = smul.u32 (%p48_p3), 48, %s284_s14 }
  0x11   : > { %s292_s19 = scalar_lea.vmem (%p48_p3), %s1511_s0, %s1115_s15 }
  0x12   : > { %v307_v0 = vld [vmem:[%s292_s19] sm:$0xff] (%p48_p3)  ;;  %v311_v2 = vld [vmem:[%s292_s19 + $0x48] sm:$0xff] (%p48_p3)  ;;  %s286_s20 = scalar_lea.vmem (%p48_p3), [#allocation3], %s1207_s16  ;;  %v1057_v6 = vld [vmem:[%s292_s19 + $0x50] sm:$0xf] (%p48_p3) }
  0x13   : > { %v309_v1 = vld [vmem:[%s292_s19 + $0x24] sm:$0xff] (%p48_p3)  ;;  %308 = vst [vmem:[%s286_s20] sm:$0xff] (%p48_p3), %v307_v0  ;;  %312 = vst [vmem:[%s286_s20 + $0x18] sm:$0xff] (%p48_p3), %v311_v2  ;;  %v313_v3 = vld [vmem:[%s292_s19 + $0x6c] sm:$0xff] (%p48_p3) }
  0x14   : > { %310 = vst [vmem:[%s286_s20 + $0xc] sm:$0xff] (%p48_p3), %v309_v1  ;;  %v1053_v4 = vld [vmem:[%s292_s19 + $0x8] sm:$0xf] (%p48_p3)  ;;  %v1055_v5 = vld [vmem:[%s292_s19 + $0x2c] sm:$0xf] (%p48_p3)  ;;  %314 = vst [vmem:[%s286_s20 + $0x24] sm:$0xff] (%p48_p3), %v313_v3 }
  0x15   : > { %1054 = vst [vmem:[%s286_s20 + $0x8] sm:$0xf] %v1053_v4  ;;  %1056 = vst [vmem:[%s286_s20 + $0x14] sm:$0xf] %v1055_v5  ;;  %v1059_v7 = vld [vmem:[%s292_s19 + $0x74] sm:$0xf] }
  0x16   : > { %1058 = vst [vmem:[%s286_s20 + $0x20] sm:$0xf] %v1057_v6  ;;  %1060 = vst [vmem:[%s286_s20 + $0x2c] sm:$0xf] %v1059_v7 }
  0x17 PF: > { %p1061_p6 = scmp.ge.s32.totalorder %s1326_s9, 1  ;;  %p343_p7 = scmp.lt.s32.totalorder %s1326_s9, 4 }
  0x19   : > { %p344_p8 = pnand %p1061_p6, %p343_p7 }
  0x1a   : > { %s350_s21 = sand.u32 (!%p344_p8), 1, %s1310_s27   ;;  %s395_s22 = smul.u32 (!%p344_p8), 48, %s1318_s29 }
  0x1b   : > { %347 = sbr.rel (%p344_p8) target bundleno = 514 (0x202), region = 74  ;;  %p1063_p10 = scmp.ne.s32.totalorder (!%p344_p8), %s1318_s29, 0 }
  0x1c   : > { %s1208_s23 = smul.u32 (!%p344_p8), 48, %s350_s21  ;;  %p396_p9 = scmp.lt.s32.totalorder (!%p344_p8), %s395_s22, 143 }
  0x1e   : > { %s1426_s12 = scalar_lea.vmem (!%p344_p8), [#allocation3], %s1208_s23 }
  0x22   : > { %s1527_s22 = smov (!%p396_p9, %s395_s22), 143  ;;  %417 = sbr.rel (%p1063_p10) target bundleno = 41 (0x29), region = 82 }
  0x23   : > { %s1062_s24 = sshll.u32 %s1527_s22, 2  ;;  %v1328_v8 = vmov (!%p1063_p10), 0.0  }
  0x24   : > { %s1424_s11 = scalar_lea.vmem %s1512_s1, %s1062_s24  ;;  %418 = vst [vmem:[#allocation2] sm:$0xff] (!%p1063_p10), %v1328_v8  ;;  %419 = vst [vmem:[#allocation2 + $0x8] sm:$0xff] (!%p1063_p10), %v1328_v8 }
  0x25   : > { %420 = vst [vmem:[#allocation2 + $0x10] sm:$0xff] (!%p1063_p10), %v1328_v8  ;;  %421 = vst [vmem:[#allocation2 + $0x18] sm:$0xff] (!%p1063_p10), %v1328_v8 }
  0x29 PF: > { %v1250_v9 = vld [vmem:[%s1424_s11 + $0x40] sm:$0xff]   ;;  %v1253_v12 = vld [vmem:[%s1424_s11 + $0x48] sm:$0xff]   ;;  %v1256_v15 = vld [vmem:[%s1424_s11 + $0x50] sm:$0xff]   ;;  %p1094_p11 = scmp.ne.s32.totalorder %s1318_s29, 2 }
  0x2a   : > { %v1251_v10 = vld [vmem:[%s1424_s11] sm:$0xff]   ;;  %1131 = vmatprep.subr.bf16.mxu0 %v1250_v9  ;;  %v1254_v13 = vld [vmem:[%s1424_s11 + $0x8] sm:$0xff]   ;;  %v1257_v16 = vld [vmem:[%s1424_s11 + $0x10] sm:$0xff]   ;;  %vm840_vm0 = vcmask (!%p1094_p11), 523264  }
  0x2b   : > { %v1252_v11 = vld [vmem:[%s1424_s11 + $0x80] sm:$0xff]   ;;  %1132 = vmatpush3.bf16.msra.mxu0 %v1251_v10  ;;  %v1255_v14 = vld [vmem:[%s1424_s11 + $0x88] sm:$0xff]   ;;  %v1258_v17 = vld [vmem:[%s1424_s11 + $0x90] sm:$0xff]  }
  0x2c   : > { %1175 = vmatprep.subr.bf16.mxu1 %v1252_v11  ;;  %1133 = vmatprep.subr.bf16.mxu0 %v1253_v12  ;;  %v1259_v18 = vld [vmem:[%s1424_s11 + $0x58] sm:$0xff]   ;;  %v1262_v21 = vld [vmem:[%s1424_s11 + $0x60] sm:$0xff]   ;;  %v1265_v24 = vld [vmem:[%s1424_s11 + $0x68] sm:$0xff]  }
  0x2d   : > { %1176 = vmatpush3.bf16.msra.mxu1 %v1252_v11  ;;  %v1260_v19 = vld [vmem:[%s1424_s11 + $0x18] sm:$0xff]   ;;  %v1264_v22 = vld [vmem:[%s1424_s11 + $0xa0] sm:$0xff]   ;;  %v1267_v25 = vld [vmem:[%s1424_s11 + $0xa8] sm:$0xff]  }
  0x2e   : > { %1177 = vmatprep.subr.bf16.mxu1 %v1255_v14  ;;  %v1261_v20 = vld [vmem:[%s1424_s11 + $0x98] sm:$0xff]   ;;  %v1263_v23 = vld [vmem:[%s1424_s11 + $0x20] sm:$0xff]   ;;  %v1266_v26 = vld [vmem:[%s1424_s11 + $0x28] sm:$0xff]  }
  0x2f   : > { %1134 = vmatpush3.bf16.msra.mxu0 %v1254_v13  ;;  %v1268_v27 = vld [vmem:[%s1424_s11 + $0x70] sm:$0xff]   ;;  %v1271_v30 = vld [vmem:[%s1424_s11 + $0x78] sm:$0xff]   ;;  %v422_v45 = vld [vmem:[#allocation2] sm:$0xff] }
  0x30   : > { %1135 = vmatprep.subr.bf16.mxu0 %v1256_v15  ;;  %v1269_v28 = vld [vmem:[%s1424_s11 + $0x30] sm:$0xff]   ;;  %v1273_v31 = vld [vmem:[%s1424_s11 + $0xb8] sm:$0xff]   ;;  %v423_v50 = vld [vmem:[#allocation2 + $0x8] sm:$0xff] }
  0x31   : > { %1178 = vmatpush3.bf16.msra.mxu1 %v1255_v14  ;;  %v1270_v29 = vld [vmem:[%s1424_s11 + $0xb0] sm:$0xff]   ;;  %v1272_v34 = vld [vmem:[%s1424_s11 + $0x38] sm:$0xff]   ;;  %v1282_v3 = vld [vmem:[%s1516_s5] sm:$0xff] (!%p1094_p11)  }
  0x32   : > { %1179 = vmatprep.subr.bf16.mxu1 %v1258_v17  ;;  %v1276_v32 = vld [vmem:[%s1426_s12 + $0x4] ss:$12 sps:$4 sm:$0xff]   ;;  %v1277_v33 = vld [vmem:[%s1426_s12 + $0x8] ss:$12 sps:$4 sm:$0xff]   ;;  %v1274_v35 = vld [vmem:[%s1426_s12] ss:$12 sps:$4 sm:$0xff]  }
  0x33   : > { %1136 = vmatpush3.bf16.msra.mxu0 %v1257_v16  ;;  %690 = vmatprep.mubr.bf16.mxu0 %v1276_v32  ;;  %v1279_v36 = vld [vmem:[%s1426_s12 + $0x1c] ss:$12 sps:$4 sm:$0xff]   ;;  %v1278_v37 = vld [vmem:[%s1426_s12 + $0x20] ss:$12 sps:$4 sm:$0xff]   ;;  %v1281_v38 = vld [vmem:[%s1426_s12 + $0x18] ss:$12 sps:$4 sm:$0xff]  }
  0x34   : > { %1137 = vmatprep.subr.bf16.mxu0 %v1259_v18  ;;  %1191 = vmatprep.mubr.bf16.mxu1 %v1277_v33  ;;  %v424_v59 = vld [vmem:[#allocation2 + $0x10] sm:$0xff]  ;;  %v425_v63 = vld [vmem:[#allocation2 + $0x18] sm:$0xff]  ;;  %v1283_v4 = vld [vmem:[%s1516_s5 + $0x8] sm:$0xff] (!%p1094_p11)  }
  0x35   : > { %1180 = vmatpush3.bf16.msra.mxu1 %v1258_v17  ;;  %v1284_v5 = vld [vmem:[%s1516_s5 + $0x10] sm:$0xff] (!%p1094_p11)   ;;  %v1286_v6 = vld [vmem:[%s1515_s4] sm:$0xff] (!%p1094_p11)   ;;  %v1285_v7 = vld [vmem:[%s1516_s5 + $0x18] sm:$0xff] (!%p1094_p11)  }
  0x36   : > { %1181 = vmatprep.subr.bf16.mxu1 %v1261_v20  ;;  %v1287_v8 = vld [vmem:[%s1515_s4 + $0x8] sm:$0xff] (!%p1094_p11)   ;;  %v1095_v10 = vld [vmem:[%s1513_s2] ss:$0 sm:$0xff] (!%p1094_p11) }
  0x37   : > { %1138 = vmatpush3.bf16.msra.mxu0 %v1260_v19  ;;  %v1096_v15 = vld [vmem:[%s1514_s3] ss:$0 sm:$0xff] (!%p1094_p11) }
  0x38   : > { %1139 = vmatprep.subr.bf16.mxu0 %v1262_v21  ;;  %v1105_v18 = vld [vmem:[%s1517_s6] ss:$0 sm:$0xff] (!%p1094_p11) }
  0x39   : > { %1182 = vmatpush3.bf16.msra.mxu1 %v1261_v20 }
  0x3a   : > { %1183 = vmatprep.subr.bf16.mxu1 %v1264_v22 }
  0x3b   : > { %1140 = vmatpush3.bf16.msra.mxu0 %v1263_v23 }
  0x3c   : > { %1141 = vmatprep.subr.bf16.mxu0 %v1265_v24 }
  0x3d   : > { %1184 = vmatpush3.bf16.msra.mxu1 %v1264_v22 }
  0x3e   : > { %1185 = vmatprep.subr.bf16.mxu1 %v1267_v25 }
  0x3f   : > { %1142 = vmatpush3.bf16.msra.mxu0 %v1266_v26  ;;  %v1106_v26 = vld [vmem:[%s1518_s7] ss:$0 sm:$0xff] (!%p1094_p11) }
  0x40   : > { %1143 = vmatprep.subr.bf16.mxu0 %v1268_v27 }
  0x41   : > { %1186 = vmatpush3.bf16.msra.mxu1 %v1267_v25 }
  0x42   : > { %1187 = vmatprep.subr.bf16.mxu1 %v1270_v29 }
  0x43   : > { %1144 = vmatpush3.bf16.msra.mxu0 %v1269_v28 }
  0x44   : > { %1145 = vmatprep.subr.bf16.mxu0 %v1271_v30 }
  0x45   : > { %1188 = vmatpush3.bf16.msra.mxu1 %v1270_v29 }
  0x46   : > { %1189 = vmatprep.subr.bf16.mxu1 %v1273_v31 }
  0x47   : > { %1146 = vmatpush3.bf16.msra.mxu0 %v1272_v34 }
  0x48   : > { %1195 = vmatprep.subr.bf16.mxu0 (!%p1094_p11), %v1282_v3 }
  0x49   : > { %1190 = vmatpush3.bf16.msra.mxu1 %v1273_v31 }
  0x4a   : > { %691 = vmatmul.mubr.bf16.vlgmr.msra.gmra.mrb[0].mxu0 %v1274_v35 }
  0x4b   : > { %698 = vmatprep.mubr.bf16.mxu0 %v1279_v36  ;;  %1196 = vmatpush3.bf16.msra.mxu0 (!%p1094_p11), %v1282_v3 }
  0x4c   : > { %1192 = vmatmul.mubr.bf16.vlgmr.msra.gmra.mrb[0].mxu1 %v1278_v37  ;;  %1197 = vmatprep.subr.bf16.mxu0 (!%p1094_p11), %v1283_v4 }
  0x4f   : > { %1198 = vmatpush3.bf16.msra.mxu0 (!%p1094_p11), %v1283_v4 }
  0x50   : > { %1199 = vmatprep.subr.bf16.mxu0 (!%p1094_p11), %v1284_v5 }
  0x52   : > { %699 = vmatmul.mubr.bf16.gmra.mrb[4].mxu0 %v1281_v38 }
  0x53   : > { %1203 = vmatprep.mubr.msk.bf16.mxu0 (!%p1094_p11), %vm840_vm0, %v1286_v6  ;;  %1200 = vmatpush3.bf16.msra.mxu0 (!%p1094_p11), %v1284_v5 }
  0x54   : > { %1201 = vmatprep.subr.bf16.mxu0 (!%p1094_p11), %v1285_v7 }
  0x57   : > { %1202 = vmatpush3.bf16.msra.mxu0 (!%p1094_p11), %v1285_v7 }
 0x11d   : > { %v1147_v39 = vpop.f32.mrb[0].mxu0 }
 0x11e   : > { %v1148_v40 = vpop.f32.mrb[1].mxu0 }
 0x11f   : > { %v1149_v41 = vadd.f32 %v1148_v40, %v1147_v39  ;;  %v1150_v42 = vpop.f32.mrb[2].mxu0  ;;  %v1193_v43 = vpop.f32.mrb[0].mxu1 }
 0x120   : > { %v1151_v44 = vpop.f32.mrb[3].mxu0  ;;  %v741_v46 = vpop.f32.mrb[1].mxu1  ;;  %1204 = vmatmul.mubr.msk.bf16.vlgmr.msra.gmra.mrb[0].mxu0 (!%p1094_p11), %vm840_vm0, %v1287_v8 }
 0x121   : > { %v1152_v47 = vadd.f32 %v1151_v44, %v1150_v42  ;;  %v742_v48 = vadd.f32 %v1149_v41, %v741_v46  ;;  %v1194_v49 = vpop.f32.mrb[2].mxu1 }
 0x122   : > { %v744_v51 = vpop.f32.mrb[3].mxu1 }
 0x123   : > { %v756_v52 = vadd.f32 %v742_v48, %v422_v45  ;;  %v745_v53 = vadd.f32 %v1152_v47, %v744_v51 }
 0x125   : > { %760 = vst [vmem:[#allocation2] sm:$0xff] %v756_v52  ;;  %v757_v54 = vadd.f32 %v745_v53, %v423_v50  ;;  %v1153_v55 = vpop.f32.mrb[4].mxu0 }
 0x126   : > { %v1154_v56 = vpop.f32.mrb[5].mxu0 }
 0x127   : > { %761 = vst [vmem:[#allocation2 + $0x8] sm:$0xff] %v757_v54  ;;  %v1155_v57 = vadd.f32 %v1154_v56, %v1153_v55  ;;  %v1156_v58 = vpop.f32.mrb[6].mxu0 }
 0x128   : > { %v1157_v60 = vpop.f32.mrb[7].mxu0 }
 0x129   : > { %v750_v61 = vadd.f32 %v1193_v43, %v1155_v57  ;;  %v1158_v62 = vadd.f32 %v1157_v60, %v1156_v58  ;;  %767 = sbr.rel (%p1094_p11) target bundleno = 514 (0x202), region = 86 }
 0x12b   : > { %v758_v0 = vadd.f32 %v750_v61, %v424_v59  ;;  %v753_v1 = vadd.f32 %v1194_v49, %v1158_v62 }
 0x12c   : > { %v768_v11 = vld [vmem:[#allocation2] sm:$0xff] (!%p1094_p11) }
 0x12d   : > { %762 = vst [vmem:[#allocation2 + $0x10] sm:$0xff] %v758_v0  ;;  %v759_v2 = vadd.f32 %v753_v1, %v425_v63  ;;  %v779_v16 = vmul.f32 (!%p1094_p11), %v1095_v10, %v768_v11 }
 0x12e   : > { %v769_v14 = vld [vmem:[#allocation2 + $0x8] sm:$0xff] (!%p1094_p11) }
 0x12f   : > { %763 = vst [vmem:[#allocation2 + $0x18] sm:$0xff] %v759_v2  ;;  %v780_v19 = vmul.f32 (!%p1094_p11), %v1095_v10, %v769_v14  ;;  %v790_v22 = vadd.f32 (!%p1094_p11), %v1096_v15, %v779_v16 }
 0x131   : > { %v791_v29 = vadd.f32 %v1096_v15, %v780_v19 }
 0x134   : > { %v770_v9 = vld [vmem:[#allocation2 + $0x10] sm:$0xff] }
 0x135   : > { %v781_v13 = vmul.f32 %v1095_v10, %v770_v9 }
 0x136   : > { %v771_v12 = vld [vmem:[#allocation2 + $0x18] sm:$0xff] }
 0x137   : > { %v782_v17 = vmul.f32 %v1095_v10, %v771_v12  ;;  %v792_v20 = vadd.f32 %v1096_v15, %v781_v13 }
 0x139   : > { %v793_v25 = vadd.f32 %v1096_v15, %v782_v17 }
 0x1f3   : > { %v1205_v21 = vpop.f32.mrb[0].mxu0 }
 0x1f4   : > { %v905_v23 = vmul.f32 %v1205_v21, %v1105_v18  ;;  %v881_v24 = vpop.f32.mrb[1].mxu0 }
 0x1f5   : > { %v903_v27 = vmul.f32 %v1105_v18, %v881_v24  ;;  %v1206_v28 = vpop.f32.mrb[2].mxu0 }
 0x1f6   : > { %v909_v30 = vadd.f32 %v905_v23, %v792_v20  ;;  %v906_v31 = vmul.f32 %v1206_v28, %v1105_v18  ;;  %v884_v32 = vpop.f32.mrb[3].mxu0 }
 0x1f7   : > { %v907_v33 = vadd.f32 %v903_v27, %v790_v22  ;;  %v904_v34 = vmul.f32 %v1105_v18, %v884_v32 }
 0x1f8   : > { %v920_v35 = vadd.f32 %v1106_v26, %v909_v30  ;;  %v910_v36 = vadd.f32 %v906_v31, %v793_v25 }
 0x1f9   : > { %v918_v37 = vadd.f32 %v1106_v26, %v907_v33  ;;  %v908_v38 = vadd.f32 %v904_v34, %v791_v29 }
 0x1fa   : > { %v921_v39 = vadd.f32 %v1106_v26, %v910_v36  ;;  %v924_v41 = vmax.f32 %v920_v35, 0.0 }
 0x1fb   : > { %v919_v40 = vadd.f32 %v1106_v26, %v908_v38  ;;  %v922_v43 = vmax.f32 %v918_v37, 0.0 }
 0x1fc   : > { %v925_v42 = vmax.f32 %v921_v39, 0.0 }
 0x1fd   : > { %v923_v44 = vmax.f32 %v919_v40, 0.0 }
 0x1fe   : > { %v1128_v45 = vpack.c.bf16 %v925_v42, %v924_v41 }
 0x1ff   : > { %v1123_v46 = vpack.c.bf16 %v923_v44, %v922_v43 }
 0x200   : > { %1130 = vst [vmem:[%s1519_s8 + $0x8] sm:$0xff] %v1128_v45  }
 0x201   : > { %1124 = vst [vmem:[%s1519_s8] sm:$0xff] %v1123_v46  }
 0x202 PF: > { %s18_s9 = sadd.s32 1, %s1326_s9   ;;  %s1520_s27 = smov %s1314_s28 }
 0x203   : > { %p15_p12 = scmp.ge.s32.totalorder %s18_s9, 5   ;;  %s1521_s28 = smov %s1409_s13 }
 0x204   : > { %s1522_s29 = smov %s1322_s30  ;;  %s1523_s30 = smov %s1525_s10 }
 0x205   :  { %17 = sbr.rel (!%p15_p12) target bundleno = 3 (0x3), region = 133 }

// kernel: _lambda_.18
= control target key start
LH: loop header
LB: loop body
LE: loop exit
PB: predicated region body
PF: predicated region fallthrough
CT: control target
= control target key end

     0   :  { %s989_s15 = smov 0   ;;  %s991_s16 = smov 0   ;;  %s1091_s0 = inlined_call_operand.vmem [shape: bf16[8,1152], index: 0, kind: input, shape index: {}]   ;;  %s1092_s1 = inlined_call_operand.vmem [shape: bf16[1152,256], index: 1, kind: input, shape index: {}]   ;;  %s1093_s2 = inlined_call_operand.vmem [shape: f32[1,256], index: 2, kind: input, shape index: {}]   ;;  %s1094_s3 = inlined_call_operand.vmem [shape: f32[1,256], index: 3, kind: input, shape index: {}]   ;;  %s1095_s4 = inlined_call_operand.vmem [shape: bf16[8,256], index: 4, kind: output, shape index: {}]  }
   0x1   :  { %s993_s17 = smov 0  }
   0x2 LB: > { %s23_s18 = sadd.s32 1, %s956_s16  ;;  %p774_p0 = scmp.ge.s32.totalorder %s960_s17, 1  ;;  %s960_s17 = sphi %s993_s17, %s14_s17   ;;  %s956_s16 = sphi %s991_s16, %s1097_s16   ;;  %s952_s15 = sphi %s989_s15, %s1096_s15  }
   0x3   : > { %p24_p1 = scmp.ge.s32.totalorder %s23_s18, 3  ;;  %p193_p2 = scmp.lt.s32.totalorder %s960_s17, 4 }
   0x5   : > { %s1099_s18 = smov (%p24_p1, %s23_s18), 0  ;;  %p194_p3 = pnand %p774_p0, %p193_p2 }
   0x6   : > { %s229_s19 = smul.u32 (!%p194_p3), 3, %s952_s15  ;;  %p778_p6 = scmp.ne.s32.totalorder (!%p194_p3), %s952_s15, 0 }
   0x7   : > { %197 = sbr.rel (%p194_p3) target bundleno = 323 (0x143), region = 36 }
   0x8   : > { %s239_s20 = smul.u32 (!%p194_p3), 48, %s952_s15  ;;  %p232_p4 = scmp.lt.s32.totalorder (!%p194_p3), %s229_s19, 8 }
   0xa   : > { %p240_p5 = scmp.lt.s32.totalorder (!%p194_p3), %s239_s20, 143 }
   0xe   : > { %s1101_s19 = smov (!%p232_p4, %s229_s19), 8  ;;  %s1103_s20 = smov (!%p240_p5, %s239_s20), 143 }
   0xf   : > { %s775_s21 = sshll.u32 %s1101_s19, 2  ;;  %s835_s25 = sshll.u32 %s1103_s20, 3  ;;  %v962_v0 = vmov (!%p778_p6), 0.0  }
  0x10   : > { %s1014_s24 = scalar_lea.vmem %s1091_s0, %s775_s21  ;;  %s1019_s28 = scalar_lea.vmem %s1092_s1, %s835_s25  ;;  %256 = vst [vmem:[#allocation2] sm:$0xff] (!%p778_p6), %v962_v0  ;;  %257 = vst [vmem:[#allocation2 + $0x8] sm:$0xff] (!%p778_p6), %v962_v0 }
  0x11   : > { %255 = sbr.rel (%p778_p6) target bundleno = 24 (0x18), region = 40 }
  0x18 PF: > { %v863_v1 = vld [vmem:[%s1019_s28 + $0x4] ss:$8 sps:$4 sm:$0xff]   ;;  %v865_v2 = vld [vmem:[%s1019_s28] ss:$8 sps:$4 sm:$0xff]   ;;  %v963_v3 = vmov 0   ;;  %p830_p7 = scmp.ne.s32.totalorder %s952_s15, 2 }
  0x19   : > { %634 = vmatprep.mubr.bf16.mxu1 %v963_v3  ;;  %561 = vmatprep.subr.bf16.mxu0 %v863_v1  ;;  %v866_v4 = vld [vmem:[%s1019_s28 + $0x14] ss:$8 sps:$4 sm:$0xff]   ;;  %v868_v5 = vld [vmem:[%s1019_s28 + $0x10] ss:$8 sps:$4 sm:$0xff]   ;;  %v869_v6 = vld [vmem:[%s1019_s28 + $0x24] ss:$8 sps:$4 sm:$0xff]  }
  0x1a   : > { %562 = vmatpush1.bf16.msra.mxu0 %v865_v2  ;;  %v871_v7 = vld [vmem:[%s1019_s28 + $0x20] ss:$8 sps:$4 sm:$0xff]   ;;  %v872_v8 = vld [vmem:[%s1019_s28 + $0x34] ss:$8 sps:$4 sm:$0xff]   ;;  %v874_v9 = vld [vmem:[%s1019_s28 + $0x30] ss:$8 sps:$4 sm:$0xff]  }
  0x1b   : > { %563 = vmatprep.subr.bf16.mxu0 %v866_v4  ;;  %v887_v10 = vld [vmem:[%s1019_s28 + $0x104] ss:$8 sps:$4 sm:$0xff]   ;;  %v889_v11 = vld [vmem:[%s1019_s28 + $0x100] ss:$8 sps:$4 sm:$0xff]   ;;  %v893_v13 = vld [vmem:[%s1019_s28 + $0x114] ss:$8 sps:$4 sm:$0xff]   ;;  %v655_v4 = vlaneseq (!%p830_p7) }
  0x1c   : > { %v875_v12 = vld [vmem:[%s1019_s28 + $0x44] ss:$8 sps:$4 sm:$0xff]   ;;  %602 = vmatprep.subr.bf16.mxu1 %v887_v10  ;;  %v895_v14 = vld [vmem:[%s1019_s28 + $0x110] ss:$8 sps:$4 sm:$0xff]   ;;  %v877_v15 = vld [vmem:[%s1019_s28 + $0x40] ss:$8 sps:$4 sm:$0xff]  }
  0x1d   : > { %603 = vmatpush1.bf16.msra.mxu1 %v889_v11  ;;  %v878_v16 = vld [vmem:[%s1019_s28 + $0x54] ss:$8 sps:$4 sm:$0xff]   ;;  %v899_v17 = vld [vmem:[%s1019_s28 + $0x124] ss:$8 sps:$4 sm:$0xff]   ;;  %v901_v18 = vld [vmem:[%s1019_s28 + $0x120] ss:$8 sps:$4 sm:$0xff]  }
  0x1e   : > { %564 = vmatpush1.bf16.msra.mxu0 %v868_v5  ;;  %604 = vmatprep.subr.bf16.mxu1 %v893_v13  ;;  %v880_v19 = vld [vmem:[%s1019_s28 + $0x50] ss:$8 sps:$4 sm:$0xff]   ;;  %v905_v20 = vld [vmem:[%s1019_s28 + $0x134] ss:$8 sps:$4 sm:$0xff]   ;;  %v881_v21 = vld [vmem:[%s1019_s28 + $0x64] ss:$8 sps:$4 sm:$0xff]  }
  0x1f   : > { %565 = vmatprep.subr.bf16.mxu0 %v869_v6  ;;  %v907_v22 = vld [vmem:[%s1019_s28 + $0x130] ss:$8 sps:$4 sm:$0xff]   ;;  %v883_v23 = vld [vmem:[%s1019_s28 + $0x60] ss:$8 sps:$4 sm:$0xff]   ;;  %v911_v24 = vld [vmem:[%s1019_s28 + $0x144] ss:$8 sps:$4 sm:$0xff]  }
  0x20   : > { %v884_v25 = vld [vmem:[%s1019_s28 + $0x74] ss:$8 sps:$4 sm:$0xff]   ;;  %v913_v26 = vld [vmem:[%s1019_s28 + $0x140] ss:$8 sps:$4 sm:$0xff]   ;;  %v886_v27 = vld [vmem:[%s1019_s28 + $0x70] ss:$8 sps:$4 sm:$0xff]  }
  0x21   : > { %605 = vmatpush1.bf16.msra.mxu1 %v895_v14  ;;  %v917_v28 = vld [vmem:[%s1019_s28 + $0x154] ss:$8 sps:$4 sm:$0xff]   ;;  %v890_v29 = vld [vmem:[%s1019_s28 + $0x84] ss:$8 sps:$4 sm:$0xff]   ;;  %v919_v30 = vld [vmem:[%s1019_s28 + $0x150] ss:$8 sps:$4 sm:$0xff]  }
  0x22   : > { %566 = vmatpush1.bf16.msra.mxu0 %v871_v7  ;;  %606 = vmatprep.subr.bf16.mxu1 %v899_v17  ;;  %v892_v31 = vld [vmem:[%s1019_s28 + $0x80] ss:$8 sps:$4 sm:$0xff]   ;;  %v923_v32 = vld [vmem:[%s1019_s28 + $0x164] ss:$8 sps:$4 sm:$0xff]   ;;  %v896_v33 = vld [vmem:[%s1019_s28 + $0x94] ss:$8 sps:$4 sm:$0xff]  }
  0x23   : > { %567 = vmatprep.subr.bf16.mxu0 %v872_v8  ;;  %v260_v34 = vld [vmem:[%s1014_s24] sm:$0xff]  ;;  %v898_v37 = vld [vmem:[%s1019_s28 + $0x90] ss:$8 sps:$4 sm:$0xff]   ;;  %v929_v38 = vld [vmem:[%s1019_s28 + $0x174] ss:$8 sps:$4 sm:$0xff]   ;;  %v656_v5 = vshrl.u32 (!%p830_p7), %v655_v4, 7 }
  0x24   : > { %v780_v35 = vcombine.high %v260_v34, %v260_v34  ;;  %v925_v36 = vld [vmem:[%s1019_s28 + $0x160] ss:$8 sps:$4 sm:$0xff]   ;;  %v902_v39 = vld [vmem:[%s1019_s28 + $0xa4] ss:$8 sps:$4 sm:$0xff]   ;;  %v931_v40 = vld [vmem:[%s1019_s28 + $0x170] ss:$8 sps:$4 sm:$0xff]   ;;  %v779_v53 = vcombine.low %v260_v34, %v260_v34 }
  0x25   : > { %607 = vmatpush1.bf16.msra.mxu1 %v901_v18  ;;  %v904_v41 = vld [vmem:[%s1019_s28 + $0xa0] ss:$8 sps:$4 sm:$0xff]   ;;  %v908_v42 = vld [vmem:[%s1019_s28 + $0xb4] ss:$8 sps:$4 sm:$0xff]   ;;  %v910_v44 = vld [vmem:[%s1019_s28 + $0xb0] ss:$8 sps:$4 sm:$0xff]  }
  0x26   : > { %568 = vmatpush1.bf16.msra.mxu0 %v874_v9  ;;  %608 = vmatprep.subr.bf16.mxu1 %v905_v20  ;;  %v935_v43 = vld [vmem:[%s1014_s24 + $0x8] ss:$0 sps:$4 sm:$0xff]   ;;  %v914_v45 = vld [vmem:[%s1019_s28 + $0xc4] ss:$8 sps:$4 sm:$0xff]   ;;  %v920_v47 = vld [vmem:[%s1019_s28 + $0xd4] ss:$8 sps:$4 sm:$0xff]  }
  0x27   : > { %569 = vmatprep.subr.bf16.mxu0 %v875_v12  ;;  %593 = vmatprep.mubr.bf16.mxu0 %v780_v35  ;;  %v916_v46 = vld [vmem:[%s1019_s28 + $0xc0] ss:$8 sps:$4 sm:$0xff]   ;;  %v922_v48 = vld [vmem:[%s1019_s28 + $0xd0] ss:$8 sps:$4 sm:$0xff]   ;;  %v926_v49 = vld [vmem:[%s1019_s28 + $0xe4] ss:$8 sps:$4 sm:$0xff]  }
  0x28   : > { %v928_v50 = vld [vmem:[%s1019_s28 + $0xe0] ss:$8 sps:$4 sm:$0xff]   ;;  %v932_v51 = vld [vmem:[%s1019_s28 + $0xf4] ss:$8 sps:$4 sm:$0xff]   ;;  %v934_v52 = vld [vmem:[%s1019_s28 + $0xf0] ss:$8 sps:$4 sm:$0xff]  }
  0x29   : > { %609 = vmatpush1.bf16.msra.mxu1 %v907_v22  ;;  %v258_v58 = vld [vmem:[#allocation2] sm:$0xff]  ;;  %v259_v61 = vld [vmem:[#allocation2 + $0x8] sm:$0xff]  ;;  %v657_v8 = vsub.s32 (!%p830_p7), 0, %v656_v5  ;;  %v661_v9 = vsub.s32 (!%p830_p7), 1, %v656_v5 }
  0x2a   : > { %570 = vmatpush1.bf16.msra.mxu0 %v877_v15  ;;  %610 = vmatprep.subr.bf16.mxu1 %v911_v24  ;;  %v653_v6 = vld [vmem:[%s1093_s2] sm:$0x3] (!%p830_p7) }
  0x2b   : > { %571 = vmatprep.subr.bf16.mxu0 %v878_v16  ;;  %v667_v7 = vld [vmem:[%s1094_s3] sm:$0x3] (!%p830_p7)  ;;  %v658_v12 = vrot.slane (!%p830_p7), %v653_v6, %v657_v8  ;;  %v662_v13 = vrot.slane (!%p830_p7), %v653_v6, %v661_v9 }
  0x2c   : > { %v672_v14 = vrot.slane (!%p830_p7), %v667_v7, %v657_v8  ;;  %v676_v15 = vrot.slane (!%p830_p7), %v667_v7, %v661_v9 }
  0x2d   : > { %611 = vmatpush1.bf16.msra.mxu1 %v913_v26 }
  0x2e   : > { %572 = vmatpush1.bf16.msra.mxu0 %v880_v19  ;;  %612 = vmatprep.subr.bf16.mxu1 %v917_v28 }
  0x2f   : > { %573 = vmatprep.subr.bf16.mxu0 %v881_v21 }
  0x31   : > { %613 = vmatpush1.bf16.msra.mxu1 %v919_v30 }
  0x32   : > { %574 = vmatpush1.bf16.msra.mxu0 %v883_v23  ;;  %614 = vmatprep.subr.bf16.mxu1 %v923_v32 }
  0x33   : > { %575 = vmatprep.subr.bf16.mxu0 %v884_v25 }
  0x35   : > { %615 = vmatpush1.bf16.msra.mxu1 %v925_v36 }
  0x36   : > { %576 = vmatpush1.bf16.msra.mxu0 %v886_v27  ;;  %616 = vmatprep.subr.bf16.mxu1 %v929_v38 }
  0x37   : > { %577 = vmatprep.subr.bf16.mxu0 %v890_v29 }
  0x39   : > { %617 = vmatpush1.bf16.msra.mxu1 %v931_v40 }
  0x3a   : > { %578 = vmatpush1.bf16.msra.mxu0 %v892_v31 }
  0x3b   : > { %579 = vmatprep.subr.bf16.mxu0 %v896_v33 }
  0x3c   : > { %635 = vmatmul.mubr.bf16.vlgmr.msra.gmra.mrb[0].mxu1 %v935_v43 }
  0x3e   : > { %580 = vmatpush1.bf16.msra.mxu0 %v898_v37 }
  0x3f   : > { %581 = vmatprep.subr.bf16.mxu0 %v902_v39 }
  0x42   : > { %582 = vmatpush1.bf16.msra.mxu0 %v904_v41 }
  0x43   : > { %583 = vmatprep.subr.bf16.mxu0 %v908_v42 }
  0x46   : > { %584 = vmatpush1.bf16.msra.mxu0 %v910_v44 }
  0x47   : > { %585 = vmatprep.subr.bf16.mxu0 %v914_v45 }
  0x4a   : > { %586 = vmatpush1.bf16.msra.mxu0 %v916_v46 }
  0x4b   : > { %587 = vmatprep.subr.bf16.mxu0 %v920_v47 }
  0x4e   : > { %588 = vmatpush1.bf16.msra.mxu0 %v922_v48 }
  0x4f   : > { %589 = vmatprep.subr.bf16.mxu0 %v926_v49 }
  0x52   : > { %590 = vmatpush1.bf16.msra.mxu0 %v928_v50 }
  0x53   : > { %591 = vmatprep.subr.bf16.mxu0 %v932_v51 }
  0x56   : > { %592 = vmatpush1.bf16.msra.mxu0 %v934_v52 }
  0x59   : > { %594 = vmatmul.mubr.bf16.vlgmr.msra.gmra.mrb[0].mxu0 %v779_v53 }
 0x10f   : > { %v636_v54 = vpop.f32.mrb[0].mxu1 }
 0x110   : > { %v638_v55 = vpop.f32.mrb[1].mxu1 }
 0x111   : > { %v640_v56 = vpop.f32.mrb[2].mxu1 }
 0x112   : > { %v641_v57 = vpop.f32.mrb[3].mxu1 }
 0x12c   : > { %v595_v59 = vpop.f32.mrb[0].mxu0  ;;  %650 = sbr.rel (%p830_p7) target bundleno = 323 (0x143), region = 44 }
 0x12d   : > { %v637_v60 = vadd.f32 %v636_v54, %v595_v59  ;;  %v597_v62 = vpop.f32.mrb[1].mxu0 }
 0x12e   : > { %v639_v63 = vadd.f32 %v638_v55, %v597_v62  ;;  %v599_v0 = vpop.f32.mrb[2].mxu0 }
 0x12f   : > { %v643_v1 = vadd.f32 %v637_v60, %v258_v58  ;;  %v600_v2 = vpop.f32.mrb[3].mxu0 }
 0x130   : > { %v644_v3 = vadd.f32 %v639_v63, %v259_v61 }
 0x131   : > { %645 = vst [vmem:[#allocation2] sm:$0xff] %v643_v1 }
 0x132   : > { %646 = vst [vmem:[#allocation2 + $0x8] sm:$0xff] %v644_v3 }
 0x138   : > { %v651_v10 = vld [vmem:[#allocation2] sm:$0xff] }
 0x139   : > { %v652_v11 = vld [vmem:[#allocation2 + $0x8] sm:$0xff]  ;;  %v665_v16 = vmul.f32 %v658_v12, %v651_v10 }
 0x13a   : > { %v666_v17 = vmul.f32 %v662_v13, %v652_v11 }
 0x13b   : > { %v679_v18 = vadd.f32 %v672_v14, %v665_v16 }
 0x13c   : > { %v680_v19 = vadd.f32 %v676_v15, %v666_v17 }
 0x13d   : > { %v681_v20 = vmax.f32 %v679_v18, 0.0 }
 0x13e   : > { %v682_v21 = vmax.f32 %v680_v19, 0.0 }
 0x140   : > { %v836_v22 = vpack.c.bf16 %v682_v21, %v681_v20 }
 0x142   : > { %691 = vst [vmem:[%s1095_s4] sm:$0xff] %v836_v22 }
 0x143 PF: > { %s14_s17 = sadd.s32 1, %s960_s17   ;;  %s1096_s15 = smov %s956_s16 }
 0x144   : > { %p11_p8 = scmp.ge.s32.totalorder %s14_s17, 5   ;;  %s1097_s16 = smov %s1099_s18 }
 0x146   :  { %13 = sbr.rel (!%p11_p8) target bundleno = 2 (0x2), region = 77 }

// kernel: _lambda_.19
= control target key start
LH: loop header
LB: loop body
LE: loop exit
PB: predicated region body
PF: predicated region fallthrough
CT: control target
= control target key end

     0   :  { %s1824_s27 = smov 0   ;;  %s1826_s28 = smov 0   ;;  %s2038_s0 = inlined_call_operand.vmem [shape: bf16[8,2304], index: 0, kind: input, shape index: {}]   ;;  %s2039_s1 = inlined_call_operand.vmem [shape: bf16[2304,256], index: 1, kind: input, shape index: {}]   ;;  %s2040_s2 = inlined_call_operand.vmem [shape: f32[1,256], index: 2, kind: input, shape index: {}]   ;;  %s2041_s3 = inlined_call_operand.vmem [shape: f32[1,256], index: 3, kind: input, shape index: {}]   ;;  %s2042_s4 = inlined_call_operand.vmem [shape: bf16[8,128], index: 4, kind: input, shape index: {}]   ;;  %s2043_s5 = inlined_call_operand.vmem [shape: bf16[128,256], index: 5, kind: input, shape index: {}]   ;;  %s2044_s6 = inlined_call_operand.vmem [shape: f32[1,256], index: 6, kind: input, shape index: {}]   ;;  %s2045_s7 = inlined_call_operand.vmem [shape: f32[1,256], index: 7, kind: input, shape index: {}]   ;;  %s2046_s8 = inlined_call_operand.vmem [shape: bf16[8,256], index: 8, kind: output, shape index: {}]  }
   0x1   :  { %s1828_s29 = smov 0  }
   0x2 LB: > { %s27_s30 = sadd.s32 1, %s1771_s28  ;;  %p1423_p0 = scmp.ge.s32.totalorder %s1775_s29, 1  ;;  %s1775_s29 = sphi %s1828_s29, %s18_s29   ;;  %s1771_s28 = sphi %s1826_s28, %s2048_s28   ;;  %s1767_s27 = sphi %s1824_s27, %s2047_s27  }
   0x3   : > { %p28_p1 = scmp.ge.s32.totalorder %s27_s30, 3  ;;  %p302_p2 = scmp.lt.s32.totalorder %s1775_s29, 4 }
   0x5   : > { %s2050_s30 = smov (%p28_p1, %s27_s30), 0  ;;  %p303_p3 = pnand %p1423_p0, %p302_p2 }
   0x6   : > { %s350_s9 = smul.u32 (!%p303_p3), 6, %s1767_s27  ;;  %p1427_p6 = scmp.ne.s32.totalorder (!%p303_p3), %s1767_s27, 0 }
   0x7   : > { %306 = sbr.rel (%p303_p3) target bundleno = 527 (0x20f), region = 52 }
   0x8   : > { %s360_s10 = smul.u32 (!%p303_p3), 96, %s1767_s27  ;;  %p353_p4 = scmp.lt.s32.totalorder (!%p303_p3), %s350_s9, 17 }
   0xa   : > { %p361_p5 = scmp.lt.s32.totalorder (!%p303_p3), %s360_s10, 287 }
   0xe   : > { %s2052_s9 = smov (!%p353_p4, %s350_s9), 17  ;;  %s2054_s10 = smov (!%p361_p5, %s360_s10), 287 }
   0xf   : > { %s1424_s11 = sshll.u32 %s2052_s9, 2  ;;  %s1551_s15 = sshll.u32 %s2054_s10, 3  ;;  %v1777_v0 = vmov (!%p1427_p6), 0.0  }
  0x10   : > { %s1849_s14 = scalar_lea.vmem %s2038_s0, %s1424_s11  ;;  %s1854_s18 = scalar_lea.vmem %s2039_s1, %s1551_s15  ;;  %381 = vst [vmem:[#allocation2] sm:$0xff] (!%p1427_p6), %v1777_v0  ;;  %382 = vst [vmem:[#allocation2 + $0x8] sm:$0xff] (!%p1427_p6), %v1777_v0 }
  0x11   : > { %380 = sbr.rel (%p1427_p6) target bundleno = 24 (0x18), region = 56 }
  0x18 PF: > { %v1579_v1 = vld [vmem:[%s1854_s18 + $0x4] ss:$8 sps:$4 sm:$0xff]   ;;  %v1583_v3 = vld [vmem:[%s1854_s18] ss:$8 sps:$4 sm:$0xff]   ;;  %v1585_v5 = vld [vmem:[%s1854_s18 + $0x14] ss:$8 sps:$4 sm:$0xff]  }
  0x19   : > { %v1581_v2 = vld [vmem:[%s1854_s18 + $0x104] ss:$8 sps:$4 sm:$0xff]   ;;  %985 = vmatprep.subr.bf16.mxu0 %v1579_v1  ;;  %v1584_v4 = vld [vmem:[%s1854_s18 + $0x100] ss:$8 sps:$4 sm:$0xff]   ;;  %v1587_v6 = vld [vmem:[%s1854_s18 + $0x114] ss:$8 sps:$4 sm:$0xff]  }
  0x1a   : > { %1026 = vmatprep.subr.bf16.mxu1 %v1581_v2  ;;  %986 = vmatpush1.bf16.msra.mxu0 %v1583_v3  ;;  %v1589_v7 = vld [vmem:[%s1854_s18 + $0x10] ss:$8 sps:$4 sm:$0xff]   ;;  %v1591_v9 = vld [vmem:[%s1854_s18 + $0x24] ss:$8 sps:$4 sm:$0xff]   ;;  %v1595_v11 = vld [vmem:[%s1854_s18 + $0x20] ss:$8 sps:$4 sm:$0xff]  }
  0x1b   : > { %1027 = vmatpush1.bf16.msra.mxu1 %v1584_v4  ;;  %987 = vmatprep.subr.bf16.mxu0 %v1585_v5  ;;  %v1590_v8 = vld [vmem:[%s1854_s18 + $0x110] ss:$8 sps:$4 sm:$0xff]   ;;  %v1593_v10 = vld [vmem:[%s1854_s18 + $0x124] ss:$8 sps:$4 sm:$0xff]   ;;  %v1596_v12 = vld [vmem:[%s1854_s18 + $0x120] ss:$8 sps:$4 sm:$0xff]  }
  0x1c   : > { %1028 = vmatprep.subr.bf16.mxu1 %v1587_v6  ;;  %v1597_v13 = vld [vmem:[%s1854_s18 + $0x34] ss:$8 sps:$4 sm:$0xff]   ;;  %v1601_v15 = vld [vmem:[%s1854_s18 + $0x30] ss:$8 sps:$4 sm:$0xff]   ;;  %v1603_v17 = vld [vmem:[%s1854_s18 + $0x44] ss:$8 sps:$4 sm:$0xff]  }
  0x1d   : > { %v1599_v14 = vld [vmem:[%s1854_s18 + $0x134] ss:$8 sps:$4 sm:$0xff]   ;;  %v1602_v16 = vld [vmem:[%s1854_s18 + $0x130] ss:$8 sps:$4 sm:$0xff]   ;;  %v1605_v18 = vld [vmem:[%s1854_s18 + $0x144] ss:$8 sps:$4 sm:$0xff]  }
  0x1e   : > { %988 = vmatpush1.bf16.msra.mxu0 %v1589_v7  ;;  %v1607_v19 = vld [vmem:[%s1854_s18 + $0x40] ss:$8 sps:$4 sm:$0xff]   ;;  %v1609_v21 = vld [vmem:[%s1854_s18 + $0x54] ss:$8 sps:$4 sm:$0xff]   ;;  %v1613_v23 = vld [vmem:[%s1854_s18 + $0x50] ss:$8 sps:$4 sm:$0xff]  }
  0x1f   : > { %1029 = vmatpush1.bf16.msra.mxu1 %v1590_v8  ;;  %989 = vmatprep.subr.bf16.mxu0 %v1591_v9  ;;  %v1608_v20 = vld [vmem:[%s1854_s18 + $0x140] ss:$8 sps:$4 sm:$0xff]   ;;  %v1611_v22 = vld [vmem:[%s1854_s18 + $0x154] ss:$8 sps:$4 sm:$0xff]   ;;  %v1614_v24 = vld [vmem:[%s1854_s18 + $0x150] ss:$8 sps:$4 sm:$0xff]  }
  0x20   : > { %1030 = vmatprep.subr.bf16.mxu1 %v1593_v10  ;;  %v1615_v25 = vld [vmem:[%s1854_s18 + $0x64] ss:$8 sps:$4 sm:$0xff]   ;;  %v1619_v27 = vld [vmem:[%s1854_s18 + $0x60] ss:$8 sps:$4 sm:$0xff]   ;;  %v1621_v29 = vld [vmem:[%s1854_s18 + $0x74] ss:$8 sps:$4 sm:$0xff]  }
  0x21   : > { %v1617_v26 = vld [vmem:[%s1854_s18 + $0x164] ss:$8 sps:$4 sm:$0xff]   ;;  %v1620_v28 = vld [vmem:[%s1854_s18 + $0x160] ss:$8 sps:$4 sm:$0xff]   ;;  %v1623_v30 = vld [vmem:[%s1854_s18 + $0x174] ss:$8 sps:$4 sm:$0xff]  }
  0x22   : > { %990 = vmatpush1.bf16.msra.mxu0 %v1595_v11  ;;  %v1625_v31 = vld [vmem:[%s1854_s18 + $0x70] ss:$8 sps:$4 sm:$0xff]   ;;  %v1627_v33 = vld [vmem:[%s1854_s18 + $0x84] ss:$8 sps:$4 sm:$0xff]   ;;  %v1631_v35 = vld [vmem:[%s1854_s18 + $0x80] ss:$8 sps:$4 sm:$0xff]  }
  0x23   : > { %1031 = vmatpush1.bf16.msra.mxu1 %v1596_v12  ;;  %991 = vmatprep.subr.bf16.mxu0 %v1597_v13  ;;  %v1626_v32 = vld [vmem:[%s1854_s18 + $0x170] ss:$8 sps:$4 sm:$0xff]   ;;  %v1629_v34 = vld [vmem:[%s1854_s18 + $0x184] ss:$8 sps:$4 sm:$0xff]   ;;  %v1632_v36 = vld [vmem:[%s1854_s18 + $0x180] ss:$8 sps:$4 sm:$0xff]  }
  0x24   : > { %1032 = vmatprep.subr.bf16.mxu1 %v1599_v14  ;;  %v1633_v37 = vld [vmem:[%s1854_s18 + $0x94] ss:$8 sps:$4 sm:$0xff]   ;;  %v1637_v39 = vld [vmem:[%s1854_s18 + $0x90] ss:$8 sps:$4 sm:$0xff]   ;;  %v1639_v41 = vld [vmem:[%s1854_s18 + $0xa4] ss:$8 sps:$4 sm:$0xff]  }
  0x25   : > { %v1635_v38 = vld [vmem:[%s1854_s18 + $0x194] ss:$8 sps:$4 sm:$0xff]   ;;  %v1638_v40 = vld [vmem:[%s1854_s18 + $0x190] ss:$8 sps:$4 sm:$0xff]   ;;  %v1641_v42 = vld [vmem:[%s1854_s18 + $0x1a4] ss:$8 sps:$4 sm:$0xff]  }
  0x26   : > { %992 = vmatpush1.bf16.msra.mxu0 %v1601_v15  ;;  %v1643_v43 = vld [vmem:[%s1854_s18 + $0xa0] ss:$8 sps:$4 sm:$0xff]   ;;  %v1645_v45 = vld [vmem:[%s1854_s18 + $0xb4] ss:$8 sps:$4 sm:$0xff]   ;;  %v1649_v50 = vld [vmem:[%s1854_s18 + $0xb0] ss:$8 sps:$4 sm:$0xff]  }
  0x27   : > { %1033 = vmatpush1.bf16.msra.mxu1 %v1602_v16  ;;  %993 = vmatprep.subr.bf16.mxu0 %v1603_v17  ;;  %v1644_v44 = vld [vmem:[%s1854_s18 + $0x1a0] ss:$8 sps:$4 sm:$0xff]   ;;  %v1647_v46 = vld [vmem:[%s1854_s18 + $0x1b4] ss:$8 sps:$4 sm:$0xff]   ;;  %v1650_v51 = vld [vmem:[%s1854_s18 + $0x1b0] ss:$8 sps:$4 sm:$0xff]  }
  0x28   : > { %1034 = vmatprep.subr.bf16.mxu1 %v1605_v18  ;;  %v385_v47 = vld [vmem:[%s1849_s14] sm:$0xff]  ;;  %v386_v49 = vld [vmem:[%s1849_s14 + $0x8] sm:$0xff]  ;;  %v1657_v57 = vld [vmem:[%s1854_s18 + $0xd4] ss:$8 sps:$4 sm:$0xff]   ;;  %p1530_p7 = scmp.ne.s32.totalorder %s1767_s27, 2 }
  0x29   : > { %v1429_v48 = vcombine.high %v385_v47, %v385_v47  ;;  %v1431_v52 = vcombine.high %v386_v49, %v386_v49  ;;  %v1651_v53 = vld [vmem:[%s1854_s18 + $0xc4] ss:$8 sps:$4 sm:$0xff]   ;;  %v1655_v55 = vld [vmem:[%s1854_s18 + $0xc0] ss:$8 sps:$4 sm:$0xff]   ;;  %v1659_v58 = vld [vmem:[%s1854_s18 + $0x1d4] ss:$8 sps:$4 sm:$0xff]   ;;  %v1428_v6 = vcombine.low %v385_v47, %v385_v47  ;;  %v1430_v7 = vcombine.low %v386_v49, %v386_v49 }
  0x2a   : > { %994 = vmatpush1.bf16.msra.mxu0 %v1607_v19  ;;  %v1653_v54 = vld [vmem:[%s1854_s18 + $0x1c4] ss:$8 sps:$4 sm:$0xff]   ;;  %v1656_v56 = vld [vmem:[%s1854_s18 + $0x1c0] ss:$8 sps:$4 sm:$0xff]   ;;  %v1661_v59 = vld [vmem:[%s1854_s18 + $0xd0] ss:$8 sps:$4 sm:$0xff]  }
  0x2b   : > { %1035 = vmatpush1.bf16.msra.mxu1 %v1608_v20  ;;  %995 = vmatprep.subr.bf16.mxu0 %v1609_v21  ;;  %v1662_v60 = vld [vmem:[%s1854_s18 + $0x1d0] ss:$8 sps:$4 sm:$0xff]   ;;  %v1663_v61 = vld [vmem:[%s1854_s18 + $0xe4] ss:$8 sps:$4 sm:$0xff]   ;;  %v1667_v63 = vld [vmem:[%s1854_s18 + $0xe0] ss:$8 sps:$4 sm:$0xff]  }
  0x2c   : > { %1036 = vmatprep.subr.bf16.mxu1 %v1611_v22  ;;  %1017 = vmatprep.mubr.bf16.mxu0 %v1429_v48  ;;  %v1665_v62 = vld [vmem:[%s1854_s18 + $0x1e4] ss:$8 sps:$4 sm:$0xff]   ;;  %v1668_v0 = vld [vmem:[%s1854_s18 + $0x1e0] ss:$8 sps:$4 sm:$0xff]   ;;  %v1669_v1 = vld [vmem:[%s1854_s18 + $0xf4] ss:$8 sps:$4 sm:$0xff]  }
  0x2d   : > { %1058 = vmatprep.mubr.bf16.mxu1 %v1431_v52  ;;  %v1671_v2 = vld [vmem:[%s1854_s18 + $0x1f4] ss:$8 sps:$4 sm:$0xff]   ;;  %v1673_v3 = vld [vmem:[%s1854_s18 + $0xf0] ss:$8 sps:$4 sm:$0xff]   ;;  %v1681_v5 = vld [vmem:[%s1854_s18 + $0x204] ss:$8 sps:$4 sm:$0xff]  }
  0x2e   : > { %996 = vmatpush1.bf16.msra.mxu0 %v1613_v23  ;;  %v1674_v4 = vld [vmem:[%s1854_s18 + $0x1f0] ss:$8 sps:$4 sm:$0xff]   ;;  %v1679_v8 = vld [vmem:[%s1854_s18 + $0x200] ss:$8 sps:$4 sm:$0xff]   ;;  %v1684_v10 = vld [vmem:[%s1854_s18 + $0x214] ss:$8 sps:$4 sm:$0xff]  }
  0x2f   : > { %1037 = vmatpush1.bf16.msra.mxu1 %v1614_v24  ;;  %997 = vmatprep.subr.bf16.mxu0 %v1615_v25  ;;  %v1926_v9 = vld [vmem:[%s1849_s14 + $0x10] sm:$0xff]  ;;  %v1687_v13 = vld [vmem:[%s1854_s18 + $0x224] ss:$8 sps:$4 sm:$0xff]   ;;  %v1685_v14 = vld [vmem:[%s1854_s18 + $0x220] ss:$8 sps:$4 sm:$0xff]  }
  0x30   : > { %1038 = vmatprep.subr.bf16.mxu1 %v1617_v26  ;;  %v1433_v11 = vcombine.high %v1926_v9, %v1926_v9  ;;  %v1682_v12 = vld [vmem:[%s1854_s18 + $0x210] ss:$8 sps:$4 sm:$0xff]   ;;  %v1690_v15 = vld [vmem:[%s1854_s18 + $0x234] ss:$8 sps:$4 sm:$0xff]   ;;  %v1693_v17 = vld [vmem:[%s1854_s18 + $0x244] ss:$8 sps:$4 sm:$0xff]  }
  0x31   : > { %v1688_v16 = vld [vmem:[%s1854_s18 + $0x230] ss:$8 sps:$4 sm:$0xff]   ;;  %v1691_v18 = vld [vmem:[%s1854_s18 + $0x240] ss:$8 sps:$4 sm:$0xff]   ;;  %v1696_v19 = vld [vmem:[%s1854_s18 + $0x254] ss:$8 sps:$4 sm:$0xff]  }
  0x32   : > { %998 = vmatpush1.bf16.msra.mxu0 %v1619_v27  ;;  %v1694_v20 = vld [vmem:[%s1854_s18 + $0x250] ss:$8 sps:$4 sm:$0xff]   ;;  %v1699_v21 = vld [vmem:[%s1854_s18 + $0x264] ss:$8 sps:$4 sm:$0xff]   ;;  %v1697_v22 = vld [vmem:[%s1854_s18 + $0x260] ss:$8 sps:$4 sm:$0xff]  }
  0x33   : > { %1039 = vmatpush1.bf16.msra.mxu1 %v1620_v28  ;;  %999 = vmatprep.subr.bf16.mxu0 %v1621_v29  ;;  %v1702_v23 = vld [vmem:[%s1854_s18 + $0x274] ss:$8 sps:$4 sm:$0xff]   ;;  %v1700_v24 = vld [vmem:[%s1854_s18 + $0x270] ss:$8 sps:$4 sm:$0xff]   ;;  %v1705_v25 = vld [vmem:[%s1854_s18 + $0x284] ss:$8 sps:$4 sm:$0xff]  }
  0x34   : > { %1040 = vmatprep.subr.bf16.mxu1 %v1623_v30  ;;  %v1703_v26 = vld [vmem:[%s1854_s18 + $0x280] ss:$8 sps:$4 sm:$0xff]   ;;  %v1708_v27 = vld [vmem:[%s1854_s18 + $0x294] ss:$8 sps:$4 sm:$0xff]   ;;  %v1706_v28 = vld [vmem:[%s1854_s18 + $0x290] ss:$8 sps:$4 sm:$0xff]  }
  0x35   : > { %v1711_v29 = vld [vmem:[%s1854_s18 + $0x2a4] ss:$8 sps:$4 sm:$0xff]   ;;  %v1709_v30 = vld [vmem:[%s1854_s18 + $0x2a0] ss:$8 sps:$4 sm:$0xff]  }
  0x36   : > { %1000 = vmatpush1.bf16.msra.mxu0 %v1625_v31  ;;  %v1714_v31 = vld [vmem:[%s1854_s18 + $0x2b4] ss:$8 sps:$4 sm:$0xff]   ;;  %v383_v52 = vld [vmem:[#allocation2] sm:$0xff] }
  0x37   : > { %1041 = vmatpush1.bf16.msra.mxu1 %v1626_v32  ;;  %1001 = vmatprep.subr.bf16.mxu0 %v1627_v33  ;;  %v1712_v32 = vld [vmem:[%s1854_s18 + $0x2b0] ss:$8 sps:$4 sm:$0xff]   ;;  %v1717_v33 = vld [vmem:[%s1854_s18 + $0x2c4] ss:$8 sps:$4 sm:$0xff]  }
  0x38   : > { %1042 = vmatprep.subr.bf16.mxu1 %v1629_v34  ;;  %v1715_v34 = vld [vmem:[%s1854_s18 + $0x2c0] ss:$8 sps:$4 sm:$0xff]  }
  0x3a   : > { %1002 = vmatpush1.bf16.msra.mxu0 %v1631_v35  ;;  %v1720_v35 = vld [vmem:[%s1854_s18 + $0x2d4] ss:$8 sps:$4 sm:$0xff]  }
  0x3b   : > { %1043 = vmatpush1.bf16.msra.mxu1 %v1632_v36  ;;  %1003 = vmatprep.subr.bf16.mxu0 %v1633_v37  ;;  %v1718_v36 = vld [vmem:[%s1854_s18 + $0x2d0] ss:$8 sps:$4 sm:$0xff]   ;;  %v1723_v37 = vld [vmem:[%s1854_s18 + $0x2e4] ss:$8 sps:$4 sm:$0xff]  }
  0x3c   : > { %1044 = vmatprep.subr.bf16.mxu1 %v1635_v38  ;;  %v1721_v38 = vld [vmem:[%s1854_s18 + $0x2e0] ss:$8 sps:$4 sm:$0xff]  }
  0x3e   : > { %1004 = vmatpush1.bf16.msra.mxu0 %v1637_v39  ;;  %v1726_v39 = vld [vmem:[%s1854_s18 + $0x2f4] ss:$8 sps:$4 sm:$0xff]  }
  0x3f   : > { %1045 = vmatpush1.bf16.msra.mxu1 %v1638_v40  ;;  %1005 = vmatprep.subr.bf16.mxu0 %v1639_v41  ;;  %v1724_v40 = vld [vmem:[%s1854_s18 + $0x2f0] ss:$8 sps:$4 sm:$0xff]   ;;  %v1432_v41 = vcombine.low %v1926_v9, %v1926_v9  ;;  %v1744_v9 = vld [vmem:[%s2043_s5 + $0x54] ss:$8 sps:$4 sm:$0xff] (!%p1530_p7)  }
  0x40   : > { %1046 = vmatprep.subr.bf16.mxu1 %v1641_v42 }
  0x42   : > { %1006 = vmatpush1.bf16.msra.mxu0 %v1643_v43 }
  0x43   : > { %1047 = vmatpush1.bf16.msra.mxu1 %v1644_v44  ;;  %1007 = vmatprep.subr.bf16.mxu0 %v1645_v45 }
  0x44   : > { %1048 = vmatprep.subr.bf16.mxu1 %v1647_v46 }
  0x46   : > { %1008 = vmatpush1.bf16.msra.mxu0 %v1649_v50 }
  0x47   : > { %1049 = vmatpush1.bf16.msra.mxu1 %v1650_v51  ;;  %1009 = vmatprep.subr.bf16.mxu0 %v1651_v53 }
  0x48   : > { %1050 = vmatprep.subr.bf16.mxu1 %v1653_v54 }
  0x4a   : > { %1010 = vmatpush1.bf16.msra.mxu0 %v1655_v55  ;;  %v384_v55 = vld [vmem:[#allocation2 + $0x8] sm:$0xff] }
  0x4b   : > { %1051 = vmatpush1.bf16.msra.mxu1 %v1656_v56  ;;  %1011 = vmatprep.subr.bf16.mxu0 %v1657_v57 }
  0x4c   : > { %1052 = vmatprep.subr.bf16.mxu1 %v1659_v58 }
  0x4e   : > { %1012 = vmatpush1.bf16.msra.mxu0 %v1661_v59 }
  0x4f   : > { %1053 = vmatpush1.bf16.msra.mxu1 %v1662_v60  ;;  %1013 = vmatprep.subr.bf16.mxu0 %v1663_v61 }
  0x50   : > { %1054 = vmatprep.subr.bf16.mxu1 %v1665_v62  ;;  %v1729_v62 = vld [vmem:[%s2043_s5 + $0x4] ss:$8 sps:$4 sm:$0xff] (!%p1530_p7)  }
  0x52   : > { %1014 = vmatpush1.bf16.msra.mxu0 %v1667_v63  ;;  %v1731_v63 = vld [vmem:[%s2043_s5] ss:$8 sps:$4 sm:$0xff] (!%p1530_p7)  }
  0x53   : > { %1055 = vmatpush1.bf16.msra.mxu1 %v1668_v0  ;;  %1015 = vmatprep.subr.bf16.mxu0 %v1669_v1  ;;  %v1778_v0 = vmov (!%p1530_p7), 0   ;;  %v1732_v1 = vld [vmem:[%s2043_s5 + $0x14] ss:$8 sps:$4 sm:$0xff] (!%p1530_p7)  }
  0x54   : > { %1056 = vmatprep.subr.bf16.mxu1 %v1671_v2  ;;  %v1734_v2 = vld [vmem:[%s2043_s5 + $0x10] ss:$8 sps:$4 sm:$0xff] (!%p1530_p7)  }
  0x56   : > { %1016 = vmatpush1.bf16.msra.mxu0 %v1673_v3  ;;  %v1735_v3 = vld [vmem:[%s2043_s5 + $0x24] ss:$8 sps:$4 sm:$0xff] (!%p1530_p7)  }
  0x57   : > { %1057 = vmatpush1.bf16.msra.mxu1 %v1674_v4  ;;  %1067 = vmatprep.subr.bf16.mxu0 %v1681_v5  ;;  %v1737_v4 = vld [vmem:[%s2043_s5 + $0x20] ss:$8 sps:$4 sm:$0xff] (!%p1530_p7)   ;;  %v1738_v5 = vld [vmem:[%s2043_s5 + $0x34] ss:$8 sps:$4 sm:$0xff] (!%p1530_p7)  }
  0x59   : > { %1018 = vmatmul.mubr.bf16.vlgmr.msra.gmra.mrb[0].mxu0 %v1428_v6  ;;  %v1740_v6 = vld [vmem:[%s2043_s5 + $0x30] ss:$8 sps:$4 sm:$0xff] (!%p1530_p7)  }
  0x5a   : > { %1059 = vmatmul.mubr.bf16.vlgmr.msra.gmra.mrb[0].mxu1 %v1430_v7  ;;  %1068 = vmatpush1.bf16.msra.mxu0 %v1679_v8  ;;  %v1741_v7 = vld [vmem:[%s2043_s5 + $0x44] ss:$8 sps:$4 sm:$0xff] (!%p1530_p7)   ;;  %v1743_v8 = vld [vmem:[%s2043_s5 + $0x40] ss:$8 sps:$4 sm:$0xff] (!%p1530_p7)  }
  0x5b   : > { %1099 = vmatprep.mubr.bf16.mxu0 %v1433_v11  ;;  %1069 = vmatprep.subr.bf16.mxu0 %v1684_v10  ;;  %v1746_v10 = vld [vmem:[%s2043_s5 + $0x50] ss:$8 sps:$4 sm:$0xff] (!%p1530_p7)   ;;  %v1747_v11 = vld [vmem:[%s2043_s5 + $0x64] ss:$8 sps:$4 sm:$0xff] (!%p1530_p7)  }
  0x5e   : > { %1070 = vmatpush1.bf16.msra.mxu0 %v1682_v12  ;;  %v1749_v12 = vld [vmem:[%s2043_s5 + $0x60] ss:$8 sps:$4 sm:$0xff] (!%p1530_p7)  }
  0x5f   : > { %1071 = vmatprep.subr.bf16.mxu0 %v1687_v13  ;;  %v1750_v13 = vld [vmem:[%s2043_s5 + $0x74] ss:$8 sps:$4 sm:$0xff] (!%p1530_p7)  }
  0x62   : > { %1072 = vmatpush1.bf16.msra.mxu0 %v1685_v14  ;;  %v1752_v14 = vld [vmem:[%s2043_s5 + $0x70] ss:$8 sps:$4 sm:$0xff] (!%p1530_p7)  }
  0x63   : > { %1073 = vmatprep.subr.bf16.mxu0 %v1690_v15  ;;  %v1146_v15 = vld [vmem:[%s2042_s4] sm:$0xf] (!%p1530_p7) }
  0x66   : > { %1074 = vmatpush1.bf16.msra.mxu0 %v1688_v16  ;;  %v1120_v16 = vlaneseq (!%p1530_p7) }
  0x67   : > { %1075 = vmatprep.subr.bf16.mxu0 %v1693_v17 }
  0x68   : > { %v1121_v17 = vshrl.u32 (!%p1530_p7), %v1120_v16, 7 }
  0x6a   : > { %1076 = vmatpush1.bf16.msra.mxu0 %v1691_v18  ;;  %v1122_v18 = vsub.s32 (!%p1530_p7), 0, %v1121_v17 }
  0x6b   : > { %1077 = vmatprep.subr.bf16.mxu0 %v1696_v19  ;;  %v1118_v19 = vld [vmem:[%s2040_s2] sm:$0x3] (!%p1530_p7) }
  0x6e   : > { %1078 = vmatpush1.bf16.msra.mxu0 %v1694_v20  ;;  %v1126_v20 = vsub.s32 (!%p1530_p7), 1, %v1121_v17 }
  0x6f   : > { %1079 = vmatprep.subr.bf16.mxu0 %v1699_v21  ;;  %v1123_v21 = vrot.slane (!%p1530_p7), %v1118_v19, %v1122_v18 }
  0x72   : > { %1080 = vmatpush1.bf16.msra.mxu0 %v1697_v22 }
  0x73   : > { %1081 = vmatprep.subr.bf16.mxu0 %v1702_v23  ;;  %v1132_v23 = vld [vmem:[%s2041_s3] sm:$0x3] (!%p1530_p7) }
  0x76   : > { %1082 = vmatpush1.bf16.msra.mxu0 %v1700_v24  ;;  %v1127_v24 = vrot.slane (!%p1530_p7), %v1118_v19, %v1126_v20 }
  0x77   : > { %1083 = vmatprep.subr.bf16.mxu0 %v1705_v25 }
  0x7a   : > { %1084 = vmatpush1.bf16.msra.mxu0 %v1703_v26  ;;  %v1284_v26 = vld [vmem:[%s2044_s6] sm:$0x3] (!%p1530_p7) }
  0x7b   : > { %1085 = vmatprep.subr.bf16.mxu0 %v1708_v27 }
  0x7e   : > { %1086 = vmatpush1.bf16.msra.mxu0 %v1706_v28  ;;  %v1137_v28 = vrot.slane (!%p1530_p7), %v1132_v23, %v1122_v18 }
  0x7f   : > { %1087 = vmatprep.subr.bf16.mxu0 %v1711_v29 }
  0x82   : > { %1088 = vmatpush1.bf16.msra.mxu0 %v1709_v30  ;;  %v1141_v30 = vrot.slane (!%p1530_p7), %v1132_v23, %v1126_v20 }
  0x83   : > { %1089 = vmatprep.subr.bf16.mxu0 %v1714_v31  ;;  %v1289_v31 = vrot.slane (!%p1530_p7), %v1284_v26, %v1122_v18 }
  0x86   : > { %1090 = vmatpush1.bf16.msra.mxu0 %v1712_v32  ;;  %v1300_v32 = vld [vmem:[%s2045_s7] sm:$0x3] (!%p1530_p7) }
  0x87   : > { %1091 = vmatprep.subr.bf16.mxu0 %v1717_v33  ;;  %v1293_v33 = vrot.slane (!%p1530_p7), %v1284_v26, %v1126_v20 }
  0x8a   : > { %1092 = vmatpush1.bf16.msra.mxu0 %v1715_v34 }
  0x8b   : > { %1093 = vmatprep.subr.bf16.mxu0 %v1720_v35 }
  0x8e   : > { %1094 = vmatpush1.bf16.msra.mxu0 %v1718_v36 }
  0x8f   : > { %1095 = vmatprep.subr.bf16.mxu0 %v1723_v37 }
  0x92   : > { %1096 = vmatpush1.bf16.msra.mxu0 %v1721_v38  ;;  %v1305_v38 = vrot.slane (!%p1530_p7), %v1300_v32, %v1122_v18 }
  0x93   : > { %1097 = vmatprep.subr.bf16.mxu0 %v1726_v39 }
  0x96   : > { %1098 = vmatpush1.bf16.msra.mxu0 %v1724_v40 }
  0x97   : > { %1243 = vmatprep.subr.bf16.mxu0 (!%p1530_p7), %v1729_v62 }
  0x99   : > { %1100 = vmatmul.mubr.bf16.vlgmr.msra.gmra.mrb[4].mxu0 %v1432_v41  ;;  %v1309_v41 = vrot.slane (!%p1530_p7), %v1300_v32, %v1126_v20 }
  0x9a   : > { %1275 = vmatprep.mubr.bf16.mxu0 (!%p1530_p7), %v1778_v0  ;;  %1244 = vmatpush1.bf16.msra.mxu0 (!%p1530_p7), %v1731_v63 }
  0x9b   : > { %1245 = vmatprep.subr.bf16.mxu0 (!%p1530_p7), %v1732_v1 }
  0x9e   : > { %1246 = vmatpush1.bf16.msra.mxu0 (!%p1530_p7), %v1734_v2 }
  0x9f   : > { %1247 = vmatprep.subr.bf16.mxu0 (!%p1530_p7), %v1735_v3 }
  0xa2   : > { %1248 = vmatpush1.bf16.msra.mxu0 (!%p1530_p7), %v1737_v4 }
  0xa3   : > { %1249 = vmatprep.subr.bf16.mxu0 (!%p1530_p7), %v1738_v5 }
  0xa6   : > { %1250 = vmatpush1.bf16.msra.mxu0 (!%p1530_p7), %v1740_v6 }
  0xa7   : > { %1251 = vmatprep.subr.bf16.mxu0 (!%p1530_p7), %v1741_v7 }
  0xaa   : > { %1252 = vmatpush1.bf16.msra.mxu0 (!%p1530_p7), %v1743_v8 }
  0xab   : > { %1253 = vmatprep.subr.bf16.mxu0 (!%p1530_p7), %v1744_v9 }
  0xae   : > { %1254 = vmatpush1.bf16.msra.mxu0 (!%p1530_p7), %v1746_v10 }
  0xaf   : > { %1255 = vmatprep.subr.bf16.mxu0 (!%p1530_p7), %v1747_v11 }
  0xb2   : > { %1256 = vmatpush1.bf16.msra.mxu0 (!%p1530_p7), %v1749_v12 }
  0xb3   : > { %1257 = vmatprep.subr.bf16.mxu0 (!%p1530_p7), %v1750_v13 }
  0xb6   : > { %1258 = vmatpush1.bf16.msra.mxu0 (!%p1530_p7), %v1752_v14 }
 0x12c   : > { %v1019_v42 = vpop.f32.mrb[0].mxu0 }
 0x12d   : > { %v1060_v43 = vpop.f32.mrb[0].mxu1  ;;  %v1021_v45 = vpop.f32.mrb[1].mxu0 }
 0x12e   : > { %v1061_v44 = vadd.f32 %v1060_v43, %v1019_v42  ;;  %v1062_v46 = vpop.f32.mrb[1].mxu1  ;;  %v1023_v48 = vpop.f32.mrb[2].mxu0 }
 0x12f   : > { %v1063_v47 = vadd.f32 %v1062_v46, %v1021_v45  ;;  %v1064_v49 = vpop.f32.mrb[2].mxu1  ;;  %v1024_v50 = vpop.f32.mrb[3].mxu0  ;;  %1276 = vmatmul.mubr.bf16.vlgmr.msra.gmra.mrb[0].mxu0 (!%p1530_p7), %v1146_v15 }
 0x130   : > { %v1065_v51 = vpop.f32.mrb[3].mxu1 }
 0x16c   : > { %v1101_v53 = vpop.f32.mrb[4].mxu0  ;;  %1115 = sbr.rel (%p1530_p7) target bundleno = 527 (0x20f), region = 60 }
 0x16d   : > { %v1102_v54 = vadd.f32 %v1101_v53, %v1061_v44  ;;  %v1103_v56 = vpop.f32.mrb[5].mxu0 }
 0x16e   : > { %v1104_v57 = vadd.f32 %v1103_v56, %v1063_v47  ;;  %v1105_v58 = vpop.f32.mrb[6].mxu0 }
 0x16f   : > { %v1108_v59 = vadd.f32 %v1102_v54, %v383_v52  ;;  %v1106_v60 = vpop.f32.mrb[7].mxu0 }
 0x170   : > { %v1109_v61 = vadd.f32 %v1104_v57, %v384_v55 }
 0x171   : > { %1110 = vst [vmem:[#allocation2] sm:$0xff] %v1108_v59 }
 0x172   : > { %1111 = vst [vmem:[#allocation2 + $0x8] sm:$0xff] %v1109_v61 }
 0x178   : > { %v1116_v22 = vld [vmem:[#allocation2] sm:$0xff] }
 0x179   : > { %v1117_v25 = vld [vmem:[#allocation2 + $0x8] sm:$0xff]  ;;  %v1130_v27 = vmul.f32 %v1123_v21, %v1116_v22 }
 0x17a   : > { %v1131_v29 = vmul.f32 %v1127_v24, %v1117_v25 }
 0x17b   : > { %v1144_v34 = vadd.f32 %v1137_v28, %v1130_v27 }
 0x17c   : > { %v1145_v36 = vadd.f32 %v1141_v30, %v1131_v29 }
 0x202   : > { %v1277_v35 = vpop.f32.mrb[0].mxu0 }
 0x203   : > { %v1296_v37 = vmul.f32 %v1289_v31, %v1277_v35  ;;  %v1279_v39 = vpop.f32.mrb[1].mxu0 }
 0x204   : > { %v1297_v40 = vmul.f32 %v1293_v33, %v1279_v39  ;;  %v1281_v42 = vpop.f32.mrb[2].mxu0 }
 0x205   : > { %v1298_v43 = vadd.f32 %v1296_v37, %v1144_v34  ;;  %v1282_v44 = vpop.f32.mrb[3].mxu0 }
 0x206   : > { %v1299_v45 = vadd.f32 %v1297_v40, %v1145_v36 }
 0x207   : > { %v1312_v46 = vadd.f32 %v1305_v38, %v1298_v43 }
 0x208   : > { %v1313_v47 = vadd.f32 %v1309_v41, %v1299_v45 }
 0x209   : > { %v1314_v48 = vmax.f32 %v1312_v46, 0.0 }
 0x20a   : > { %v1315_v49 = vmax.f32 %v1313_v47, 0.0 }
 0x20c   : > { %v1552_v50 = vpack.c.bf16 %v1315_v49, %v1314_v48 }
 0x20e   : > { %1324 = vst [vmem:[%s2046_s8] sm:$0xff] %v1552_v50 }
 0x20f PF: > { %s18_s29 = sadd.s32 1, %s1775_s29   ;;  %s2047_s27 = smov %s1771_s28 }
 0x210   : > { %p15_p8 = scmp.ge.s32.totalorder %s18_s29, 5   ;;  %s2048_s28 = smov %s2050_s30 }
 0x212   :  { %17 = sbr.rel (!%p15_p8) target bundleno = 2 (0x2), region = 96 }

// kernel: _lambda_.22
= control target key start
LH: loop header
LB: loop body
LE: loop exit
PB: predicated region body
PF: predicated region fallthrough
CT: control target
= control target key end

     0   :  { %s1114_s18 = smov 0   ;;  %s1116_s19 = smov 0   ;;  %s1415_s0 = inlined_call_operand.vmem [shape: bf16[2,1,1,9,512], index: 0, kind: input, shape index: {}, may-alias: {0,5}]   ;;  %s1416_s1 = inlined_call_operand.vmem [shape: bf16[2,2304], index: 1, kind: input, shape index: {}]   ;;  %s1417_s2 = inlined_call_operand.vmem [shape: bf16[2304,512], index: 2, kind: input, shape index: {}]   ;;  %s1418_s3 = inlined_call_operand.vmem [shape: f32[1,512], index: 3, kind: input, shape index: {}]   ;;  %s1419_s4 = inlined_call_operand.vmem [shape: f32[1,512], index: 4, kind: input, shape index: {}]   ;;  %s1420_s5 = inlined_call_operand.vmem [shape: bf16[2,1,1,9,512], index: 5, kind: output, shape index: {}, may-alias: {0,5}]  }
   0x1   :  { %s1118_s0 = smov 0  }
   0x2 LB: > { %s997_s20 = sadd.s32 4294967295, %s1079_s0   ;;  %s25_s21 = sadd.s32 1, %s1075_s19  ;;  %s1079_s0 = sphi %s1118_s0, %s16_s0   ;;  %s1075_s19 = sphi %s1116_s19, %s1422_s19   ;;  %s1071_s18 = sphi %s1114_s18, %s1421_s18  }
   0x3   : > { %p26_p0 = scmp.ge.s32.totalorder %s25_s21, 3  ;;  %p1000_p1 = scmp.ge.s32.totalorder %s1079_s0, 1 }
   0x4   : > { %p194_p2 = scmp.lt.s32.totalorder %s1079_s0, 4 }
   0x5   : > { %s1424_s21 = smov (%p26_p0, %s25_s21), 0 }
   0x6   : > { %p195_p3 = pnand %p1000_p1, %p194_p2 }
   0x7   : > { %s224_s22 = smul.u32 (!%p195_p3), 6, %s1071_s18  ;;  %p1003_p6 = scmp.ne.s32.totalorder (!%p195_p3), %s1071_s18, 0 }
   0x8   : > { %198 = sbr.rel (%p195_p3) target bundleno = 474 (0x1da), region = 36 }
   0x9   : > { %s233_s23 = smul.u32 (!%p195_p3), 48, %s1071_s18  ;;  %p227_p4 = scmp.lt.s32.totalorder (!%p195_p3), %s224_s22, 17 }
   0xb   : > { %p234_p5 = scmp.lt.s32.totalorder (!%p195_p3), %s233_s23, 143 }
   0xf   : > { %s1426_s22 = smov (!%p227_p4, %s224_s22), 17  ;;  %s1428_s23 = smov (!%p234_p5, %s233_s23), 143 }
  0x10   : > { %s231_s26 = scalar_lea.vmem %s1416_s1, %s1426_s22  ;;  %s1012_s27 = sshll.u32 %s1428_s23, 5  ;;  %v1081_v0 = vmov (!%p1003_p6), 0.0  }
  0x11   : > { %s1146_s30 = scalar_lea.vmem %s1417_s2, %s1012_s27  ;;  %243 = sbr.rel (%p1003_p6) target bundleno = 24 (0x18), region = 40  ;;  %244 = vst [vmem:[#allocation2] sm:$0xff] (!%p1003_p6), %v1081_v0 }
  0x18 PF: > { %v248_v1 = vld [vmem:[%s1146_s30 + $0x8] sm:$0xff]  ;;  %v250_v2 = vld [vmem:[%s1146_s30 + $0x18] sm:$0xff]  ;;  %v247_v3 = vld [vmem:[%s1146_s30] sm:$0xff]  ;;  %v1082_v15 = vmov 1966171168   ;;  %v444_v17 = vlaneseq  ;;  %p1004_p7 = scmp.ne.s32.totalorder %s1071_s18, 2 }
  0x19   : > { %493 = vmatprep.subr.bf16.mxu0 %v248_v1  ;;  %616 = vmatprep.subr.bf16.mxu1 %v250_v2  ;;  %v249_v4 = vld [vmem:[%s1146_s30 + $0x10] sm:$0xff]  ;;  %v252_v5 = vld [vmem:[%s1146_s30 + $0x28] sm:$0xff]  ;;  %v254_v6 = vld [vmem:[%s1146_s30 + $0x38] sm:$0xff]  ;;  %v442_v16 = vunpack.c.l.s4 %v1082_v15 }
  0x1a   : > { %494 = vmatpush1.bf16.msra.mxu0 %v247_v3  ;;  %617 = vmatpush1.bf16.msra.mxu1 %v249_v4  ;;  %v251_v7 = vld [vmem:[%s1146_s30 + $0x20] sm:$0xff]  ;;  %v253_v8 = vld [vmem:[%s1146_s30 + $0x30] sm:$0xff]  ;;  %v256_v9 = vld [vmem:[%s1146_s30 + $0x48] sm:$0xff]  ;;  %v1167_v23 = vshrl.u32 %v444_v17, 7 }
  0x1b   : > { %495 = vmatprep.subr.bf16.mxu0 %v252_v5  ;;  %618 = vmatprep.subr.bf16.mxu1 %v254_v6  ;;  %v258_v10 = vld [vmem:[%s1146_s30 + $0x58] sm:$0xff]  ;;  %v255_v11 = vld [vmem:[%s1146_s30 + $0x40] sm:$0xff]  ;;  %v257_v12 = vld [vmem:[%s1146_s30 + $0x50] sm:$0xff]  ;;  %v443_v22 = vunpack.c.0.s8 %v442_v16 }
  0x1c   : > { %v260_v13 = vld [vmem:[%s1146_s30 + $0x68] sm:$0xff]  ;;  %v262_v14 = vld [vmem:[%s1146_s30 + $0x78] sm:$0xff]  ;;  %v259_v18 = vld [vmem:[%s1146_s30 + $0x60] sm:$0xff] }
  0x1d   : > { %v261_v19 = vld [vmem:[%s1146_s30 + $0x70] sm:$0xff]  ;;  %v264_v20 = vld [vmem:[%s1146_s30 + $0x88] sm:$0xff]  ;;  %v266_v21 = vld [vmem:[%s1146_s30 + $0x98] sm:$0xff]  ;;  %v1174_v28 = vsub.s32 %v443_v22, %v1167_v23 }
  0x1e   : > { %496 = vmatpush1.bf16.msra.mxu0 %v251_v7  ;;  %619 = vmatpush1.bf16.msra.mxu1 %v253_v8  ;;  %v263_v24 = vld [vmem:[%s1146_s30 + $0x80] sm:$0xff]  ;;  %v265_v25 = vld [vmem:[%s1146_s30 + $0x90] sm:$0xff]  ;;  %v268_v26 = vld [vmem:[%s1146_s30 + $0xa8] sm:$0xff] }
  0x1f   : > { %497 = vmatprep.subr.bf16.mxu0 %v256_v9  ;;  %620 = vmatprep.subr.bf16.mxu1 %v258_v10  ;;  %v270_v27 = vld [vmem:[%s1146_s30 + $0xb8] sm:$0xff]  ;;  %v267_v29 = vld [vmem:[%s1146_s30 + $0xa0] sm:$0xff]  ;;  %v269_v30 = vld [vmem:[%s1146_s30 + $0xb0] sm:$0xff] }
  0x20   : > { %v272_v31 = vld [vmem:[%s1146_s30 + $0xc8] sm:$0xff]  ;;  %v274_v32 = vld [vmem:[%s1146_s30 + $0xd8] sm:$0xff]  ;;  %v1185_v33 = vld [vmem:[%s231_s26] sm:$0x3f] }
  0x21   : > { %v1189_v34 = vrot.slane %v1185_v33, %v1174_v28  ;;  %v271_v35 = vld [vmem:[%s1146_s30 + $0xc0] sm:$0xff]  ;;  %v273_v36 = vld [vmem:[%s1146_s30 + $0xd0] sm:$0xff]  ;;  %v276_v37 = vld [vmem:[%s1146_s30 + $0xe8] sm:$0xff]  ;;  %v440_v9 = vcombine.high %v1185_v33, %v1185_v33 }
  0x22   : > { %498 = vmatpush1.bf16.msra.mxu0 %v255_v11  ;;  %621 = vmatpush1.bf16.msra.mxu1 %v257_v12  ;;  %v278_v38 = vld [vmem:[%s1146_s30 + $0xf8] sm:$0xff]  ;;  %v275_v41 = vld [vmem:[%s1146_s30 + $0xe0] sm:$0xff]  ;;  %v277_v42 = vld [vmem:[%s1146_s30 + $0xf0] sm:$0xff] }
  0x23   : > { %499 = vmatprep.subr.bf16.mxu0 %v260_v13  ;;  %622 = vmatprep.subr.bf16.mxu1 %v262_v14  ;;  %v455_v39 = vcombine.high %v1189_v34, %v1189_v34  ;;  %v280_v43 = vld [vmem:[%s1146_s30 + $0x108] sm:$0xff]  ;;  %v282_v44 = vld [vmem:[%s1146_s30 + $0x118] sm:$0xff]  ;;  %v279_v45 = vld [vmem:[%s1146_s30 + $0x100] sm:$0xff]  ;;  %v454_v10 = vrot.slane %v440_v9, %v1174_v28  ;;  %v1243_v16 = vrot.slane %v1189_v34, %v1174_v28 }
  0x24   : > { %v281_v46 = vld [vmem:[%s1146_s30 + $0x110] sm:$0xff]  ;;  %v284_v47 = vld [vmem:[%s1146_s30 + $0x128] sm:$0xff]  ;;  %v286_v48 = vld [vmem:[%s1146_s30 + $0x138] sm:$0xff] }
  0x25   : > { %v1198_v40 = vrot.slane %v455_v39, %v1174_v28  ;;  %v283_v49 = vld [vmem:[%s1146_s30 + $0x120] sm:$0xff]  ;;  %v285_v50 = vld [vmem:[%s1146_s30 + $0x130] sm:$0xff]  ;;  %v288_v51 = vld [vmem:[%s1146_s30 + $0x148] sm:$0xff]  ;;  %v456_v15 = vcombine.high %v454_v10, %v454_v10 }
  0x26   : > { %500 = vmatpush1.bf16.msra.mxu0 %v259_v18  ;;  %623 = vmatpush1.bf16.msra.mxu1 %v261_v19  ;;  %v290_v52 = vld [vmem:[%s1146_s30 + $0x158] sm:$0xff]  ;;  %v287_v53 = vld [vmem:[%s1146_s30 + $0x140] sm:$0xff]  ;;  %v289_v54 = vld [vmem:[%s1146_s30 + $0x150] sm:$0xff]  ;;  %v1249_v18 = vrot.slane %v454_v10, %v1174_v28 }
  0x27   : > { %501 = vmatprep.subr.bf16.mxu0 %v264_v20  ;;  %624 = vmatprep.subr.bf16.mxu1 %v266_v21  ;;  %v292_v55 = vld [vmem:[%s1146_s30 + $0x168] sm:$0xff]  ;;  %v294_v56 = vld [vmem:[%s1146_s30 + $0x178] sm:$0xff]  ;;  %v291_v57 = vld [vmem:[%s1146_s30 + $0x160] sm:$0xff]  ;;  %v1246_v17 = vrot.slane %v456_v15, %v1174_v28 }
  0x28   : > { %525 = vmatprep.mubr.bf16.mxu0 %v1198_v40  ;;  %648 = vmatprep.mubr.bf16.mxu1 %v1198_v40  ;;  %v293_v58 = vld [vmem:[%s1146_s30 + $0x170] sm:$0xff]  ;;  %v296_v59 = vld [vmem:[%s1146_s30 + $0x188] sm:$0xff]  ;;  %v298_v60 = vld [vmem:[%s1146_s30 + $0x198] sm:$0xff] }
  0x29   : > { %v295_v61 = vld [vmem:[%s1146_s30 + $0x180] sm:$0xff]  ;;  %v297_v62 = vld [vmem:[%s1146_s30 + $0x190] sm:$0xff]  ;;  %v300_v63 = vld [vmem:[%s1146_s30 + $0x1a8] sm:$0xff] }
  0x2a   : > { %502 = vmatpush1.bf16.msra.mxu0 %v263_v24  ;;  %625 = vmatpush1.bf16.msra.mxu1 %v265_v25  ;;  %v302_v0 = vld [vmem:[%s1146_s30 + $0x1b8] sm:$0xff]  ;;  %v299_v1 = vld [vmem:[%s1146_s30 + $0x1a0] sm:$0xff]  ;;  %v301_v2 = vld [vmem:[%s1146_s30 + $0x1b0] sm:$0xff]  ;;  %v486_v24 = vcombine.high %v1198_v40, %v1198_v40 }
  0x2b   : > { %503 = vmatprep.subr.bf16.mxu0 %v268_v26  ;;  %626 = vmatprep.subr.bf16.mxu1 %v270_v27  ;;  %v304_v3 = vld [vmem:[%s1146_s30 + $0x1c8] sm:$0xff]  ;;  %v306_v4 = vld [vmem:[%s1146_s30 + $0x1d8] sm:$0xff]  ;;  %v303_v5 = vld [vmem:[%s1146_s30 + $0x1c0] sm:$0xff] }
  0x2c   : > { %v305_v6 = vld [vmem:[%s1146_s30 + $0x1d0] sm:$0xff]  ;;  %v308_v7 = vld [vmem:[%s1146_s30 + $0x1e8] sm:$0xff]  ;;  %v310_v8 = vld [vmem:[%s1146_s30 + $0x1f8] sm:$0xff] }
  0x2d   : > { %v307_v11 = vld [vmem:[%s1146_s30 + $0x1e0] sm:$0xff]  ;;  %v309_v12 = vld [vmem:[%s1146_s30 + $0x1f0] sm:$0xff]  ;;  %v312_v13 = vld [vmem:[%s1146_s30 + $0x208] sm:$0xff] }
  0x2e   : > { %504 = vmatpush1.bf16.msra.mxu0 %v267_v29  ;;  %627 = vmatpush1.bf16.msra.mxu1 %v269_v30  ;;  %v314_v14 = vld [vmem:[%s1146_s30 + $0x218] sm:$0xff]  ;;  %v311_v19 = vld [vmem:[%s1146_s30 + $0x200] sm:$0xff]  ;;  %v313_v20 = vld [vmem:[%s1146_s30 + $0x210] sm:$0xff] }
  0x2f   : > { %505 = vmatprep.subr.bf16.mxu0 %v272_v31  ;;  %628 = vmatprep.subr.bf16.mxu1 %v274_v32  ;;  %v316_v21 = vld [vmem:[%s1146_s30 + $0x228] sm:$0xff]  ;;  %v318_v22 = vld [vmem:[%s1146_s30 + $0x238] sm:$0xff]  ;;  %v315_v25 = vld [vmem:[%s1146_s30 + $0x220] sm:$0xff] }
  0x30   : > { %v317_v26 = vld [vmem:[%s1146_s30 + $0x230] sm:$0xff]  ;;  %v320_v27 = vld [vmem:[%s1146_s30 + $0x248] sm:$0xff]  ;;  %v322_v29 = vld [vmem:[%s1146_s30 + $0x258] sm:$0xff] }
  0x31   : > { %v319_v30 = vld [vmem:[%s1146_s30 + $0x240] sm:$0xff]  ;;  %v321_v31 = vld [vmem:[%s1146_s30 + $0x250] sm:$0xff]  ;;  %v324_v32 = vld [vmem:[%s1146_s30 + $0x268] sm:$0xff] }
  0x32   : > { %506 = vmatpush1.bf16.msra.mxu0 %v271_v35  ;;  %629 = vmatpush1.bf16.msra.mxu1 %v273_v36  ;;  %v326_v33 = vld [vmem:[%s1146_s30 + $0x278] sm:$0xff]  ;;  %v323_v34 = vld [vmem:[%s1146_s30 + $0x260] sm:$0xff]  ;;  %v325_v35 = vld [vmem:[%s1146_s30 + $0x270] sm:$0xff] }
  0x33   : > { %507 = vmatprep.subr.bf16.mxu0 %v276_v37  ;;  %630 = vmatprep.subr.bf16.mxu1 %v278_v38  ;;  %v328_v36 = vld [vmem:[%s1146_s30 + $0x288] sm:$0xff]  ;;  %v330_v37 = vld [vmem:[%s1146_s30 + $0x298] sm:$0xff]  ;;  %v327_v38 = vld [vmem:[%s1146_s30 + $0x280] sm:$0xff] }
  0x34   : > { %v329_v39 = vld [vmem:[%s1146_s30 + $0x290] sm:$0xff]  ;;  %v332_v40 = vld [vmem:[%s1146_s30 + $0x2a8] sm:$0xff]  ;;  %v366_v9 = vld [vmem:[%s1146_s30 + $0x3b8] sm:$0xff] }
  0x35   : > { %v363_v10 = vld [vmem:[%s1146_s30 + $0x3a0] sm:$0xff]  ;;  %v369_v15 = vld [vmem:[%s1146_s30 + $0x3d0] sm:$0xff] }
  0x36   : > { %508 = vmatpush1.bf16.msra.mxu0 %v275_v41  ;;  %631 = vmatpush1.bf16.msra.mxu1 %v277_v42  ;;  %v334_v41 = vld [vmem:[%s1146_s30 + $0x2b8] sm:$0xff]  ;;  %v331_v42 = vld [vmem:[%s1146_s30 + $0x2a0] sm:$0xff] }
  0x37   : > { %509 = vmatprep.subr.bf16.mxu0 %v280_v43  ;;  %632 = vmatprep.subr.bf16.mxu1 %v282_v44  ;;  %v333_v43 = vld [vmem:[%s1146_s30 + $0x2b0] sm:$0xff]  ;;  %v336_v44 = vld [vmem:[%s1146_s30 + $0x2c8] sm:$0xff] }
  0x3a   : > { %510 = vmatpush1.bf16.msra.mxu0 %v279_v45  ;;  %633 = vmatpush1.bf16.msra.mxu1 %v281_v46  ;;  %v338_v45 = vld [vmem:[%s1146_s30 + $0x2d8] sm:$0xff]  ;;  %v335_v46 = vld [vmem:[%s1146_s30 + $0x2c0] sm:$0xff] }
  0x3b   : > { %511 = vmatprep.subr.bf16.mxu0 %v284_v47  ;;  %634 = vmatprep.subr.bf16.mxu1 %v286_v48  ;;  %v337_v47 = vld [vmem:[%s1146_s30 + $0x2d0] sm:$0xff]  ;;  %v340_v48 = vld [vmem:[%s1146_s30 + $0x2e8] sm:$0xff] }
  0x3e   : > { %512 = vmatpush1.bf16.msra.mxu0 %v283_v49  ;;  %635 = vmatpush1.bf16.msra.mxu1 %v285_v50  ;;  %v342_v49 = vld [vmem:[%s1146_s30 + $0x2f8] sm:$0xff]  ;;  %v339_v50 = vld [vmem:[%s1146_s30 + $0x2e0] sm:$0xff] }
  0x3f   : > { %513 = vmatprep.subr.bf16.mxu0 %v288_v51  ;;  %636 = vmatprep.subr.bf16.mxu1 %v290_v52  ;;  %v341_v51 = vld [vmem:[%s1146_s30 + $0x2f0] sm:$0xff]  ;;  %v344_v52 = vld [vmem:[%s1146_s30 + $0x308] sm:$0xff] }
  0x42   : > { %514 = vmatpush1.bf16.msra.mxu0 %v287_v53  ;;  %637 = vmatpush1.bf16.msra.mxu1 %v289_v54  ;;  %v346_v53 = vld [vmem:[%s1146_s30 + $0x318] sm:$0xff]  ;;  %v343_v54 = vld [vmem:[%s1146_s30 + $0x300] sm:$0xff] }
  0x43   : > { %515 = vmatprep.subr.bf16.mxu0 %v292_v55  ;;  %638 = vmatprep.subr.bf16.mxu1 %v294_v56  ;;  %v345_v55 = vld [vmem:[%s1146_s30 + $0x310] sm:$0xff]  ;;  %v348_v56 = vld [vmem:[%s1146_s30 + $0x328] sm:$0xff] }
  0x46   : > { %516 = vmatpush1.bf16.msra.mxu0 %v291_v57  ;;  %639 = vmatpush1.bf16.msra.mxu1 %v293_v58  ;;  %v350_v57 = vld [vmem:[%s1146_s30 + $0x338] sm:$0xff]  ;;  %v347_v58 = vld [vmem:[%s1146_s30 + $0x320] sm:$0xff] }
  0x47   : > { %517 = vmatprep.subr.bf16.mxu0 %v296_v59  ;;  %640 = vmatprep.subr.bf16.mxu1 %v298_v60  ;;  %v349_v59 = vld [vmem:[%s1146_s30 + $0x330] sm:$0xff]  ;;  %v352_v60 = vld [vmem:[%s1146_s30 + $0x348] sm:$0xff] }
  0x4a   : > { %518 = vmatpush1.bf16.msra.mxu0 %v295_v61  ;;  %641 = vmatpush1.bf16.msra.mxu1 %v297_v62  ;;  %v354_v61 = vld [vmem:[%s1146_s30 + $0x358] sm:$0xff]  ;;  %v351_v62 = vld [vmem:[%s1146_s30 + $0x340] sm:$0xff] }
  0x4b   : > { %519 = vmatprep.subr.bf16.mxu0 %v300_v63  ;;  %642 = vmatprep.subr.bf16.mxu1 %v302_v0  ;;  %v353_v63 = vld [vmem:[%s1146_s30 + $0x350] sm:$0xff]  ;;  %v356_v0 = vld [vmem:[%s1146_s30 + $0x368] sm:$0xff] }
  0x4e   : > { %520 = vmatpush1.bf16.msra.mxu0 %v299_v1  ;;  %643 = vmatpush1.bf16.msra.mxu1 %v301_v2  ;;  %v358_v1 = vld [vmem:[%s1146_s30 + $0x378] sm:$0xff]  ;;  %v355_v2 = vld [vmem:[%s1146_s30 + $0x360] sm:$0xff] }
  0x4f   : > { %521 = vmatprep.subr.bf16.mxu0 %v304_v3  ;;  %644 = vmatprep.subr.bf16.mxu1 %v306_v4  ;;  %v357_v3 = vld [vmem:[%s1146_s30 + $0x370] sm:$0xff]  ;;  %v360_v4 = vld [vmem:[%s1146_s30 + $0x388] sm:$0xff] }
  0x52   : > { %522 = vmatpush1.bf16.msra.mxu0 %v303_v5  ;;  %645 = vmatpush1.bf16.msra.mxu1 %v305_v6  ;;  %v362_v5 = vld [vmem:[%s1146_s30 + $0x398] sm:$0xff]  ;;  %v359_v6 = vld [vmem:[%s1146_s30 + $0x380] sm:$0xff] }
  0x53   : > { %523 = vmatprep.subr.bf16.mxu0 %v308_v7  ;;  %646 = vmatprep.subr.bf16.mxu1 %v310_v8  ;;  %v361_v7 = vld [vmem:[%s1146_s30 + $0x390] sm:$0xff]  ;;  %v364_v8 = vld [vmem:[%s1146_s30 + $0x3a8] sm:$0xff] }
  0x56   : > { %524 = vmatpush1.bf16.msra.mxu0 %v307_v11  ;;  %647 = vmatpush1.bf16.msra.mxu1 %v309_v12  ;;  %v365_v11 = vld [vmem:[%s1146_s30 + $0x3b0] sm:$0xff]  ;;  %v368_v12 = vld [vmem:[%s1146_s30 + $0x3c8] sm:$0xff] }
  0x57   : > { %534 = vmatprep.subr.bf16.mxu0 %v312_v13  ;;  %657 = vmatprep.subr.bf16.mxu1 %v314_v14  ;;  %v370_v13 = vld [vmem:[%s1146_s30 + $0x3d8] sm:$0xff]  ;;  %v367_v14 = vld [vmem:[%s1146_s30 + $0x3c0] sm:$0xff] }
  0x59   : > { %526 = vmatmul.mubr.bf16.vlgmr.msra.gmra.mrb[0].mxu0 %v1243_v16  ;;  %649 = vmatmul.mubr.bf16.vlgmr.msra.gmra.mrb[0].mxu1 %v1243_v16 }
  0x5a   : > { %535 = vmatpush1.bf16.msra.mxu0 %v311_v19  ;;  %658 = vmatpush1.bf16.msra.mxu1 %v313_v20  ;;  %v372_v19 = vld [vmem:[%s1146_s30 + $0x3e8] sm:$0xff]  ;;  %v374_v20 = vld [vmem:[%s1146_s30 + $0x3f8] sm:$0xff] }
  0x5b   : > { %536 = vmatprep.subr.bf16.mxu0 %v316_v21  ;;  %659 = vmatprep.subr.bf16.mxu1 %v318_v22  ;;  %v371_v21 = vld [vmem:[%s1146_s30 + $0x3e0] sm:$0xff]  ;;  %v373_v22 = vld [vmem:[%s1146_s30 + $0x3f0] sm:$0xff] }
  0x5c   : > { %566 = vmatprep.mubr.bf16.mxu0 %v486_v24  ;;  %689 = vmatprep.mubr.bf16.mxu1 %v486_v24  ;;  %v376_v24 = vld [vmem:[%s1146_s30 + $0x408] sm:$0xff] }
  0x5e   : > { %537 = vmatpush1.bf16.msra.mxu0 %v315_v25  ;;  %660 = vmatpush1.bf16.msra.mxu1 %v317_v26  ;;  %v378_v25 = vld [vmem:[%s1146_s30 + $0x418] sm:$0xff]  ;;  %v485_v26 = vcombine.high %v1243_v16, %v1243_v16  ;;  %v379_v16 = vld [vmem:[%s1146_s30 + $0x420] sm:$0xff] }
  0x5f   : > { %538 = vmatprep.subr.bf16.mxu0 %v320_v27  ;;  %661 = vmatprep.subr.bf16.mxu1 %v322_v29  ;;  %v375_v27 = vld [vmem:[%s1146_s30 + $0x400] sm:$0xff]  ;;  %v377_v29 = vld [vmem:[%s1146_s30 + $0x410] sm:$0xff] }
  0x62   : > { %539 = vmatpush1.bf16.msra.mxu0 %v319_v30  ;;  %662 = vmatpush1.bf16.msra.mxu1 %v321_v31  ;;  %v380_v30 = vld [vmem:[%s1146_s30 + $0x428] sm:$0xff]  ;;  %v382_v31 = vld [vmem:[%s1146_s30 + $0x438] sm:$0xff] }
  0x63   : > { %540 = vmatprep.subr.bf16.mxu0 %v324_v32  ;;  %663 = vmatprep.subr.bf16.mxu1 %v326_v33  ;;  %v381_v32 = vld [vmem:[%s1146_s30 + $0x430] sm:$0xff]  ;;  %v384_v33 = vld [vmem:[%s1146_s30 + $0x448] sm:$0xff] }
  0x66   : > { %541 = vmatpush1.bf16.msra.mxu0 %v323_v34  ;;  %664 = vmatpush1.bf16.msra.mxu1 %v325_v35  ;;  %v386_v34 = vld [vmem:[%s1146_s30 + $0x458] sm:$0xff]  ;;  %v383_v35 = vld [vmem:[%s1146_s30 + $0x440] sm:$0xff] }
  0x67   : > { %542 = vmatprep.subr.bf16.mxu0 %v328_v36  ;;  %665 = vmatprep.subr.bf16.mxu1 %v330_v37  ;;  %v385_v36 = vld [vmem:[%s1146_s30 + $0x450] sm:$0xff]  ;;  %v388_v37 = vld [vmem:[%s1146_s30 + $0x468] sm:$0xff] }
  0x6a   : > { %543 = vmatpush1.bf16.msra.mxu0 %v327_v38  ;;  %666 = vmatpush1.bf16.msra.mxu1 %v329_v39  ;;  %v390_v38 = vld [vmem:[%s1146_s30 + $0x478] sm:$0xff]  ;;  %v387_v39 = vld [vmem:[%s1146_s30 + $0x460] sm:$0xff] }
  0x6b   : > { %544 = vmatprep.subr.bf16.mxu0 %v332_v40  ;;  %667 = vmatprep.subr.bf16.mxu1 %v334_v41  ;;  %v392_v40 = vld [vmem:[%s1146_s30 + $0x488] sm:$0xff]  ;;  %v394_v41 = vld [vmem:[%s1146_s30 + $0x498] sm:$0xff] }
  0x6e   : > { %545 = vmatpush1.bf16.msra.mxu0 %v331_v42  ;;  %668 = vmatpush1.bf16.msra.mxu1 %v333_v43  ;;  %v391_v42 = vld [vmem:[%s1146_s30 + $0x480] sm:$0xff]  ;;  %v393_v43 = vld [vmem:[%s1146_s30 + $0x490] sm:$0xff] }
  0x6f   : > { %546 = vmatprep.subr.bf16.mxu0 %v336_v44  ;;  %669 = vmatprep.subr.bf16.mxu1 %v338_v45  ;;  %v396_v44 = vld [vmem:[%s1146_s30 + $0x4a8] sm:$0xff]  ;;  %v398_v45 = vld [vmem:[%s1146_s30 + $0x4b8] sm:$0xff] }
  0x72   : > { %547 = vmatpush1.bf16.msra.mxu0 %v335_v46  ;;  %670 = vmatpush1.bf16.msra.mxu1 %v337_v47  ;;  %v395_v46 = vld [vmem:[%s1146_s30 + $0x4a0] sm:$0xff]  ;;  %v397_v47 = vld [vmem:[%s1146_s30 + $0x4b0] sm:$0xff] }
  0x73   : > { %548 = vmatprep.subr.bf16.mxu0 %v340_v48  ;;  %671 = vmatprep.subr.bf16.mxu1 %v342_v49  ;;  %v400_v48 = vld [vmem:[%s1146_s30 + $0x4c8] sm:$0xff]  ;;  %v402_v49 = vld [vmem:[%s1146_s30 + $0x4d8] sm:$0xff] }
  0x76   : > { %549 = vmatpush1.bf16.msra.mxu0 %v339_v50  ;;  %672 = vmatpush1.bf16.msra.mxu1 %v341_v51  ;;  %v399_v50 = vld [vmem:[%s1146_s30 + $0x4c0] sm:$0xff]  ;;  %v401_v51 = vld [vmem:[%s1146_s30 + $0x4d0] sm:$0xff] }
  0x77   : > { %550 = vmatprep.subr.bf16.mxu0 %v344_v52  ;;  %673 = vmatprep.subr.bf16.mxu1 %v346_v53  ;;  %v404_v52 = vld [vmem:[%s1146_s30 + $0x4e8] sm:$0xff]  ;;  %v406_v53 = vld [vmem:[%s1146_s30 + $0x4f8] sm:$0xff] }
  0x7a   : > { %551 = vmatpush1.bf16.msra.mxu0 %v343_v54  ;;  %674 = vmatpush1.bf16.msra.mxu1 %v345_v55  ;;  %v403_v54 = vld [vmem:[%s1146_s30 + $0x4e0] sm:$0xff]  ;;  %v405_v55 = vld [vmem:[%s1146_s30 + $0x4f0] sm:$0xff] }
  0x7b   : > { %552 = vmatprep.subr.bf16.mxu0 %v348_v56  ;;  %675 = vmatprep.subr.bf16.mxu1 %v350_v57  ;;  %v408_v56 = vld [vmem:[%s1146_s30 + $0x508] sm:$0xff]  ;;  %v410_v57 = vld [vmem:[%s1146_s30 + $0x518] sm:$0xff] }
  0x7e   : > { %553 = vmatpush1.bf16.msra.mxu0 %v347_v58  ;;  %676 = vmatpush1.bf16.msra.mxu1 %v349_v59  ;;  %v407_v58 = vld [vmem:[%s1146_s30 + $0x500] sm:$0xff]  ;;  %v409_v59 = vld [vmem:[%s1146_s30 + $0x510] sm:$0xff] }
  0x7f   : > { %554 = vmatprep.subr.bf16.mxu0 %v352_v60  ;;  %677 = vmatprep.subr.bf16.mxu1 %v354_v61  ;;  %v412_v60 = vld [vmem:[%s1146_s30 + $0x528] sm:$0xff]  ;;  %v414_v61 = vld [vmem:[%s1146_s30 + $0x538] sm:$0xff] }
  0x82   : > { %555 = vmatpush1.bf16.msra.mxu0 %v351_v62  ;;  %678 = vmatpush1.bf16.msra.mxu1 %v353_v63  ;;  %v411_v62 = vld [vmem:[%s1146_s30 + $0x520] sm:$0xff]  ;;  %v413_v63 = vld [vmem:[%s1146_s30 + $0x530] sm:$0xff] }
  0x83   : > { %556 = vmatprep.subr.bf16.mxu0 %v356_v0  ;;  %679 = vmatprep.subr.bf16.mxu1 %v358_v1  ;;  %v416_v0 = vld [vmem:[%s1146_s30 + $0x548] sm:$0xff]  ;;  %v418_v1 = vld [vmem:[%s1146_s30 + $0x558] sm:$0xff] }
  0x86   : > { %557 = vmatpush1.bf16.msra.mxu0 %v355_v2  ;;  %680 = vmatpush1.bf16.msra.mxu1 %v357_v3  ;;  %v415_v2 = vld [vmem:[%s1146_s30 + $0x540] sm:$0xff]  ;;  %v417_v3 = vld [vmem:[%s1146_s30 + $0x550] sm:$0xff] }
  0x87   : > { %558 = vmatprep.subr.bf16.mxu0 %v360_v4  ;;  %681 = vmatprep.subr.bf16.mxu1 %v362_v5  ;;  %v420_v4 = vld [vmem:[%s1146_s30 + $0x568] sm:$0xff]  ;;  %v422_v5 = vld [vmem:[%s1146_s30 + $0x578] sm:$0xff] }
  0x8a   : > { %559 = vmatpush1.bf16.msra.mxu0 %v359_v6  ;;  %682 = vmatpush1.bf16.msra.mxu1 %v361_v7  ;;  %v419_v6 = vld [vmem:[%s1146_s30 + $0x560] sm:$0xff]  ;;  %v421_v7 = vld [vmem:[%s1146_s30 + $0x570] sm:$0xff] }
  0x8b   : > { %560 = vmatprep.subr.bf16.mxu0 %v364_v8  ;;  %683 = vmatprep.subr.bf16.mxu1 %v366_v9  ;;  %v424_v8 = vld [vmem:[%s1146_s30 + $0x588] sm:$0xff]  ;;  %v426_v9 = vld [vmem:[%s1146_s30 + $0x598] sm:$0xff] }
  0x8e   : > { %561 = vmatpush1.bf16.msra.mxu0 %v363_v10  ;;  %684 = vmatpush1.bf16.msra.mxu1 %v365_v11  ;;  %v423_v10 = vld [vmem:[%s1146_s30 + $0x580] sm:$0xff]  ;;  %v425_v11 = vld [vmem:[%s1146_s30 + $0x590] sm:$0xff] }
  0x8f   : > { %562 = vmatprep.subr.bf16.mxu0 %v368_v12  ;;  %685 = vmatprep.subr.bf16.mxu1 %v370_v13  ;;  %v428_v12 = vld [vmem:[%s1146_s30 + $0x5a8] sm:$0xff]  ;;  %v430_v13 = vld [vmem:[%s1146_s30 + $0x5b8] sm:$0xff] }
  0x92   : > { %563 = vmatpush1.bf16.msra.mxu0 %v367_v14  ;;  %686 = vmatpush1.bf16.msra.mxu1 %v369_v15  ;;  %v427_v14 = vld [vmem:[%s1146_s30 + $0x5a0] sm:$0xff]  ;;  %v429_v15 = vld [vmem:[%s1146_s30 + $0x5b0] sm:$0xff] }
  0x93   : > { %564 = vmatprep.subr.bf16.mxu0 %v372_v19  ;;  %687 = vmatprep.subr.bf16.mxu1 %v374_v20  ;;  %v432_v19 = vld [vmem:[%s1146_s30 + $0x5c8] sm:$0xff]  ;;  %v434_v20 = vld [vmem:[%s1146_s30 + $0x5d8] sm:$0xff] }
  0x96   : > { %565 = vmatpush1.bf16.msra.mxu0 %v371_v21  ;;  %688 = vmatpush1.bf16.msra.mxu1 %v373_v22  ;;  %v431_v21 = vld [vmem:[%s1146_s30 + $0x5c0] sm:$0xff]  ;;  %v433_v22 = vld [vmem:[%s1146_s30 + $0x5d0] sm:$0xff] }
  0x97   : > { %575 = vmatprep.subr.bf16.mxu0 %v376_v24  ;;  %698 = vmatprep.subr.bf16.mxu1 %v378_v25  ;;  %v436_v24 = vld [vmem:[%s1146_s30 + $0x5e8] sm:$0xff]  ;;  %v438_v25 = vld [vmem:[%s1146_s30 + $0x5f8] sm:$0xff] }
  0x99   : > { %567 = vmatmul.mubr.bf16.vlgmr.msra.gmra.mrb[0].mxu0 %v485_v26  ;;  %690 = vmatmul.mubr.bf16.vlgmr.msra.gmra.mrb[0].mxu1 %v485_v26  ;;  %v435_v26 = vld [vmem:[%s1146_s30 + $0x5e0] sm:$0xff] }
  0x9a   : > { %576 = vmatpush1.bf16.msra.mxu0 %v375_v27  ;;  %699 = vmatpush1.bf16.msra.mxu1 %v377_v29  ;;  %v437_v27 = vld [vmem:[%s1146_s30 + $0x5f0] sm:$0xff]  ;;  %v1083_v29 = vmov 1983009808  }
  0x9b   : > { %577 = vmatprep.subr.bf16.mxu0 %v380_v30  ;;  %700 = vmatprep.subr.bf16.mxu1 %v382_v31  ;;  %v746_v30 = vunpack.c.l.s4 %v1083_v29 }
  0x9c   : > { %607 = vmatprep.mubr.bf16.mxu0 %v1246_v17  ;;  %730 = vmatprep.mubr.bf16.mxu1 %v1246_v17  ;;  %v389_v17 = vld [vmem:[%s1146_s30 + $0x470] sm:$0xff] }
  0x9d   : > { %v747_v31 = vunpack.c.0.s8 %v746_v30 }
  0x9e   : > { %578 = vmatpush1.bf16.msra.mxu0 %v379_v16  ;;  %701 = vmatpush1.bf16.msra.mxu1 %v381_v32 }
  0x9f   : > { %579 = vmatprep.subr.bf16.mxu0 %v384_v33  ;;  %702 = vmatprep.subr.bf16.mxu1 %v386_v34  ;;  %v750_v33 = vsub.s32 %v747_v31, %v1167_v23 }
  0xa2   : > { %580 = vmatpush1.bf16.msra.mxu0 %v383_v35  ;;  %703 = vmatpush1.bf16.msra.mxu1 %v385_v36 }
  0xa3   : > { %581 = vmatprep.subr.bf16.mxu0 %v388_v37  ;;  %704 = vmatprep.subr.bf16.mxu1 %v390_v38 }
  0xa6   : > { %582 = vmatpush1.bf16.msra.mxu0 %v387_v39  ;;  %705 = vmatpush1.bf16.msra.mxu1 %v389_v17 }
  0xa7   : > { %583 = vmatprep.subr.bf16.mxu0 %v392_v40  ;;  %706 = vmatprep.subr.bf16.mxu1 %v394_v41 }
  0xaa   : > { %584 = vmatpush1.bf16.msra.mxu0 %v391_v42  ;;  %707 = vmatpush1.bf16.msra.mxu1 %v393_v43  ;;  %v245_v43 = vld [vmem:[#allocation2] sm:$0xff] }
  0xab   : > { %585 = vmatprep.subr.bf16.mxu0 %v396_v44  ;;  %708 = vmatprep.subr.bf16.mxu1 %v398_v45  ;;  %v768_v45 = vld [vmem:[%s1418_s3] sm:$0xf] (!%p1004_p7) }
  0xae   : > { %586 = vmatpush1.bf16.msra.mxu0 %v395_v46  ;;  %709 = vmatpush1.bf16.msra.mxu1 %v397_v47  ;;  %v772_v46 = vsub.s32 (!%p1004_p7), 0, %v1167_v23  ;;  %v776_v47 = vsub.s32 (!%p1004_p7), 1, %v1167_v23 }
  0xaf   : > { %587 = vmatprep.subr.bf16.mxu0 %v400_v48  ;;  %710 = vmatprep.subr.bf16.mxu1 %v402_v49  ;;  %v780_v48 = vsub.s32 (!%p1004_p7), 2, %v1167_v23  ;;  %v784_v49 = vsub.s32 (!%p1004_p7), 3, %v1167_v23 }
  0xb2   : > { %588 = vmatpush1.bf16.msra.mxu0 %v399_v50  ;;  %711 = vmatpush1.bf16.msra.mxu1 %v401_v51  ;;  %v805_v50 = vld [vmem:[%s1419_s4] sm:$0xf] (!%p1004_p7)  ;;  %v773_v51 = vrot.slane (!%p1004_p7), %v768_v45, %v772_v46 }
  0xb3   : > { %589 = vmatprep.subr.bf16.mxu0 %v404_v52  ;;  %712 = vmatprep.subr.bf16.mxu1 %v406_v53  ;;  %v777_v52 = vrot.slane (!%p1004_p7), %v768_v45, %v776_v47  ;;  %v781_v53 = vrot.slane (!%p1004_p7), %v768_v45, %v780_v48 }
  0xb6   : > { %590 = vmatpush1.bf16.msra.mxu0 %v403_v54  ;;  %713 = vmatpush1.bf16.msra.mxu1 %v405_v55  ;;  %v810_v54 = vrot.slane (!%p1004_p7), %v805_v50, %v772_v46  ;;  %v785_v55 = vrot.slane (!%p1004_p7), %v768_v45, %v784_v49 }
  0xb7   : > { %591 = vmatprep.subr.bf16.mxu0 %v408_v56  ;;  %714 = vmatprep.subr.bf16.mxu1 %v410_v57  ;;  %v814_v56 = vrot.slane (!%p1004_p7), %v805_v50, %v776_v47  ;;  %v818_v57 = vrot.slane (!%p1004_p7), %v805_v50, %v780_v48 }
  0xba   : > { %592 = vmatpush1.bf16.msra.mxu0 %v407_v58  ;;  %715 = vmatpush1.bf16.msra.mxu1 %v409_v59  ;;  %v822_v58 = vrot.slane (!%p1004_p7), %v805_v50, %v784_v49  ;;  %v786_v59 = vcombine.low (!%p1004_p7), %v773_v51, %v777_v52 }
  0xbb   : > { %593 = vmatprep.subr.bf16.mxu0 %v412_v60  ;;  %716 = vmatprep.subr.bf16.mxu1 %v414_v61  ;;  %v787_v60 = vcombine.low (!%p1004_p7), %v781_v53, %v785_v55  ;;  %v823_v61 = vcombine.low (!%p1004_p7), %v810_v54, %v814_v56 }
  0xbe   : > { %594 = vmatpush1.bf16.msra.mxu0 %v411_v62  ;;  %717 = vmatpush1.bf16.msra.mxu1 %v413_v63  ;;  %v824_v62 = vcombine.low (!%p1004_p7), %v818_v57, %v822_v58  ;;  %v794_v63 = vrot.slane (!%p1004_p7), %v786_v59, %v750_v33 }
  0xbf   : > { %595 = vmatprep.subr.bf16.mxu0 %v416_v0  ;;  %718 = vmatprep.subr.bf16.mxu1 %v418_v1  ;;  %v801_v0 = vrot.slane (!%p1004_p7), %v787_v60, %v750_v33  ;;  %v831_v1 = vrot.slane (!%p1004_p7), %v823_v61, %v750_v33 }
  0xc0   : > { %v838_v23 = vrot.slane (!%p1004_p7), %v824_v62, %v750_v33 }
  0xc2   : > { %596 = vmatpush1.bf16.msra.mxu0 %v415_v2  ;;  %719 = vmatpush1.bf16.msra.mxu1 %v417_v3  ;;  %v802_v3 = vcombine.low (!%p1004_p7), %v794_v63, %v801_v0 }
  0xc3   : > { %597 = vmatprep.subr.bf16.mxu0 %v420_v4  ;;  %720 = vmatprep.subr.bf16.mxu1 %v422_v5  ;;  %v839_v4 = vcombine.low (!%p1004_p7), %v831_v1, %v838_v23 }
  0xc6   : > { %598 = vmatpush1.bf16.msra.mxu0 %v419_v6  ;;  %721 = vmatpush1.bf16.msra.mxu1 %v421_v7 }
  0xc7   : > { %599 = vmatprep.subr.bf16.mxu0 %v424_v8  ;;  %722 = vmatprep.subr.bf16.mxu1 %v426_v9 }
  0xca   : > { %600 = vmatpush1.bf16.msra.mxu0 %v423_v10  ;;  %723 = vmatpush1.bf16.msra.mxu1 %v425_v11 }
  0xcb   : > { %601 = vmatprep.subr.bf16.mxu0 %v428_v12  ;;  %724 = vmatprep.subr.bf16.mxu1 %v430_v13 }
  0xce   : > { %602 = vmatpush1.bf16.msra.mxu0 %v427_v14  ;;  %725 = vmatpush1.bf16.msra.mxu1 %v429_v15 }
  0xcf   : > { %603 = vmatprep.subr.bf16.mxu0 %v432_v19  ;;  %726 = vmatprep.subr.bf16.mxu1 %v434_v20 }
  0xd2   : > { %604 = vmatpush1.bf16.msra.mxu0 %v431_v21  ;;  %727 = vmatpush1.bf16.msra.mxu1 %v433_v22 }
  0xd3   : > { %605 = vmatprep.subr.bf16.mxu0 %v436_v24  ;;  %728 = vmatprep.subr.bf16.mxu1 %v438_v25 }
  0xd6   : > { %606 = vmatpush1.bf16.msra.mxu0 %v435_v26  ;;  %729 = vmatpush1.bf16.msra.mxu1 %v437_v27 }
  0xd9   : > { %608 = vmatmul.mubr.bf16.vlgmr.msra.gmra.mrb[0].mxu0 %v1249_v18  ;;  %731 = vmatmul.mubr.bf16.vlgmr.msra.gmra.mrb[0].mxu1 %v1249_v18 }
 0x1ac   : > { %v609_v16 = vpop.f32.mrb[0].mxu0  ;;  %v732_v32 = vpop.f32.mrb[0].mxu1 }
 0x1ad   : > { %v611_v34 = vpop.f32.mrb[1].mxu0  ;;  %v734_v35 = vpop.f32.mrb[1].mxu1 }
 0x1ae   : > { %v743_v36 = vcombine.low %v609_v16, %v611_v34  ;;  %v744_v37 = vcombine.low %v732_v32, %v734_v35  ;;  %v613_v38 = vpop.f32.mrb[2].mxu0  ;;  %v736_v39 = vpop.f32.mrb[2].mxu1 }
 0x1af   : > { %v614_v17 = vpop.f32.mrb[3].mxu0  ;;  %v737_v40 = vpop.f32.mrb[3].mxu1 }
 0x1b0   : > { %v751_v41 = vrot.slane %v743_v36, %v750_v33  ;;  %v758_v42 = vrot.slane %v744_v37, %v750_v33  ;;  %766 = sbr.rel (%p1004_p7) target bundleno = 465 (0x1d1), region = 44 }
 0x1b2   : > { %v759_v44 = vcombine.low %v751_v41, %v758_v42 }
 0x1b4   : > { %v761_v18 = vadd.f32 %v759_v44, %v245_v43 }
 0x1b6   : > { %762 = vst [vmem:[#allocation2] sm:$0xff] %v761_v18 }
 0x1bd   : > { %v767_v2 = vld [vmem:[#allocation2] sm:$0xff] }
 0x1be   : > { %v804_v5 = vmul.f32 %v802_v3, %v767_v2 }
 0x1c0   : > { %v841_v6 = vadd.f32 %v839_v4, %v804_v5 }
 0x1c2   : > { %v842_v7 = vmax.f32 %v841_v6, 0.0 }
 0x1c4   : > { %v844_v8 = vcombine.high %v842_v7, %v842_v7  ;;  %v851_v9 = vrot.slane %v842_v7, %v750_v33 }
 0x1c6   : > { %v858_v10 = vrot.slane %v844_v8, %v750_v33  ;;  %v859_v11 = vcombine.high %v851_v9, %v851_v9 }
 0x1c8   : > { %v860_v12 = vcombine.high %v858_v10, %v858_v10  ;;  %v1005_v13 = vpack.c.bf16 %v859_v11, %v851_v9 }
 0x1ca   : > { %v1006_v14 = vpack.c.bf16 %v860_v12, %v858_v10  ;;  %v881_v15 = vrot.slane %v1005_v13, %v1174_v28 }
 0x1cc   : > { %v888_v19 = vrot.slane %v1006_v14, %v1174_v28 }
 0x1ce   : > { %v889_v20 = vcombine.low %v881_v15, %v888_v19 }
 0x1d0   : > { %1007 = vst.sshfl [vmem:[#allocation3] sm:$0x55 pattern:$0x73625140] %v889_v20 }
 0x1d1 PF: > { %p1008_p8 = scmp.ne.s32.totalorder %s997_s20, 2 }
 0x1d3   : > { %901 = sbr.rel (%p1008_p8) target bundleno = 474 (0x1da), region = 48 }
 0x1d7   : > { %v919_v21 = vld [vmem:[#allocation3] sm:$0xf] (!%p1008_p8) }
 0x1d8   : > { %1009 = vst [vmem:[%s1420_s5 + $0x10] sm:$0xf] (!%p1008_p8), %v919_v21 }
 0x1da PF: > { %s16_s0 = sadd.s32 1, %s1079_s0   ;;  %s1421_s18 = smov %s1075_s19 }
 0x1db   : > { %p13_p9 = scmp.ge.s32.totalorder %s16_s0, 5   ;;  %s1422_s19 = smov %s1424_s21 }
 0x1dd   :  { %15 = sbr.rel (!%p13_p9) target bundleno = 2 (0x2), region = 109 }

// kernel: _lambda_.21
= control target key start
LH: loop header
LB: loop body
LE: loop exit
PB: predicated region body
PF: predicated region fallthrough
CT: control target
= control target key end

     0   :  { %v24_v23 = vlaneseq  ;;  %s740_s0 = inlined_call_operand.vmem [shape: bf16[2,1,512], index: 0, kind: input, shape index: {}]   ;;  %s741_s1 = inlined_call_operand.vmem [shape: bf16[512,128], index: 1, kind: input, shape index: {}]   ;;  %s742_s2 = inlined_call_operand.vmem [shape: f32[1,128], index: 2, kind: input, shape index: {}]   ;;  %s743_s3 = inlined_call_operand.hbm [shape: f32[2,128], index: 3, kind: output, shape index: {}]  }
   0x1   :  { %v545_v0 = vld [vmem:[%s741_s1 + $0x40] sm:$0xff]   ;;  %v549_v4 = vld [vmem:[%s741_s1 + $0x48] sm:$0xff]   ;;  %v553_v8 = vld [vmem:[%s741_s1 + $0x50] sm:$0xff]  }
   0x2   :  { %v546_v1 = vld [vmem:[%s741_s1 + $0xc0] sm:$0xff]   ;;  %500 = vmatprep.subr.bf16.mxu0 %v545_v0  ;;  %v550_v5 = vld [vmem:[%s741_s1 + $0xc8] sm:$0xff]   ;;  %v554_v9 = vld [vmem:[%s741_s1 + $0xd0] sm:$0xff]   ;;  %v25_v28 = vshrl.u32 %v24_v23, 7 }
   0x3   :  { %v547_v2 = vld [vmem:[%s741_s1] sm:$0xff]   ;;  %522 = vmatprep.subr.bf16.mxu1 %v546_v1  ;;  %v551_v6 = vld [vmem:[%s741_s1 + $0x8] sm:$0xff]   ;;  %v555_v10 = vld [vmem:[%s741_s1 + $0x10] sm:$0xff]  }
   0x4   :  { %v548_v3 = vld [vmem:[%s741_s1 + $0x80] sm:$0xff]   ;;  %501 = vmatpush3.bf16.msra.mxu0 %v547_v2  ;;  %v552_v7 = vld [vmem:[%s741_s1 + $0x88] sm:$0xff]   ;;  %v556_v11 = vld [vmem:[%s741_s1 + $0x90] sm:$0xff]   ;;  %v30_v33 = vsub.s32 2, %v25_v28  ;;  %v38_v35 = vsub.s32 6, %v25_v28  ;;  %v26_v37 = vsub.s32 0, %v25_v28 }
   0x5   :  { %523 = vmatpush3.bf16.msra.mxu1 %v548_v3  ;;  %502 = vmatprep.subr.bf16.mxu0 %v549_v4  ;;  %v557_v12 = vld [vmem:[%s741_s1 + $0x58] sm:$0xff]   ;;  %v561_v16 = vld [vmem:[%s741_s1 + $0x60] sm:$0xff]   ;;  %v565_v20 = vld [vmem:[%s741_s1 + $0x68] sm:$0xff]   ;;  %v34_v38 = vsub.s32 4, %v25_v28 }
   0x6   :  { %524 = vmatprep.subr.bf16.mxu1 %v550_v5  ;;  %v558_v13 = vld [vmem:[%s741_s1 + $0xd8] sm:$0xff]   ;;  %v562_v17 = vld [vmem:[%s741_s1 + $0xe0] sm:$0xff]   ;;  %v566_v21 = vld [vmem:[%s741_s1 + $0xe8] sm:$0xff]  }
   0x7   :  { %v559_v14 = vld [vmem:[%s741_s1 + $0x18] sm:$0xff]   ;;  %v563_v18 = vld [vmem:[%s741_s1 + $0x20] sm:$0xff]   ;;  %v567_v22 = vld [vmem:[%s741_s1 + $0x28] sm:$0xff]  }
   0x8   :  { %503 = vmatpush3.bf16.msra.mxu0 %v551_v6  ;;  %v560_v15 = vld [vmem:[%s741_s1 + $0x98] sm:$0xff]   ;;  %v564_v19 = vld [vmem:[%s741_s1 + $0xa0] sm:$0xff]   ;;  %v568_v24 = vld [vmem:[%s741_s1 + $0xa8] sm:$0xff]  }
   0x9   :  { %525 = vmatpush3.bf16.msra.mxu1 %v552_v7  ;;  %504 = vmatprep.subr.bf16.mxu0 %v553_v8  ;;  %v569_v25 = vld [vmem:[%s741_s1 + $0x70] sm:$0xff]   ;;  %v573_v30 = vld [vmem:[%s741_s1 + $0x78] sm:$0xff]   ;;  %v497_v36 = vld [vmem:[%s740_s0] sm:$0xff]  }
   0xa   :  { %526 = vmatprep.subr.bf16.mxu1 %v554_v9  ;;  %v570_v26 = vld [vmem:[%s741_s1 + $0xf0] sm:$0xff]   ;;  %v574_v31 = vld [vmem:[%s741_s1 + $0xf8] sm:$0xff]  }
   0xb   :  { %v571_v27 = vld [vmem:[%s741_s1 + $0x30] sm:$0xff]   ;;  %v575_v32 = vld [vmem:[%s741_s1 + $0x38] sm:$0xff]  }
   0xc   :  { %505 = vmatpush3.bf16.msra.mxu0 %v555_v10  ;;  %v572_v29 = vld [vmem:[%s741_s1 + $0xb0] sm:$0xff]   ;;  %v576_v34 = vld [vmem:[%s741_s1 + $0xb8] sm:$0xff]  }
   0xd   :  { %527 = vmatpush3.bf16.msra.mxu1 %v556_v11  ;;  %506 = vmatprep.subr.bf16.mxu0 %v557_v12 }
   0xe   :  { %528 = vmatprep.subr.bf16.mxu1 %v558_v13 }
  0x10   :  { %507 = vmatpush3.bf16.msra.mxu0 %v559_v14 }
  0x11   :  { %529 = vmatpush3.bf16.msra.mxu1 %v560_v15  ;;  %508 = vmatprep.subr.bf16.mxu0 %v561_v16 }
  0x12   :  { %530 = vmatprep.subr.bf16.mxu1 %v562_v17 }
  0x14   :  { %509 = vmatpush3.bf16.msra.mxu0 %v563_v18 }
  0x15   :  { %531 = vmatpush3.bf16.msra.mxu1 %v564_v19  ;;  %510 = vmatprep.subr.bf16.mxu0 %v565_v20 }
  0x16   :  { %532 = vmatprep.subr.bf16.mxu1 %v566_v21 }
  0x18   :  { %511 = vmatpush3.bf16.msra.mxu0 %v567_v22 }
  0x19   :  { %533 = vmatpush3.bf16.msra.mxu1 %v568_v24  ;;  %512 = vmatprep.subr.bf16.mxu0 %v569_v25 }
  0x1a   :  { %534 = vmatprep.subr.bf16.mxu1 %v570_v26 }
  0x1c   :  { %513 = vmatpush3.bf16.msra.mxu0 %v571_v27 }
  0x1d   :  { %535 = vmatpush3.bf16.msra.mxu1 %v572_v29  ;;  %514 = vmatprep.subr.bf16.mxu0 %v573_v30 }
  0x1e   :  { %536 = vmatprep.subr.bf16.mxu1 %v574_v31 }
  0x20   :  { %515 = vmatpush3.bf16.msra.mxu0 %v575_v32 }
  0x21   :  { %8 = vsyncpa [#allocation3], 0  ;;  %537 = vmatpush3.bf16.msra.mxu1 %v576_v34  ;;  %v498_v39 = vunpack.c.l.bf16 %v497_v36  ;;  %v499_v40 = vunpack.c.h.bf16 %v497_v36  ;;  %vm160_vm0 = vcmask 1041409   ;;  %v463_v15 = vld [vmem:[%s742_s2] ss:$0 sm:$0xff]  ;;  %s601_s24 = smov [#allocation2]  }
  0x22   :  { %s455_s25 = sshll.u32 %s601_s24, 4  ;;  %s456_s25 = int_to_ptr.vmem [resolvable:$true] %s455_s25 }
  0x23   :  { %v31_v41 = vrot.slane %v498_v39, %v30_v33  ;;  %v47_v42 = vrot.slane %v499_v40, %v30_v33  ;;  %v39_v43 = vrot.slane %v498_v39, %v38_v35  ;;  %v55_v44 = vrot.slane %v499_v40, %v38_v35  ;;  %s577_s26 = scalar_lea.vmem %s456_s25, 32  ;;  %p582_p1 = scmp.lt.s32.totalorder %s456_s25, %s456_s25 }
  0x24   :  { %v27_v45 = vrot.slane %v498_v39, %v26_v37  ;;  %v43_v46 = vrot.slane %v499_v40, %v26_v37  ;;  %v35_v47 = vrot.slane %v498_v39, %v34_v38  ;;  %v51_v48 = vrot.slane %v499_v40, %v34_v38  ;;  %p578_p0 = scmp.ne.s32.totalorder %s456_s25, %s577_s26  ;;  %p583_p2 = scmp.lt.s32.totalorder %s577_s26, %s577_s26 }
  0x25   :  { %v65_v49 = vpack.c.bf16 %v31_v41, %v31_v41  ;;  %v69_v50 = vpack.c.bf16 %v47_v42, %v47_v42  ;;  %v67_v51 = vpack.c.bf16 %v39_v43, %v39_v43  ;;  %v71_v52 = vpack.c.bf16 %v55_v44, %v55_v44 }
  0x26   :  { %v64_v53 = vpack.c.bf16 %v27_v45, %v27_v45  ;;  %v68_v54 = vpack.c.bf16 %v43_v46, %v43_v46  ;;  %v66_v55 = vpack.c.bf16 %v35_v47, %v35_v47  ;;  %v70_v56 = vpack.c.bf16 %v51_v48, %v51_v48  ;;  %p584_p3 = por %p583_p2, %p582_p1 }
  0x27   :  { %v152_v57 = vunpack.c.l.b16 %v65_v49  ;;  %v156_v58 = vunpack.c.l.b16 %v69_v50  ;;  %v154_v59 = vunpack.c.l.b16 %v67_v51  ;;  %v158_v60 = vunpack.c.l.b16 %v71_v52 }
  0x28   :  { %v151_v61 = vunpack.c.l.b16 %v64_v53  ;;  %v155_v62 = vunpack.c.l.b16 %v68_v54  ;;  %v153_v63 = vunpack.c.l.b16 %v66_v55  ;;  %v157_v0 = vunpack.c.l.b16 %v70_v56  ;;  %p585_p4 = pnand %p584_p3, %p578_p0 }
  0x29   :  { %v162_v1 = vrot.slane %v156_v58, 7  ;;  %v166_v2 = vrot.slane %v158_v60, 7 }
  0x2a   :  { %v159_v3 = vrot.slane %v155_v62, 7  ;;  %v164_v4 = vrot.slane %v157_v0, 7 }
  0x2b   :  { %v163_v5 = vsel %vm160_vm0, %v162_v1, %v152_v57  ;;  %v167_v6 = vsel %vm160_vm0, %v166_v2, %v154_v59 }
  0x2c   :  { %v169_v7 = vpack.c.b16 %v163_v5, %v163_v5  ;;  %v171_v8 = vpack.c.b16 %v167_v6, %v167_v6  ;;  %v161_v9 = vsel %vm160_vm0, %v159_v3, %v151_v61  ;;  %v165_v10 = vsel %vm160_vm0, %v164_v4, %v153_v63 }
  0x2d   :  { %v168_v11 = vpack.c.b16 %v161_v9, %v161_v9  ;;  %v170_v12 = vpack.c.b16 %v165_v10, %v165_v10 }
  0x2e   :  { %400 = vmatprep.mubr.bf16.mxu0 %v169_v7  ;;  %440 = vmatprep.mubr.bf16.mxu1 %v171_v8 }
  0x2f   :  { %401 = vmatmul.mubr.bf16.vlgmr.msra.gmra.mrb[0].mxu0 %v168_v11  ;;  %441 = vmatmul.mubr.bf16.vlgmr.msra.gmra.mrb[0].mxu1 %v170_v12 }
 0x102   :  { %v516_v13 = vpop.f32.mrb[0].mxu0  ;;  %v538_v14 = vpop.f32.mrb[0].mxu1 }
 0x103   :  { %v517_v16 = vpop.f32.mrb[1].mxu0  ;;  %v539_v17 = vpop.f32.mrb[1].mxu1 }
 0x104   :  { %v518_v18 = vadd.f32 %v517_v16, %v516_v13  ;;  %v540_v19 = vadd.f32 %v539_v17, %v538_v14  ;;  %v519_v20 = vpop.f32.mrb[2].mxu0  ;;  %v541_v21 = vpop.f32.mrb[2].mxu1 }
 0x105   :  { %v520_v22 = vpop.f32.mrb[3].mxu0  ;;  %v542_v23 = vpop.f32.mrb[3].mxu1 }
 0x106   :  { %v403_v24 = vadd.f32 %v518_v18, %v463_v15 }
 0x108   :  { %v443_v25 = vadd.f32 %v540_v19, %v403_v24 }
 0x10a   :  { %448 = vst [vmem:[#allocation2] sm:$0x3] %v443_v25 }
 0x10b   :  { %588 = shalt.err (!%p585_p4)
}
 0x10c   :  { %s589_s28 = scalar_lea.hbm %s743_s3, 32 }
 0x10d   :  { %p590_p5 = scmp.ne.s32.totalorder %s743_s3, %s589_s28  ;;  %p593_p6 = scmp.lt.u32.totalorder %s589_s28, %s743_s3 }
 0x10f   :  { %p595_p7 = pnand %p593_p6, %p590_p5 }
 0x111   :  { %598 = shalt.err (!%p595_p7)
}
 0x112   :  { %458 = dma.vmem_to_hbm [thread:$0]  %s456_s25, 32, %s743_s3, [#allocation3]  }
 0x113   :  { %599 = dma.done.wait [#allocation3], 32  }
 0x114   :  { %600 = vsyncadd [#allocation3], 4294967264 }
 0x115   :  { %462 = vsyncpa [#allocation3], 1 }

// kernel: _lambda_.20
= control target key start
LH: loop header
LB: loop body
LE: loop exit
PB: predicated region body
PF: predicated region fallthrough
CT: control target
= control target key end

     0   :  { %s3430_s27 = smov 0   ;;  %s3432_s28 = smov 0   ;;  %s3929_s0 = inlined_call_operand.vmem [shape: bf16[2,4608], index: 0, kind: input, shape index: {}]   ;;  %s3930_s1 = inlined_call_operand.vmem [shape: bf16[4608,512], index: 1, kind: input, shape index: {}]   ;;  %s3931_s2 = inlined_call_operand.vmem [shape: f32[1,512], index: 2, kind: input, shape index: {}]   ;;  %s3932_s3 = inlined_call_operand.vmem [shape: f32[1,512], index: 3, kind: input, shape index: {}]   ;;  %s3933_s4 = inlined_call_operand.vmem [shape: bf16[2,256], index: 4, kind: input, shape index: {}]   ;;  %s3934_s5 = inlined_call_operand.vmem [shape: bf16[256,512], index: 5, kind: input, shape index: {}]   ;;  %s3935_s6 = inlined_call_operand.vmem [shape: f32[1,512], index: 6, kind: input, shape index: {}]   ;;  %s3936_s7 = inlined_call_operand.vmem [shape: f32[1,512], index: 7, kind: input, shape index: {}]   ;;  %s3937_s8 = inlined_call_operand.vmem [shape: bf16[2,512], index: 8, kind: output, shape index: {}]  }
   0x1   :  { %s3434_s29 = smov 0  }
   0x2 LB: > { %s27_s30 = sadd.s32 1, %s3376_s28  ;;  %p2661_p0 = scmp.ge.s32.totalorder %s3380_s29, 1  ;;  %s3380_s29 = sphi %s3434_s29, %s18_s29   ;;  %s3376_s28 = sphi %s3432_s28, %s3939_s28   ;;  %s3372_s27 = sphi %s3430_s27, %s3938_s27  }
   0x3   : > { %p28_p1 = scmp.ge.s32.totalorder %s27_s30, 6  ;;  %p301_p2 = scmp.lt.s32.totalorder %s3380_s29, 7 }
   0x5   : > { %s3941_s30 = smov (%p28_p1, %s27_s30), 0  ;;  %p302_p3 = pnand %p2661_p0, %p301_p2 }
   0x6   : > { %s347_s9 = smul.u32 (!%p302_p3), 6, %s3372_s27  ;;  %p2664_p6 = scmp.ne.s32.totalorder (!%p302_p3), %s3372_s27, 0 }
   0x7   : > { %305 = sbr.rel (%p302_p3) target bundleno = 690 (0x2b2), region = 52 }
   0x8   : > { %s356_s10 = smul.u32 (!%p302_p3), 96, %s3372_s27  ;;  %p350_p4 = scmp.lt.s32.totalorder (!%p302_p3), %s347_s9, 35 }
   0xa   : > { %p357_p5 = scmp.lt.s32.totalorder (!%p302_p3), %s356_s10, 575 }
   0xe   : > { %s3943_s9 = smov (!%p350_p4, %s347_s9), 35  ;;  %s3945_s10 = smov (!%p357_p5, %s356_s10), 575 }
   0xf   : > { %s354_s13 = scalar_lea.vmem %s3929_s0, %s3943_s9  ;;  %s2929_s14 = sshll.u32 %s3945_s10, 4  ;;  %v3382_v0 = vmov (!%p2664_p6), 0.0  }
  0x10   : > { %s3461_s17 = scalar_lea.vmem %s3930_s1, %s2929_s14  ;;  %374 = sbr.rel (%p2664_p6) target bundleno = 23 (0x17), region = 56  ;;  %375 = vst [vmem:[#allocation2] sm:$0xff] (!%p2664_p6), %v3382_v0 }
  0x17 PF: > { %v2973_v1 = vld [vmem:[%s3461_s17 + $0x4] ss:$16 sps:$4 sm:$0xff]   ;;  %v2975_v2 = vld [vmem:[%s3461_s17 + $0xc] ss:$16 sps:$4 sm:$0xff]   ;;  %v2977_v3 = vld [vmem:[%s3461_s17] ss:$16 sps:$4 sm:$0xff]   ;;  %v575_v39 = vlaneseq }
  0x18   : > { %1584 = vmatprep.subr.bf16.mxu0 %v2973_v1  ;;  %v2978_v4 = vld [vmem:[%s3461_s17 + $0x8] ss:$16 sps:$4 sm:$0xff]   ;;  %1707 = vmatprep.subr.bf16.mxu1 %v2975_v2  ;;  %v2979_v5 = vld [vmem:[%s3461_s17 + $0x24] ss:$16 sps:$4 sm:$0xff]   ;;  %v2981_v6 = vld [vmem:[%s3461_s17 + $0x2c] ss:$16 sps:$4 sm:$0xff]  }
  0x19   : > { %1585 = vmatpush1.bf16.msra.mxu0 %v2977_v3  ;;  %1708 = vmatpush1.bf16.msra.mxu1 %v2978_v4  ;;  %v2983_v7 = vld [vmem:[%s3461_s17 + $0x20] ss:$16 sps:$4 sm:$0xff]   ;;  %v2984_v8 = vld [vmem:[%s3461_s17 + $0x28] ss:$16 sps:$4 sm:$0xff]   ;;  %v2985_v9 = vld [vmem:[%s3461_s17 + $0x44] ss:$16 sps:$4 sm:$0xff]  }
  0x1a   : > { %1586 = vmatprep.subr.bf16.mxu0 %v2979_v5  ;;  %1709 = vmatprep.subr.bf16.mxu1 %v2981_v6  ;;  %v2987_v10 = vld [vmem:[%s3461_s17 + $0x4c] ss:$16 sps:$4 sm:$0xff]   ;;  %v2989_v11 = vld [vmem:[%s3461_s17 + $0x40] ss:$16 sps:$4 sm:$0xff]   ;;  %v2990_v12 = vld [vmem:[%s3461_s17 + $0x48] ss:$16 sps:$4 sm:$0xff]  }
  0x1b   : > { %v2991_v13 = vld [vmem:[%s3461_s17 + $0x64] ss:$16 sps:$4 sm:$0xff]   ;;  %v2993_v14 = vld [vmem:[%s3461_s17 + $0x6c] ss:$16 sps:$4 sm:$0xff]   ;;  %v2995_v15 = vld [vmem:[%s3461_s17 + $0x60] ss:$16 sps:$4 sm:$0xff]  }
  0x1c   : > { %v2996_v16 = vld [vmem:[%s3461_s17 + $0x68] ss:$16 sps:$4 sm:$0xff]   ;;  %v2997_v17 = vld [vmem:[%s3461_s17 + $0x84] ss:$16 sps:$4 sm:$0xff]   ;;  %v2999_v18 = vld [vmem:[%s3461_s17 + $0x8c] ss:$16 sps:$4 sm:$0xff]  }
  0x1d   : > { %1587 = vmatpush1.bf16.msra.mxu0 %v2983_v7  ;;  %1710 = vmatpush1.bf16.msra.mxu1 %v2984_v8  ;;  %v3001_v19 = vld [vmem:[%s3461_s17 + $0x80] ss:$16 sps:$4 sm:$0xff]   ;;  %v3002_v20 = vld [vmem:[%s3461_s17 + $0x88] ss:$16 sps:$4 sm:$0xff]   ;;  %v3003_v21 = vld [vmem:[%s3461_s17 + $0xa4] ss:$16 sps:$4 sm:$0xff]  }
  0x1e   : > { %1588 = vmatprep.subr.bf16.mxu0 %v2985_v9  ;;  %1711 = vmatprep.subr.bf16.mxu1 %v2987_v10  ;;  %v3005_v22 = vld [vmem:[%s3461_s17 + $0xac] ss:$16 sps:$4 sm:$0xff]   ;;  %v3007_v23 = vld [vmem:[%s3461_s17 + $0xa0] ss:$16 sps:$4 sm:$0xff]   ;;  %v3008_v24 = vld [vmem:[%s3461_s17 + $0xa8] ss:$16 sps:$4 sm:$0xff]  }
  0x1f   : > { %v3009_v25 = vld [vmem:[%s3461_s17 + $0xc4] ss:$16 sps:$4 sm:$0xff]   ;;  %v3011_v26 = vld [vmem:[%s3461_s17 + $0xcc] ss:$16 sps:$4 sm:$0xff]   ;;  %v3013_v27 = vld [vmem:[%s3461_s17 + $0xc0] ss:$16 sps:$4 sm:$0xff]  }
  0x20   : > { %v3014_v28 = vld [vmem:[%s3461_s17 + $0xc8] ss:$16 sps:$4 sm:$0xff]   ;;  %v3015_v29 = vld [vmem:[%s3461_s17 + $0xe4] ss:$16 sps:$4 sm:$0xff]   ;;  %v3017_v30 = vld [vmem:[%s3461_s17 + $0xec] ss:$16 sps:$4 sm:$0xff]  }
  0x21   : > { %1589 = vmatpush1.bf16.msra.mxu0 %v2989_v11  ;;  %1712 = vmatpush1.bf16.msra.mxu1 %v2990_v12  ;;  %v3019_v31 = vld [vmem:[%s3461_s17 + $0xe0] ss:$16 sps:$4 sm:$0xff]   ;;  %v3020_v32 = vld [vmem:[%s3461_s17 + $0xe8] ss:$16 sps:$4 sm:$0xff]   ;;  %v3021_v33 = vld [vmem:[%s3461_s17 + $0x104] ss:$16 sps:$4 sm:$0xff]  }
  0x22   : > { %1590 = vmatprep.subr.bf16.mxu0 %v2991_v13  ;;  %1713 = vmatprep.subr.bf16.mxu1 %v2993_v14  ;;  %v3023_v34 = vld [vmem:[%s3461_s17 + $0x10c] ss:$16 sps:$4 sm:$0xff]   ;;  %v3025_v35 = vld [vmem:[%s3461_s17 + $0x100] ss:$16 sps:$4 sm:$0xff]   ;;  %v3026_v36 = vld [vmem:[%s3461_s17 + $0x108] ss:$16 sps:$4 sm:$0xff]  }
  0x23   : > { %v3383_v37 = vmov 1966171168   ;;  %v3027_v40 = vld [vmem:[%s3461_s17 + $0x124] ss:$16 sps:$4 sm:$0xff]   ;;  %v3029_v41 = vld [vmem:[%s3461_s17 + $0x12c] ss:$16 sps:$4 sm:$0xff]  }
  0x24   : > { %v573_v38 = vunpack.c.l.s4 %v3383_v37  ;;  %v3031_v42 = vld [vmem:[%s3461_s17 + $0x120] ss:$16 sps:$4 sm:$0xff]   ;;  %v3503_v44 = vshrl.u32 %v575_v39, 7  ;;  %v3032_v45 = vld [vmem:[%s3461_s17 + $0x128] ss:$16 sps:$4 sm:$0xff]   ;;  %p2857_p7 = scmp.ne.s32.totalorder %s3372_s27, 5 }
  0x25   : > { %1591 = vmatpush1.bf16.msra.mxu0 %v2995_v15  ;;  %1714 = vmatpush1.bf16.msra.mxu1 %v2996_v16  ;;  %v3033_v46 = vld [vmem:[%s3461_s17 + $0x144] ss:$16 sps:$4 sm:$0xff]   ;;  %v3035_v47 = vld [vmem:[%s3461_s17 + $0x14c] ss:$16 sps:$4 sm:$0xff]   ;;  %v3037_v48 = vld [vmem:[%s3461_s17 + $0x140] ss:$16 sps:$4 sm:$0xff]  }
  0x26   : > { %1592 = vmatprep.subr.bf16.mxu0 %v2997_v17  ;;  %1715 = vmatprep.subr.bf16.mxu1 %v2999_v18  ;;  %v574_v43 = vunpack.c.0.s8 %v573_v38  ;;  %v3038_v49 = vld [vmem:[%s3461_s17 + $0x148] ss:$16 sps:$4 sm:$0xff]   ;;  %v3039_v51 = vld [vmem:[%s3461_s17 + $0x164] ss:$16 sps:$4 sm:$0xff]   ;;  %v3041_v52 = vld [vmem:[%s3461_s17 + $0x16c] ss:$16 sps:$4 sm:$0xff]  }
  0x27   : > { %v377_v53 = vld [vmem:[%s354_s13] sm:$0x3f]  ;;  %v3044_v56 = vld [vmem:[%s3461_s17 + $0x168] ss:$16 sps:$4 sm:$0xff]   ;;  %v3047_v58 = vld [vmem:[%s3461_s17 + $0x18c] ss:$16 sps:$4 sm:$0xff]  }
  0x28   : > { %v3511_v50 = vsub.s32 %v574_v43, %v3503_v44  ;;  %v3043_v54 = vld [vmem:[%s3461_s17 + $0x160] ss:$16 sps:$4 sm:$0xff]   ;;  %v3045_v57 = vld [vmem:[%s3461_s17 + $0x184] ss:$16 sps:$4 sm:$0xff]   ;;  %v3050_v62 = vld [vmem:[%s3461_s17 + $0x188] ss:$16 sps:$4 sm:$0xff]   ;;  %v571_v9 = vcombine.high %v377_v53, %v377_v53 }
  0x29   : > { %1593 = vmatpush1.bf16.msra.mxu0 %v3001_v19  ;;  %1716 = vmatpush1.bf16.msra.mxu1 %v3002_v20  ;;  %v3049_v60 = vld [vmem:[%s3461_s17 + $0x180] ss:$16 sps:$4 sm:$0xff]   ;;  %v3051_v63 = vld [vmem:[%s3461_s17 + $0x1a4] ss:$16 sps:$4 sm:$0xff]   ;;  %v3053_v0 = vld [vmem:[%s3461_s17 + $0x1ac] ss:$16 sps:$4 sm:$0xff]  }
  0x2a   : > { %1594 = vmatprep.subr.bf16.mxu0 %v3003_v21  ;;  %1717 = vmatprep.subr.bf16.mxu1 %v3005_v22  ;;  %v578_v55 = vrot.slane %v377_v53, %v3511_v50  ;;  %v3055_v1 = vld [vmem:[%s3461_s17 + $0x1a0] ss:$16 sps:$4 sm:$0xff]   ;;  %v3056_v2 = vld [vmem:[%s3461_s17 + $0x1a8] ss:$16 sps:$4 sm:$0xff]   ;;  %v3057_v3 = vld [vmem:[%s3461_s17 + $0x1c4] ss:$16 sps:$4 sm:$0xff]   ;;  %v585_v12 = vrot.slane %v571_v9, %v3511_v50 }
  0x2b   : > { %v3059_v4 = vld [vmem:[%s3461_s17 + $0x1cc] ss:$16 sps:$4 sm:$0xff]   ;;  %v3061_v5 = vld [vmem:[%s3461_s17 + $0x1c0] ss:$16 sps:$4 sm:$0xff]   ;;  %v3062_v6 = vld [vmem:[%s3461_s17 + $0x1c8] ss:$16 sps:$4 sm:$0xff]  }
  0x2c   : > { %v586_v59 = vcombine.high %v578_v55, %v578_v55  ;;  %v3063_v7 = vld [vmem:[%s3461_s17 + $0x1e4] ss:$16 sps:$4 sm:$0xff]   ;;  %v3065_v8 = vld [vmem:[%s3461_s17 + $0x1ec] ss:$16 sps:$4 sm:$0xff]   ;;  %v3067_v10 = vld [vmem:[%s3461_s17 + $0x1e0] ss:$16 sps:$4 sm:$0xff]   ;;  %v587_v15 = vcombine.high %v585_v12, %v585_v12  ;;  %v3545_v17 = vrot.slane %v578_v55, %v3511_v50  ;;  %v3552_v20 = vrot.slane %v585_v12, %v3511_v50 }
  0x2d   : > { %1595 = vmatpush1.bf16.msra.mxu0 %v3007_v23  ;;  %1718 = vmatpush1.bf16.msra.mxu1 %v3008_v24  ;;  %v3068_v11 = vld [vmem:[%s3461_s17 + $0x1e8] ss:$16 sps:$4 sm:$0xff]   ;;  %v3071_v13 = vld [vmem:[%s3461_s17 + $0x204] ss:$16 sps:$4 sm:$0xff]   ;;  %v3074_v14 = vld [vmem:[%s3461_s17 + $0x20c] ss:$16 sps:$4 sm:$0xff]  }
  0x2e   : > { %1596 = vmatprep.subr.bf16.mxu0 %v3009_v25  ;;  %1719 = vmatprep.subr.bf16.mxu1 %v3011_v26  ;;  %v608_v61 = vrot.slane %v586_v59, %v3511_v50  ;;  %v3069_v16 = vld [vmem:[%s3461_s17 + $0x200] ss:$16 sps:$4 sm:$0xff]   ;;  %v3072_v18 = vld [vmem:[%s3461_s17 + $0x208] ss:$16 sps:$4 sm:$0xff]   ;;  %v3549_v19 = vrot.slane %v587_v15, %v3511_v50  ;;  %v3077_v21 = vld [vmem:[%s3461_s17 + $0x224] ss:$16 sps:$4 sm:$0xff]  }
  0x2f   : > { %v3080_v22 = vld [vmem:[%s3461_s17 + $0x22c] ss:$16 sps:$4 sm:$0xff]   ;;  %v3075_v24 = vld [vmem:[%s3461_s17 + $0x220] ss:$16 sps:$4 sm:$0xff]   ;;  %v3078_v25 = vld [vmem:[%s3461_s17 + $0x228] ss:$16 sps:$4 sm:$0xff]  }
  0x30   : > { %1616 = vmatprep.mubr.bf16.mxu0 %v608_v61  ;;  %1739 = vmatprep.mubr.bf16.mxu1 %v608_v61  ;;  %v617_v23 = vcombine.high %v608_v61, %v608_v61  ;;  %v3083_v26 = vld [vmem:[%s3461_s17 + $0x244] ss:$16 sps:$4 sm:$0xff]   ;;  %v3096_v37 = vld [vmem:[%s3461_s17 + $0x288] ss:$16 sps:$4 sm:$0xff]   ;;  %v3104_v39 = vld [vmem:[%s3461_s17 + $0x2ac] ss:$16 sps:$4 sm:$0xff]  }
  0x31   : > { %1597 = vmatpush1.bf16.msra.mxu0 %v3013_v27  ;;  %1720 = vmatpush1.bf16.msra.mxu1 %v3014_v28  ;;  %v3086_v27 = vld [vmem:[%s3461_s17 + $0x24c] ss:$16 sps:$4 sm:$0xff]   ;;  %v3081_v28 = vld [vmem:[%s3461_s17 + $0x240] ss:$16 sps:$4 sm:$0xff]   ;;  %v3101_v38 = vld [vmem:[%s3461_s17 + $0x2a4] ss:$16 sps:$4 sm:$0xff]  }
  0x32   : > { %1598 = vmatprep.subr.bf16.mxu0 %v3015_v29  ;;  %1721 = vmatprep.subr.bf16.mxu1 %v3017_v30  ;;  %v3084_v29 = vld [vmem:[%s3461_s17 + $0x248] ss:$16 sps:$4 sm:$0xff]   ;;  %v3089_v30 = vld [vmem:[%s3461_s17 + $0x264] ss:$16 sps:$4 sm:$0xff]   ;;  %v3110_v43 = vld [vmem:[%s3461_s17 + $0x2cc] ss:$16 sps:$4 sm:$0xff]  }
  0x33   : > { %v3122_v53 = vld [vmem:[%s3461_s17 + $0x30c] ss:$16 sps:$4 sm:$0xff]   ;;  %v3120_v55 = vld [vmem:[%s3461_s17 + $0x308] ss:$16 sps:$4 sm:$0xff]   ;;  %v3155_v12 = vld [vmem:[%s3461_s17 + $0x3c4] ss:$16 sps:$4 sm:$0xff]  }
  0x34   : > { %v3126_v59 = vld [vmem:[%s3461_s17 + $0x328] ss:$16 sps:$4 sm:$0xff]   ;;  %v3134_v61 = vld [vmem:[%s3461_s17 + $0x34c] ss:$16 sps:$4 sm:$0xff]  }
  0x35   : > { %1599 = vmatpush1.bf16.msra.mxu0 %v3019_v31  ;;  %1722 = vmatpush1.bf16.msra.mxu1 %v3020_v32  ;;  %v3092_v31 = vld [vmem:[%s3461_s17 + $0x26c] ss:$16 sps:$4 sm:$0xff]   ;;  %v3087_v32 = vld [vmem:[%s3461_s17 + $0x260] ss:$16 sps:$4 sm:$0xff]   ;;  %v3156_v15 = vld [vmem:[%s3461_s17 + $0x3c8] ss:$16 sps:$4 sm:$0xff]  }
  0x36   : > { %1600 = vmatprep.subr.bf16.mxu0 %v3021_v33  ;;  %1723 = vmatprep.subr.bf16.mxu1 %v3023_v34  ;;  %v3090_v33 = vld [vmem:[%s3461_s17 + $0x268] ss:$16 sps:$4 sm:$0xff]   ;;  %v3095_v34 = vld [vmem:[%s3461_s17 + $0x284] ss:$16 sps:$4 sm:$0xff]   ;;  %v3152_v9 = vld [vmem:[%s3461_s17 + $0x3ac] ss:$16 sps:$4 sm:$0xff]  }
  0x39   : > { %1601 = vmatpush1.bf16.msra.mxu0 %v3025_v35  ;;  %1724 = vmatpush1.bf16.msra.mxu1 %v3026_v36  ;;  %v3098_v35 = vld [vmem:[%s3461_s17 + $0x28c] ss:$16 sps:$4 sm:$0xff]   ;;  %v3093_v36 = vld [vmem:[%s3461_s17 + $0x280] ss:$16 sps:$4 sm:$0xff]  }
  0x3a   : > { %1602 = vmatprep.subr.bf16.mxu0 %v3027_v40  ;;  %1725 = vmatprep.subr.bf16.mxu1 %v3029_v41  ;;  %v3099_v40 = vld [vmem:[%s3461_s17 + $0x2a0] ss:$16 sps:$4 sm:$0xff]   ;;  %v3102_v41 = vld [vmem:[%s3461_s17 + $0x2a8] ss:$16 sps:$4 sm:$0xff]  }
  0x3d   : > { %1603 = vmatpush1.bf16.msra.mxu0 %v3031_v42  ;;  %1726 = vmatpush1.bf16.msra.mxu1 %v3032_v45  ;;  %v3107_v42 = vld [vmem:[%s3461_s17 + $0x2c4] ss:$16 sps:$4 sm:$0xff]   ;;  %v3105_v45 = vld [vmem:[%s3461_s17 + $0x2c0] ss:$16 sps:$4 sm:$0xff]  }
  0x3e   : > { %1604 = vmatprep.subr.bf16.mxu0 %v3033_v46  ;;  %1727 = vmatprep.subr.bf16.mxu1 %v3035_v47  ;;  %v3108_v46 = vld [vmem:[%s3461_s17 + $0x2c8] ss:$16 sps:$4 sm:$0xff]   ;;  %v3113_v47 = vld [vmem:[%s3461_s17 + $0x2e4] ss:$16 sps:$4 sm:$0xff]  }
  0x41   : > { %1605 = vmatpush1.bf16.msra.mxu0 %v3037_v48  ;;  %1728 = vmatpush1.bf16.msra.mxu1 %v3038_v49  ;;  %v3116_v48 = vld [vmem:[%s3461_s17 + $0x2ec] ss:$16 sps:$4 sm:$0xff]   ;;  %v3111_v49 = vld [vmem:[%s3461_s17 + $0x2e0] ss:$16 sps:$4 sm:$0xff]  }
  0x42   : > { %1606 = vmatprep.subr.bf16.mxu0 %v3039_v51  ;;  %1729 = vmatprep.subr.bf16.mxu1 %v3041_v52  ;;  %v3114_v51 = vld [vmem:[%s3461_s17 + $0x2e8] ss:$16 sps:$4 sm:$0xff]   ;;  %v3119_v52 = vld [vmem:[%s3461_s17 + $0x304] ss:$16 sps:$4 sm:$0xff]  }
  0x45   : > { %1607 = vmatpush1.bf16.msra.mxu0 %v3043_v54  ;;  %1730 = vmatpush1.bf16.msra.mxu1 %v3044_v56  ;;  %v3117_v54 = vld [vmem:[%s3461_s17 + $0x300] ss:$16 sps:$4 sm:$0xff]   ;;  %v3125_v56 = vld [vmem:[%s3461_s17 + $0x324] ss:$16 sps:$4 sm:$0xff]  }
  0x46   : > { %1608 = vmatprep.subr.bf16.mxu0 %v3045_v57  ;;  %1731 = vmatprep.subr.bf16.mxu1 %v3047_v58  ;;  %v3128_v57 = vld [vmem:[%s3461_s17 + $0x32c] ss:$16 sps:$4 sm:$0xff]   ;;  %v3123_v58 = vld [vmem:[%s3461_s17 + $0x320] ss:$16 sps:$4 sm:$0xff]  }
  0x49   : > { %1609 = vmatpush1.bf16.msra.mxu0 %v3049_v60  ;;  %1732 = vmatpush1.bf16.msra.mxu1 %v3050_v62  ;;  %v3131_v60 = vld [vmem:[%s3461_s17 + $0x344] ss:$16 sps:$4 sm:$0xff]   ;;  %v3129_v62 = vld [vmem:[%s3461_s17 + $0x340] ss:$16 sps:$4 sm:$0xff]  }
  0x4a   : > { %1610 = vmatprep.subr.bf16.mxu0 %v3051_v63  ;;  %1733 = vmatprep.subr.bf16.mxu1 %v3053_v0  ;;  %v3132_v63 = vld [vmem:[%s3461_s17 + $0x348] ss:$16 sps:$4 sm:$0xff]   ;;  %v3137_v0 = vld [vmem:[%s3461_s17 + $0x364] ss:$16 sps:$4 sm:$0xff]  }
  0x4d   : > { %1611 = vmatpush1.bf16.msra.mxu0 %v3055_v1  ;;  %1734 = vmatpush1.bf16.msra.mxu1 %v3056_v2  ;;  %v3140_v1 = vld [vmem:[%s3461_s17 + $0x36c] ss:$16 sps:$4 sm:$0xff]   ;;  %v3135_v2 = vld [vmem:[%s3461_s17 + $0x360] ss:$16 sps:$4 sm:$0xff]  }
  0x4e   : > { %1612 = vmatprep.subr.bf16.mxu0 %v3057_v3  ;;  %1735 = vmatprep.subr.bf16.mxu1 %v3059_v4  ;;  %v3138_v3 = vld [vmem:[%s3461_s17 + $0x368] ss:$16 sps:$4 sm:$0xff]   ;;  %v3143_v4 = vld [vmem:[%s3461_s17 + $0x384] ss:$16 sps:$4 sm:$0xff]  }
  0x51   : > { %1613 = vmatpush1.bf16.msra.mxu0 %v3061_v5  ;;  %1736 = vmatpush1.bf16.msra.mxu1 %v3062_v6  ;;  %v3146_v5 = vld [vmem:[%s3461_s17 + $0x38c] ss:$16 sps:$4 sm:$0xff]   ;;  %v3141_v6 = vld [vmem:[%s3461_s17 + $0x380] ss:$16 sps:$4 sm:$0xff]  }
  0x52   : > { %1614 = vmatprep.subr.bf16.mxu0 %v3063_v7  ;;  %1737 = vmatprep.subr.bf16.mxu1 %v3065_v8  ;;  %v3144_v7 = vld [vmem:[%s3461_s17 + $0x388] ss:$16 sps:$4 sm:$0xff]   ;;  %v3149_v8 = vld [vmem:[%s3461_s17 + $0x3a4] ss:$16 sps:$4 sm:$0xff]  }
  0x55   : > { %1615 = vmatpush1.bf16.msra.mxu0 %v3067_v10  ;;  %1738 = vmatpush1.bf16.msra.mxu1 %v3068_v11  ;;  %v3147_v10 = vld [vmem:[%s3461_s17 + $0x3a0] ss:$16 sps:$4 sm:$0xff]   ;;  %v3150_v11 = vld [vmem:[%s3461_s17 + $0x3a8] ss:$16 sps:$4 sm:$0xff]  }
  0x56   : > { %1625 = vmatprep.subr.bf16.mxu0 %v3071_v13  ;;  %1748 = vmatprep.subr.bf16.mxu1 %v3074_v14  ;;  %v3158_v13 = vld [vmem:[%s3461_s17 + $0x3cc] ss:$16 sps:$4 sm:$0xff]   ;;  %v3153_v14 = vld [vmem:[%s3461_s17 + $0x3c0] ss:$16 sps:$4 sm:$0xff]  }
  0x58   : > { %1617 = vmatmul.mubr.bf16.vlgmr.msra.gmra.mrb[0].mxu0 %v3545_v17  ;;  %1740 = vmatmul.mubr.bf16.vlgmr.msra.gmra.mrb[0].mxu1 %v3545_v17 }
  0x59   : > { %1626 = vmatpush1.bf16.msra.mxu0 %v3069_v16  ;;  %1749 = vmatpush1.bf16.msra.mxu1 %v3072_v18  ;;  %v3161_v16 = vld [vmem:[%s3461_s17 + $0x3e4] ss:$16 sps:$4 sm:$0xff]   ;;  %v3164_v18 = vld [vmem:[%s3461_s17 + $0x3ec] ss:$16 sps:$4 sm:$0xff]  }
  0x5a   : > { %1627 = vmatprep.subr.bf16.mxu0 %v3077_v21  ;;  %1750 = vmatprep.subr.bf16.mxu1 %v3080_v22  ;;  %v3159_v21 = vld [vmem:[%s3461_s17 + $0x3e0] ss:$16 sps:$4 sm:$0xff]   ;;  %v3162_v22 = vld [vmem:[%s3461_s17 + $0x3e8] ss:$16 sps:$4 sm:$0xff]  }
  0x5b   : > { %1657 = vmatprep.mubr.bf16.mxu0 %v617_v23  ;;  %1780 = vmatprep.mubr.bf16.mxu1 %v617_v23  ;;  %v3167_v23 = vld [vmem:[%s3461_s17 + $0x404] ss:$16 sps:$4 sm:$0xff]  }
  0x5d   : > { %1628 = vmatpush1.bf16.msra.mxu0 %v3075_v24  ;;  %1751 = vmatpush1.bf16.msra.mxu1 %v3078_v25  ;;  %v3170_v24 = vld [vmem:[%s3461_s17 + $0x40c] ss:$16 sps:$4 sm:$0xff]   ;;  %v616_v25 = vcombine.high %v3545_v17, %v3545_v17  ;;  %v3174_v17 = vld [vmem:[%s3461_s17 + $0x428] ss:$16 sps:$4 sm:$0xff]  }
  0x5e   : > { %1629 = vmatprep.subr.bf16.mxu0 %v3083_v26  ;;  %1752 = vmatprep.subr.bf16.mxu1 %v3086_v27  ;;  %v3165_v26 = vld [vmem:[%s3461_s17 + $0x400] ss:$16 sps:$4 sm:$0xff]   ;;  %v3168_v27 = vld [vmem:[%s3461_s17 + $0x408] ss:$16 sps:$4 sm:$0xff]  }
  0x61   : > { %1630 = vmatpush1.bf16.msra.mxu0 %v3081_v28  ;;  %1753 = vmatpush1.bf16.msra.mxu1 %v3084_v29  ;;  %v3173_v28 = vld [vmem:[%s3461_s17 + $0x424] ss:$16 sps:$4 sm:$0xff]   ;;  %v3176_v29 = vld [vmem:[%s3461_s17 + $0x42c] ss:$16 sps:$4 sm:$0xff]  }
  0x62   : > { %1631 = vmatprep.subr.bf16.mxu0 %v3089_v30  ;;  %1754 = vmatprep.subr.bf16.mxu1 %v3092_v31  ;;  %v3171_v30 = vld [vmem:[%s3461_s17 + $0x420] ss:$16 sps:$4 sm:$0xff]   ;;  %v3179_v31 = vld [vmem:[%s3461_s17 + $0x444] ss:$16 sps:$4 sm:$0xff]  }
  0x65   : > { %1632 = vmatpush1.bf16.msra.mxu0 %v3087_v32  ;;  %1755 = vmatpush1.bf16.msra.mxu1 %v3090_v33  ;;  %v3182_v32 = vld [vmem:[%s3461_s17 + $0x44c] ss:$16 sps:$4 sm:$0xff]   ;;  %v3177_v33 = vld [vmem:[%s3461_s17 + $0x440] ss:$16 sps:$4 sm:$0xff]  }
  0x66   : > { %1633 = vmatprep.subr.bf16.mxu0 %v3095_v34  ;;  %1756 = vmatprep.subr.bf16.mxu1 %v3098_v35  ;;  %v3180_v34 = vld [vmem:[%s3461_s17 + $0x448] ss:$16 sps:$4 sm:$0xff]   ;;  %v3185_v35 = vld [vmem:[%s3461_s17 + $0x464] ss:$16 sps:$4 sm:$0xff]  }
  0x69   : > { %1634 = vmatpush1.bf16.msra.mxu0 %v3093_v36  ;;  %1757 = vmatpush1.bf16.msra.mxu1 %v3096_v37  ;;  %v3188_v36 = vld [vmem:[%s3461_s17 + $0x46c] ss:$16 sps:$4 sm:$0xff]   ;;  %v3183_v37 = vld [vmem:[%s3461_s17 + $0x460] ss:$16 sps:$4 sm:$0xff]  }
  0x6a   : > { %1635 = vmatprep.subr.bf16.mxu0 %v3101_v38  ;;  %1758 = vmatprep.subr.bf16.mxu1 %v3104_v39  ;;  %v3186_v38 = vld [vmem:[%s3461_s17 + $0x468] ss:$16 sps:$4 sm:$0xff]   ;;  %v3194_v39 = vld [vmem:[%s3461_s17 + $0x48c] ss:$16 sps:$4 sm:$0xff]  }
  0x6d   : > { %1636 = vmatpush1.bf16.msra.mxu0 %v3099_v40  ;;  %1759 = vmatpush1.bf16.msra.mxu1 %v3102_v41  ;;  %v3189_v40 = vld [vmem:[%s3461_s17 + $0x480] ss:$16 sps:$4 sm:$0xff]   ;;  %v3192_v41 = vld [vmem:[%s3461_s17 + $0x488] ss:$16 sps:$4 sm:$0xff]  }
  0x6e   : > { %1637 = vmatprep.subr.bf16.mxu0 %v3107_v42  ;;  %1760 = vmatprep.subr.bf16.mxu1 %v3110_v43  ;;  %v3197_v42 = vld [vmem:[%s3461_s17 + $0x4a4] ss:$16 sps:$4 sm:$0xff]   ;;  %v3200_v43 = vld [vmem:[%s3461_s17 + $0x4ac] ss:$16 sps:$4 sm:$0xff]  }
  0x71   : > { %1638 = vmatpush1.bf16.msra.mxu0 %v3105_v45  ;;  %1761 = vmatpush1.bf16.msra.mxu1 %v3108_v46  ;;  %v3195_v45 = vld [vmem:[%s3461_s17 + $0x4a0] ss:$16 sps:$4 sm:$0xff]   ;;  %v3198_v46 = vld [vmem:[%s3461_s17 + $0x4a8] ss:$16 sps:$4 sm:$0xff]  }
  0x72   : > { %1639 = vmatprep.subr.bf16.mxu0 %v3113_v47  ;;  %1762 = vmatprep.subr.bf16.mxu1 %v3116_v48  ;;  %v3203_v47 = vld [vmem:[%s3461_s17 + $0x4c4] ss:$16 sps:$4 sm:$0xff]   ;;  %v3206_v48 = vld [vmem:[%s3461_s17 + $0x4cc] ss:$16 sps:$4 sm:$0xff]  }
  0x75   : > { %1640 = vmatpush1.bf16.msra.mxu0 %v3111_v49  ;;  %1763 = vmatpush1.bf16.msra.mxu1 %v3114_v51  ;;  %v3201_v49 = vld [vmem:[%s3461_s17 + $0x4c0] ss:$16 sps:$4 sm:$0xff]   ;;  %v3204_v51 = vld [vmem:[%s3461_s17 + $0x4c8] ss:$16 sps:$4 sm:$0xff]  }
  0x76   : > { %1641 = vmatprep.subr.bf16.mxu0 %v3119_v52  ;;  %1764 = vmatprep.subr.bf16.mxu1 %v3122_v53  ;;  %v3209_v52 = vld [vmem:[%s3461_s17 + $0x4e4] ss:$16 sps:$4 sm:$0xff]   ;;  %v3212_v53 = vld [vmem:[%s3461_s17 + $0x4ec] ss:$16 sps:$4 sm:$0xff]  }
  0x79   : > { %1642 = vmatpush1.bf16.msra.mxu0 %v3117_v54  ;;  %1765 = vmatpush1.bf16.msra.mxu1 %v3120_v55  ;;  %v3207_v54 = vld [vmem:[%s3461_s17 + $0x4e0] ss:$16 sps:$4 sm:$0xff]   ;;  %v3210_v55 = vld [vmem:[%s3461_s17 + $0x4e8] ss:$16 sps:$4 sm:$0xff]  }
  0x7a   : > { %1643 = vmatprep.subr.bf16.mxu0 %v3125_v56  ;;  %1766 = vmatprep.subr.bf16.mxu1 %v3128_v57  ;;  %v3215_v56 = vld [vmem:[%s3461_s17 + $0x504] ss:$16 sps:$4 sm:$0xff]   ;;  %v3218_v57 = vld [vmem:[%s3461_s17 + $0x50c] ss:$16 sps:$4 sm:$0xff]  }
  0x7d   : > { %1644 = vmatpush1.bf16.msra.mxu0 %v3123_v58  ;;  %1767 = vmatpush1.bf16.msra.mxu1 %v3126_v59  ;;  %v3213_v58 = vld [vmem:[%s3461_s17 + $0x500] ss:$16 sps:$4 sm:$0xff]   ;;  %v3216_v59 = vld [vmem:[%s3461_s17 + $0x508] ss:$16 sps:$4 sm:$0xff]  }
  0x7e   : > { %1645 = vmatprep.subr.bf16.mxu0 %v3131_v60  ;;  %1768 = vmatprep.subr.bf16.mxu1 %v3134_v61  ;;  %v3221_v60 = vld [vmem:[%s3461_s17 + $0x524] ss:$16 sps:$4 sm:$0xff]   ;;  %v3224_v61 = vld [vmem:[%s3461_s17 + $0x52c] ss:$16 sps:$4 sm:$0xff]  }
  0x81   : > { %1646 = vmatpush1.bf16.msra.mxu0 %v3129_v62  ;;  %1769 = vmatpush1.bf16.msra.mxu1 %v3132_v63  ;;  %v3219_v62 = vld [vmem:[%s3461_s17 + $0x520] ss:$16 sps:$4 sm:$0xff]   ;;  %v3222_v63 = vld [vmem:[%s3461_s17 + $0x528] ss:$16 sps:$4 sm:$0xff]  }
  0x82   : > { %1647 = vmatprep.subr.bf16.mxu0 %v3137_v0  ;;  %1770 = vmatprep.subr.bf16.mxu1 %v3140_v1  ;;  %v3227_v0 = vld [vmem:[%s3461_s17 + $0x544] ss:$16 sps:$4 sm:$0xff]   ;;  %v3230_v1 = vld [vmem:[%s3461_s17 + $0x54c] ss:$16 sps:$4 sm:$0xff]  }
  0x85   : > { %1648 = vmatpush1.bf16.msra.mxu0 %v3135_v2  ;;  %1771 = vmatpush1.bf16.msra.mxu1 %v3138_v3  ;;  %v3225_v2 = vld [vmem:[%s3461_s17 + $0x540] ss:$16 sps:$4 sm:$0xff]   ;;  %v3228_v3 = vld [vmem:[%s3461_s17 + $0x548] ss:$16 sps:$4 sm:$0xff]  }
  0x86   : > { %1649 = vmatprep.subr.bf16.mxu0 %v3143_v4  ;;  %1772 = vmatprep.subr.bf16.mxu1 %v3146_v5  ;;  %v3233_v4 = vld [vmem:[%s3461_s17 + $0x564] ss:$16 sps:$4 sm:$0xff]   ;;  %v3236_v5 = vld [vmem:[%s3461_s17 + $0x56c] ss:$16 sps:$4 sm:$0xff]  }
  0x89   : > { %1650 = vmatpush1.bf16.msra.mxu0 %v3141_v6  ;;  %1773 = vmatpush1.bf16.msra.mxu1 %v3144_v7  ;;  %v3231_v6 = vld [vmem:[%s3461_s17 + $0x560] ss:$16 sps:$4 sm:$0xff]   ;;  %v3234_v7 = vld [vmem:[%s3461_s17 + $0x568] ss:$16 sps:$4 sm:$0xff]  }
  0x8a   : > { %1651 = vmatprep.subr.bf16.mxu0 %v3149_v8  ;;  %1774 = vmatprep.subr.bf16.mxu1 %v3152_v9  ;;  %v3239_v8 = vld [vmem:[%s3461_s17 + $0x584] ss:$16 sps:$4 sm:$0xff]   ;;  %v3242_v9 = vld [vmem:[%s3461_s17 + $0x58c] ss:$16 sps:$4 sm:$0xff]  }
  0x8d   : > { %1652 = vmatpush1.bf16.msra.mxu0 %v3147_v10  ;;  %1775 = vmatpush1.bf16.msra.mxu1 %v3150_v11  ;;  %v3237_v10 = vld [vmem:[%s3461_s17 + $0x580] ss:$16 sps:$4 sm:$0xff]   ;;  %v3240_v11 = vld [vmem:[%s3461_s17 + $0x588] ss:$16 sps:$4 sm:$0xff]  }
  0x8e   : > { %1653 = vmatprep.subr.bf16.mxu0 %v3155_v12  ;;  %1776 = vmatprep.subr.bf16.mxu1 %v3158_v13  ;;  %v3245_v12 = vld [vmem:[%s3461_s17 + $0x5a4] ss:$16 sps:$4 sm:$0xff]   ;;  %v3248_v13 = vld [vmem:[%s3461_s17 + $0x5ac] ss:$16 sps:$4 sm:$0xff]  }
  0x91   : > { %1654 = vmatpush1.bf16.msra.mxu0 %v3153_v14  ;;  %1777 = vmatpush1.bf16.msra.mxu1 %v3156_v15  ;;  %v3243_v14 = vld [vmem:[%s3461_s17 + $0x5a0] ss:$16 sps:$4 sm:$0xff]   ;;  %v3246_v15 = vld [vmem:[%s3461_s17 + $0x5a8] ss:$16 sps:$4 sm:$0xff]  }
  0x92   : > { %1655 = vmatprep.subr.bf16.mxu0 %v3161_v16  ;;  %1778 = vmatprep.subr.bf16.mxu1 %v3164_v18  ;;  %v3251_v16 = vld [vmem:[%s3461_s17 + $0x5c4] ss:$16 sps:$4 sm:$0xff]   ;;  %v3254_v18 = vld [vmem:[%s3461_s17 + $0x5cc] ss:$16 sps:$4 sm:$0xff]  }
  0x95   : > { %1656 = vmatpush1.bf16.msra.mxu0 %v3159_v21  ;;  %1779 = vmatpush1.bf16.msra.mxu1 %v3162_v22  ;;  %v3249_v21 = vld [vmem:[%s3461_s17 + $0x5c0] ss:$16 sps:$4 sm:$0xff]   ;;  %v3252_v22 = vld [vmem:[%s3461_s17 + $0x5c8] ss:$16 sps:$4 sm:$0xff]  }
  0x96   : > { %1666 = vmatprep.subr.bf16.mxu0 %v3167_v23  ;;  %1789 = vmatprep.subr.bf16.mxu1 %v3170_v24  ;;  %v3257_v23 = vld [vmem:[%s3461_s17 + $0x5e4] ss:$16 sps:$4 sm:$0xff]   ;;  %v3260_v24 = vld [vmem:[%s3461_s17 + $0x5ec] ss:$16 sps:$4 sm:$0xff]  }
  0x98   : > { %1658 = vmatmul.mubr.bf16.vlgmr.msra.gmra.mrb[0].mxu0 %v616_v25  ;;  %1781 = vmatmul.mubr.bf16.vlgmr.msra.gmra.mrb[0].mxu1 %v616_v25  ;;  %v3255_v25 = vld [vmem:[%s3461_s17 + $0x5e0] ss:$16 sps:$4 sm:$0xff]  }
  0x99   : > { %1667 = vmatpush1.bf16.msra.mxu0 %v3165_v26  ;;  %1790 = vmatpush1.bf16.msra.mxu1 %v3168_v27  ;;  %v3258_v26 = vld [vmem:[%s3461_s17 + $0x5e8] ss:$16 sps:$4 sm:$0xff]   ;;  %v3384_v27 = vmov 1983009808  }
  0x9a   : > { %1668 = vmatprep.subr.bf16.mxu0 %v3173_v28  ;;  %1791 = vmatprep.subr.bf16.mxu1 %v3176_v29  ;;  %v1837_v28 = vunpack.c.l.s4 %v3384_v27  ;;  %v3327_v27 = vld [vmem:[%s3934_s5 + $0x148] ss:$16 sps:$4 sm:$0xff] (!%p2857_p7)  }
  0x9b   : > { %1698 = vmatprep.mubr.bf16.mxu0 %v3549_v19  ;;  %1821 = vmatprep.mubr.bf16.mxu1 %v3549_v19  ;;  %v3191_v19 = vld [vmem:[%s3461_s17 + $0x484] ss:$16 sps:$4 sm:$0xff]  }
  0x9c   : > { %v1838_v29 = vunpack.c.0.s8 %v1837_v28  ;;  %v3328_v28 = vld [vmem:[%s3934_s5 + $0x164] ss:$16 sps:$4 sm:$0xff] (!%p2857_p7)  }
  0x9d   : > { %1669 = vmatpush1.bf16.msra.mxu0 %v3171_v30  ;;  %1792 = vmatpush1.bf16.msra.mxu1 %v3174_v17 }
  0x9e   : > { %1670 = vmatprep.subr.bf16.mxu0 %v3179_v31  ;;  %1793 = vmatprep.subr.bf16.mxu1 %v3182_v32  ;;  %v3687_v31 = vsub.s32 %v1838_v29, %v3503_v44  ;;  %v3330_v29 = vld [vmem:[%s3934_s5 + $0x16c] ss:$16 sps:$4 sm:$0xff] (!%p2857_p7)  }
  0xa1   : > { %1671 = vmatpush1.bf16.msra.mxu0 %v3177_v33  ;;  %1794 = vmatpush1.bf16.msra.mxu1 %v3180_v34 }
  0xa2   : > { %1672 = vmatprep.subr.bf16.mxu0 %v3185_v35  ;;  %1795 = vmatprep.subr.bf16.mxu1 %v3188_v36 }
  0xa5   : > { %1673 = vmatpush1.bf16.msra.mxu0 %v3183_v37  ;;  %1796 = vmatpush1.bf16.msra.mxu1 %v3186_v38 }
  0xa6   : > { %1674 = vmatprep.subr.bf16.mxu0 %v3191_v19  ;;  %1797 = vmatprep.subr.bf16.mxu1 %v3194_v39 }
  0xa9   : > { %1675 = vmatpush1.bf16.msra.mxu0 %v3189_v40  ;;  %1798 = vmatpush1.bf16.msra.mxu1 %v3192_v41  ;;  %v376_v40 = vld [vmem:[#allocation2] sm:$0xff] }
  0xaa   : > { %1676 = vmatprep.subr.bf16.mxu0 %v3197_v42  ;;  %1799 = vmatprep.subr.bf16.mxu1 %v3200_v43  ;;  %v3262_v43 = vld [vmem:[%s3934_s5 + $0x4] ss:$16 sps:$4 sm:$0xff] (!%p2857_p7)  }
  0xad   : > { %1677 = vmatpush1.bf16.msra.mxu0 %v3195_v45  ;;  %1800 = vmatpush1.bf16.msra.mxu1 %v3198_v46  ;;  %v3264_v45 = vld [vmem:[%s3934_s5 + $0xc] ss:$16 sps:$4 sm:$0xff] (!%p2857_p7)   ;;  %v3266_v46 = vld [vmem:[%s3934_s5] ss:$16 sps:$4 sm:$0xff] (!%p2857_p7)  }
  0xae   : > { %1678 = vmatprep.subr.bf16.mxu0 %v3203_v47  ;;  %1801 = vmatprep.subr.bf16.mxu1 %v3206_v48  ;;  %v3267_v47 = vld [vmem:[%s3934_s5 + $0x8] ss:$16 sps:$4 sm:$0xff] (!%p2857_p7)   ;;  %v3268_v48 = vld [vmem:[%s3934_s5 + $0x24] ss:$16 sps:$4 sm:$0xff] (!%p2857_p7)  }
  0xb1   : > { %1679 = vmatpush1.bf16.msra.mxu0 %v3201_v49  ;;  %1802 = vmatpush1.bf16.msra.mxu1 %v3204_v51  ;;  %v3270_v49 = vld [vmem:[%s3934_s5 + $0x2c] ss:$16 sps:$4 sm:$0xff] (!%p2857_p7)   ;;  %v3272_v51 = vld [vmem:[%s3934_s5 + $0x20] ss:$16 sps:$4 sm:$0xff] (!%p2857_p7)  }
  0xb2   : > { %1680 = vmatprep.subr.bf16.mxu0 %v3209_v52  ;;  %1803 = vmatprep.subr.bf16.mxu1 %v3212_v53  ;;  %v3273_v52 = vld [vmem:[%s3934_s5 + $0x28] ss:$16 sps:$4 sm:$0xff] (!%p2857_p7)   ;;  %v3274_v53 = vld [vmem:[%s3934_s5 + $0x44] ss:$16 sps:$4 sm:$0xff] (!%p2857_p7)  }
  0xb5   : > { %1681 = vmatpush1.bf16.msra.mxu0 %v3207_v54  ;;  %1804 = vmatpush1.bf16.msra.mxu1 %v3210_v55  ;;  %v3276_v54 = vld [vmem:[%s3934_s5 + $0x4c] ss:$16 sps:$4 sm:$0xff] (!%p2857_p7)   ;;  %v3278_v55 = vld [vmem:[%s3934_s5 + $0x40] ss:$16 sps:$4 sm:$0xff] (!%p2857_p7)  }
  0xb6   : > { %1682 = vmatprep.subr.bf16.mxu0 %v3215_v56  ;;  %1805 = vmatprep.subr.bf16.mxu1 %v3218_v57  ;;  %v3279_v56 = vld [vmem:[%s3934_s5 + $0x48] ss:$16 sps:$4 sm:$0xff] (!%p2857_p7)   ;;  %v3280_v57 = vld [vmem:[%s3934_s5 + $0x64] ss:$16 sps:$4 sm:$0xff] (!%p2857_p7)  }
  0xb9   : > { %1683 = vmatpush1.bf16.msra.mxu0 %v3213_v58  ;;  %1806 = vmatpush1.bf16.msra.mxu1 %v3216_v59  ;;  %v3282_v58 = vld [vmem:[%s3934_s5 + $0x6c] ss:$16 sps:$4 sm:$0xff] (!%p2857_p7)   ;;  %v3284_v59 = vld [vmem:[%s3934_s5 + $0x60] ss:$16 sps:$4 sm:$0xff] (!%p2857_p7)  }
  0xba   : > { %1684 = vmatprep.subr.bf16.mxu0 %v3221_v60  ;;  %1807 = vmatprep.subr.bf16.mxu1 %v3224_v61  ;;  %v3285_v60 = vld [vmem:[%s3934_s5 + $0x68] ss:$16 sps:$4 sm:$0xff] (!%p2857_p7)   ;;  %v3286_v61 = vld [vmem:[%s3934_s5 + $0x84] ss:$16 sps:$4 sm:$0xff] (!%p2857_p7)  }
  0xbd   : > { %1685 = vmatpush1.bf16.msra.mxu0 %v3219_v62  ;;  %1808 = vmatpush1.bf16.msra.mxu1 %v3222_v63  ;;  %v3288_v62 = vld [vmem:[%s3934_s5 + $0x8c] ss:$16 sps:$4 sm:$0xff] (!%p2857_p7)   ;;  %v3290_v63 = vld [vmem:[%s3934_s5 + $0x80] ss:$16 sps:$4 sm:$0xff] (!%p2857_p7)  }
  0xbe   : > { %1686 = vmatprep.subr.bf16.mxu0 %v3227_v0  ;;  %1809 = vmatprep.subr.bf16.mxu1 %v3230_v1  ;;  %v3291_v0 = vld [vmem:[%s3934_s5 + $0x88] ss:$16 sps:$4 sm:$0xff] (!%p2857_p7)   ;;  %v3292_v1 = vld [vmem:[%s3934_s5 + $0xa4] ss:$16 sps:$4 sm:$0xff] (!%p2857_p7)  }
  0xc1   : > { %1687 = vmatpush1.bf16.msra.mxu0 %v3225_v2  ;;  %1810 = vmatpush1.bf16.msra.mxu1 %v3228_v3  ;;  %v3294_v2 = vld [vmem:[%s3934_s5 + $0xac] ss:$16 sps:$4 sm:$0xff] (!%p2857_p7)   ;;  %v3296_v3 = vld [vmem:[%s3934_s5 + $0xa0] ss:$16 sps:$4 sm:$0xff] (!%p2857_p7)  }
  0xc2   : > { %1688 = vmatprep.subr.bf16.mxu0 %v3233_v4  ;;  %1811 = vmatprep.subr.bf16.mxu1 %v3236_v5  ;;  %v3297_v4 = vld [vmem:[%s3934_s5 + $0xa8] ss:$16 sps:$4 sm:$0xff] (!%p2857_p7)   ;;  %v3298_v5 = vld [vmem:[%s3934_s5 + $0xc4] ss:$16 sps:$4 sm:$0xff] (!%p2857_p7)  }
  0xc5   : > { %1689 = vmatpush1.bf16.msra.mxu0 %v3231_v6  ;;  %1812 = vmatpush1.bf16.msra.mxu1 %v3234_v7  ;;  %v3300_v6 = vld [vmem:[%s3934_s5 + $0xcc] ss:$16 sps:$4 sm:$0xff] (!%p2857_p7)   ;;  %v3302_v7 = vld [vmem:[%s3934_s5 + $0xc0] ss:$16 sps:$4 sm:$0xff] (!%p2857_p7)  }
  0xc6   : > { %1690 = vmatprep.subr.bf16.mxu0 %v3239_v8  ;;  %1813 = vmatprep.subr.bf16.mxu1 %v3242_v9  ;;  %v3303_v8 = vld [vmem:[%s3934_s5 + $0xc8] ss:$16 sps:$4 sm:$0xff] (!%p2857_p7)   ;;  %v3304_v9 = vld [vmem:[%s3934_s5 + $0xe4] ss:$16 sps:$4 sm:$0xff] (!%p2857_p7)  }
  0xc9   : > { %1691 = vmatpush1.bf16.msra.mxu0 %v3237_v10  ;;  %1814 = vmatpush1.bf16.msra.mxu1 %v3240_v11  ;;  %v3306_v10 = vld [vmem:[%s3934_s5 + $0xec] ss:$16 sps:$4 sm:$0xff] (!%p2857_p7)   ;;  %v3308_v11 = vld [vmem:[%s3934_s5 + $0xe0] ss:$16 sps:$4 sm:$0xff] (!%p2857_p7)  }
  0xca   : > { %1692 = vmatprep.subr.bf16.mxu0 %v3245_v12  ;;  %1815 = vmatprep.subr.bf16.mxu1 %v3248_v13  ;;  %v3309_v12 = vld [vmem:[%s3934_s5 + $0xe8] ss:$16 sps:$4 sm:$0xff] (!%p2857_p7)   ;;  %v3310_v13 = vld [vmem:[%s3934_s5 + $0x104] ss:$16 sps:$4 sm:$0xff] (!%p2857_p7)  }
  0xcd   : > { %1693 = vmatpush1.bf16.msra.mxu0 %v3243_v14  ;;  %1816 = vmatpush1.bf16.msra.mxu1 %v3246_v15  ;;  %v3312_v14 = vld [vmem:[%s3934_s5 + $0x10c] ss:$16 sps:$4 sm:$0xff] (!%p2857_p7)   ;;  %v3314_v15 = vld [vmem:[%s3934_s5 + $0x100] ss:$16 sps:$4 sm:$0xff] (!%p2857_p7)  }
  0xce   : > { %1694 = vmatprep.subr.bf16.mxu0 %v3251_v16  ;;  %1817 = vmatprep.subr.bf16.mxu1 %v3254_v18  ;;  %v3315_v16 = vld [vmem:[%s3934_s5 + $0x108] ss:$16 sps:$4 sm:$0xff] (!%p2857_p7)   ;;  %v3316_v18 = vld [vmem:[%s3934_s5 + $0x124] ss:$16 sps:$4 sm:$0xff] (!%p2857_p7)  }
  0xd1   : > { %1695 = vmatpush1.bf16.msra.mxu0 %v3249_v21  ;;  %1818 = vmatpush1.bf16.msra.mxu1 %v3252_v22  ;;  %v3318_v21 = vld [vmem:[%s3934_s5 + $0x12c] ss:$16 sps:$4 sm:$0xff] (!%p2857_p7)   ;;  %v3320_v22 = vld [vmem:[%s3934_s5 + $0x120] ss:$16 sps:$4 sm:$0xff] (!%p2857_p7)  }
  0xd2   : > { %1696 = vmatprep.subr.bf16.mxu0 %v3257_v23  ;;  %1819 = vmatprep.subr.bf16.mxu1 %v3260_v24  ;;  %v3321_v23 = vld [vmem:[%s3934_s5 + $0x128] ss:$16 sps:$4 sm:$0xff] (!%p2857_p7)   ;;  %v3322_v24 = vld [vmem:[%s3934_s5 + $0x144] ss:$16 sps:$4 sm:$0xff] (!%p2857_p7)  }
  0xd5   : > { %1697 = vmatpush1.bf16.msra.mxu0 %v3255_v25  ;;  %1820 = vmatpush1.bf16.msra.mxu1 %v3258_v26  ;;  %v3324_v25 = vld [vmem:[%s3934_s5 + $0x14c] ss:$16 sps:$4 sm:$0xff] (!%p2857_p7)   ;;  %v3326_v26 = vld [vmem:[%s3934_s5 + $0x140] ss:$16 sps:$4 sm:$0xff] (!%p2857_p7)  }
  0xd6   : > { %2343 = vmatprep.subr.bf16.mxu0 (!%p2857_p7), %v3262_v43  ;;  %2384 = vmatprep.subr.bf16.mxu1 (!%p2857_p7), %v3264_v45  ;;  %v3350_v43 = vld [vmem:[%s3934_s5 + $0x1c0] ss:$16 sps:$4 sm:$0xff] (!%p2857_p7)   ;;  %v3351_v45 = vld [vmem:[%s3934_s5 + $0x1c8] ss:$16 sps:$4 sm:$0xff] (!%p2857_p7)  }
  0xd8   : > { %1699 = vmatmul.mubr.bf16.vlgmr.msra.gmra.mrb[0].mxu0 %v3552_v20  ;;  %1822 = vmatmul.mubr.bf16.vlgmr.msra.gmra.mrb[0].mxu1 %v3552_v20 }
  0xd9   : > { %2344 = vmatpush1.bf16.msra.mxu0 (!%p2857_p7), %v3266_v46  ;;  %2385 = vmatpush1.bf16.msra.mxu1 (!%p2857_p7), %v3267_v47  ;;  %v3352_v46 = vld [vmem:[%s3934_s5 + $0x1e4] ss:$16 sps:$4 sm:$0xff] (!%p2857_p7)   ;;  %v3354_v47 = vld [vmem:[%s3934_s5 + $0x1ec] ss:$16 sps:$4 sm:$0xff] (!%p2857_p7)  }
  0xda   : > { %2345 = vmatprep.subr.bf16.mxu0 (!%p2857_p7), %v3268_v48  ;;  %2386 = vmatprep.subr.bf16.mxu1 (!%p2857_p7), %v3270_v49  ;;  %v3356_v48 = vld [vmem:[%s3934_s5 + $0x1e0] ss:$16 sps:$4 sm:$0xff] (!%p2857_p7)   ;;  %v3357_v49 = vld [vmem:[%s3934_s5 + $0x1e8] ss:$16 sps:$4 sm:$0xff] (!%p2857_p7)  }
  0xdd   : > { %2346 = vmatpush1.bf16.msra.mxu0 (!%p2857_p7), %v3272_v51  ;;  %2387 = vmatpush1.bf16.msra.mxu1 (!%p2857_p7), %v3273_v52  ;;  %v1863_v52 = vsub.s32 (!%p2857_p7), 0, %v3503_v44 }
  0xde   : > { %2347 = vmatprep.subr.bf16.mxu0 (!%p2857_p7), %v3274_v53  ;;  %2388 = vmatprep.subr.bf16.mxu1 (!%p2857_p7), %v3276_v54  ;;  %v1871_v53 = vsub.s32 (!%p2857_p7), 2, %v3503_v44  ;;  %v1867_v54 = vsub.s32 (!%p2857_p7), 1, %v3503_v44 }
  0xe1   : > { %2348 = vmatpush1.bf16.msra.mxu0 (!%p2857_p7), %v3278_v55  ;;  %2389 = vmatpush1.bf16.msra.mxu1 (!%p2857_p7), %v3279_v56  ;;  %v1875_v55 = vsub.s32 (!%p2857_p7), 3, %v3503_v44  ;;  %v1859_v56 = vld [vmem:[%s3931_s2] sm:$0xf] (!%p2857_p7) }
  0xe2   : > { %2349 = vmatprep.subr.bf16.mxu0 (!%p2857_p7), %v3280_v57  ;;  %2390 = vmatprep.subr.bf16.mxu1 (!%p2857_p7), %v3282_v58  ;;  %v1864_v57 = vrot.slane (!%p2857_p7), %v1859_v56, %v1863_v52  ;;  %v1868_v58 = vrot.slane (!%p2857_p7), %v1859_v56, %v1867_v54  ;;  %v2474_v44 = vld [vmem:[%s3936_s7] sm:$0xf] (!%p2857_p7) }
  0xe5   : > { %2350 = vmatpush1.bf16.msra.mxu0 (!%p2857_p7), %v3284_v59  ;;  %2391 = vmatpush1.bf16.msra.mxu1 (!%p2857_p7), %v3285_v60  ;;  %v1872_v59 = vrot.slane (!%p2857_p7), %v1859_v56, %v1871_v53  ;;  %v1876_v60 = vrot.slane (!%p2857_p7), %v1859_v56, %v1875_v55 }
  0xe6   : > { %2351 = vmatprep.subr.bf16.mxu0 (!%p2857_p7), %v3286_v61  ;;  %2392 = vmatprep.subr.bf16.mxu1 (!%p2857_p7), %v3288_v62  ;;  %v1896_v61 = vld [vmem:[%s3932_s3] sm:$0xf] (!%p2857_p7)  ;;  %v1877_v62 = vcombine.low (!%p2857_p7), %v1864_v57, %v1868_v58 }
  0xe9   : > { %2352 = vmatpush1.bf16.msra.mxu0 (!%p2857_p7), %v3290_v63  ;;  %2393 = vmatpush1.bf16.msra.mxu1 (!%p2857_p7), %v3291_v0  ;;  %v1878_v63 = vcombine.low (!%p2857_p7), %v1872_v59, %v1876_v60  ;;  %v1901_v0 = vrot.slane (!%p2857_p7), %v1896_v61, %v1863_v52 }
  0xea   : > { %2353 = vmatprep.subr.bf16.mxu0 (!%p2857_p7), %v3292_v1  ;;  %2394 = vmatprep.subr.bf16.mxu1 (!%p2857_p7), %v3294_v2  ;;  %v1905_v1 = vrot.slane (!%p2857_p7), %v1896_v61, %v1867_v54  ;;  %v1909_v2 = vrot.slane (!%p2857_p7), %v1896_v61, %v1871_v53 }
  0xed   : > { %2354 = vmatpush1.bf16.msra.mxu0 (!%p2857_p7), %v3296_v3  ;;  %2395 = vmatpush1.bf16.msra.mxu1 (!%p2857_p7), %v3297_v4  ;;  %v1913_v3 = vrot.slane (!%p2857_p7), %v1896_v61, %v1875_v55  ;;  %v2425_v4 = vld [vmem:[%s3935_s6] sm:$0xf] (!%p2857_p7) }
  0xee   : > { %2355 = vmatprep.subr.bf16.mxu0 (!%p2857_p7), %v3298_v5  ;;  %2396 = vmatprep.subr.bf16.mxu1 (!%p2857_p7), %v3300_v6  ;;  %v1885_v5 = vrot.slane (!%p2857_p7), %v1877_v62, %v3687_v31  ;;  %v1892_v6 = vrot.slane (!%p2857_p7), %v1878_v63, %v3687_v31 }
  0xf1   : > { %2356 = vmatpush1.bf16.msra.mxu0 (!%p2857_p7), %v3302_v7  ;;  %2397 = vmatpush1.bf16.msra.mxu1 (!%p2857_p7), %v3303_v8  ;;  %v1914_v7 = vcombine.low (!%p2857_p7), %v1901_v0, %v1905_v1  ;;  %v1915_v8 = vcombine.low (!%p2857_p7), %v1909_v2, %v1913_v3 }
  0xf2   : > { %2357 = vmatprep.subr.bf16.mxu0 (!%p2857_p7), %v3304_v9  ;;  %2398 = vmatprep.subr.bf16.mxu1 (!%p2857_p7), %v3306_v10  ;;  %v2479_v9 = vrot.slane (!%p2857_p7), %v2474_v44, %v1863_v52  ;;  %v2483_v10 = vrot.slane (!%p2857_p7), %v2474_v44, %v1867_v54 }
  0xf5   : > { %2358 = vmatpush1.bf16.msra.mxu0 (!%p2857_p7), %v3308_v11  ;;  %2399 = vmatpush1.bf16.msra.mxu1 (!%p2857_p7), %v3309_v12  ;;  %v2487_v11 = vrot.slane (!%p2857_p7), %v2474_v44, %v1871_v53  ;;  %v2491_v12 = vrot.slane (!%p2857_p7), %v2474_v44, %v1875_v55 }
  0xf6   : > { %2359 = vmatprep.subr.bf16.mxu0 (!%p2857_p7), %v3310_v13  ;;  %2400 = vmatprep.subr.bf16.mxu1 (!%p2857_p7), %v3312_v14  ;;  %v2430_v13 = vrot.slane (!%p2857_p7), %v2425_v4, %v1863_v52  ;;  %v2438_v14 = vrot.slane (!%p2857_p7), %v2425_v4, %v1871_v53 }
  0xf9   : > { %2360 = vmatpush1.bf16.msra.mxu0 (!%p2857_p7), %v3314_v15  ;;  %2401 = vmatpush1.bf16.msra.mxu1 (!%p2857_p7), %v3315_v16  ;;  %v2434_v15 = vrot.slane (!%p2857_p7), %v2425_v4, %v1867_v54  ;;  %v1893_v16 = vcombine.low (!%p2857_p7), %v1885_v5, %v1892_v6 }
  0xfa   : > { %2361 = vmatprep.subr.bf16.mxu0 (!%p2857_p7), %v3316_v18  ;;  %2402 = vmatprep.subr.bf16.mxu1 (!%p2857_p7), %v3318_v21  ;;  %v1922_v18 = vrot.slane (!%p2857_p7), %v1914_v7, %v3687_v31  ;;  %v1929_v21 = vrot.slane (!%p2857_p7), %v1915_v8, %v3687_v31 }
  0xfd   : > { %2362 = vmatpush1.bf16.msra.mxu0 (!%p2857_p7), %v3320_v22  ;;  %2403 = vmatpush1.bf16.msra.mxu1 (!%p2857_p7), %v3321_v23  ;;  %v2442_v22 = vrot.slane (!%p2857_p7), %v2425_v4, %v1875_v55 }
  0xfe   : > { %2363 = vmatprep.subr.bf16.mxu0 (!%p2857_p7), %v3322_v24  ;;  %2404 = vmatprep.subr.bf16.mxu1 (!%p2857_p7), %v3324_v25 }
 0x101   : > { %2364 = vmatpush1.bf16.msra.mxu0 (!%p2857_p7), %v3326_v26  ;;  %2405 = vmatpush1.bf16.msra.mxu1 (!%p2857_p7), %v3327_v27  ;;  %v2492_v26 = vcombine.low (!%p2857_p7), %v2479_v9, %v2483_v10  ;;  %v2493_v27 = vcombine.low (!%p2857_p7), %v2487_v11, %v2491_v12 }
 0x102   : > { %2365 = vmatprep.subr.bf16.mxu0 (!%p2857_p7), %v3328_v28  ;;  %2406 = vmatprep.subr.bf16.mxu1 (!%p2857_p7), %v3330_v29 }
 0x1ab   : > { %v1700_v30 = vpop.f32.mrb[0].mxu0  ;;  %v1823_v17 = vpop.f32.mrb[0].mxu1 }
 0x1ac   : > { %v1702_v32 = vpop.f32.mrb[1].mxu0  ;;  %v1825_v33 = vpop.f32.mrb[1].mxu1 }
 0x1ad   : > { %v1834_v34 = vcombine.low %v1700_v30, %v1702_v32  ;;  %v1835_v35 = vcombine.low %v1823_v17, %v1825_v33  ;;  %v1704_v36 = vpop.f32.mrb[2].mxu0  ;;  %v1827_v37 = vpop.f32.mrb[2].mxu1  ;;  %v2858_v30 = vld.sshfl [vmem:[%s3933_s4] sm:$0x11 pattern:$0x75316420] (!%p2857_p7) }
 0x1ae   : > { %v1705_v38 = vpop.f32.mrb[3].mxu0  ;;  %v1828_v19 = vpop.f32.mrb[3].mxu1  ;;  %v3332_v17 = vld [vmem:[%s3934_s5 + $0x160] ss:$16 sps:$4 sm:$0xff] (!%p2857_p7)   ;;  %v3333_v32 = vld [vmem:[%s3934_s5 + $0x168] ss:$16 sps:$4 sm:$0xff] (!%p2857_p7)   ;;  %v2006_v33 = vcombine.high (!%p2857_p7), %v2858_v30, %v2858_v30  ;;  %v2013_v51 = vrot.slane (!%p2857_p7), %v2858_v30, %v3511_v50 }
 0x1af   : > { %v1842_v39 = vrot.slane %v1834_v34, %v3687_v31  ;;  %v1849_v20 = vrot.slane %v1835_v35, %v3687_v31  ;;  %1857 = sbr.rel (%p2857_p7) target bundleno = 690 (0x2b2), region = 60  ;;  %v3334_v34 = vld [vmem:[%s3934_s5 + $0x184] ss:$16 sps:$4 sm:$0xff] (!%p2857_p7)   ;;  %v3336_v35 = vld [vmem:[%s3934_s5 + $0x18c] ss:$16 sps:$4 sm:$0xff] (!%p2857_p7)   ;;  %2366 = vmatpush1.bf16.msra.mxu0 (!%p2857_p7), %v3332_v17  ;;  %2407 = vmatpush1.bf16.msra.mxu1 (!%p2857_p7), %v3333_v32 }
 0x1b0   : > { %v2020_v36 = vrot.slane (!%p2857_p7), %v2006_v33, %v3511_v50  ;;  %v3338_v37 = vld [vmem:[%s3934_s5 + $0x180] ss:$16 sps:$4 sm:$0xff] (!%p2857_p7)   ;;  %v3339_v38 = vld [vmem:[%s3934_s5 + $0x188] ss:$16 sps:$4 sm:$0xff] (!%p2857_p7)   ;;  %2367 = vmatprep.subr.bf16.mxu0 (!%p2857_p7), %v3334_v34  ;;  %2408 = vmatprep.subr.bf16.mxu1 (!%p2857_p7), %v3336_v35  ;;  %v3340_v19 = vld [vmem:[%s3934_s5 + $0x1a4] ss:$16 sps:$4 sm:$0xff] (!%p2857_p7)   ;;  %v1930_v34 = vcombine.low (!%p2857_p7), %v1922_v18, %v1929_v21 }
 0x1b1   : > { %v1850_v41 = vcombine.low %v1842_v39, %v1849_v20  ;;  %v3342_v39 = vld [vmem:[%s3934_s5 + $0x1ac] ss:$16 sps:$4 sm:$0xff] (!%p2857_p7)   ;;  %v3344_v20 = vld [vmem:[%s3934_s5 + $0x1a0] ss:$16 sps:$4 sm:$0xff] (!%p2857_p7)  }
 0x1b2   : > { %2375 = vmatprep.mubr.bf16.mxu0 (!%p2857_p7), %v2020_v36  ;;  %2416 = vmatprep.mubr.bf16.mxu1 (!%p2857_p7), %v2020_v36 }
 0x1b3   : > { %v1852_v42 = vadd.f32 %v1850_v41, %v376_v40  ;;  %2368 = vmatpush1.bf16.msra.mxu0 (!%p2857_p7), %v3338_v37  ;;  %2409 = vmatpush1.bf16.msra.mxu1 (!%p2857_p7), %v3339_v38  ;;  %v3345_v40 = vld [vmem:[%s3934_s5 + $0x1a8] ss:$16 sps:$4 sm:$0xff] (!%p2857_p7)   ;;  %v3346_v41 = vld [vmem:[%s3934_s5 + $0x1c4] ss:$16 sps:$4 sm:$0xff] (!%p2857_p7)  }
 0x1b4   : > { %2369 = vmatprep.subr.bf16.mxu0 (!%p2857_p7), %v3340_v19  ;;  %2410 = vmatprep.subr.bf16.mxu1 (!%p2857_p7), %v3342_v39 }
 0x1b5   : > { %1853 = vst [vmem:[#allocation2] sm:$0xff] %v1852_v42  ;;  %v3348_v42 = vld [vmem:[%s3934_s5 + $0x1cc] ss:$16 sps:$4 sm:$0xff] (!%p2857_p7)  }
 0x1b7   : > { %2370 = vmatpush1.bf16.msra.mxu0 %v3344_v20  ;;  %2411 = vmatpush1.bf16.msra.mxu1 %v3345_v40  ;;  %v2500_v40 = vrot.slane %v2492_v26, %v3687_v31 }
 0x1b8   : > { %2371 = vmatprep.subr.bf16.mxu0 %v3346_v41  ;;  %2412 = vmatprep.subr.bf16.mxu1 %v3348_v42  ;;  %v2507_v41 = vrot.slane %v2493_v27, %v3687_v31 }
 0x1bb   : > { %2372 = vmatpush1.bf16.msra.mxu0 %v3350_v43  ;;  %2413 = vmatpush1.bf16.msra.mxu1 %v3351_v45 }
 0x1bc   : > { %2373 = vmatprep.subr.bf16.mxu0 %v3352_v46  ;;  %2414 = vmatprep.subr.bf16.mxu1 %v3354_v47  ;;  %v1858_v23 = vld [vmem:[#allocation2] sm:$0xff]  ;;  %v2508_v47 = vcombine.low %v2500_v40, %v2507_v41 }
 0x1bd   : > { %v1895_v33 = vmul.f32 %v1893_v16, %v1858_v23 }
 0x1bf   : > { %2374 = vmatpush1.bf16.msra.mxu0 %v3356_v48  ;;  %2415 = vmatpush1.bf16.msra.mxu1 %v3357_v49  ;;  %v1932_v43 = vadd.f32 %v1930_v34, %v1895_v33 }
 0x1c2   : > { %2376 = vmatmul.mubr.bf16.vlgmr.msra.gmra.mrb[0].mxu0 %v2013_v51  ;;  %2417 = vmatmul.mubr.bf16.vlgmr.msra.gmra.mrb[0].mxu1 %v2013_v51 }
 0x295   : > { %v2377_v24 = vpop.f32.mrb[0].mxu0  ;;  %v2418_v25 = vpop.f32.mrb[0].mxu1 }
 0x296   : > { %v2447_v28 = vmul.f32 %v2430_v13, %v2377_v24  ;;  %v2449_v29 = vmul.f32 %v2438_v14, %v2418_v25  ;;  %v2379_v30 = vpop.f32.mrb[1].mxu0  ;;  %v2420_v17 = vpop.f32.mrb[1].mxu1 }
 0x297   : > { %v2448_v32 = vmul.f32 %v2434_v15, %v2379_v30  ;;  %v2450_v35 = vmul.f32 %v2442_v22, %v2420_v17  ;;  %v2381_v36 = vpop.f32.mrb[2].mxu0  ;;  %v2422_v37 = vpop.f32.mrb[2].mxu1 }
 0x298   : > { %v2382_v38 = vpop.f32.mrb[3].mxu0  ;;  %v2423_v19 = vpop.f32.mrb[3].mxu1 }
 0x299   : > { %v2455_v39 = vcombine.low %v2447_v28, %v2448_v32  ;;  %v2456_v20 = vcombine.low %v2449_v29, %v2450_v35 }
 0x29b   : > { %v2463_v42 = vrot.slane %v2455_v39, %v3687_v31  ;;  %v2470_v45 = vrot.slane %v2456_v20, %v3687_v31 }
 0x29d   : > { %v2471_v46 = vcombine.low %v2463_v42, %v2470_v45 }
 0x29f   : > { %v2473_v48 = vadd.f32 %v2471_v46, %v1932_v43 }
 0x2a1   : > { %v2510_v49 = vadd.f32 %v2508_v47, %v2473_v48 }
 0x2a3   : > { %v2511_v51 = vmax.f32 %v2510_v49, 0.0 }
 0x2a5   : > { %v2513_v52 = vcombine.high %v2511_v51, %v2511_v51  ;;  %v2520_v53 = vrot.slane %v2511_v51, %v3687_v31 }
 0x2a7   : > { %v2527_v54 = vrot.slane %v2513_v52, %v3687_v31  ;;  %v2528_v55 = vcombine.high %v2520_v53, %v2520_v53 }
 0x2a9   : > { %v2529_v56 = vcombine.high %v2527_v54, %v2527_v54  ;;  %v2923_v57 = vpack.c.bf16 %v2528_v55, %v2520_v53 }
 0x2ab   : > { %v2924_v58 = vpack.c.bf16 %v2529_v56, %v2527_v54  ;;  %v2550_v59 = vrot.slane %v2923_v57, %v3511_v50 }
 0x2ad   : > { %v2557_v60 = vrot.slane %v2924_v58, %v3511_v50 }
 0x2af   : > { %v2558_v61 = vcombine.low %v2550_v59, %v2557_v60 }
 0x2b1   : > { %2925 = vst.sshfl [vmem:[%s3937_s8] sm:$0x55 pattern:$0x73625140] %v2558_v61 }
 0x2b2 PF: > { %s18_s29 = sadd.s32 1, %s3380_s29   ;;  %s3938_s27 = smov %s3376_s28 }
 0x2b3   : > { %p15_p8 = scmp.ge.s32.totalorder %s18_s29, 8   ;;  %s3939_s28 = smov %s3941_s30 }
 0x2b5   :  { %17 = sbr.rel (!%p15_p8) target bundleno = 2 (0x2), region = 96 }

</bundles_post_ra>
